<compile_context>
chip_gen: v5e
topology: v5e:2x2
jax: 0.10.0
libtpu: 0.0.40
codegen_flags: <defaults>
</compile_context>

<pallas_src>
import functools
import math

import jax
import jax.numpy as jnp
from jax.experimental import pallas as pl
from jax.experimental.pallas import tpu as pltpu

MIN_NORM = 1e-15     # manifold min_norm (matches hyperboloid.py)
EPS_F32 = 1e-7       # manifold eps for float32

_NETWORKS = ("plainGCN", "resSumGCN", "resAddGCN", "denseGCN")
_BUF_OK = hasattr(pl, "Buffered")   # deeper adj pipelining if supported by this JAX version


def _round_up(v, m):
    return -(-v // m) * m


# --------------------------------------------------------------------------------------
# Per-generation VMEM budget (v7x has 64 MiB vs 128 MiB on v5e/v6e).
# --------------------------------------------------------------------------------------
def _vmem_budget_bytes():
    cap = 128 * 1024 * 1024
    try:
        info = pltpu.get_tpu_info()
        cap = int(getattr(info, "vmem_capacity_bytes", cap))
    except Exception:
        pass
    return max(32 * 1024 * 1024, min(cap - 8 * 1024 * 1024, int(cap * 0.85)))


# --------------------------------------------------------------------------------------
# Hyperboloid manifold math (shared by fused and tiled kernels). All f32, exact division.
# --------------------------------------------------------------------------------------
def _spatial_mask(shape):
    # 1.0 on spatial columns (>=1), 0.0 on the Lorentz time column (0).
    col = jax.lax.broadcasted_iota(jnp.int32, shape, 1)
    return (col >= 1).astype(jnp.float32)


def _logmap0_math(x, c):
    """Hyperboloid.logmap0(x, c): tangent vector at the origin (time column == 0)."""
    K = 1.0 / c
    sqrtK = K ** 0.5
    mask = _spatial_mask(x.shape)
    y = x * mask                                                  # x[:, 1:]
    y_norm = jnp.maximum(jnp.sqrt(jnp.sum(y * y, axis=1, keepdims=True)), MIN_NORM)
    theta = jnp.maximum(x[:, 0:1] / sqrtK, 1.0 + EPS_F32)
    arcosh = jnp.log(theta + jnp.sqrt(theta * theta - 1.0))       # arccosh(theta)
    return (sqrtK * arcosh / y_norm) * y


def _expmap0_proj_math(h, c):
    """proj(expmap0(h, c), c). Cancellation-free sinh(t)/t; exp clamped to avoid inf*0."""
    K = 1.0 / c
    sqrtK = K ** 0.5
    mask = _spatial_mask(h.shape)
    u = h * mask                                                  # expmap0 ignores u[:, 0]
    u_norm = jnp.maximum(jnp.sqrt(jnp.sum(u * u, axis=1, keepdims=True)), MIN_NORM)
    th = u_norm / sqrtK
    th_c = jnp.minimum(th, 85.0)                                  # avoid inf in exp
    taylor = 1.0 + th * th * (1.0 / 6.0)                          # accurate for tiny th
    exp_form = 0.5 * (jnp.exp(th_c) - jnp.exp(-th_c)) / th
    sinh_over_th = jnp.where(th < 1e-4, taylor, exp_form)
    # sqrtK * sinh(th) * u / u_norm == (sinh(th)/th) * u  (u_norm == th * sqrtK)
    spatial = sinh_over_th * u
    sq = jnp.sum(spatial * spatial, axis=1, keepdims=True)
    time = jnp.sqrt(jnp.maximum(K + sq, EPS_F32))                 # proj time coordinate
    return spatial + (1.0 - mask) * time


# --------------------------------------------------------------------------------------
# Tiled spmm kernel: out[i] (+= over k) adj[i,k] @ m[k],  with optional fused
#   logmap0 on the m tile (first layer), residual add and expmap0+proj (last layer).
# Accumulates directly into the resident output block (no scratch).
# --------------------------------------------------------------------------------------
def _spmm_body(adj_ref, m_ref, res_ref, o_ref, *, c, tk, logmap_m, expmap_out, m_resident):
    k = pl.program_id(1)

    @pl.when(k == 0)
    def _():
        o_ref[...] = jnp.zeros_like(o_ref)

    if m_resident:
        k_off = pl.multiple_of(k * tk, tk)
        m_tile = m_ref[pl.ds(k_off, tk), :]
    else:
        m_tile = m_ref[...]
    m_tile = m_tile.astype(jnp.float32)
    if logmap_m:
        m_tile = _logmap0_math(m_tile, c)       # recomputed per row tile; rides under adj DMA

    # adj arrives pre-cast to bf16 (halves HBM bytes on the dominant operand).
    o_ref[...] += jnp.dot(adj_ref[...], m_tile.astype(jnp.bfloat16),
                          preferred_element_type=jnp.float32)

    if (res_ref is not None) or expmap_out:
        @pl.when(k == pl.num_programs(1) - 1)
        def _():
            h = o_ref[...]
            if res_ref is not None:
                h = h + res_ref[...].astype(jnp.float32)
            if expmap_out:
                h = _expmap0_proj_math(h, c)
            o_ref[...] = h


def _spmm_kernel_nores(adj_ref, m_ref, o_ref, **kw):
    _spmm_body(adj_ref, m_ref, None, o_ref, **kw)


def _spmm_kernel_res(adj_ref, m_ref, res_ref, o_ref, **kw):
    _spmm_body(adj_ref, m_ref, res_ref, o_ref, **kw)


@functools.lru_cache(maxsize=None)
def _build_spmm(n, d, tm, tk, with_res, logmap_m, expmap_out, c, m_resident, bufs, budget):
    ni, nk = n // tm, n // tk
    adj_kwargs = {}
    if bufs > 2 and hasattr(pl, "Buffered"):
        adj_kwargs["pipeline_mode"] = pl.Buffered(bufs)           # deeper adj DMA pipeline
    adj_spec = pl.BlockSpec((tm, tk), lambda i, k: (i, k), **adj_kwargs)
    if m_resident:
        # full-height feature matrix, constant index -> fetched ONCE per call.
        m_spec = pl.BlockSpec((n, d), lambda i, k: (0, 0))
    else:
        m_spec = pl.BlockSpec((tk, d), lambda i, k: (k, 0))
    in_specs = [adj_spec, m_spec]
    kw = dict(c=c, tk=tk, logmap_m=logmap_m, expmap_out=expmap_out, m_resident=m_resident)
    if with_res:
        in_specs.append(pl.BlockSpec((tm, d), lambda i, k: (i, 0)))
        kernel = functools.partial(_spmm_kernel_res, **kw)
    else:
        kernel = functools.partial(_spmm_kernel_nores, **kw)
    nbytes = n * n * 2 + n * d * 4 * (3 if with_res else 2)        # adj (bf16) dominates
    return pl.pallas_call(
        kernel,
        out_shape=jax.ShapeDtypeStruct((n, d), jnp.float32),
        grid=(ni, nk),
        in_specs=in_specs,
        out_specs=pl.BlockSpec((tm, d), lambda i, k: (i, 0)),
        compiler_params=pltpu.CompilerParams(
            dimension_semantics=("parallel", "arbitrary"),         # row tiles -> both v7x TCs
            vmem_limit_bytes=budget),
        cost_estimate=pl.CostEstimate(
            flops=2 * n * n * d,
            transcendentals=(8 * n if (logmap_m or expmap_out) else 0),
            bytes_accessed=nbytes),
    )


def _call_spmm(adjp, m, res, *, Np, D, tm, tk, bufs, m_resident, logmap_m, expmap_out, c, budget):
    """Tiled adj @ m (+ res) with fused manifold maps; falls back to default
    double-buffering if pl.Buffered is rejected by this JAX/Mosaic version."""
    global _BUF_OK
    with_res = res is not None
    args = (adjp, m, res) if with_res else (adjp, m)
    eff_bufs = bufs if _BUF_OK else 2
    try:
        fn = _build_spmm(Np, D, tm, tk, with_res, logmap_m, expmap_out, c,
                         m_resident, eff_bufs, budget)
        return fn(*args)
    except Exception:
        if eff_bufs <= 2:
            raise
        _BUF_OK = False
        fn = _build_spmm(Np, D, tm, tk, with_res, logmap_m, expmap_out, c,
                         m_resident, 2, budget)
        return fn(*args)


# --------------------------------------------------------------------------------------
# StackGCNs combination logic mapped onto spmm calls with fused first/last epilogues.
#   spmm_call(m, res, first, last):
#     first -> logmap0 applied to m tile in-kernel; last -> expmap0+proj in epilogue;
#     res   -> added in the k==last epilogue (before expmap).
# x_tangent is only ever consumed as the input of the first spmm in all four variants.
# --------------------------------------------------------------------------------------
def _run_stack(spmm_call, x, L, network):
    if network == "plainGCN":
        h = x
        for i in range(L):
            h = spmm_call(h, None, i == 0, i == L - 1)
        return h
    if network == "resSumGCN":
        prev, s = x, None
        for i in range(L):
            last = i == L - 1
            out = spmm_call(prev, s if last else None, i == 0, last)
            if last:
                return out
            s = out if s is None else s + out
            prev = out
    if network == "resAddGCN":
        if L == 1:
            return spmm_call(x, None, True, True)
        prev = x
        for i in range(L):
            res = None if i == 0 else prev
            prev = spmm_call(prev, res, i == 0, i == L - 1)
        return prev
    if network == "denseGCN":
        if L == 1:
            return spmm_call(x, None, True, True)
        prev = spmm_call(x, None, True, False)
        s = prev
        for i in range(1, L):
            last = i == L - 1
            new = spmm_call(prev, s, False, last)
            if last:
                return new
            s = s + new
            prev = new
    raise ValueError(f"unknown network {network}")


# Same combination logic but starting from output[1] (used inside the fused fast path).
def _stack_from_h1(spmm, h1, L, network):
    if network == "plainGCN":
        h = h1
        for _ in range(L - 1):
            h = spmm(h)
        return h
    if network == "resSumGCN":
        prev, s = h1, h1
        for _ in range(L - 1):
            prev = spmm(prev)
            s = s + prev
        return s
    if network == "resAddGCN":
        prev = h1
        for _ in range(L - 1):
            prev = prev + spmm(prev)
        return prev
    # denseGCN
    prev, s = h1, h1
    for _ in range(L - 1):
        new = s + spmm(prev)
        s = s + new
        prev = new
    return prev


# --------------------------------------------------------------------------------------
# Fused fast path (small graphs): adjacency is read from HBM exactly once, streamed in
# column chunks so its DMA overlaps the layer-0 matmul + logmap0, and retained in a VMEM
# scratch for the remaining L-1 layers.  Everything (logmap0, L layers, expmap0+proj) in
# a single pallas_call.
# --------------------------------------------------------------------------------------
def _fused_kernel(x_ref, adj_ref, o_ref, adj_vmem, h1_ref, *, c, tk, nk, L, network):
    k = pl.program_id(0)
    k_off = pl.multiple_of(k * tk, tk)

    adj_chunk = adj_ref[...]                  # (Np, tk) bf16, pipelined by BlockSpec
    adj_vmem[k] = adj_chunk                   # retain for layers >= 1

    x_tan = _logmap0_math(x_ref[pl.ds(k_off, tk), :].astype(jnp.float32), c)

    @pl.when(k == 0)
    def _():
        h1_ref[...] = jnp.zeros_like(h1_ref)

    h1_ref[...] += jnp.dot(adj_chunk, x_tan.astype(jnp.bfloat16),
                           preferred_element_type=jnp.float32)

    @pl.when(k == nk - 1)
    def _():
        def spmm(m):
            acc = None
            for kk in range(nk):
                part = jnp.dot(adj_vmem[kk],
                               m[kk * tk:(kk + 1) * tk, :].astype(jnp.bfloat16),
                               preferred_element_type=jnp.float32)
                acc = part if acc is None else acc + part
            return acc

        h = _stack_from_h1(spmm, h1_ref[...], L, network)
        o_ref[...] = _expmap0_proj_math(h, c).astype(o_ref.dtype)


@functools.lru_cache(maxsize=None)
def _build_fused(n, d, tk, c, L, network, out_dtype, budget):
    nk = n // tk
    kernel = functools.partial(_fused_kernel, c=c, tk=tk, nk=nk, L=L, network=network)
    return pl.pallas_call(
        kernel,
        out_shape=jax.ShapeDtypeStruct((n, d), jnp.dtype(out_dtype)),
        grid=(nk,),
        in_specs=[pl.BlockSpec((n, d), lambda k: (0, 0)),          # x: fetched once
                  pl.BlockSpec((n, tk), lambda k: (0, k))],        # adj column chunks
        out_specs=pl.BlockSpec((n, d), lambda k: (0, 0)),
        scratch_shapes=[pltpu.VMEM((nk, n, tk), jnp.bfloat16),     # resident adj copy
                        pltpu.VMEM((n, d), jnp.float32)],          # layer-0 accumulator
        compiler_params=pltpu.CompilerParams(
            dimension_semantics=("arbitrary",),
            vmem_limit_bytes=budget),
        cost_estimate=pl.CostEstimate(
            flops=2 * L * n * n * d, transcendentals=8 * n,
            bytes_accessed=n * n * 2 + 2 * n * d * 4),
    )


# --------------------------------------------------------------------------------------
# Padding / tile selection helpers.
# --------------------------------------------------------------------------------------
def _pad_inputs(x, adj_bf16, Np, c):
    N, D = x.shape
    if Np == N:
        return x, adj_bf16
    pad = Np - N
    sqrtK = float((1.0 / c) ** 0.5)
    # pad with valid on-manifold points (time=sqrtK, spatial=0) and zero adj rows/cols.
    pad_x = jnp.zeros((pad, D), x.dtype).at[:, 0].set(jnp.asarray(sqrtK, x.dtype))
    xp = jnp.concatenate([x, pad_x], axis=0)
    adjp = jnp.pad(adj_bf16, ((0, pad), (0, pad)))
    return xp, adjp


def _pick_tiles(N, D, budget, want_tm, want_tk):
    base = 256
    Np0 = _round_up(max(N, base), base)
    tm = min(_round_up(max(want_tm, base), base), Np0)
    tk = min(_round_up(max(want_tk, base), base), Np0)
    # keep ni >= 2 so the "parallel" row axis shards across both TensorCores on v7x.
    if Np0 // tm < 2 and Np0 >= 2 * base:
        tm = max(base, (Np0 // 2) // base * base)
    bufs = 3 if budget >= 96 * 1024 * 1024 else 2                  # Buffered(2) on v7x
    m_bound = 2 * (Np0 + (tm * tk) // base) * D * 4                # padded full-height m (f32)
    m_resident = m_bound <= budget // 8
    m_bytes = m_bound if m_resident else 4 * tk * D * 4

    def fits(tm_, tk_, bufs_):
        return bufs_ * tm_ * tk_ * 2 + m_bytes + 4 * tm_ * D * 4 <= int(0.7 * budget)

    while not fits(tm, tk, bufs):
        if bufs > 2:
            bufs = 2
        elif tk > base:
            tk -= base
        elif tm > base:
            tm -= base
        else:
            break
    Np = _round_up(N, math.lcm(tm, tk))
    return tm, tk, bufs, Np, m_resident


def _tiled_forward(x, adj_bf16, c, L, network, budget, want_tm, want_tk):
    N, D = x.shape
    tm, tk, bufs, Np, m_resident = _pick_tiles(N, D, budget, want_tm, want_tk)
    xp, adjp = _pad_inputs(x, adj_bf16, Np, c)

    def spmm_call(m, res, first, last):
        return _call_spmm(adjp, m, res, Np=Np, D=D, tm=tm, tk=tk, bufs=bufs,
                          m_resident=m_resident, logmap_m=first, expmap_out=last,
                          c=c, budget=budget)

    h = _run_stack(spmm_call, xp, L, network)
    return h[:N].astype(x.dtype)


# --------------------------------------------------------------------------------------
# Public wrapper: HyperbolicGraphConvolution.forward((x, adj)) -> (h, adj)
# --------------------------------------------------------------------------------------
def hyperbolic_graph_convolution(x, adj, *, c=1.0, network="resSumGCN", num_layers=3,
                                 block_m=512, block_k=2048, force_tiled=False):
    if network not in _NETWORKS:
        raise ValueError(f"unknown network {network}")
    assert num_layers >= 2, "num_layers must be >= 2"
    N, D = x.shape
    L = num_layers - 1                      # StackGCNs.num_gcn_layers
    budget = _vmem_budget_bytes()
    adj_bf16 = adj.astype(jnp.bfloat16)     # halve HBM bytes on the dominant operand

    use_fast = False
    Np_f = tk_f = 0
    if not force_tiled:
        Np_f = _round_up(max(N, 256), 256)
        tk_f = 256
        for cand in (2048, 1024, 512, 256):
            if Np_f % cand == 0 and 2 * Np_f * cand * 2 <= budget // 6:
                tk_f = cand
                break
        fast_bytes = Np_f * Np_f * 2 + 2 * Np_f * tk_f * 2 + 6 * Np_f * D * 4
        frac = 0.75 if budget >= 96 * 1024 * 1024 else 0.55        # conservative on v7x
        use_fast = fast_bytes <= frac * budget

    if use_fast:
        xp, adjp = _pad_inputs(x, adj_bf16, Np_f, c)
        h = _build_fused(Np_f, D, tk_f, float(c), L, network, str(x.dtype), budget)(xp, adjp)
        h = h[:N]
    else:
        h = _tiled_forward(x, adj_bf16, float(c), L, network, budget,
                           int(block_m), int(block_k))
    return h, adj


# --------------------------------------------------------------------------------------
# Pure-JAX f32 reference (direct translation of the torch module) for validation.
# --------------------------------------------------------------------------------------
def _reference_forward(x, adj, c, network, num_layers):
    L = num_layers - 1
    K = 1.0 / c
    sqrtK = K ** 0.5
    x = x.astype(jnp.float32)
    adj = adj.astype(jnp.float32)
    y = x[:, 1:]
    y_norm = jnp.maximum(jnp.linalg.norm(y, axis=1, keepdims=True), MIN_NORM)
    theta = jnp.maximum(x[:, 0:1] / sqrtK, 1.0 + EPS_F32)
    arcosh = jnp.log(theta + jnp.sqrt(theta * theta - 1.0))
    x_tan = jnp.concatenate([jnp.zeros_like(x[:, :1]), sqrtK * arcosh * y / y_norm], 1)
    output = [x_tan]
    if network == "plainGCN":
        for i in range(L):
            output.append(adj @ output[i])
        h = output[-1]
    elif network == "resSumGCN":
        for i in range(L):
            output.append(adj @ output[i])
        h = sum(output[1:])
    elif network == "resAddGCN":
        if L == 1:
            h = adj @ x_tan
        else:
            for i in range(L):
                if i == 0:
                    output.append(adj @ output[i])
                else:
                    output.append(output[i] + adj @ output[i])
            h = output[-1]
    else:  # denseGCN
        for i in range(L):
            if i > 0:
                output.append(sum(output[1:i + 1]) + adj @ output[i])
            else:
                output.append(adj @ output[i])
        h = output[-1]
    u = h[:, 1:]
    u_norm = jnp.maximum(jnp.linalg.norm(u, axis=1, keepdims=True), MIN_NORM)
    th = u_norm / sqrtK
    spatial = sqrtK * jnp.sinh(th) * u / u_norm
    time = jnp.sqrt(jnp.maximum(K + jnp.sum(spatial * spatial, 1, keepdims=True), EPS_F32))
    return jnp.concatenate([time, spatial], 1)


# --------------------------------------------------------------------------------------
# Demo / self-test.
# --------------------------------------------------------------------------------------
if __name__ == "__main__":
    def make_inputs(key, n, d, c, density):
        k1, k2 = jax.random.split(key)
        spatial = 0.1 * jax.random.normal(k1, (n, d - 1), dtype=jnp.float32)
        time = jnp.sqrt(1.0 / c + jnp.sum(spatial * spatial, axis=1, keepdims=True))
        x = jnp.concatenate([time, spatial], axis=1)               # on-manifold points
        a = (jax.random.uniform(k2, (n, n)) < density).astype(jnp.float32)
        a = jnp.maximum(a, a.T) + jnp.eye(n, dtype=jnp.float32)
        deg = jnp.sum(a, axis=1, keepdims=True)
        adj = a / jnp.sqrt(deg) / jnp.sqrt(deg.T)                  # symmetric normalized
        return x, adj

    c = 1.0
    key = jax.random.PRNGKey(0)
    ka, kb, kc = jax.random.split(key, 3)
    max_err = 0.0

    # Path A: small graph -> fused fast path (adj read from HBM once, streamed into VMEM).
    x, adj = make_inputs(ka, 64, 16, c, density=0.1)
    h, adj_out = hyperbolic_graph_convolution(x, adj, c=c, network="resSumGCN", num_layers=3)
    jax.block_until_ready(h)
    assert h.shape == (64, 16) and bool(jnp.all(jnp.isfinite(h)))
    ref = _reference_forward(x, adj, c, "resSumGCN", 3)
    max_err = max(max_err, float(jnp.max(jnp.abs(h - ref))))

    # Path B: tiled/pipelined path (grid over (row_tile, k_tile), fused logmap/expmap).
    x, adj = make_inputs(kb, 512, 16, c, density=0.05)
    for network in _NETWORKS:
        h, _ = hyperbolic_graph_convolution(x, adj, c=c, network=network, num_layers=3,
                                            block_m=256, block_k=256, force_tiled=True)
        jax.block_until_ready(h)
        assert h.shape == (512, 16) and bool(jnp.all(jnp.isfinite(h)))
        ref = _reference_forward(x, adj, c, network, 3)
        max_err = max(max_err, float(jnp.max(jnp.abs(h - ref))))

    # Path B with a non-tile-multiple node count (exercises padding; reuses the kernels
    # compiled above since it rounds up to the same padded size 512).
    x, adj = make_inputs(kc, 320, 16, c, density=0.05)
    h, _ = hyperbolic_graph_convolution(x, adj, c=c, network="resSumGCN", num_layers=3,
                                        block_m=256, block_k=256, force_tiled=True)
    jax.block_until_ready(h)
    assert h.shape == (320, 16) and bool(jnp.all(jnp.isfinite(h)))
    ref = _reference_forward(x, adj, c, "resSumGCN", 3)
    max_err = max(max_err, float(jnp.max(jnp.abs(h - ref))))

    assert max_err < 2e-2, f"max abs error vs f32 reference too large: {max_err}"
    print("KERNEL_OK")
</pallas_src>

<mosaic_0001>
module attributes {stable_mosaic.version = 11 : i64} {
  func.func @_fused_kernel(%arg0: i32, %arg1: memref<256x16xf32, #tpu.memory_space<vmem>>, %arg2: memref<256x256xbf16, #tpu.memory_space<vmem>>, %arg3: memref<256x16xf32, #tpu.memory_space<vmem>>, %arg4: memref<1x256x256xbf16, #tpu.memory_space<vmem>>, %arg5: memref<256x16xf32, #tpu.memory_space<vmem>>) attributes {dimension_semantics = [#tpu.dimension_semantics<arbitrary>], iteration_bounds = array<i64: 1>, scalar_prefetch = 0 : i64, scratch_operands = 2 : i64, tpu.core_type = #tpu.core_type<tc>, window_params = [{pipeline_mode = #tpu.pipeline_mode<synchronous>, transform_indices = @transform_0, window_bounds = array<i64: 256, 16>}, {transform_indices = @transform_1, window_bounds = array<i64: 256, 256>}, {pipeline_mode = #tpu.pipeline_mode<synchronous>, transform_indices = @transform_2, window_bounds = array<i64: 256, 16>}]} {
    %c256_i32 = arith.constant 256 : i32
    %0 = arith.muli %arg0, %c256_i32 : i32
    %1 = tpu.assume_multiple %0, 256 : i32
    %c0 = arith.constant 0 : index
    %c0_0 = arith.constant 0 : index
    %2 = vector.load %arg2[%c0, %c0_0] : memref<256x256xbf16, #tpu.memory_space<vmem>>, vector<256x256xbf16>
    %3 = arith.index_cast %arg0 : i32 to index
    %c0_1 = arith.constant 0 : index
    %c0_2 = arith.constant 0 : index
    %4 = vector.load %arg4[%3, %c0_1, %c0_2] : memref<1x256x256xbf16, #tpu.memory_space<vmem>>, vector<1x256x256xbf16>
    %5 = vector.shape_cast %4 : vector<1x256x256xbf16> to vector<256x256xbf16>
    %6 = vector.shape_cast %2 : vector<256x256xbf16> to vector<1x256x256xbf16>
    tpu.vector_store %arg4[%3, %c0_1, %c0_2], %6 {strides = array<i32>} : memref<1x256x256xbf16, #tpu.memory_space<vmem>>, vector<1x256x256xbf16>,
    %7 = arith.index_cast %1 : i32 to index
    %c0_3 = arith.constant 0 : index
    %8 = vector.load %arg1[%7, %c0_3] : memref<256x16xf32, #tpu.memory_space<vmem>>, vector<256x16xf32>
    %9 = tpu.iota {dimensions = array<i32: 1>} : vector<256x16xi32>
    %c1_i32 = arith.constant 1 : i32
    %10 = vector.broadcast %c1_i32 : i32 to vector<256x16xi32>
    %11 = arith.cmpi sge, %9, %10 : vector<256x16xi32>
    %12 = arith.extui %11 : vector<256x16xi1> to vector<256x16xi32>
    %13 = arith.sitofp %12 : vector<256x16xi32> to vector<256x16xf32>
    %14 = arith.mulf %8, %13 : vector<256x16xf32>
    %15 = arith.mulf %14, %14 : vector<256x16xf32>
    %cst = arith.constant dense<0.000000e+00> : vector<256xf32>
    %16 = vector.multi_reduction <add>, %15, %cst [1] : vector<256x16xf32> to vector<256xf32>
    %17 = vector.shape_cast %16 : vector<256xf32> to vector<256x1xf32>
    %18 = math.sqrt %17 : vector<256x1xf32>
    %cst_4 = arith.constant 1.000000e-15 : f32
    %19 = vector.broadcast %cst_4 : f32 to vector<256x1xf32>
    %20 = arith.maximumf %18, %19 : vector<256x1xf32>
    %21 = vector.extract_strided_slice %8 {offsets = [0, 0], sizes = [256, 1], strides = [1, 1]} : vector<256x16xf32> to vector<256x1xf32>
    %cst_5 = arith.constant 1.000000e+00 : f32
    %22 = vector.broadcast %cst_5 : f32 to vector<256x1xf32>
    %23 = arith.divf %21, %22 : vector<256x1xf32>
    %cst_6 = arith.constant 1.00000012 : f32
    %24 = vector.broadcast %cst_6 : f32 to vector<256x1xf32>
    %25 = arith.maximumf %23, %24 : vector<256x1xf32>
    %26 = arith.mulf %25, %25 : vector<256x1xf32>
    %cst_7 = arith.constant 1.000000e+00 : f32
    %27 = vector.broadcast %cst_7 : f32 to vector<256x1xf32>
    %28 = arith.subf %26, %27 : vector<256x1xf32>
    %29 = math.sqrt %28 : vector<256x1xf32>
    %30 = arith.addf %25, %29 : vector<256x1xf32>
    %31 = math.log %30 : vector<256x1xf32>
    %cst_8 = arith.constant 1.000000e+00 : f32
    %32 = vector.broadcast %cst_8 : f32 to vector<256x1xf32>
    %33 = arith.mulf %32, %31 : vector<256x1xf32>
    %34 = arith.divf %33, %20 : vector<256x1xf32>
    %35 = vector.broadcast %34 : vector<256x1xf32> to vector<256x16xf32>
    %36 = arith.mulf %35, %14 : vector<256x16xf32>
    %c0_i32 = arith.constant 0 : i32
    %37 = arith.cmpi eq, %arg0, %c0_i32 : i32
    %38 = arith.extui %37 : i1 to i32
    %c0_i32_9 = arith.constant 0 : i32
    %39 = arith.cmpi ne, %38, %c0_i32_9 : i32
    scf.if %39 {
      %cst_17 = arith.constant 0.000000e+00 : f32
      %48 = vector.broadcast %cst_17 : f32 to vector<256x16xf32>
      %c0_18 = arith.constant 0 : index
      %c0_19 = arith.constant 0 : index
      %49 = vector.load %arg5[%c0_18, %c0_19] : memref<256x16xf32, #tpu.memory_space<vmem>>, vector<256x16xf32>
      tpu.vector_store %arg5[%c0_18, %c0_19], %48 {strides = array<i32>} : memref<256x16xf32, #tpu.memory_space<vmem>>, vector<256x16xf32>,
    } else {
    }
    %c0_10 = arith.constant 0 : index
    %c0_11 = arith.constant 0 : index
    %40 = vector.load %arg5[%c0_10, %c0_11] : memref<256x16xf32, #tpu.memory_space<vmem>>, vector<256x16xf32>
    %41 = arith.truncf %36 : vector<256x16xf32> to vector<256x16xbf16>
    %cst_12 = arith.constant dense<0.000000e+00> : vector<256x16xf32>
    %42 = tpu.matmul %2, %41, %cst_12 {dimension_numbers = #tpu.dot_dimension_numbers<[1], [0], [0], [1], [0, 0, 1, 1], [], []>} : vector<256x256xbf16>, vector<256x16xbf16>, vector<256x16xf32> -> vector<256x16xf32>
    %43 = arith.addf %40, %42 : vector<256x16xf32>
    %c0_13 = arith.constant 0 : index
    %c0_14 = arith.constant 0 : index
    %44 = vector.load %arg5[%c0_13, %c0_14] : memref<256x16xf32, #tpu.memory_space<vmem>>, vector<256x16xf32>
    tpu.vector_store %arg5[%c0_13, %c0_14], %43 {strides = array<i32>} : memref<256x16xf32, #tpu.memory_space<vmem>>, vector<256x16xf32>,
    %c0_i32_15 = arith.constant 0 : i32
    %45 = arith.cmpi eq, %arg0, %c0_i32_15 : i32
    %46 = arith.extui %45 : i1 to i32
    %c0_i32_16 = arith.constant 0 : i32
    %47 = arith.cmpi ne, %46, %c0_i32_16 : i32
    scf.if %47 {
      %c0_17 = arith.constant 0 : index
      %c0_18 = arith.constant 0 : index
      %48 = vector.load %arg5[%c0_17, %c0_18] : memref<256x16xf32, #tpu.memory_space<vmem>>, vector<256x16xf32>
      %c0_19 = arith.constant 0 : index
      %c0_20 = arith.constant 0 : index
      %c0_21 = arith.constant 0 : index
      %49 = vector.load %arg4[%c0_19, %c0_20, %c0_21] : memref<1x256x256xbf16, #tpu.memory_space<vmem>>, vector<1x256x256xbf16>
      %50 = vector.shape_cast %49 : vector<1x256x256xbf16> to vector<256x256xbf16>
      %51 = arith.truncf %48 : vector<256x16xf32> to vector<256x16xbf16>
      %cst_22 = arith.constant dense<0.000000e+00> : vector<256x16xf32>
      %52 = tpu.matmul %50, %51, %cst_22 {dimension_numbers = #tpu.dot_dimension_numbers<[1], [0], [0], [1], [0, 0, 1, 1], [], []>} : vector<256x256xbf16>, vector<256x16xbf16>, vector<256x16xf32> -> vector<256x16xf32>
      %53 = arith.addf %48, %52 : vector<256x16xf32>
      %54 = tpu.iota {dimensions = array<i32: 1>} : vector<256x16xi32>
      %c1_i32_23 = arith.constant 1 : i32
      %55 = vector.broadcast %c1_i32_23 : i32 to vector<256x16xi32>
      %56 = arith.cmpi sge, %54, %55 : vector<256x16xi32>
      %57 = arith.extui %56 : vector<256x16xi1> to vector<256x16xi32>
      %58 = arith.sitofp %57 : vector<256x16xi32> to vector<256x16xf32>
      %59 = arith.mulf %53, %58 : vector<256x16xf32>
      %60 = arith.mulf %59, %59 : vector<256x16xf32>
      %cst_24 = arith.constant dense<0.000000e+00> : vector<256xf32>
      %61 = vector.multi_reduction <add>, %60, %cst_24 [1] : vector<256x16xf32> to vector<256xf32>
      %62 = vector.shape_cast %61 : vector<256xf32> to vector<256x1xf32>
      %63 = math.sqrt %62 : vector<256x1xf32>
      %cst_25 = arith.constant 1.000000e-15 : f32
      %64 = vector.broadcast %cst_25 : f32 to vector<256x1xf32>
      %65 = arith.maximumf %63, %64 : vector<256x1xf32>
      %cst_26 = arith.constant 1.000000e+00 : f32
      %66 = vector.broadcast %cst_26 : f32 to vector<256x1xf32>
      %67 = arith.divf %65, %66 : vector<256x1xf32>
      %cst_27 = arith.constant 8.500000e+01 : f32
      %68 = vector.broadcast %cst_27 : f32 to vector<256x1xf32>
      %69 = arith.minimumf %67, %68 : vector<256x1xf32>
      %70 = arith.mulf %67, %67 : vector<256x1xf32>
      %cst_28 = arith.constant 0.166666672 : f32
      %71 = vector.broadcast %cst_28 : f32 to vector<256x1xf32>
      %72 = arith.mulf %70, %71 : vector<256x1xf32>
      %cst_29 = arith.constant 1.000000e+00 : f32
      %73 = vector.broadcast %cst_29 : f32 to vector<256x1xf32>
      %74 = arith.addf %73, %72 : vector<256x1xf32>
      %75 = math.exp %69 : vector<256x1xf32>
      %cst_30 = arith.constant 0.000000e+00 : f32
      %76 = vector.broadcast %cst_30 : f32 to vector<256x1xf32>
      %77 = arith.subf %76, %69 : vector<256x1xf32>
      %78 = math.exp %77 : vector<256x1xf32>
      %79 = arith.subf %75, %78 : vector<256x1xf32>
      %cst_31 = arith.constant 5.000000e-01 : f32
      %80 = vector.broadcast %cst_31 : f32 to vector<256x1xf32>
      %81 = arith.mulf %80, %79 : vector<256x1xf32>
      %82 = arith.divf %81, %67 : vector<256x1xf32>
      %cst_32 = arith.constant 9.99999974E-5 : f32
      %83 = vector.broadcast %cst_32 : f32 to vector<256x1xf32>
      %84 = arith.cmpf olt, %67, %83 : vector<256x1xf32>
      %85 = arith.select %84, %74, %82 : vector<256x1xi1>, vector<256x1xf32>
      %86 = vector.broadcast %85 : vector<256x1xf32> to vector<256x16xf32>
      %87 = arith.mulf %86, %59 : vector<256x16xf32>
      %88 = arith.mulf %87, %87 : vector<256x16xf32>
      %cst_33 = arith.constant dense<0.000000e+00> : vector<256xf32>
      %89 = vector.multi_reduction <add>, %88, %cst_33 [1] : vector<256x16xf32> to vector<256xf32>
      %90 = vector.shape_cast %89 : vector<256xf32> to vector<256x1xf32>
      %cst_34 = arith.constant 1.000000e+00 : f32
      %91 = vector.broadcast %cst_34 : f32 to vector<256x1xf32>
      %92 = arith.addf %91, %90 : vector<256x1xf32>
      %cst_35 = arith.constant 1.000000e-07 : f32
      %93 = vector.broadcast %cst_35 : f32 to vector<256x1xf32>
      %94 = arith.maximumf %92, %93 : vector<256x1xf32>
      %95 = math.sqrt %94 : vector<256x1xf32>
      %cst_36 = arith.constant 1.000000e+00 : f32
      %96 = vector.broadcast %cst_36 : f32 to vector<256x16xf32>
      %97 = arith.subf %96, %58 : vector<256x16xf32>
      %98 = vector.broadcast %95 : vector<256x1xf32> to vector<256x16xf32>
      %99 = arith.mulf %97, %98 : vector<256x16xf32>
      %100 = arith.addf %87, %99 : vector<256x16xf32>
      %c0_37 = arith.constant 0 : index
      %c0_38 = arith.constant 0 : index
      %101 = vector.load %arg3[%c0_37, %c0_38] : memref<256x16xf32, #tpu.memory_space<vmem>>, vector<256x16xf32>
      tpu.vector_store %arg3[%c0_37, %c0_38], %100 {strides = array<i32>} : memref<256x16xf32, #tpu.memory_space<vmem>>, vector<256x16xf32>,
    } else {
    }
    return
  }
  func.func @transform_0(%arg0: i32) -> (i32, i32) {
    %c0_i32 = arith.constant 0 : i32
    %c0_i32_0 = arith.constant 0 : i32
    %c0_i32_1 = arith.constant 0 : i32
    return %c0_i32, %c0_i32_0 : i32, i32
  }
  func.func @transform_1(%arg0: i32) -> (i32, i32) {
    %c0_i32 = arith.constant 0 : i32
    %c0_i32_0 = arith.constant 0 : i32
    return %c0_i32, %arg0 : i32, i32
  }
  func.func @transform_2(%arg0: i32) -> (i32, i32) {
    %c0_i32 = arith.constant 0 : i32
    %c0_i32_0 = arith.constant 0 : i32
    %c0_i32_1 = arith.constant 0 : i32
    return %c0_i32, %c0_i32_0 : i32, i32
  }
}

</mosaic_0001>

<bundles_post_ra>
// kernel: tpu_custom_call.1
= control target key start
LH: loop header
LB: loop body
LE: loop exit
PB: predicated region body
PF: predicated region fallthrough
CT: control target
= control target key end

     0   :  { %v112_v0 = vlaneseq  ;;  %vm181_vm0 = vcmask 130048   ;;  %v6004_v1 = vmov 0.0   ;;  %s11115_s0 = inlined_call_operand.vmem [shape: f32[256,16], index: 0, kind: input, shape index: {}]   ;;  %s11116_s1 = inlined_call_operand.vmem [shape: bf16[256,256], index: 1, kind: input, shape index: {}]   ;;  %s11117_s2 = inlined_call_operand.vmem [shape: f32[256,16], index: 2, kind: output, shape index: {}]  }
   0x1   :  { %1946 = vst.msk [vmem:[#allocation3] sm:$0xff] %vm181_vm0, %v6004_v1  ;;  %v6028_v3 = vld [vmem:[%s11115_s0 + $0xf0] sm:$0xff]  ;;  %v6042_v5 = vld [vmem:[%s11115_s0 + $0x60] sm:$0xff]  ;;  %v6052_v7 = vld [vmem:[%s11115_s0 + $0xf8] sm:$0xff] }
   0x2   :  { %v113_v2 = vand.u32 127, %v112_v0  ;;  %1947 = vst.msk [vmem:[#allocation3 + $0x8] sm:$0xff] %vm181_vm0, %v6004_v1  ;;  %v6035_v4 = vld [vmem:[%s11115_s0 + $0x70] sm:$0xff]  ;;  %v6090_v16 = vld [vmem:[%s11115_s0 + $0x78] sm:$0xff]  ;;  %v6095_v17 = vld [vmem:[%s11115_s0 + $0x68] sm:$0xff] }
   0x3   :  { %1948 = vst.msk [vmem:[#allocation3 + $0x10] sm:$0xff] %vm181_vm0, %v6004_v1  ;;  %v6118_v23 = vld [vmem:[%s11115_s0 + $0xe8] sm:$0xff]  ;;  %v6138_v28 = vld [vmem:[%s11115_s0 + $0xe0] sm:$0xff]  ;;  %v6146_v30 = vld [vmem:[%s11115_s0 + $0x50] sm:$0xff] }
   0x4   :  { %vm114_vm1 = vcmp.ge.s32.totalorder %v113_v2, 1  ;;  %1949 = vst.msk [vmem:[#allocation3 + $0x18] sm:$0xff] %vm181_vm0, %v6004_v1  ;;  %v6172_v36 = vld [vmem:[%s11115_s0 + $0xd0] sm:$0xff]  ;;  %v6183_v38 = vld [vmem:[%s11115_s0 + $0x58] sm:$0xff]  ;;  %v6226_v48 = vld [vmem:[%s11115_s0 + $0x48] sm:$0xff] }
   0x5   :  { %v6045_v6 = vsel %vm114_vm1, 1.0, %v6004_v1  ;;  %1950 = vst.msk [vmem:[#allocation3 + $0x20] sm:$0xff] %vm181_vm0, %v6004_v1  ;;  %v6207_v44 = vld [vmem:[%s11115_s0 + $0xd8] sm:$0xff]  ;;  %v6233_v49 = vld [vmem:[%s11115_s0 + $0xc0] sm:$0xff]  ;;  %v6266_v60 = vld [vmem:[%s11115_s0 + $0x30] sm:$0xff] }
   0x6   :  { %11281 = vst [vmem:[#allocation4_spill] sm:$0xff] %v6045_v6  ;;  %v6056_v8 = vmul.f32 %v6045_v6, %v6028_v3  ;;  %v6062_v9 = vmul.f32 %v6045_v6, %v6035_v4  ;;  %v6068_v10 = vmul.f32 %v6045_v6, %v6042_v5  ;;  %v6076_v12 = vmul.f32 %v6045_v6, %v6052_v7  ;;  %v6238_v50 = vld [vmem:[%s11115_s0 + $0x40] sm:$0xff]  ;;  %v6273_v62 = vld [vmem:[%s11115_s0 + $0xc8] sm:$0xff]  ;;  %v6278_v63 = vld [vmem:[%s11115_s0 + $0x38] sm:$0xff] }
   0x7   :  { %1951 = vst.msk [vmem:[#allocation3 + $0x28] sm:$0xff] %vm181_vm0, %v6004_v1  ;;  %v6109_v21 = vmul.f32 %v6045_v6, %v6090_v16  ;;  %v6113_v22 = vmul.f32 %v6045_v6, %v6095_v17  ;;  %v6133_v27 = vmul.f32 %v6045_v6, %v6118_v23  ;;  %v6155_v32 = vmul.f32 %v6045_v6, %v6138_v28 }
   0x8   :  { %11282 = vst [vmem:[#allocation5_spill] sm:$0xff] %v6056_v8  ;;  %v179_v11 = vmul.f32 %v6056_v8, %v6056_v8  ;;  %v163_v13 = vmul.f32 %v6062_v9, %v6062_v9  ;;  %v161_v15 = vmul.f32 %v6068_v10, %v6068_v10  ;;  %v180_v20 = vmul.f32 %v6076_v12, %v6076_v12 }
   0x9   :  { %11283 = vst [vmem:[#allocation6_spill] sm:$0xff] %v6062_v9  ;;  %v164_v24 = vmul.f32 %v6109_v21, %v6109_v21  ;;  %v162_v25 = vmul.f32 %v6113_v22, %v6113_v22  ;;  %v178_v33 = vmul.f32 %v6133_v27, %v6133_v27  ;;  %v6163_v34 = vmul.f32 %v6045_v6, %v6146_v30 }
   0xa   :  { %1952 = vst.msk [vmem:[#allocation3 + $0x30] sm:$0xff] %vm181_vm0, %v6004_v1  ;;  %v272_v14 = vsel %vm181_vm0, %v179_v11, 0.0  ;;  %v224_v18 = vsel %vm181_vm0, %v163_v13, 0.0  ;;  %v218_v19 = vsel %vm181_vm0, %v161_v15, 0.0  ;;  %v275_v26 = vsel %vm181_vm0, %v180_v20, 0.0 }
   0xb   :  { %11284 = vst [vmem:[#allocation7_spill] sm:$0xff] %v6068_v10  ;;  %273 = vadd.xlane.f32.xlu1 %v272_v14  ;;  %225 = vadd.xlane.f32.xlu0 %v224_v18  ;;  %v227_v29 = vsel %vm181_vm0, %v164_v24, 0.0  ;;  %v221_v31 = vsel %vm181_vm0, %v162_v25, 0.0  ;;  %v177_v35 = vmul.f32 %v6155_v32, %v6155_v32  ;;  %v159_v37 = vmul.f32 %v6163_v34, %v6163_v34  ;;  %v6309_v24 = vld [vmem:[%s11115_s0 + $0xb0] sm:$0xff]  ;;  %v6314_v25 = vld [vmem:[%s11115_s0 + $0x20] sm:$0xff] }
   0xc   :  { %1953 = vst.msk [vmem:[#allocation3 + $0x38] sm:$0xff] %vm181_vm0, %v6004_v1  ;;  %219 = vadd.xlane.f32.xlu2 %v218_v19  ;;  %v269_v39 = vsel %vm181_vm0, %v178_v33, 0.0  ;;  %v6190_v40 = vmul.f32 %v6045_v6, %v6172_v36  ;;  %v6200_v43 = vmul.f32 %v6045_v6, %v6183_v38  ;;  %v6221_v47 = vmul.f32 %v6045_v6, %v6207_v44  ;;  %v6302_v19 = vld [vmem:[%s11115_s0 + $0xb8] sm:$0xff] }
   0xd   :  { %11285 = vst [vmem:[#allocation8_spill] sm:$0xff] %v6076_v12  ;;  %v266_v41 = vsel %vm181_vm0, %v177_v35, 0.0  ;;  %v212_v42 = vsel %vm181_vm0, %v159_v37, 0.0  ;;  %v6248_v54 = vmul.f32 %v6045_v6, %v6226_v48  ;;  %v6253_v56 = vmul.f32 %v6045_v6, %v6233_v49 }
   0xe   :  { %1954 = vst.msk [vmem:[#allocation3 + $0x40] sm:$0xff] %vm181_vm0, %v6004_v1  ;;  %v175_v45 = vmul.f32 %v6190_v40, %v6190_v40  ;;  %v160_v46 = vmul.f32 %v6200_v43, %v6200_v43  ;;  %v176_v52 = vmul.f32 %v6221_v47, %v6221_v47  ;;  %v6257_v57 = vmul.f32 %v6045_v6, %v6238_v50 }
   0xf   :  { %1955 = vst.msk [vmem:[#allocation3 + $0x48] sm:$0xff] %vm181_vm0, %v6004_v1  ;;  %v158_v58 = vmul.f32 %v6248_v54, %v6248_v54  ;;  %v173_v61 = vmul.f32 %v6253_v56, %v6253_v56  ;;  %v6288_v11 = vmul.f32 %v6045_v6, %v6273_v62  ;;  %v6293_v14 = vmul.f32 %v6045_v6, %v6278_v63 }
  0x10   :  { %1956 = vst.msk [vmem:[#allocation3 + $0x50] sm:$0xff] %vm181_vm0, %v6004_v1  ;;  %v260_v51 = vsel %vm181_vm0, %v175_v45, 0.0  ;;  %v215_v53 = vsel %vm181_vm0, %v160_v46, 0.0  ;;  %v263_v55 = vsel %vm181_vm0, %v176_v52, 0.0  ;;  %v157_v59 = vmul.f32 %v6257_v57, %v6257_v57  ;;  %v6345_v46 = vld [vmem:[%s11115_s0 + $0x28] sm:$0xff] }
  0x11   :  { %1957 = vst.msk [vmem:[#allocation3 + $0x58] sm:$0xff] %vm181_vm0, %v6004_v1  ;;  %v209_v0 = vsel %vm181_vm0, %v158_v58, 0.0  ;;  %v254_v13 = vsel %vm181_vm0, %v173_v61, 0.0  ;;  %v174_v18 = vmul.f32 %v6288_v11, %v6288_v11  ;;  %v156_v20 = vmul.f32 %v6293_v14, %v6293_v14 }
  0x12   :  { %1958 = vst.msk [vmem:[#allocation3 + $0x60] sm:$0xff] %vm181_vm0, %v6004_v1  ;;  %v206_v2 = vsel %vm181_vm0, %v157_v59, 0.0  ;;  %v6324_v33 = vmul.f32 %v6045_v6, %v6309_v24  ;;  %v6329_v37 = vmul.f32 %v6045_v6, %v6314_v25  ;;  %v6360_v58 = vmul.f32 %v6045_v6, %v6345_v46 }
  0x13   :  { %11286 = vst [vmem:[#allocation9_spill] sm:$0xff] %v6109_v21  ;;  %276 = vadd.xlane.f32.xlu1 %v275_v26  ;;  %228 = vadd.xlane.f32.xlu0 %v227_v29  ;;  %v6319_v29 = vmul.f32 %v6045_v6, %v6302_v19  ;;  %v203_v35 = vsel %vm181_vm0, %v156_v20, 0.0  ;;  %v6386_v20 = vld [vmem:[%s11115_s0 + $0x90] sm:$0xff]  ;;  %v6637_v9 = vmax.f32 %v6314_v25, 1.0000001 }
  0x14   :  { %11287 = vst [vmem:[#allocation10_spill] sm:$0xff] %v6113_v22  ;;  %222 = vadd.xlane.f32.xlu2 %v221_v31  ;;  %v257_v31 = vsel %vm181_vm0, %v174_v18, 0.0  ;;  %v153_v45 = vmul.f32 %v6329_v37, %v6329_v37  ;;  %v6381_v18 = vld [vmem:[%s11115_s0 + $0x10] sm:$0xff]  ;;  %v6653_v25 = vmax.f32 %v6345_v46, 1.0000001 }
  0x15   :  { %1959 = vst.msk [vmem:[#allocation3 + $0x68] sm:$0xff] %vm181_vm0, %v6004_v1  ;;  %v6671_v46 = vmax.f32 %v6386_v20, 1.0000001 }
  0x16   :  { %1960 = vst.msk [vmem:[#allocation3 + $0x70] sm:$0xff] %vm181_vm0, %v6004_v1  ;;  %v194_v59 = vsel %vm181_vm0, %v153_v45, 0.0  ;;  %v6401_v45 = vmul.f32 %v6045_v6, %v6386_v20 }
  0x17   :  { %1961 = vst.msk [vmem:[#allocation3 + $0x78] sm:$0xff] %vm181_vm0, %v6004_v1 }
  0x18   :  { %11288 = vst [vmem:[#allocation11_spill] sm:$0xff] %v6133_v27  ;;  %v6606_v27 = vmax.f32 %v6302_v19, 1.0000001 }
  0x19   :  { %1962 = vst.msk [vmem:[#allocation3 + $0x80] sm:$0xff] %vm181_vm0, %v6004_v1 }
  0x1a   :  { %1963 = vst.msk [vmem:[#allocation3 + $0x88] sm:$0xff] %vm181_vm0, %v6004_v1  ;;  %v749_v12 = vmul.f32 %v6606_v27, %v6606_v27 }
  0x1b   :  { %1964 = vst.msk [vmem:[#allocation3 + $0x90] sm:$0xff] %vm181_vm0, %v6004_v1  ;;  %270 = vadd.xlane.f32.xlu1 %v269_v39  ;;  %267 = vadd.xlane.f32.xlu0 %v266_v41  ;;  %v172_v39 = vmul.f32 %v6319_v29, %v6319_v29  ;;  %v171_v41 = vmul.f32 %v6324_v33, %v6324_v33 }
  0x1c   :  { %11289 = vst [vmem:[#allocation12_spill] sm:$0xff] %v6155_v32  ;;  %213 = vadd.xlane.f32.xlu2 %v212_v42  ;;  %v6338_v42 = vld [vmem:[%s11115_s0 + $0xa0] sm:$0xff] }
  0x1d   :  { %1965 = vst.msk [vmem:[#allocation3 + $0x98] sm:$0xff] %vm181_vm0, %v6004_v1  ;;  %v251_v52 = vsel %vm181_vm0, %v172_v39, 0.0  ;;  %v6396_v39 = vmul.f32 %v6045_v6, %v6381_v18 }
  0x1e   :  { %11290 = vst [vmem:[#allocation13_spill] sm:$0xff] %v6163_v34 }
  0x1f   :  { %1966 = vst.msk [vmem:[#allocation3 + $0xa0] sm:$0xff] %vm181_vm0, %v6004_v1 }
  0x20   :  { %1967 = vst.msk [vmem:[#allocation3 + $0xa8] sm:$0xff] %vm181_vm0, %v6004_v1 }
  0x21   :  { %1968 = vst.msk [vmem:[#allocation3 + $0xb0] sm:$0xff] %vm181_vm0, %v6004_v1 }
  0x22   :  { %1969 = vst.msk [vmem:[#allocation3 + $0xb8] sm:$0xff] %vm181_vm0, %v6004_v1 }
  0x23   :  { %11291 = vst [vmem:[#allocation14_spill] sm:$0xff] %v6190_v40  ;;  %261 = vadd.xlane.f32.xlu1 %v260_v51  ;;  %216 = vadd.xlane.f32.xlu0 %v215_v53  ;;  %v6350_v51 = vld [vmem:[%s11115_s0 + $0xa8] sm:$0xff]  ;;  %v6355_v53 = vmul.f32 %v6045_v6, %v6338_v42 }
  0x24   :  { %1970 = vst.msk [vmem:[#allocation3 + $0xc0] sm:$0xff] %vm181_vm0, %v6004_v1  ;;  %264 = vadd.xlane.f32.xlu2 %v263_v55  ;;  %v248_v55 = vsel %vm181_vm0, %v171_v41, 0.0  ;;  %v6365_v61 = vmul.f32 %v6045_v6, %v6350_v51 }
  0x25   :  { %1971 = vst.msk [vmem:[#allocation3 + $0xc8] sm:$0xff] %vm181_vm0, %v6004_v1 }
  0x26   :  { %11292 = vst [vmem:[#allocation15_spill] sm:$0xff] %v6200_v43 }
  0x27   :  { %1972 = vst.msk [vmem:[#allocation3 + $0xd0] sm:$0xff] %vm181_vm0, %v6004_v1 }
  0x28   :  { %1973 = vst.msk [vmem:[#allocation3 + $0xd8] sm:$0xff] %vm181_vm0, %v6004_v1 }
  0x29   :  { %1974 = vst.msk [vmem:[#allocation3 + $0xe0] sm:$0xff] %vm181_vm0, %v6004_v1 }
  0x2a   :  { %1975 = vst.msk [vmem:[#allocation3 + $0xe8] sm:$0xff] %vm181_vm0, %v6004_v1 }
  0x2b   :  { %11293 = vst [vmem:[#allocation16_spill] sm:$0xff] %v6221_v47  ;;  %210 = vadd.xlane.f32.xlu1 %v209_v0  ;;  %207 = vadd.xlane.f32.xlu0 %v206_v2  ;;  %v169_v0 = vmul.f32 %v6355_v53, %v6355_v53  ;;  %v154_v2 = vmul.f32 %v6360_v58, %v6360_v58  ;;  %v6596_v47 = vmax.f32 %v6309_v24, 1.0000001 }
  0x2c   :  { %1976 = vst.msk [vmem:[#allocation3 + $0xf0] sm:$0xff] %vm181_vm0, %v6004_v1  ;;  %255 = vadd.xlane.f32.xlu2 %v254_v13  ;;  %v6374_v13 = vld [vmem:[%s11115_s0 + $0x18] sm:$0xff] }
  0x2d   :  { %1977 = vst.msk [vmem:[#allocation3 + $0xf8] sm:$0xff] %vm181_vm0, %v6004_v1  ;;  %v6283_v1 = vmul.f32 %v6045_v6, %v6266_v60  ;;  %v748_v8 = vmul.f32 %v6596_v47, %v6596_v47 }
  0x2e   :  { %11294 = vst [vmem:[#allocation17_spill] sm:$0xff] %v6248_v54  ;;  %v6570_v54 = vmax.f32 %v6273_v62, 1.0000001  ;;  %v6586_v62 = vmax.f32 %v6266_v60, 1.0000001 }
  0x2f   :  { %11295 = vst [vmem:[#allocation18_spill] sm:$0xff] %v6253_v56  ;;  %v155_v15 = vmul.f32 %v6283_v1, %v6283_v1  ;;  %v6552_v56 = vmax.f32 %v6226_v48, 1.0000001 }
  0x30   :  { %11296 = vst [vmem:[#allocation19_spill] sm:$0xff] %v6257_v57  ;;  %v751_v60 = vmul.f32 %v6570_v54, %v6570_v54  ;;  %v732_v21 = vmul.f32 %v6586_v62, %v6586_v62 }
  0x31   :  { %11297 = vst [vmem:[#allocation20_spill] sm:$0xff] %v6283_v1  ;;  %v200_v26 = vsel %vm181_vm0, %v155_v15, 0.0  ;;  %v170_v15 = vmul.f32 %v6365_v61, %v6365_v61  ;;  %v735_v34 = vmul.f32 %v6552_v56, %v6552_v56 }
  0x32   :  { %11298 = vst [vmem:[#allocation21_spill] sm:$0xff] %v6288_v11 }
  0x33   :  { %11299 = vst [vmem:[#allocation22_spill] sm:$0xff] %v6293_v14  ;;  %201 = vadd.xlane.f32.xlu1 %v200_v26  ;;  %258 = vadd.xlane.f32.xlu0 %v257_v31  ;;  %v242_v26 = vsel %vm181_vm0, %v169_v0, 0.0  ;;  %v6391_v31 = vmul.f32 %v6045_v6, %v6374_v13  ;;  %v245_v41 = vsel %vm181_vm0, %v170_v15, 0.0  ;;  %v167_v0 = vmul.f32 %v6401_v45, %v6401_v45  ;;  %v6422_v15 = vld [vmem:[%s11115_s0 + $0x8] sm:$0xff] }
  0x34   :  { %11300 = vst [vmem:[#allocation23_spill] sm:$0xff] %v6319_v29  ;;  %204 = vadd.xlane.f32.xlu2 %v203_v35  ;;  %v197_v35 = vsel %vm181_vm0, %v154_v2, 0.0  ;;  %v6417_v2 = vld [vmem:[%s11115_s0 + $0x98] sm:$0xff] }
  0x35   :  { %11301 = vst [vmem:[#allocation24_spill] sm:$0xff] %v6324_v33 }
  0x36   :  { %11302 = vst [vmem:[#allocation25_spill] sm:$0xff] %v6329_v37  ;;  %v6475_v37 = vmax.f32 %v6035_v4, 1.0000001 }
  0x37   :  { %11303 = vst [vmem:[#allocation26_spill] sm:$0xff] %v6355_v53 }
  0x38   :  { %11304 = vst [vmem:[#allocation27_spill] sm:$0xff] %v6360_v58  ;;  %v6471_v58 = vmax.f32 %v6028_v3, 1.0000001 }
  0x39   :  { %11305 = vst [vmem:[#allocation28_spill] sm:$0xff] %v6365_v61 }
  0x3a   :  { %11306 = vst [vmem:[#allocation29_spill] sm:$0xff] %v6391_v31 }
  0x3b   :  { %252 = vadd.xlane.f32.xlu1 %v251_v52  ;;  %249 = vadd.xlane.f32.xlu0 %v248_v55  ;;  %11307 = vst [vmem:[#allocation30_spill] sm:$0xff] %v6396_v39  ;;  %v152_v52 = vmul.f32 %v6391_v31, %v6391_v31  ;;  %v151_v55 = vmul.f32 %v6396_v39, %v6396_v39  ;;  %v236_v31 = vsel %vm181_vm0, %v167_v0, 0.0 }
  0x3c   :  { %195 = vadd.xlane.f32.xlu2 %v194_v59  ;;  %11308 = vst [vmem:[#allocation31_spill] sm:$0xff] %v6401_v45  ;;  %v6410_v59 = vld [vmem:[%s11115_s0] sm:$0xff]  ;;  %v6432_v45 = vmul.f32 %v6045_v6, %v6417_v2  ;;  %v6437_v39 = vmul.f32 %v6045_v6, %v6422_v15 }
  0x3d   :  { %11321 = vst [vmem:[#allocation44_spill] sm:$0xff] %v6552_v56 }
  0x3e   :  { %11310 = vst [vmem:[#allocation33_spill] sm:$0xff] %v6432_v45  ;;  %v168_v53 = vmul.f32 %v6432_v45, %v6432_v45  ;;  %v150_v0 = vmul.f32 %v6437_v39, %v6437_v39 }
  0x3f   :  { %11311 = vst [vmem:[#allocation34_spill] sm:$0xff] %v6437_v39 }
  0x40   :  { %v185_v61 = vsel %vm181_vm0, %v150_v0, 0.0  ;;  %v6483_v0 = vmax.f32 %v6042_v5, 1.0000001  ;;  %v6501_v5 = vmax.f32 %v6095_v17, 1.0000001  ;;  %11325 = vst [vmem:[#allocation48_spill] sm:$0xff] %v6570_v54 }
  0x41   :  { %11328 = vst [vmem:[#allocation51_spill] sm:$0xff] %v6586_v62 }
  0x42   :  { %v739_v17 = vmul.f32 %v6501_v5, %v6501_v5  ;;  %11330 = vst [vmem:[#allocation53_spill] sm:$0xff] %v6596_v47  ;;  %v6645_v47 = vmax.f32 %v6338_v42, 1.0000001 }
  0x43   :  { %243 = vadd.xlane.f32.xlu1 %v242_v26  ;;  %198 = vadd.xlane.f32.xlu0 %v197_v35  ;;  %v191_v26 = vsel %vm181_vm0, %v152_v52, 0.0  ;;  %v6427_v35 = vmul.f32 %v6045_v6, %v6410_v59  ;;  %11332 = vst [vmem:[#allocation55_spill] sm:$0xff] %v6606_v27 }
  0x44   :  { %246 = vadd.xlane.f32.xlu2 %v245_v41  ;;  %v188_v41 = vsel %vm181_vm0, %v151_v55, 0.0  ;;  %v6446_v55 = vld [vmem:[%s11115_s0 + $0x88] sm:$0xff]  ;;  %v6547_v11 = vadd.f32 -1.0, %v739_v17  ;;  %11337 = vst [vmem:[#allocation60_spill] sm:$0xff] %v6637_v9 }
  0x45   :  { %11309 = vst [vmem:[#allocation32_spill] sm:$0xff] %v6427_v35  ;;  %v149_v52 = vmul.f32 %v6427_v35, %v6427_v35  ;;  %v239_v35 = vsel %vm181_vm0, %v168_v53, 0.0 }
  0x46   :  { %11340 = vst [vmem:[#allocation63_spill] sm:$0xff] %v6645_v47 }
  0x47   :  { %11343 = vst [vmem:[#allocation66_spill] sm:$0xff] %v6653_v25 }
  0x48   :  { %11348 = vst [vmem:[#allocation71_spill] sm:$0xff] %v6671_v46 }
  0x4b   :  { %192 = vadd.xlane.f32.xlu1 %v191_v26  ;;  %189 = vadd.xlane.f32.xlu0 %v188_v41  ;;  %v6453_v26 = vld [vmem:[%s11115_s0 + $0x80] sm:$0xff]  ;;  %v182_v41 = vsel %vm181_vm0, %v149_v52, 0.0 }
  0x4c   :  { %237 = vadd.xlane.f32.xlu2 %v236_v31  ;;  %v6458_v31 = vmul.f32 %v6045_v6, %v6446_v55  ;;  %v6463_v45 = vmul.f32 %v6045_v6, %v6453_v26 }
  0x4e   :  { %11312 = vst [vmem:[#allocation35_spill] sm:$0xff] %v6458_v31  ;;  %v166_v39 = vmul.f32 %v6458_v31, %v6458_v31  ;;  %v165_v52 = vmul.f32 %v6463_v45, %v6463_v45 }
  0x4f   :  { %11313 = vst [vmem:[#allocation36_spill] sm:$0xff] %v6463_v45  ;;  %v6522_v45 = vmax.f32 %v6172_v36, 1.0000001 }
  0x50   :  { %v233_v53 = vsel %vm181_vm0, %v166_v39, 0.0  ;;  %v230_v6 = vsel %vm181_vm0, %v165_v52, 0.0  ;;  %v6488_v39 = vmax.f32 %v6052_v7, 1.0000001  ;;  %v6495_v52 = vmax.f32 %v6090_v16, 1.0000001 }
  0x51   :  { %v6505_v7 = vmax.f32 %v6118_v23, 1.0000001  ;;  %11317 = vst [vmem:[#allocation40_spill] sm:$0xff] %v6522_v45 }
  0x52   :  { %v741_v16 = vmul.f32 %v6495_v52, %v6495_v52 }
  0x53   :  { %183 = vadd.xlane.f32.xlu1 %v182_v41  ;;  %240 = vadd.xlane.f32.xlu0 %v239_v35  ;;  %v756_v35 = vmul.f32 %v6471_v58, %v6471_v58  ;;  %v738_v41 = vmul.f32 %v6483_v0, %v6483_v0  ;;  %11314 = vst [vmem:[#allocation37_spill] sm:$0xff] %v6505_v7 }
  0x54   :  { %186 = vadd.xlane.f32.xlu2 %v185_v61  ;;  %v740_v61 = vmul.f32 %v6475_v37, %v6475_v37  ;;  %v755_v23 = vmul.f32 %v6505_v7, %v6505_v7  ;;  %v6539_v36 = vadd.f32 -1.0, %v741_v16 }
  0x55   :  { %v6485_v3 = vadd.f32 -1.0, %v756_v35  ;;  %v6510_v35 = vadd.f32 -1.0, %v738_v41 }
  0x56   :  { %v6490_v4 = vadd.f32 -1.0, %v740_v61  ;;  %v6515_v61 = vmax.f32 %v6146_v30, 1.0000001  ;;  %v6556_v1 = vadd.f32 -1.0, %v755_v23 }
  0x57   :  { %5420 = vrsqrt.f32 %v6485_v3  ;;  %vm1157_vm2 = vcmp.eq.f32.partialorder %v6485_v3, inf  ;;  %vm1159_vm3 = vcmp.eq.f32.partialorder %v6485_v3, 0.0 }
  0x58   :  { %5422 = vrsqrt.f32 %v6490_v4  ;;  %11316 = vst [vmem:[#allocation39_spill] sm:$0xff] %v6515_v61  ;;  %v736_v33 = vmul.f32 %v6515_v61, %v6515_v61  ;;  %vm965_vm4 = vcmp.eq.f32.partialorder %v6490_v4, inf  ;;  %vm967_vm8 = vcmp.eq.f32.partialorder %v6490_v4, 0.0 }
  0x59   :  { %5424 = vrsqrt.f32 %v6510_v35  ;;  %11322 = vst [vmem:[#allocation45_spill] sm:$0xff] %v6556_v1 }
  0x5a   :  { %v6573_v23 = vadd.f32 -1.0, %v736_v33 }
  0x5b   :  { %234 = vadd.xlane.f32.xlu1 %v233_v53  ;;  %231 = vadd.xlane.f32.xlu0 %v230_v6  ;;  %v757_v6 = vmul.f32 %v6488_v39, %v6488_v39  ;;  %v6508_v53 = vmax.f32 %v6138_v28, 1.0000001  ;;  %v6527_v28 = vmax.f32 %v6183_v38, 1.0000001  ;;  %v6544_v38 = vmax.f32 %v6233_v49, 1.0000001 }
  0x5c   :  { %v6561_v49 = vmax.f32 %v6238_v50, 1.0000001  ;;  %v6578_v50 = vmax.f32 %v6278_v63, 1.0000001 }
  0x5d   :  { %11315 = vst [vmem:[#allocation38_spill] sm:$0xff] %v6508_v53  ;;  %v6517_v31 = vadd.f32 -1.0, %v757_v6  ;;  %v6529_v41 = vpop.eup %5420  ;;  %v754_v30 = vmul.f32 %v6508_v53, %v6508_v53  ;;  %v6534_v6 = vmax.f32 %v6207_v44, 1.0000001  ;;  %v752_v44 = vmul.f32 %v6522_v45, %v6522_v45 }
  0x5e   :  { %11318 = vst [vmem:[#allocation41_spill] sm:$0xff] %v6527_v28  ;;  %v6536_v29 = vpop.eup %5422  ;;  %v1151_v16 = vmul.f32 %v6529_v41, %v6485_v3  ;;  %v737_v14 = vmul.f32 %v6527_v28, %v6527_v28  ;;  %v750_v43 = vmul.f32 %v6544_v38, %v6544_v38  ;;  %v734_v63 = vmul.f32 %v6561_v49, %v6561_v49 }
  0x5f   :  { %11319 = vst [vmem:[#allocation42_spill] sm:$0xff] %v6534_v6  ;;  %5426 = vrsqrt.f32 %v6517_v31  ;;  %v959_v17 = vmul.f32 %v6536_v29, %v6490_v4  ;;  %v6565_v57 = vadd.f32 -1.0, %v754_v30  ;;  %v753_v48 = vmul.f32 %v6534_v6, %v6534_v6  ;;  %v6588_v40 = vpop.eup %5424 }
  0x60   :  { %11320 = vst [vmem:[#allocation43_spill] sm:$0xff] %v6544_v38  ;;  %5428 = vrsqrt.f32 %v6539_v36  ;;  %v6581_v30 = vadd.f32 -1.0, %v752_v44  ;;  %v6591_v33 = vadd.f32 -1.0, %v737_v14  ;;  %v1152_v14 = vmul.f32 %v6529_v41, %v1151_v16 }
  0x61   :  { %11323 = vst [vmem:[#allocation46_spill] sm:$0xff] %v6561_v49  ;;  %5430 = vrsqrt.f32 %v6547_v11  ;;  %v6601_v32 = vadd.f32 -1.0, %v753_v48  ;;  %v6610_v10 = vadd.f32 -1.0, %v750_v43  ;;  %v733_v24 = vmul.f32 %v6578_v50, %v6578_v50 }
  0x62   :  { %11324 = vst [vmem:[#allocation47_spill] sm:$0xff] %v6565_v57  ;;  %5432 = vrsqrt.f32 %v6556_v1  ;;  %v960_v22 = vmul.f32 %v6536_v29, %v959_v17  ;;  %v6616_v48 = vadd.f32 -1.0, %v735_v34  ;;  %v935_v16 = vmul.f32 %v6588_v40, %v6510_v35 }
  0x63   :  { %11326 = vst [vmem:[#allocation49_spill] sm:$0xff] %v6578_v50  ;;  %5434 = vrsqrt.f32 %v6565_v57  ;;  %v6625_v43 = vadd.f32 -1.0, %v734_v63  ;;  %v6632_v34 = vadd.f32 -1.0, %v751_v60  ;;  %v1153_v62 = vmul.f32 0.5, %v1152_v14 }
  0x64   :  { %11327 = vst [vmem:[#allocation50_spill] sm:$0xff] %v6581_v30  ;;  %5436 = vrsqrt.f32 %v6573_v23  ;;  %v6642_v63 = vadd.f32 -1.0, %v733_v24  ;;  %v961_v60 = vmul.f32 0.5, %v960_v22  ;;  %v6650_v50 = vadd.f32 -1.0, %v732_v21 }
  0x65   :  { %11329 = vst [vmem:[#allocation52_spill] sm:$0xff] %v6591_v33  ;;  %v6598_v44 = vpop.eup %5426  ;;  %5438 = vrsqrt.f32 %v6581_v30  ;;  %v6658_v14 = vadd.f32 -1.0, %v748_v8  ;;  %v6661_v24 = vmax.f32 %v6350_v51, 1.0000001  ;;  %v6666_v22 = vadd.f32 -1.0, %v749_v12 }
  0x66   :  { %11331 = vst [vmem:[#allocation54_spill] sm:$0xff] %v6601_v32  ;;  %v6620_v19 = vpop.eup %5428  ;;  %5440 = vrsqrt.f32 %v6591_v33  ;;  %v730_v21 = vmul.f32 %v6637_v9, %v6637_v9  ;;  %v936_v8 = vmul.f32 %v6588_v40, %v935_v16  ;;  %v746_v51 = vmul.f32 %v6645_v47, %v6645_v47 }
  0x67   :  { %11333 = vst [vmem:[#allocation56_spill] sm:$0xff] %v6610_v10  ;;  %v6629_v17 = vpop.eup %5430  ;;  %5442 = vrsqrt.f32 %v6601_v32  ;;  %v962_v12 = vsub.f32 1.5, %v961_v60  ;;  %v731_v9 = vmul.f32 %v6653_v25, %v6653_v25  ;;  %v747_v16 = vmul.f32 %v6661_v24, %v6661_v24 }
  0x68   :  { %11334 = vst [vmem:[#allocation57_spill] sm:$0xff] %v6616_v48  ;;  %v6639_v54 = vpop.eup %5432  ;;  %5444 = vrsqrt.f32 %v6610_v10  ;;  %v6691_v47 = vmax.f32 %v6374_v13, 1.0000001  ;;  %v744_v60 = vmul.f32 %v6671_v46, %v6671_v46  ;;  %v6702_v28 = vmax.f32 %v6381_v18, 1.0000001 }
  0x69   :  { %11335 = vst [vmem:[#allocation58_spill] sm:$0xff] %v6625_v43  ;;  %v6647_v49 = vpop.eup %5434  ;;  %5446 = vrsqrt.f32 %v6616_v48  ;;  %v6708_v13 = vmul.f32 0.5, %v936_v8  ;;  %v963_v46 = vmul.f32 %v6536_v29, %v962_v12  ;;  %v6734_v48 = vmax.f32 %v6422_v15, 1.0000001 }
  0x6a   :  { %11336 = vst [vmem:[#allocation59_spill] sm:$0xff] %v6632_v34  ;;  %v6655_v27 = vpop.eup %5436  ;;  %5448 = vrsqrt.f32 %v6625_v43  ;;  %v728_v29 = vmul.f32 %v6702_v28, %v6702_v28 }
  0x6b   :  { %11338 = vst [vmem:[#allocation61_spill] sm:$0xff] %v6639_v54  ;;  %v6663_v42 = vpop.eup %5438  ;;  %5450 = vrsqrt.f32 %v6632_v34  ;;  %v1154_v34 = vsub.f32 1.5, %v1153_v62  ;;  %v6697_v62 = vadd.f32 -1.0, %v730_v21  ;;  %v964_v12 = vmul.f32 %v6490_v4, %v963_v46 }
  0x6c   :  { %11339 = vst [vmem:[#allocation62_spill] sm:$0xff] %v6642_v63  ;;  %v6673_v56 = vpop.eup %5440  ;;  %5452 = vrsqrt.f32 %v6642_v63 }
  0x6d   :  { %11341 = vst [vmem:[#allocation64_spill] sm:$0xff] %v6647_v49  ;;  %v6679_v43 = vpop.eup %5442  ;;  %5454 = vrsqrt.f32 %v6650_v50  ;;  %v1155_v18 = vmul.f32 %v6529_v41, %v1154_v34  ;;  %v6747_v34 = vmax.f32 %v6410_v59, 1.0000001  ;;  %v6762_v59 = vmax.f32 %v6453_v26, 1.0000001 }
  0x6e   :  { %11342 = vst [vmem:[#allocation65_spill] sm:$0xff] %v6650_v50  ;;  %v6684_v20 = vpop.eup %5444  ;;  %5456 = vrsqrt.f32 %v6658_v14  ;;  %v6713_v50 = vmax.f32 %v6417_v2, 1.0000001  ;;  %v6729_v2 = vadd.f32 -1.0, %v747_v16 }
  0x6f   :  { %11344 = vst [vmem:[#allocation67_spill] sm:$0xff] %v6658_v14  ;;  %v6693_v63 = vpop.eup %5446  ;;  %5458 = vrsqrt.f32 %v6666_v22  ;;  %v6710_v14 = vadd.f32 -1.0, %v746_v51 }
  0x70   :  { %11345 = vst [vmem:[#allocation68_spill] sm:$0xff] %v6661_v24  ;;  %v6706_v24 = vpop.eup %5448 }
  0x71   :  { %11346 = vst [vmem:[#allocation69_spill] sm:$0xff] %v6663_v42 }
  0x72   :  { %11347 = vst [vmem:[#allocation70_spill] sm:$0xff] %v6666_v22  ;;  %v6718_v22 = vpop.eup %5450 }
  0x73   :  { %11349 = vst [vmem:[#allocation72_spill] sm:$0xff] %v6673_v56  ;;  %v6727_v51 = vpop.eup %5452 }
  0x74   :  { %11350 = vst [vmem:[#allocation73_spill] sm:$0xff] %v6679_v43  ;;  %v6737_v41 = vpop.eup %5454 }
  0x75   :  { %11351 = vst [vmem:[#allocation74_spill] sm:$0xff] %v6684_v20  ;;  %v6749_v15 = vpop.eup %5456 }
  0x76   :  { %11352 = vst [vmem:[#allocation75_spill] sm:$0xff] %v6691_v47 }
  0x77   :  { %11353 = vst [vmem:[#allocation76_spill] sm:$0xff] %v6693_v63  ;;  %v6722_v63 = vadd.f32 -1.0, %v731_v9  ;;  %v6742_v9 = vadd.f32 -1.0, %v744_v60  ;;  %v1156_v60 = vmul.f32 %v6485_v3, %v1155_v18  ;;  %v6771_v18 = vadd.f32 -1.0, %v728_v29 }
  0x78   :  { %11354 = vst [vmem:[#allocation77_spill] sm:$0xff] %v6697_v62 }
  0x79   :  { %11355 = vst [vmem:[#allocation78_spill] sm:$0xff] %v6702_v28  ;;  %v938_v28 = vsub.f32 1.5, %v6708_v13  ;;  %v726_v13 = vmul.f32 %v6747_v34, %v6747_v34 }
  0x7a   :  { %11356 = vst [vmem:[#allocation79_spill] sm:$0xff] %v6706_v24  ;;  %v729_v24 = vmul.f32 %v6691_v47, %v6691_v47  ;;  %v745_v47 = vmul.f32 %v6713_v50, %v6713_v50 }
  0x7b   :  { %11357 = vst [vmem:[#allocation80_spill] sm:$0xff] %v6710_v14 }
  0x7c   :  { %11358 = vst [vmem:[#allocation81_spill] sm:$0xff] %v6713_v50  ;;  %v6766_v16 = vadd.f32 -1.0, %v729_v24  ;;  %v727_v50 = vmul.f32 %v6734_v48, %v6734_v48  ;;  %v6781_v24 = vmax.f32 %v6446_v55, 1.0000001 }
  0x7d   :  { %11359 = vst [vmem:[#allocation82_spill] sm:$0xff] %v6718_v22  ;;  %v6756_v22 = vpop.eup %5458 }
  0x7e   :  { %v6704_v25 = vpop.xlane.xlu1 %273  ;;  %v6716_v21 = vpop.xlane.xlu0 %225  ;;  %11360 = vst [vmem:[#allocation83_spill] sm:$0xff] %v6722_v63 }
  0x7f   :  { %5460 = vrsqrt.f32 %v6704_v25  ;;  %v6725_v8 = vpop.xlane.xlu2 %219  ;;  %11361 = vst [vmem:[#allocation84_spill] sm:$0xff] %v6727_v51  ;;  %v6801_v51 = vadd.f32 -1.0, %v727_v50  ;;  %v743_v50 = vmul.f32 %v6781_v24, %v6781_v24  ;;  %vm645_vm5 = vcmp.eq.f32.partialorder %v6704_v25, inf }
  0x80   :  { %5462 = vrsqrt.f32 %v6716_v21  ;;  %11362 = vst [vmem:[#allocation85_spill] sm:$0xff] %v6729_v2  ;;  %vm647_vm6 = vcmp.eq.f32.partialorder %v6704_v25, 0.0  ;;  %vm453_vm7 = vcmp.eq.f32.partialorder %v6716_v21, inf  ;;  %vm455_vm9 = vcmp.eq.f32.partialorder %v6716_v21, 0.0 }
  0x81   :  { %11363 = vst [vmem:[#allocation86_spill] sm:$0xff] %v6734_v48  ;;  %5464 = vrsqrt.f32 %v6725_v8  ;;  %vm429_vm10 = vcmp.eq.f32.partialorder %v6725_v8, inf  ;;  %vm431_vm11 = vcmp.eq.f32.partialorder %v6725_v8, 0.0 }
  0x82   :  { %11364 = vst [vmem:[#allocation87_spill] sm:$0xff] %v6737_v41  ;;  %5466 = vrsqrt.f32 %v6697_v62  ;;  %v1158_v41 = vsel %vm1157_vm2, %v6485_v3, %v1156_v60 }
  0x83   :  { %11365 = vst [vmem:[#allocation88_spill] sm:$0xff] %v6742_v9  ;;  %5468 = vrsqrt.f32 %v6710_v14 }
  0x84   :  { %11366 = vst [vmem:[#allocation89_spill] sm:$0xff] %v6747_v34  ;;  %5470 = vrsqrt.f32 %v6722_v63  ;;  %v742_v34 = vmul.f32 %v6762_v59, %v6762_v59 }
  0x85   :  { %11367 = vst [vmem:[#allocation90_spill] sm:$0xff] %v6749_v15  ;;  %v5461_v15 = vpop.eup %5460  ;;  %5472 = vrsqrt.f32 %v6729_v2 }
  0x86   :  { %11368 = vst [vmem:[#allocation91_spill] sm:$0xff] %v6756_v22  ;;  %v5463_v14 = vpop.eup %5462  ;;  %5474 = vrsqrt.f32 %v6742_v9  ;;  %v639_v26 = vmul.f32 %v5461_v15, %v6704_v25  ;;  %v6776_v63 = vpop.xlane.xlu1 %276  ;;  %v6778_v22 = vadd.f32 -1.0, %v745_v47 }
  0x87   :  { %11369 = vst [vmem:[#allocation92_spill] sm:$0xff] %v6762_v59  ;;  %v5465_v46 = vpop.eup %5464  ;;  %v447_v48 = vmul.f32 %v5463_v14, %v6716_v21  ;;  %5476 = vrsqrt.f32 %v6776_v63  ;;  %v6785_v9 = vpop.xlane.xlu0 %228  ;;  %vm657_vm12 = vcmp.eq.f32.partialorder %v6776_v63, inf  ;;  %vm659_vm14 = vcmp.eq.f32.partialorder %v6776_v63, 0.0 }
  0x88   :  { %11370 = vst [vmem:[#allocation93_spill] sm:$0xff] %v6766_v16  ;;  %v6787_v29 = vpop.eup %5466  ;;  %v640_v2 = vmul.f32 %v5461_v15, %v639_v26  ;;  %v423_v62 = vmul.f32 %v5465_v46, %v6725_v8  ;;  %5478 = vrsqrt.f32 %v6785_v9  ;;  %v6793_v47 = vpop.xlane.xlu2 %222  ;;  %v6805_v26 = vadd.f32 -1.0, %v726_v13 }
  0x89   :  { %11371 = vst [vmem:[#allocation94_spill] sm:$0xff] %v6771_v18  ;;  %v6795_v55 = vpop.eup %5468  ;;  %5480 = vrsqrt.f32 %v6766_v16  ;;  %v6819_v13 = vadd.f32 -1.0, %v742_v34  ;;  %vm465_vm13 = vcmp.eq.f32.partialorder %v6785_v9, inf  ;;  %vm467_vm15 = vcmp.eq.f32.partialorder %v6785_v9, 0.0 }
  0x8a   :  { %11372 = vst [vmem:[#allocation95_spill] sm:$0xff] %v6778_v22  ;;  %v6803_v38 = vpop.eup %5470  ;;  %v641_v59 = vmul.f32 0.5, %v640_v2  ;;  %v424_v56 = vmul.f32 %v5465_v46, %v423_v62  ;;  %5482 = vrsqrt.f32 %v6793_v47  ;;  %vm441_vm1 = vcmp.eq.f32.partialorder %v6793_v47, inf }
  0x8b   :  { %11373 = vst [vmem:[#allocation96_spill] sm:$0xff] %v6781_v24  ;;  %v6808_v33 = vpop.eup %5472  ;;  %5484 = vrsqrt.f32 %v6771_v18  ;;  %vm443_vm2 = vcmp.eq.f32.partialorder %v6793_v47, 0.0 }
  0x8c   :  { %11374 = vst [vmem:[#allocation97_spill] sm:$0xff] %v6787_v29  ;;  %v448_v29 = vmul.f32 %v5463_v14, %v447_v48  ;;  %v6816_v48 = vpop.eup %5474  ;;  %5486 = vrsqrt.f32 %v6778_v22  ;;  %v642_v62 = vsub.f32 1.5, %v641_v59  ;;  %v425_v2 = vmul.f32 0.5, %v424_v56 }
  0x8d   :  { %11375 = vst [vmem:[#allocation98_spill] sm:$0xff] %v6795_v55  ;;  %v6811_v55 = vmul.f32 %v6588_v40, %v938_v28  ;;  %v5477_v16 = vpop.eup %5476  ;;  %v6830_v28 = vsel %vm965_vm4, %v6490_v4, %v964_v12  ;;  %5488 = vrsqrt.f32 %v6801_v51 }
  0x8e   :  { %11376 = vst [vmem:[#allocation99_spill] sm:$0xff] %v6801_v51  ;;  %v449_v60 = vmul.f32 0.5, %v448_v29  ;;  %v5479_v24 = vpop.eup %5478  ;;  %5490 = vrsqrt.f32 %v6805_v26  ;;  %v643_v34 = vmul.f32 %v5461_v15, %v642_v62  ;;  %v426_v56 = vsub.f32 1.5, %v425_v2  ;;  %v6835_v22 = vpop.xlane.xlu1 %270 }
  0x8f   :  { %11377 = vst [vmem:[#allocation100_spill] sm:$0xff] %v6803_v38  ;;  %v11382_v38 = vand.u32 2147483648, %v6485_v3  ;;  %v651_v59 = vmul.f32 %v5477_v16, %v6776_v63  ;;  %v6837_v3 = vpop.eup %5480  ;;  %v459_v12 = vmul.f32 %v5479_v24, %v6785_v9  ;;  %5492 = vrsqrt.f32 %v6835_v22  ;;  %v6843_v51 = vpop.xlane.xlu0 %267 }
  0x90   :  { %11378 = vst [vmem:[#allocation101_spill] sm:$0xff] %v6805_v26  ;;  %v450_v29 = vsub.f32 1.5, %v449_v60  ;;  %v5483_v60 = vpop.eup %5482  ;;  %5494 = vrsqrt.f32 %v6819_v13  ;;  %v644_v15 = vmul.f32 %v643_v34, %v6704_v25  ;;  %v427_v62 = vmul.f32 %v5465_v46, %v426_v56  ;;  %v6847_v26 = vpop.xlane.xlu2 %213 }
  0x91   :  { %11379 = vst [vmem:[#allocation102_spill] sm:$0xff] %v6808_v33  ;;  %v6825_v40 = vsel %vm1159_vm3, %v11382_v38, %v1158_v41  ;;  %v6839_v38 = vadd.f32 -1.0, %v743_v50  ;;  %v652_v2 = vmul.f32 %v5477_v16, %v651_v59  ;;  %v6849_v18 = vpop.eup %5484  ;;  %v460_v50 = vmul.f32 %v5479_v24, %v459_v12 }
  0x92   :  { %11380 = vst [vmem:[#allocation103_spill] sm:$0xff] %v6816_v48  ;;  %v451_v41 = vmul.f32 %v5463_v14, %v450_v29  ;;  %v435_v29 = vmul.f32 %v5483_v60, %v6793_v47  ;;  %5496 = vrsqrt.f32 %v6843_v51  ;;  %v428_v56 = vmul.f32 %v427_v62, %v6725_v8 }
  0x93   :  { %11381 = vst [vmem:[#allocation104_spill] sm:$0xff] %v6819_v13  ;;  %v648_v13 = vand.u32 2147483648, %v6704_v25  ;;  %v653_v34 = vmul.f32 0.5, %v652_v2  ;;  %v461_v59 = vmul.f32 0.5, %v460_v50  ;;  %v456_v2 = vand.u32 2147483648, %v6716_v21 }
  0x94   :  { %11383 = vst [vmem:[#allocation105_spill] sm:$0xff] %v6837_v3  ;;  %v452_v14 = vmul.f32 %v451_v41, %v6716_v21  ;;  %v6854_v3 = vpop.eup %5486  ;;  %v436_v41 = vmul.f32 %v5483_v60, %v435_v29  ;;  %5498 = vrsqrt.f32 %v6847_v26  ;;  %vm633_vm3 = vcmp.eq.f32.partialorder %v6835_v22, inf }
  0x95   :  { %11384 = vst [vmem:[#allocation106_spill] sm:$0xff] %v6839_v38  ;;  %v6859_v46 = vpop.eup %5488  ;;  %v462_v62 = vsub.f32 1.5, %v461_v59  ;;  %5500 = vrsqrt.f32 %v6839_v38  ;;  %vm635_vm4 = vcmp.eq.f32.partialorder %v6835_v22, 0.0 }
  0x96   :  { %11385 = vst [vmem:[#allocation107_spill] sm:$0xff] %v6849_v18  ;;  %v6863_v12 = vpop.eup %5490  ;;  %v654_v18 = vsub.f32 1.5, %v653_v34  ;;  %v454_v48 = vsel %vm453_vm7, %v6716_v21, %v452_v14  ;;  %v437_v50 = vmul.f32 0.5, %v436_v41  ;;  %v430_v34 = vsel %vm429_vm10, %v6725_v8, %v428_v56 }
  0x97   :  { %11386 = vst [vmem:[#allocation108_spill] sm:$0xff] %v6854_v3  ;;  %v646_v3 = vsel %vm645_vm5, %v6704_v25, %v644_v15  ;;  %v463_v20 = vmul.f32 %v5479_v24, %v462_v62  ;;  %v6881_v10 = vpop.xlane.xlu0 %216  ;;  %v457_v41 = vsel %vm455_vm9, %v456_v2, %v454_v48  ;;  %vm621_vm5 = vcmp.eq.f32.partialorder %v6843_v51, inf }
  0x98   :  { %11387 = vst [vmem:[#allocation109_spill] sm:$0xff] %v6859_v46  ;;  %v5493_v46 = vpop.eup %5492  ;;  %v655_v33 = vmul.f32 %v5477_v16, %v654_v18  ;;  %v649_v45 = vsel %vm647_vm6, %v648_v13, %v646_v3  ;;  %v438_v14 = vsub.f32 1.5, %v437_v50  ;;  %v6887_v18 = vpop.xlane.xlu2 %264  ;;  %v6899_v56 = vmax.f32 %v457_v41, 1e-15 }
  0x99   :  { %11388 = vst [vmem:[#allocation110_spill] sm:$0xff] %v6863_v12  ;;  %v6873_v29 = vpop.eup %5494  ;;  %v432_v12 = vand.u32 2147483648, %v6725_v8  ;;  %v627_v15 = vmul.f32 %v5493_v46, %v6835_v22  ;;  %v464_v25 = vmul.f32 %v463_v20, %v6785_v9  ;;  %v6892_v3 = vmax.f32 %v649_v45, 1e-15 }
  0x9a   :  { %11389 = vst [vmem:[#allocation111_spill] sm:$0xff] %v6873_v29  ;;  %v5497_v59 = vpop.eup %5496  ;;  %v656_v29 = vmul.f32 %v655_v33, %v6776_v63  ;;  %v439_v13 = vmul.f32 %v5483_v60, %v438_v14  ;;  %v6897_v33 = vpop.xlane.xlu1 %261  ;;  %v660_v45 = vand.u32 2147483648, %v6776_v63  ;;  %v468_v50 = vand.u32 2147483648, %v6785_v9 }
  0x9b   :  { %v628_v16 = vmul.f32 %v5493_v46, %v627_v15  ;;  %v615_v24 = vmul.f32 %v5497_v59, %v6843_v51  ;;  %v433_v21 = vsel %vm431_vm11, %v432_v12, %v430_v34  ;;  %v466_v60 = vsel %vm465_vm13, %v6785_v9, %v464_v25  ;;  %v5499_v25 = vpop.eup %5498 }
  0x9c   :  { %v658_v2 = vsel %vm657_vm12, %v6776_v63, %v656_v29  ;;  %v440_v20 = vmul.f32 %v439_v13, %v6793_v47  ;;  %v6906_v12 = vmax.f32 %v433_v21, 1e-15  ;;  %5502 = vrcp.f32 %v6892_v3 }
  0x9d   :  { %v629_v48 = vmul.f32 0.5, %v628_v16  ;;  %v616_v62 = vmul.f32 %v5497_v59, %v615_v24  ;;  %v661_v29 = vsel %vm659_vm14, %v660_v45, %v658_v2  ;;  %v11391_v34 = vand.u32 2147483648, %v6490_v4 }
  0x9e   :  { %11390 = vst [vmem:[#allocation112_spill] sm:$0xff] %v6906_v12  ;;  %5504 = vrcp.f32 %v6899_v56  ;;  %v469_v41 = vsel %vm467_vm15, %v468_v50, %v466_v60  ;;  %v442_v63 = vsel %vm441_vm1, %v6793_v47, %v440_v20  ;;  %v444_v13 = vand.u32 2147483648, %v6793_v47 }
  0x9f   :  { %v630_v8 = vsub.f32 1.5, %v629_v48  ;;  %v617_v15 = vmul.f32 0.5, %v616_v62  ;;  %v969_v14 = vsel %vm967_vm8, %v11391_v34, %v6830_v28  ;;  %v6920_v16 = vpop.xlane.xlu0 %207  ;;  %5506 = vrsqrt.f32 %v6897_v33  ;;  %v6931_v48 = vpop.eup %5500 }
  0xa0   :  { %5508 = vrcp.f32 %v6906_v12  ;;  %v6925_v21 = vmax.f32 %v661_v29, 1e-15  ;;  %v399_v4 = vmul.f32 %v5499_v25, %v6847_v26  ;;  %v6929_v28 = vpop.xlane.xlu2 %255  ;;  %11392 = vst [vmem:[#allocation113_spill] sm:$0xff] %v6931_v48  ;;  %v6935_v2 = vmul.f32 %v6510_v35, %v6811_v55 }
  0xa1   :  { %v631_v24 = vmul.f32 %v5493_v46, %v630_v8  ;;  %v618_v9 = vsub.f32 1.5, %v617_v15  ;;  %v6937_v46 = vmax.f32 %v469_v41, 1e-15  ;;  %v445_v20 = vsel %vm443_vm2, %v444_v13, %v442_v63 }
  0xa2   :  { %5510 = vrsqrt.f32 %v6881_v10  ;;  %v6942_v62 = vadd.f32 %v6825_v40, %v6471_v58  ;;  %v6945_v47 = vadd.f32 %v969_v14, %v6475_v37  ;;  %v400_v45 = vmul.f32 %v5499_v25, %v399_v4  ;;  %v6948_v60 = vpop.eup %5502  ;;  %v6953_v50 = vpop.xlane.xlu1 %210 }
  0xa3   :  { %5512 = vrsqrt.f32 %v6887_v18  ;;  %v632_v55 = vmul.f32 %v631_v24, %v6835_v22  ;;  %v619_v8 = vmul.f32 %v5497_v59, %v618_v9  ;;  %v6958_v37 = vmax.f32 %v445_v20, 1e-15 }
  0xa4   :  { %5514 = vrsqrt.f32 %v6929_v28  ;;  %v6955_v15 = vpop.eup %5504  ;;  %v401_v58 = vmul.f32 0.5, %v400_v45  ;;  %v636_v29 = vand.u32 2147483648, %v6835_v22  ;;  %vm623_vm6 = vcmp.eq.f32.partialorder %v6843_v51, 0.0 }
  0xa5   :  { %5516 = vrcp.f32 %v6925_v21  ;;  %v5507_v40 = vpop.eup %5506  ;;  %v624_v34 = vand.u32 2147483648, %v6843_v51  ;;  %v634_v24 = vsel %vm633_vm3, %v6835_v22, %v632_v55  ;;  %v620_v9 = vmul.f32 %v619_v8, %v6843_v51 }
  0xa6   :  { %5518 = vrcp.f32 %v6937_v46  ;;  %v6965_v59 = vpop.eup %5508  ;;  %v402_v14 = vsub.f32 1.5, %v401_v58  ;;  %v591_v41 = vmul.f32 %v5507_v40, %v6897_v33  ;;  %vm405_vm7 = vcmp.eq.f32.partialorder %v6847_v26, inf }
  0xa7   :  { %11393 = vst [vmem:[#allocation114_spill] sm:$0xff] %v6965_v59  ;;  %5520 = vrsqrt.f32 %v6953_v50  ;;  %v6970_v63 = vpop.xlane.xlu0 %258  ;;  %v408_v4 = vand.u32 2147483648, %v6847_v26  ;;  %vm597_vm8 = vcmp.eq.f32.partialorder %v6897_v33, inf  ;;  %vm417_vm9 = vcmp.eq.f32.partialorder %v6881_v10, inf }
  0xa8   :  { %v5511_v13 = vpop.eup %5510  ;;  %5522 = vrsqrt.f32 %v6920_v16  ;;  %v403_v45 = vmul.f32 %v5499_v25, %v402_v14  ;;  %v592_v58 = vmul.f32 %v5507_v40, %v591_v41  ;;  %v637_v30 = vsel %vm635_vm4, %v636_v29, %v634_v24 }
  0xa9   :  { %v5513_v20 = vpop.eup %5512  ;;  %5524 = vrcp.f32 %v6958_v37  ;;  %v411_v48 = vmul.f32 %v5511_v13, %v6881_v10  ;;  %vm407_vm10 = vcmp.eq.f32.partialorder %v6847_v26, 0.0  ;;  %v622_v55 = vsel %vm621_vm5, %v6843_v51, %v620_v9 }
  0xaa   :  { %v5515_v38 = vpop.eup %5514  ;;  %v603_v8 = vmul.f32 %v5513_v20, %v6887_v18  ;;  %5526 = vrsqrt.f32 %v6970_v63  ;;  %v593_v25 = vmul.f32 0.5, %v592_v58  ;;  %vm419_vm11 = vcmp.eq.f32.partialorder %v6881_v10, 0.0  ;;  %v7002_v58 = vpop.xlane.xlu2 %204 }
  0xab   :  { %v6986_v42 = vpop.eup %5516  ;;  %v412_v14 = vmul.f32 %v5511_v13, %v411_v48  ;;  %v567_v41 = vmul.f32 %v5515_v38, %v6929_v28  ;;  %v420_v6 = vand.u32 2147483648, %v6881_v10  ;;  %v404_v22 = vmul.f32 %v403_v45, %v6847_v26 }
  0xac   :  { %v6992_v53 = vpop.eup %5518  ;;  %v604_v49 = vmul.f32 %v5513_v20, %v603_v8  ;;  %v594_v29 = vsub.f32 1.5, %v593_v25  ;;  %vm599_vm12 = vcmp.eq.f32.partialorder %v6897_v33, 0.0  ;;  %vm609_vm13 = vcmp.eq.f32.partialorder %v6887_v18, inf }
  0xad   :  { %v5521_v57 = vpop.eup %5520  ;;  %v413_v48 = vmul.f32 0.5, %v412_v14  ;;  %v568_v24 = vmul.f32 %v5515_v38, %v567_v41  ;;  %v7004_v43 = vmax.f32 %v637_v30, 1e-15  ;;  %v612_v32 = vand.u32 2147483648, %v6887_v18 }
  0xae   :  { %v5523_v7 = vpop.eup %5522  ;;  %v605_v9 = vmul.f32 0.5, %v604_v49  ;;  %v387_v8 = vmul.f32 %v5521_v57, %v6953_v50  ;;  %v625_v45 = vsel %vm623_vm6, %v624_v34, %v622_v55  ;;  %v595_v25 = vmul.f32 %v5507_v40, %v594_v29 }
  0xaf   :  { %v7008_v54 = vpop.eup %5524  ;;  %v414_v14 = vsub.f32 1.5, %v413_v48  ;;  %v569_v1 = vmul.f32 0.5, %v568_v24  ;;  %vm611_vm14 = vcmp.eq.f32.partialorder %v6887_v18, 0.0  ;;  %v375_v49 = vmul.f32 %v5523_v7, %v6920_v16 }
  0xb0   :  { %v7012_v61 = vpop.eup %5526  ;;  %v606_v41 = vsub.f32 1.5, %v605_v9  ;;  %v388_v30 = vmul.f32 %v5521_v57, %v387_v8  ;;  %5528 = vrsqrt.f32 %v7002_v58  ;;  %v406_v59 = vsel %vm405_vm7, %v6847_v26, %v404_v22 }
  0xb1   :  { %v596_v51 = vmul.f32 %v595_v25, %v6897_v33  ;;  %v415_v34 = vmul.f32 %v5511_v13, %v414_v14  ;;  %v570_v40 = vsub.f32 1.5, %v569_v1  ;;  %vm573_vm15 = vcmp.eq.f32.partialorder %v6929_v28, inf }
  0xb2   :  { %v607_v55 = vmul.f32 %v5513_v20, %v606_v41  ;;  %v389_v29 = vmul.f32 0.5, %v388_v30  ;;  %v376_v48 = vmul.f32 %v5523_v7, %v375_v49  ;;  %v579_v24 = vmul.f32 %v7012_v61, %v6970_v63 }
  0xb3   :  { %v7024_v9 = vmax.f32 %v625_v45, 1e-15  ;;  %v598_v8 = vsel %vm597_vm8, %v6897_v33, %v596_v51  ;;  %v416_v22 = vmul.f32 %v415_v34, %v6881_v10  ;;  %v571_v12 = vmul.f32 %v5515_v38, %v570_v40 }
  0xb4   :  { %v409_v1 = vsel %vm407_vm10, %v408_v4, %v406_v59  ;;  %v608_v13 = vmul.f32 %v607_v55, %v6887_v18  ;;  %vm575_vm1 = vcmp.eq.f32.partialorder %v6929_v28, 0.0  ;;  %v390_v20 = vsub.f32 1.5, %v389_v29 }
  0xb5   :  { %v377_v25 = vmul.f32 0.5, %v376_v48  ;;  %5530 = vrcp.f32 %v7004_v43  ;;  %v418_v45 = vsel %vm417_vm9, %v6881_v10, %v416_v22  ;;  %v576_v14 = vand.u32 2147483648, %v6929_v28 }
  0xb6   :  { %v580_v41 = vmul.f32 %v7012_v61, %v579_v24  ;;  %v5529_v38 = vpop.eup %5528  ;;  %v11394_v26 = vand.u32 2147483648, %v6897_v33  ;;  %v610_v4 = vsel %vm609_vm13, %v6887_v18, %v608_v13  ;;  %v572_v30 = vmul.f32 %v571_v12, %v6929_v28 }
  0xb7   :  { %v378_v49 = vsub.f32 1.5, %v377_v25  ;;  %v7048_v51 = vmax.f32 %v409_v1, 1e-15  ;;  %v421_v34 = vsel %vm419_vm11, %v420_v6, %v418_v45  ;;  %v391_v40 = vmul.f32 %v5521_v57, %v390_v20  ;;  %v7062_v57 = vpop.xlane.xlu1 %201 }
  0xb8   :  { %v601_v59 = vsel %vm599_vm12, %v11394_v26, %v598_v8  ;;  %vm393_vm2 = vcmp.eq.f32.partialorder %v6953_v50, inf  ;;  %5532 = vrcp.f32 %v7024_v9  ;;  %v396_v33 = vand.u32 2147483648, %v6953_v50 }
  0xb9   :  { %v379_v55 = vmul.f32 %v5523_v7, %v378_v49  ;;  %vm381_vm3 = vcmp.eq.f32.partialorder %v6920_v16, inf  ;;  %v7056_v29 = vmax.f32 %v601_v59, 1e-15  ;;  %v613_v12 = vsel %vm611_vm14, %v612_v32, %v610_v4 }
  0xba   :  { %vm395_vm4 = vcmp.eq.f32.partialorder %v6953_v50, 0.0  ;;  %v581_v48 = vmul.f32 0.5, %v580_v41  ;;  %v363_v10 = vmul.f32 %v5529_v38, %v7002_v58  ;;  %v7064_v6 = vmax.f32 %v421_v34, 1e-15 }
  0xbb   :  { %v574_v7 = vsel %vm573_vm15, %v6929_v28, %v572_v30  ;;  %vm383_vm5 = vcmp.eq.f32.partialorder %v6920_v16, 0.0  ;;  %v384_v24 = vand.u32 2147483648, %v6920_v16  ;;  %v7071_v8 = vpop.eup %5530  ;;  %5534 = vrcp.f32 %v7048_v51 }
  0xbc   :  { %v392_v32 = vmul.f32 %v391_v40, %v6953_v50  ;;  %v582_v18 = vsub.f32 1.5, %v581_v48  ;;  %v364_v22 = vmul.f32 %v5529_v38, %v363_v10  ;;  %v7075_v1 = vmax.f32 %v613_v12, 1e-15 }
  0xbd   :  { %v380_v13 = vmul.f32 %v379_v55, %v6920_v16  ;;  %vm585_vm6 = vcmp.eq.f32.partialorder %v6970_v63, inf  ;;  %5536 = vrsqrt.f32 %v7062_v57  ;;  %v577_v20 = vsel %vm575_vm1, %v576_v14, %v574_v7 }
  0xbe   :  { %5538 = vrcp.f32 %v7056_v29  ;;  %v583_v25 = vmul.f32 %v7012_v61, %v582_v18  ;;  %v365_v45 = vmul.f32 0.5, %v364_v22  ;;  %v7084_v41 = vpop.eup %5532  ;;  %vm587_vm7 = vcmp.eq.f32.partialorder %v6970_v63, 0.0 }
  0xbf   :  { %5540 = vrcp.f32 %v7064_v6  ;;  %v588_v26 = vand.u32 2147483648, %v6970_v63  ;;  %vm369_vm8 = vcmp.eq.f32.partialorder %v7002_v58, inf  ;;  %v394_v59 = vsel %vm393_vm2, %v6953_v50, %v392_v32 }
  0xc0   :  { %v366_v4 = vsub.f32 1.5, %v365_v45  ;;  %v6005_v28 = vmov 0   ;;  %5542 = vlog2.f32 %v6945_v47  ;;  %v1481_v61 = vmul.f32 %v6955_v15, %v6899_v56 }
  0xc1   :  { %5419 = vset.pattern.permute.xlu1 %v6005_v28  ;;  %5417 = vset.pattern.permute.xlu2 %v6005_v28  ;;  %vm941_vm9 = vcmp.eq.f32.partialorder %v6510_v35, inf  ;;  %5544 = vrcp.f32 %v7075_v1  ;;  %v7098_v14 = vmax.f32 %v577_v20, 1e-15  ;;  %v382_v30 = vsel %vm381_vm3, %v6920_v16, %v380_v13  ;;  %v7104_v34 = vpop.eup %5534 }
  0xc2   :  { %v584_v49 = vmul.f32 %v583_v25, %v6970_v63  ;;  %5418 = vset.pattern.permute.xlu0 %v6005_v28  ;;  %v367_v40 = vmul.f32 %v5529_v38, %v366_v4  ;;  %vm371_vm10 = vcmp.eq.f32.partialorder %v7002_v58, 0.0  ;;  %v1482_v47 = vsub.f32 1.0, %v1481_v61  ;;  %v7131_v28 = vpop.xlane.xlu0 %249 }
  0xc3   :  { %v1489_v55 = vand.u32 2147483647, %v6899_v56  ;;  %v1491_v12 = vand.u32 2147483648, %v6899_v56  ;;  %v5537_v48 = vpop.eup %5536  ;;  %v397_v10 = vsel %vm395_vm4, %v396_v33, %v394_v59  ;;  %v372_v7 = vand.u32 2147483648, %v7002_v58 }
  0xc4   :  { %5546 = vlog2.f32 %v6942_v62  ;;  %v1721_v32 = vmul.f32 %v6948_v60, %v6892_v3  ;;  %v7115_v18 = vpop.eup %5538  ;;  %v368_v38 = vmul.f32 %v367_v40, %v7002_v58  ;;  %v351_v22 = vmul.f32 %v5537_v48, %v7062_v57 }
  0xc5   :  { %v1483_v13 = vmul.f32 %v6955_v15, %v1482_v47  ;;  %vm1486_vm11 = vweird.f32 %v6955_v15  ;;  %v7121_v20 = vpop.eup %5540  ;;  %vm943_vm12 = vcmp.eq.f32.partialorder %v6510_v35, 0.0  ;;  %v385_v62 = vsel %vm383_vm5, %v384_v24, %v382_v30 }
  0xc6   :  { %v586_v50 = vsel %vm585_vm6, %v6970_v63, %v584_v49  ;;  %vm1485_vm13 = vweird.f32 %v6899_v56  ;;  %v1722_v33 = vsub.f32 1.0, %v1721_v32  ;;  %v5543_v25 = vpop.eup %5542  ;;  %v352_v45 = vmul.f32 %v5537_v48, %v351_v22 }
  0xc7   :  { %v1484_v59 = vadd.f32 %v6955_v15, %v1483_v13  ;;  %vm1490_vm14 = vcmp.eq.f32.partialorder %v1489_v55, 8.507059e+37  ;;  %v1492_v4 = vor.u32 1.1754944e-38, %v1491_v12  ;;  %v7133_v61 = vpop.eup %5544  ;;  %v370_v16 = vsel %vm369_vm8, %v7002_v58, %v368_v38  ;;  %vm1487_vm15 = vmor %vm1485_vm13, %vm1486_vm11  ;;  %v7148_v38 = vpop.xlane.xlu1 %252 }
  0xc8   :  { %v1235_v24 = vmul.f32 0.6931472, %v5543_v25  ;;  %v1723_v56 = vmul.f32 %v6948_v60, %v1722_v33  ;;  %vm1726_vm1 = vweird.f32 %v6948_v60  ;;  %v353_v30 = vmul.f32 0.5, %v352_v45  ;;  %v7154_v25 = vpop.xlane.xlu2 %195 }
  0xc9   :  { %v1488_v49 = vsel %vm1487_vm15, %v6955_v15, %v1484_v59  ;;  %v1729_v40 = vand.u32 2147483647, %v6892_v3  ;;  %v1731_v47 = vand.u32 2147483648, %v6892_v3  ;;  %vm1725_vm2 = vweird.f32 %v6892_v3 }
  0xca   :  { %v5547_v55 = vpop.eup %5546  ;;  %v1493_v12 = vsel %vm1490_vm14, %v1492_v4, %v1488_v49  ;;  %v1724_v32 = vadd.f32 %v6948_v60, %v1723_v56  ;;  %5548 = vrsqrt.f32 %v7131_v28  ;;  %v589_v22 = vsel %vm587_vm7, %v588_v26, %v586_v50  ;;  %vm1727_vm3 = vmor %vm1725_vm2, %vm1726_vm1 }
  0xcb   :  { %v354_v13 = vsub.f32 1.5, %v353_v30  ;;  %v1494_v33 = vmul.f32 %v1493_v12, %v1235_v24  ;;  %v1267_v15 = vmul.f32 0.6931472, %v5547_v55  ;;  %v7156_v45 = vmax.f32 %v397_v10, 1e-15 }
  0xcc   :  { %v373_v3 = vsel %vm371_vm10, %v372_v7, %v370_v16  ;;  %v1728_v59 = vsel %vm1727_vm3, %v6948_v60, %v1724_v32  ;;  %v1732_v4 = vor.u32 1.1754944e-38, %v1731_v47  ;;  %v942_v63 = vsel %vm941_vm9, %v6510_v35, %v6935_v2 }
  0xcd   :  { %v7165_v26 = vmax.f32 %v385_v62, 1e-15  ;;  %1822 = vperm.xlu2 %5417, %v1494_v33   ;;  %vm1730_vm4 = vcmp.eq.f32.partialorder %v1729_v40, 8.507059e+37  ;;  %5550 = vrsqrt.f32 %v7148_v38  ;;  %v7168_v50 = vmax.f32 %v589_v22, 1e-15 }
  0xce   :  { %v355_v10 = vmul.f32 %v5537_v48, %v354_v13  ;;  %v1733_v24 = vsel %vm1730_vm4, %v1732_v4, %v1728_v59  ;;  %5552 = vrsqrt.f32 %v7154_v25  ;;  %v7172_v60 = vmax.f32 %v373_v3, 1e-15 }
  0xcf   :  { %11395 = vst [vmem:[#allocation115_spill] sm:$0xff] %v7168_v50  ;;  %5554 = vrcp.f32 %v7098_v14  ;;  %v1734_v58 = vmul.f32 %v1733_v24, %v1267_v15  ;;  %v971_v2 = vmul.f32 %v6620_v19, %v6539_v36  ;;  %v11396_v62 = vand.u32 2147483648, %v6510_v35 }
  0xd0   :  { %v5549_v7 = vpop.eup %5548  ;;  %5556 = vrcp.f32 %v7156_v45  ;;  %v1496_v56 = vmul.f32 %v6992_v53, %v6937_v46  ;;  %v356_v30 = vmul.f32 %v355_v10, %v7062_v57  ;;  %vm357_vm5 = vcmp.eq.f32.partialorder %v7062_v57, inf }
  0xd1   :  { %v7181_v16 = vsel %vm943_vm12, %v11396_v62, %v942_v63  ;;  %5558 = vrcp.f32 %v7165_v26  ;;  %1902 = vperm.xlu1 %5419, %v1734_v58   ;;  %v543_v48 = vmul.f32 %v5549_v7, %v7131_v28  ;;  %v972_v49 = vmul.f32 %v6620_v19, %v971_v2 }
  0xd2   :  { %5560 = vrcp.f32 %v7168_v50  ;;  %vm359_vm6 = vcmp.eq.f32.partialorder %v7062_v57, 0.0  ;;  %v360_v35 = vand.u32 2147483648, %v7062_v57  ;;  %v1497_v22 = vsub.f32 1.0, %v1496_v56 }
  0xd3   :  { %v5551_v40 = vpop.eup %5550  ;;  %5562 = vrcp.f32 %v7172_v60  ;;  %v544_v47 = vmul.f32 %v5549_v7, %v543_v48  ;;  %v973_v32 = vmul.f32 0.5, %v972_v49  ;;  %v1163_v13 = vmul.f32 %v6598_v44, %v6517_v31 }
  0xd4   :  { %v5553_v55 = vpop.eup %5552  ;;  %v555_v12 = vmul.f32 %v5551_v40, %v7148_v38  ;;  %vm549_vm7 = vcmp.eq.f32.partialorder %v7131_v28, inf  ;;  %v552_v3 = vand.u32 2147483648, %v7131_v28  ;;  %v358_v63 = vsel %vm357_vm5, %v7062_v57, %v356_v30 }
  0xd5   :  { %v7197_v33 = vpop.eup %5554  ;;  %v545_v15 = vmul.f32 0.5, %v544_v47  ;;  %v327_v59 = vmul.f32 %v5553_v55, %v7154_v25  ;;  %v974_v24 = vsub.f32 1.5, %v973_v32  ;;  %vm977_vm8 = vcmp.eq.f32.partialorder %v6539_v36, inf }
  0xd6   :  { %v7202_v4 = vpop.eup %5556  ;;  %v556_v10 = vmul.f32 %v5551_v40, %v555_v12  ;;  %vm551_vm9 = vcmp.eq.f32.partialorder %v7131_v28, 0.0  ;;  %vm979_vm10 = vcmp.eq.f32.partialorder %v6539_v36, 0.0  ;;  %v1164_v48 = vmul.f32 %v6598_v44, %v1163_v13 }
  0xd7   :  { %v7208_v58 = vpop.eup %5558  ;;  %v546_v2 = vsub.f32 1.5, %v545_v15  ;;  %v328_v62 = vmul.f32 %v5553_v55, %v327_v59  ;;  %vm561_vm11 = vcmp.eq.f32.partialorder %v7148_v38, inf  ;;  %v975_v30 = vmul.f32 %v6620_v19, %v974_v24 }
  0xd8   :  { %11397 = vst [vmem:[#allocation116_spill] sm:$0xff] %v7208_v58  ;;  %v7213_v56 = vpop.eup %5560  ;;  %v557_v49 = vmul.f32 0.5, %v556_v10  ;;  %v980_v47 = vand.u32 2147483648, %v6539_v36  ;;  %v1498_v12 = vmul.f32 %v6992_v53, %v1497_v22  ;;  %v361_v15 = vsel %vm359_vm6, %v360_v35, %v358_v63 }
  0xd9   :  { %11398 = vst [vmem:[#allocation117_spill] sm:$0xff] %v7213_v56  ;;  %v7219_v32 = vpop.eup %5562  ;;  %v547_v59 = vmul.f32 %v5549_v7, %v546_v2  ;;  %v329_v50 = vmul.f32 0.5, %v328_v62  ;;  %v1165_v58 = vmul.f32 0.5, %v1164_v48  ;;  %v976_v56 = vmul.f32 %v6539_v36, %v975_v30 }
  0xda   :  { %v558_v13 = vsub.f32 1.5, %v557_v49  ;;  %vm1500_vm12 = vweird.f32 %v6937_v46  ;;  %vm1501_vm13 = vweird.f32 %v6992_v53  ;;  %vm563_vm14 = vcmp.eq.f32.partialorder %v7148_v38, 0.0 }
  0xdb   :  { %v548_v19 = vmul.f32 %v547_v59, %v7131_v28  ;;  %v330_v22 = vsub.f32 1.5, %v329_v50  ;;  %v1166_v10 = vsub.f32 1.5, %v1165_v58  ;;  %v1736_v57 = vmul.f32 %v6986_v42, %v6925_v21  ;;  %vm7249_vm1 = vmor %vm1500_vm12, %vm1501_vm13 }
  0xdc   :  { %v559_v35 = vmul.f32 %v5551_v40, %v558_v13  ;;  %v978_v7 = vsel %vm977_vm8, %v6539_v36, %v976_v56  ;;  %v1499_v63 = vadd.f32 %v6992_v53, %v1498_v12  ;;  %v1506_v24 = vand.u32 2147483648, %v6937_v46 }
  0xdd   :  { %v331_v2 = vmul.f32 %v5553_v55, %v330_v22  ;;  %v981_v62 = vsel %vm979_vm10, %v980_v47, %v978_v7  ;;  %v1167_v48 = vmul.f32 %v6598_v44, %v1166_v10  ;;  %vm1169_vm15 = vcmp.eq.f32.partialorder %v6517_v31, inf }
  0xde   :  { %v560_v50 = vmul.f32 %v559_v35, %v7148_v38  ;;  %v1189_v40 = vadd.f32 %v981_v62, %v6495_v52  ;;  %v1172_v58 = vand.u32 2147483648, %v6517_v31  ;;  %v1737_v49 = vsub.f32 1.0, %v1736_v57 }
  0xdf   :  { %v550_v56 = vsel %vm549_vm7, %v7131_v28, %v548_v19  ;;  %v1504_v44 = vand.u32 2147483647, %v6937_v46  ;;  %v1168_v55 = vmul.f32 %v6517_v31, %v1167_v48  ;;  %vm1171_vm2 = vcmp.eq.f32.partialorder %v6517_v31, 0.0 }
  0xe0   :  { %v7256_v52 = vmax.f32 %v361_v15, 1e-15  ;;  %v564_v30 = vand.u32 2147483648, %v7148_v38  ;;  %5564 = vlog2.f32 %v1189_v40  ;;  %v1503_v47 = vsel %vm7249_vm1, %v6992_v53, %v1499_v63  ;;  %v7286_v63 = vpop.xlane.xlu1 %243  ;;  %v7296_v40 = vpop.xlane.xlu0 %198 }
  0xe1   :  { %v562_v12 = vsel %vm561_vm11, %v7148_v38, %v560_v50  ;;  %v332_v59 = vmul.f32 %v331_v2, %v7154_v25  ;;  %v1170_v46 = vsel %vm1169_vm15, %v6517_v31, %v1168_v55  ;;  %v1738_v15 = vmul.f32 %v6986_v42, %v1737_v49 }
  0xe2   :  { %v553_v13 = vsel %vm551_vm9, %v552_v3, %v550_v56  ;;  %vm333_vm3 = vcmp.eq.f32.partialorder %v7154_v25, inf  ;;  %v1507_v19 = vor.u32 1.1754944e-38, %v1506_v24  ;;  %v1173_v22 = vsel %vm1171_vm2, %v1172_v58, %v1170_v46 }
  0xe3   :  { %vm335_vm4 = vcmp.eq.f32.partialorder %v7154_v25, 0.0  ;;  %v336_v53 = vand.u32 2147483648, %v7154_v25  ;;  %vm1505_vm5 = vcmp.eq.f32.partialorder %v1504_v44, 8.507059e+37  ;;  %v1205_v10 = vadd.f32 %v1173_v22, %v6488_v39  ;;  %v7305_v44 = vpop.xlane.xlu2 %246 }
  0xe4   :  { %5566 = vrcp.f32 %v7256_v52  ;;  %v565_v31 = vsel %vm563_vm14, %v564_v30, %v562_v12  ;;  %v1508_v57 = vsel %vm1505_vm5, %v1507_v19, %v1503_v47  ;;  %v947_v28 = vmul.f32 %v6629_v17, %v6547_v11 }
  0xe5   :  { %v7281_v3 = vmax.f32 %v553_v13, 1e-15  ;;  %v334_v35 = vsel %vm333_vm3, %v7154_v25, %v332_v59  ;;  %v1739_v7 = vadd.f32 %v6986_v42, %v1738_v15  ;;  %vm1741_vm6 = vweird.f32 %v6986_v42 }
  0xe6   :  { %v5565_v39 = vpop.eup %5564  ;;  %5568 = vlog2.f32 %v1205_v10  ;;  %v1746_v24 = vand.u32 2147483648, %v6925_v21  ;;  %v948_v38 = vmul.f32 %v6629_v17, %v947_v28  ;;  %v1466_v2 = vmul.f32 %v7008_v54, %v6958_v37 }
  0xe7   :  { %v7292_v62 = vmax.f32 %v565_v31, 1e-15  ;;  %v1237_v48 = vmul.f32 0.6931472, %v5565_v39  ;;  %vm1740_vm7 = vweird.f32 %v6925_v21  ;;  %v1744_v50 = vand.u32 2147483647, %v6925_v21 }
  0xe8   :  { %v337_v58 = vsel %vm335_vm4, %v336_v53, %v334_v35  ;;  %vm7300_vm8 = vmor %vm1740_vm7, %vm1741_vm6  ;;  %v949_v56 = vmul.f32 0.5, %v948_v38  ;;  %v1467_v36 = vsub.f32 1.0, %v1466_v2  ;;  %5570 = vrsqrt.f32 %v7286_v63 }
  0xe9   :  { %5572 = vrcp.f32 %v7281_v3  ;;  %v1509_v55 = vmul.f32 %v1508_v57, %v1237_v48  ;;  %v1743_v21 = vsel %vm7300_vm8, %v6986_v42, %v1739_v7  ;;  %v1747_v25 = vor.u32 1.1754944e-38, %v1746_v24 }
  0xea   :  { %v7311_v30 = vpop.eup %5566  ;;  %v950_v47 = vsub.f32 1.5, %v949_v56  ;;  %5574 = vrsqrt.f32 %v7296_v40  ;;  %v1186_v12 = vadd.f32 %v7181_v16, %v6483_v0  ;;  %v7316_v59 = vmax.f32 %v337_v58, 1e-15 }
  0xeb   :  { %1827 = vperm.xlu0 %5418, %v1509_v55   ;;  %vm1745_vm9 = vcmp.eq.f32.partialorder %v1744_v50, 8.507059e+37  ;;  %5576 = vrsqrt.f32 %v7305_v44  ;;  %v1468_v13 = vmul.f32 %v7008_v54, %v1467_v36  ;;  %vm953_vm10 = vcmp.eq.f32.partialorder %v6547_v11, inf }
  0xec   :  { %v5569_v46 = vpop.eup %5568  ;;  %5578 = vrcp.f32 %v7292_v62  ;;  %v1748_v15 = vsel %vm1745_vm9, %v1747_v25, %v1743_v21  ;;  %v951_v42 = vmul.f32 %v6629_v17, %v950_v47  ;;  %v956_v22 = vand.u32 2147483648, %v6547_v11  ;;  %v11409_v25 = vld [vmem:[#allocation39_spill] sm:$0xff] }
  0xed   :  { %v1269_v19 = vmul.f32 0.6931472, %v5569_v46  ;;  %v911_v0 = vmul.f32 %v6655_v27, %v6573_v23  ;;  %vm955_vm11 = vcmp.eq.f32.partialorder %v6547_v11, 0.0  ;;  %vm1470_vm12 = vweird.f32 %v6958_v37 }
  0xee   :  { %v5571_v16 = vpop.eup %5570  ;;  %v952_v53 = vmul.f32 %v6547_v11, %v951_v42  ;;  %v1474_v10 = vand.u32 2147483647, %v6958_v37  ;;  %v1476_v57 = vand.u32 2147483648, %v6958_v37  ;;  %v1469_v24 = vadd.f32 %v7008_v54, %v1468_v13 }
  0xef   :  { %v7330_v17 = vpop.eup %5572  ;;  %v1749_v31 = vmul.f32 %v1748_v15, %v1269_v19  ;;  %v519_v28 = vmul.f32 %v5571_v16, %v7286_v63  ;;  %v912_v35 = vmul.f32 %v6655_v27, %v911_v0  ;;  %vm1471_vm13 = vweird.f32 %v7008_v54 }
  0xf0   :  { %v5575_v7 = vpop.eup %5574  ;;  %v954_v39 = vsel %vm953_vm10, %v6547_v11, %v952_v53  ;;  %v1421_v38 = vmul.f32 %v7104_v34, %v7048_v51  ;;  %vm7344_vm14 = vcmp.eq.f32.partialorder %v1474_v10, 8.507059e+37  ;;  %vm7351_vm15 = vmor %vm1470_vm12, %vm1471_vm13  ;;  %v1477_v47 = vor.u32 1.1754944e-38, %v1476_v57  ;;  %v11408_v57 = vld [vmem:[#allocation114_spill] sm:$0xff] }
  0xf1   :  { %v5577_v2 = vpop.eup %5576  ;;  %1907 = vperm.xlu2 %5417, %v1749_v31   ;;  %v957_v48 = vsel %vm955_vm11, %v956_v22, %v954_v39  ;;  %v520_v50 = vmul.f32 %v5571_v16, %v519_v28  ;;  %v339_v58 = vmul.f32 %v5575_v7, %v7296_v40  ;;  %v913_v49 = vmul.f32 0.5, %v912_v35  ;;  %v11407_v31 = vld [vmem:[#allocation112_spill] sm:$0xff] }
  0xf2   :  { %v7341_v56 = vpop.eup %5578  ;;  %v1187_v36 = vadd.f32 %v957_v48, %v6501_v5  ;;  %v531_v55 = vmul.f32 %v5577_v2, %v7305_v44  ;;  %v1422_v21 = vsub.f32 1.0, %v1421_v38  ;;  %v1473_v5 = vsel %vm7351_vm15, %v7008_v54, %v1469_v24 }
  0xf3   :  { %v521_v46 = vmul.f32 0.5, %v520_v50  ;;  %v340_v15 = vmul.f32 %v5575_v7, %v339_v58  ;;  %v914_v42 = vsub.f32 1.5, %v913_v49  ;;  %vm917_vm1 = vcmp.eq.f32.partialorder %v6573_v23, inf }
  0xf4   :  { %5580 = vlog2.f32 %v1187_v36  ;;  %v532_v13 = vmul.f32 %v5577_v2, %v531_v55  ;;  %vm919_vm2 = vcmp.eq.f32.partialorder %v6573_v23, 0.0  ;;  %vm525_vm3 = vcmp.eq.f32.partialorder %v7286_v63, inf }
  0xf5   :  { %v522_v19 = vsub.f32 1.5, %v521_v46  ;;  %v341_v22 = vmul.f32 0.5, %v340_v15  ;;  %v915_v37 = vmul.f32 %v6655_v27, %v914_v42  ;;  %v920_v53 = vand.u32 2147483648, %v6573_v23 }
  0xf6   :  { %v533_v0 = vmul.f32 0.5, %v532_v13  ;;  %v1423_v10 = vmul.f32 %v7104_v34, %v1422_v21  ;;  %v1451_v28 = vmul.f32 %v11408_v57, %v11407_v31  ;;  %5582 = vlog2.f32 %v1186_v12 }
  0xf7   :  { %v523_v54 = vmul.f32 %v5571_v16, %v522_v19  ;;  %v342_v35 = vsub.f32 1.5, %v341_v22  ;;  %v916_v39 = vmul.f32 %v6573_v23, %v915_v37  ;;  %v528_v24 = vand.u32 2147483648, %v7286_v63 }
  0xf8   :  { %vm345_vm4 = vcmp.eq.f32.partialorder %v7296_v40, inf  ;;  %v534_v27 = vsub.f32 1.5, %v533_v0  ;;  %v1452_v38 = vsub.f32 1.0, %v1451_v28  ;;  %v1478_v48 = vsel %vm7344_vm14, %v1477_v47, %v1473_v5 }
  0xf9   :  { %vm527_vm5 = vcmp.eq.f32.partialorder %v7286_v63, 0.0  ;;  %v343_v50 = vmul.f32 %v5575_v7, %v342_v35  ;;  %v918_v16 = vsel %vm917_vm1, %v6573_v23, %v916_v39  ;;  %vm1426_vm6 = vweird.f32 %v7104_v34  ;;  %v11414_v39 = vld [vmem:[#allocation45_spill] sm:$0xff] }
  0xfa   :  { %v5581_v58 = vpop.eup %5580  ;;  %v921_v12 = vsel %vm919_vm2, %v920_v53, %v918_v16  ;;  %v1424_v49 = vadd.f32 %v7104_v34, %v1423_v10  ;;  %v1431_v36 = vand.u32 2147483648, %v7048_v51  ;;  %v1453_v11 = vmul.f32 %v11408_v57, %v1452_v38 }
  0xfb   :  { %v1233_v55 = vmul.f32 0.6931472, %v5581_v58  ;;  %v524_v21 = vmul.f32 %v523_v54, %v7286_v63  ;;  %v535_v7 = vmul.f32 %v5577_v2, %v534_v27  ;;  %v1184_v47 = vadd.f32 %v921_v12, %v11409_v25  ;;  %v11415_v27 = vld [vmem:[#allocation61_spill] sm:$0xff]  ;;  %v7432_v25 = vpop.xlane.xlu1 %192 }
  0xfc   :  { %v344_v46 = vmul.f32 %v343_v50, %v7296_v40  ;;  %vm347_vm7 = vcmp.eq.f32.partialorder %v7296_v40, 0.0  ;;  %v1454_v15 = vadd.f32 %v11408_v57, %v1453_v11  ;;  %vm1456_vm8 = vweird.f32 %v11408_v57  ;;  %v5583_v23 = vpop.eup %5582 }
  0xfd   :  { %v1479_v42 = vmul.f32 %v1478_v48, %v1233_v55  ;;  %5584 = vlog2.f32 %v1184_v47  ;;  %vm1425_vm9 = vweird.f32 %v7048_v51  ;;  %v1429_v5 = vand.u32 2147483647, %v7048_v51  ;;  %v7437_v47 = vpop.xlane.xlu0 %189 }
  0xfe   :  { %v348_v13 = vand.u32 2147483648, %v7296_v40  ;;  %vm7392_vm10 = vmor %vm1425_vm9, %vm1426_vm6  ;;  %v1432_v19 = vor.u32 1.1754944e-38, %v1431_v36  ;;  %vm1455_vm11 = vweird.f32 %v11407_v31  ;;  %v1459_v22 = vand.u32 2147483647, %v11407_v31 }
  0xff   :  { %1817 = vperm.xlu1 %5419, %v1479_v42   ;;  %v526_v37 = vsel %vm525_vm3, %v7286_v63, %v524_v21  ;;  %v536_v51 = vmul.f32 %v535_v7, %v7305_v44  ;;  %v1428_v0 = vsel %vm7392_vm10, %v7104_v34, %v1424_v49  ;;  %vm7407_vm12 = vmor %vm1455_vm11, %vm1456_vm8  ;;  %v1461_v10 = vand.u32 2147483648, %v11407_v31  ;;  %v7423_v31 = vpop.xlane.xlu2 %237 }
 0x100   :  { %v346_v28 = vsel %vm345_vm4, %v7296_v40, %v344_v46  ;;  %v1231_v54 = vmul.f32 0.6931472, %v5583_v23  ;;  %v1458_v35 = vsel %vm7407_vm12, %v11408_v57, %v1454_v15  ;;  %v1139_v34 = vmul.f32 %v11415_v27, %v11414_v39 }
 0x101   :  { %vm537_vm13 = vcmp.eq.f32.partialorder %v7305_v44, inf  ;;  %vm1430_vm14 = vcmp.eq.f32.partialorder %v1429_v5, 8.507059e+37  ;;  %v1462_v38 = vor.u32 1.1754944e-38, %v1461_v10  ;;  %v1706_v48 = vmul.f32 %v7071_v8, %v7004_v43 }
 0x102   :  { %v529_v50 = vsel %vm527_vm5, %v528_v24, %v526_v37  ;;  %v1433_v16 = vsel %vm1430_vm14, %v1432_v19, %v1428_v0  ;;  %vm1460_vm15 = vcmp.eq.f32.partialorder %v1459_v22, 8.507059e+37  ;;  %v1140_v58 = vmul.f32 %v11415_v27, %v1139_v34  ;;  %v11416_v19 = vld [vmem:[#allocation54_spill] sm:$0xff]  ;;  %v11417_v22 = vld [vmem:[#allocation73_spill] sm:$0xff] }
 0x103   :  { %v5585_v57 = vpop.eup %5584  ;;  %v349_v12 = vsel %vm347_vm7, %v348_v13, %v346_v28  ;;  %v538_v49 = vsel %vm537_vm13, %v7305_v44, %v536_v51  ;;  %v1463_v36 = vsel %vm1460_vm15, %v1462_v38, %v1458_v35  ;;  %v1707_v11 = vsub.f32 1.0, %v1706_v48 }
 0x104   :  { %v1227_v55 = vmul.f32 0.6931472, %v5585_v57  ;;  %v1464_v21 = vmul.f32 %v1463_v36, %v1231_v54  ;;  %v1141_v7 = vmul.f32 0.5, %v1140_v58  ;;  %5586 = vrsqrt.f32 %v7423_v31 }
 0x105   :  { %5588 = vrcp.f32 %v7316_v59  ;;  %v540_v63 = vand.u32 2147483648, %v7305_v44  ;;  %v1708_v24 = vmul.f32 %v7071_v8, %v1707_v11  ;;  %v7439_v40 = vmax.f32 %v529_v50, 1e-15 }
 0x106   :  { %vm539_vm1 = vcmp.eq.f32.partialorder %v7305_v44, 0.0  ;;  %v1434_v46 = vmul.f32 %v1433_v16, %v1227_v55  ;;  %1812 = vperm.xlu2 %5417, %v1464_v21   ;;  %v1142_v15 = vsub.f32 1.5, %v1141_v7  ;;  %v7442_v23 = vmax.f32 %v349_v12, 1e-15 }
 0x107   :  { %v541_v42 = vsel %vm539_vm1, %v540_v63, %v538_v49  ;;  %5590 = vrsqrt.f32 %v7432_v25  ;;  %vm1145_vm2 = vcmp.eq.f32.partialorder %v11414_v39, inf  ;;  %v1714_v13 = vand.u32 2147483647, %v7004_v43 }
 0x108   :  { %1802 = vperm.xlu0 %5418, %v1434_v46   ;;  %v1143_v5 = vmul.f32 %v11415_v27, %v1142_v15  ;;  %5592 = vrsqrt.f32 %v7437_v47  ;;  %v1148_v2 = vand.u32 2147483648, %v11414_v39  ;;  %v1709_v44 = vadd.f32 %v7071_v8, %v1708_v24 }
 0x109   :  { %vm1711_vm3 = vweird.f32 %v7071_v8  ;;  %v1115_v37 = vmul.f32 %v11417_v22, %v11416_v19  ;;  %5594 = vrcp.f32 %v7439_v40  ;;  %vm1147_vm4 = vcmp.eq.f32.partialorder %v11414_v39, 0.0 }
 0x10a   :  { %v5587_v51 = vpop.eup %5586  ;;  %v1144_v0 = vmul.f32 %v11414_v39, %v1143_v5  ;;  %v1716_v53 = vand.u32 2147483648, %v7004_v43  ;;  %vm1710_vm5 = vweird.f32 %v7004_v43  ;;  %v1676_v35 = vmul.f32 %v7133_v61, %v7075_v1  ;;  %v11424_v5 = vld [vmem:[#allocation64_spill] sm:$0xff] }
 0x10b   :  { %v7458_v10 = vpop.eup %5588  ;;  %v495_v28 = vmul.f32 %v5587_v51, %v7423_v31  ;;  %v1116_v54 = vmul.f32 %v11417_v22, %v1115_v37  ;;  %5596 = vrcp.f32 %v7442_v23  ;;  %v7466_v27 = vmax.f32 %v541_v42, 1e-15  ;;  %vm7473_vm6 = vmor %vm1710_vm5, %vm1711_vm3  ;;  %v11423_v42 = vld [vmem:[#allocation47_spill] sm:$0xff] }
 0x10c   :  { %v1146_v34 = vsel %vm1145_vm2, %v11414_v39, %v1144_v0  ;;  %vm7477_vm7 = vcmp.eq.f32.partialorder %v1714_v13, 8.507059e+37  ;;  %v1713_v16 = vsel %vm7473_vm6, %v7071_v8, %v1709_v44  ;;  %v11422_v39 = vld [vmem:[#allocation37_spill] sm:$0xff]  ;;  %v1717_v36 = vor.u32 1.1754944e-38, %v1716_v53 }
 0x10d   :  { %v5591_v48 = vpop.eup %5590  ;;  %v1149_v50 = vsel %vm1147_vm4, %v1148_v2, %v1146_v34  ;;  %v496_v58 = vmul.f32 %v5587_v51, %v495_v28  ;;  %v1117_v57 = vmul.f32 0.5, %v1116_v54  ;;  %v504_v11 = vand.u32 2147483648, %v7423_v31 }
 0x10e   :  { %v5593_v12 = vpop.eup %5592  ;;  %v1203_v49 = vadd.f32 %v1149_v50, %v11422_v39  ;;  %v315_v55 = vmul.f32 %v5591_v48, %v7432_v25  ;;  %v1677_v24 = vsub.f32 1.0, %v1676_v35  ;;  %v1718_v8 = vsel %vm7477_vm7, %v1717_v36, %v1713_v16 }
 0x10f   :  { %v497_v21 = vmul.f32 0.5, %v496_v58  ;;  %v303_v7 = vmul.f32 %v5593_v12, %v7437_v47  ;;  %v1118_v63 = vsub.f32 1.5, %v1117_v57  ;;  %v7488_v46 = vpop.eup %5594  ;;  %vm501_vm8 = vcmp.eq.f32.partialorder %v7423_v31, inf }
 0x110   :  { %5598 = vlog2.f32 %v1203_v49  ;;  %v316_v15 = vmul.f32 %v5591_v48, %v315_v55  ;;  %v1127_v13 = vmul.f32 %v11424_v5, %v11423_v42  ;;  %vm1121_vm9 = vcmp.eq.f32.partialorder %v11416_v19, inf }
 0x111   :  { %v498_v2 = vsub.f32 1.5, %v497_v21  ;;  %v304_v44 = vmul.f32 %v5593_v12, %v303_v7  ;;  %v1119_v37 = vmul.f32 %v11417_v22, %v1118_v63  ;;  %v7497_v0 = vpop.eup %5596  ;;  %vm1123_vm10 = vcmp.eq.f32.partialorder %v11416_v19, 0.0 }
 0x112   :  { %v317_v53 = vmul.f32 0.5, %v316_v15  ;;  %v1124_v28 = vand.u32 2147483648, %v11416_v19  ;;  %v1128_v54 = vmul.f32 %v11424_v5, %v1127_v13  ;;  %vm503_vm11 = vcmp.eq.f32.partialorder %v7423_v31, 0.0 }
 0x113   :  { %v499_v35 = vmul.f32 %v5587_v51, %v498_v2  ;;  %v305_v34 = vmul.f32 0.5, %v304_v44  ;;  %v1120_v38 = vmul.f32 %v11416_v19, %v1119_v37  ;;  %v1678_v43 = vmul.f32 %v7133_v61, %v1677_v24  ;;  %v11425_v24 = vld [vmem:[#allocation42_spill] sm:$0xff] }
 0x114   :  { %v318_v22 = vsub.f32 1.5, %v317_v53  ;;  %vm1680_vm12 = vweird.f32 %v7075_v1  ;;  %vm1681_vm13 = vweird.f32 %v7133_v61  ;;  %v1129_v50 = vmul.f32 0.5, %v1128_v54 }
 0x115   :  { %v500_v16 = vmul.f32 %v499_v35, %v7423_v31  ;;  %vm321_vm14 = vcmp.eq.f32.partialorder %v7432_v25, inf  ;;  %v306_v58 = vsub.f32 1.5, %v305_v34  ;;  %v1122_v51 = vsel %vm1121_vm9, %v11416_v19, %v1120_v38  ;;  %vm7532_vm2 = vmor %vm1680_vm12, %vm1681_vm13 }
 0x116   :  { %v1691_v57 = vmul.f32 %v7084_v41, %v7024_v9  ;;  %v5599_v39 = vpop.eup %5598  ;;  %v319_v49 = vmul.f32 %v5591_v48, %v318_v22  ;;  %v1125_v36 = vsel %vm1123_vm10, %v1124_v28, %v1122_v51  ;;  %v1684_v55 = vand.u32 2147483647, %v7075_v1  ;;  %v11430_v51 = vld [vmem:[#allocation69_spill] sm:$0xff] }
 0x117   :  { %v1130_v21 = vsub.f32 1.5, %v1129_v50  ;;  %v1265_v7 = vmul.f32 0.6931472, %v5599_v39  ;;  %v307_v63 = vmul.f32 %v5593_v12, %v306_v58  ;;  %v1201_v15 = vadd.f32 %v1125_v36, %v11425_v24  ;;  %v11429_v58 = vld [vmem:[#allocation50_spill] sm:$0xff] }
 0x118   :  { %v1679_v13 = vadd.f32 %v7133_v61, %v1678_v43  ;;  %v1686_v2 = vand.u32 2147483648, %v7075_v1  ;;  %vm1133_vm15 = vcmp.eq.f32.partialorder %v11423_v42, inf  ;;  %v1692_v37 = vsub.f32 1.0, %v1691_v57 }
 0x119   :  { %v1131_v44 = vmul.f32 %v11424_v5, %v1130_v21  ;;  %v1719_v48 = vmul.f32 %v1718_v8, %v1265_v7  ;;  %v502_v19 = vsel %vm501_vm8, %v7423_v31, %v500_v16  ;;  %5600 = vlog2.f32 %v1201_v15  ;;  %v11428_v31 = vld [vmem:[#allocation38_spill] sm:$0xff] }
 0x11a   :  { %v1136_v53 = vand.u32 2147483648, %v11423_v42  ;;  %v320_v12 = vmul.f32 %v319_v49, %v7432_v25  ;;  %vm323_vm1 = vcmp.eq.f32.partialorder %v7432_v25, 0.0  ;;  %vm1135_vm3 = vcmp.eq.f32.partialorder %v11423_v42, 0.0 }
 0x11b   :  { %v1132_v8 = vmul.f32 %v11423_v42, %v1131_v44  ;;  %1897 = vperm.xlu1 %5419, %v1719_v48   ;;  %v324_v28 = vand.u32 2147483648, %v7432_v25  ;;  %v308_v54 = vmul.f32 %v307_v63, %v7437_v47  ;;  %v1683_v35 = vsel %vm7532_vm2, %v7133_v61, %v1679_v13  ;;  %v7567_v63 = vpop.xlane.xlu0 %240 }
 0x11c   :  { %v1693_v34 = vmul.f32 %v7084_v41, %v1692_v37  ;;  %v505_v1 = vsel %vm503_vm11, %v504_v11, %v502_v19  ;;  %vm309_vm4 = vcmp.eq.f32.partialorder %v7437_v47, inf  ;;  %v1687_v38 = vor.u32 1.1754944e-38, %v1686_v2  ;;  %v11437_v37 = vld [vmem:[#allocation40_spill] sm:$0xff] }
 0x11d   :  { %v1134_v43 = vsel %vm1133_vm15, %v11423_v42, %v1132_v8  ;;  %vm311_vm5 = vcmp.eq.f32.partialorder %v7437_v47, 0.0  ;;  %v312_v22 = vand.u32 2147483648, %v7437_v47  ;;  %vm1685_vm6 = vcmp.eq.f32.partialorder %v1684_v55, 8.507059e+37 }
 0x11e   :  { %v1137_v61 = vsel %vm1135_vm3, %v1136_v53, %v1134_v43  ;;  %v322_v50 = vsel %vm321_vm14, %v7432_v25, %v320_v12  ;;  %v1688_v16 = vsel %vm1685_vm6, %v1687_v38, %v1683_v35  ;;  %v1103_v57 = vmul.f32 %v11430_v51, %v11429_v58  ;;  %v7582_v25 = vpop.xlane.xlu2 %186  ;;  %v7588_v53 = vpop.xlane.xlu1 %183 }
 0x11f   :  { %v1202_v11 = vadd.f32 %v1137_v61, %v11428_v31  ;;  %v5601_v39 = vpop.eup %5600  ;;  %v7560_v49 = vmax.f32 %v505_v1, 1e-15  ;;  %v310_v42 = vsel %vm309_vm4, %v7437_v47, %v308_v54  ;;  %v1694_v36 = vadd.f32 %v7084_v41, %v1693_v34 }
 0x120   :  { %vm1696_vm7 = vweird.f32 %v7084_v41  ;;  %v1261_v55 = vmul.f32 0.6931472, %v5601_v39  ;;  %v1701_v21 = vand.u32 2147483648, %v7024_v9  ;;  %v1104_v7 = vmul.f32 %v11430_v51, %v1103_v57 }
 0x121   :  { %5602 = vlog2.f32 %v1202_v11  ;;  %v325_v24 = vsel %vm323_vm1, %v324_v28, %v322_v50  ;;  %vm1695_vm8 = vweird.f32 %v7024_v9  ;;  %v1699_v15 = vand.u32 2147483647, %v7024_v9  ;;  %v11433_v50 = vld [vmem:[#allocation56_spill] sm:$0xff] }
 0x122   :  { %v1661_v13 = vmul.f32 %v7115_v18, %v7056_v29  ;;  %5604 = vrcp.f32 %v7466_v27  ;;  %v313_v2 = vsel %vm311_vm5, %v312_v22, %v310_v42  ;;  %v1689_v44 = vmul.f32 %v1688_v16, %v1261_v55  ;;  %vm7578_vm9 = vmor %vm1695_vm8, %vm1696_vm7  ;;  %v11434_v16 = vld [vmem:[#allocation74_spill] sm:$0xff] }
 0x123   :  { %v1105_v48 = vmul.f32 0.5, %v1104_v7  ;;  %v1698_v9 = vsel %vm7578_vm9, %v7084_v41, %v1694_v36  ;;  %5606 = vrsqrt.f32 %v7567_v63  ;;  %v7591_v47 = vmax.f32 %v325_v24, 1e-15 }
 0x124   :  { %v1662_v19 = vsub.f32 1.0, %v1661_v13  ;;  %5608 = vrcp.f32 %v7560_v49  ;;  %1887 = vperm.xlu0 %5418, %v1689_v44   ;;  %v1702_v12 = vor.u32 1.1754944e-38, %v1701_v21  ;;  %v7593_v8 = vmax.f32 %v313_v2, 1e-15 }
 0x125   :  { %v1106_v5 = vsub.f32 1.5, %v1105_v48  ;;  %vm1700_vm10 = vcmp.eq.f32.partialorder %v1699_v15, 8.507059e+37  ;;  %5610 = vrsqrt.f32 %v7582_v25  ;;  %vm1109_vm11 = vcmp.eq.f32.partialorder %v11429_v58, inf }
 0x126   :  { %v1663_v28 = vmul.f32 %v7115_v18, %v1662_v19  ;;  %v1703_v54 = vsel %vm1700_vm10, %v1702_v12, %v1698_v9  ;;  %5612 = vrsqrt.f32 %v7588_v53  ;;  %v1112_v1 = vand.u32 2147483648, %v11429_v58 }
 0x127   :  { %v5603_v41 = vpop.eup %5602  ;;  %v1107_v35 = vmul.f32 %v11430_v51, %v1106_v5  ;;  %v1669_v38 = vand.u32 2147483647, %v7056_v29  ;;  %v1671_v43 = vand.u32 2147483648, %v7056_v29  ;;  %5614 = vrcp.f32 %v7591_v47 }
 0x128   :  { %v1263_v34 = vmul.f32 0.6931472, %v5603_v41  ;;  %v7603_v22 = vpop.eup %5604  ;;  %vm1111_vm12 = vcmp.eq.f32.partialorder %v11429_v58, 0.0  ;;  %v1079_v31 = vmul.f32 %v11434_v16, %v11433_v50  ;;  %v1664_v57 = vadd.f32 %v7115_v18, %v1663_v28 }
 0x129   :  { %v1108_v61 = vmul.f32 %v11429_v58, %v1107_v35  ;;  %v5607_v11 = vpop.eup %5606  ;;  %vm1666_vm13 = vweird.f32 %v7115_v18  ;;  %v1631_v39 = vmul.f32 %v7197_v33, %v7098_v14  ;;  %vm1665_vm14 = vweird.f32 %v7056_v29 }
 0x12a   :  { %v1704_v51 = vmul.f32 %v1703_v54, %v1263_v34  ;;  %v7614_v42 = vpop.eup %5608  ;;  %v507_v55 = vmul.f32 %v5607_v11, %v7567_v63  ;;  %v1080_v21 = vmul.f32 %v11434_v16, %v1079_v31  ;;  %vm7622_vm15 = vcmp.eq.f32.partialorder %v1669_v38, 8.507059e+37  ;;  %vm7630_vm2 = vmor %vm1665_vm14, %vm1666_vm13 }
 0x12b   :  { %v1110_v36 = vsel %vm1109_vm11, %v11429_v58, %v1108_v61  ;;  %v5611_v7 = vpop.eup %5610  ;;  %v1672_v13 = vor.u32 1.1754944e-38, %v1671_v43  ;;  %vm513_vm1 = vcmp.eq.f32.partialorder %v7567_v63, inf  ;;  %v1632_v2 = vsub.f32 1.0, %v1631_v39 }
 0x12c   :  { %1892 = vperm.xlu2 %5417, %v1704_v51   ;;  %v1113_v24 = vsel %vm1111_vm12, %v1112_v1, %v1110_v36  ;;  %v5613_v44 = vpop.eup %5612  ;;  %v508_v48 = vmul.f32 %v5607_v11, %v507_v55  ;;  %vm515_vm3 = vcmp.eq.f32.partialorder %v7567_v63, 0.0  ;;  %v291_v9 = vmul.f32 %v5611_v7, %v7582_v25  ;;  %v11440_v51 = vld [vmem:[#allocation52_spill] sm:$0xff] }
 0x12d   :  { %v1200_v58 = vadd.f32 %v1113_v24, %v11437_v37  ;;  %v1081_v19 = vmul.f32 0.5, %v1080_v21  ;;  %v1668_v12 = vsel %vm7630_vm2, %v7115_v18, %v1664_v57  ;;  %v516_v5 = vand.u32 2147483648, %v7567_v63  ;;  %v7642_v54 = vpop.eup %5614  ;;  %v11441_v57 = vld [vmem:[#allocation72_spill] sm:$0xff] }
 0x12e   :  { %v300_v28 = vand.u32 2147483648, %v7582_v25  ;;  %v279_v41 = vmul.f32 %v5613_v44, %v7588_v53  ;;  %v509_v35 = vmul.f32 0.5, %v508_v48  ;;  %v292_v34 = vmul.f32 %v5611_v7, %v291_v9 }
 0x12f   :  { %5616 = vlog2.f32 %v1200_v58  ;;  %v1082_v1 = vsub.f32 1.5, %v1081_v19  ;;  %vm297_vm4 = vcmp.eq.f32.partialorder %v7582_v25, inf  ;;  %vm1085_vm5 = vcmp.eq.f32.partialorder %v11433_v50, inf }
 0x130   :  { %v280_v38 = vmul.f32 %v5613_v44, %v279_v41  ;;  %vm1087_vm6 = vcmp.eq.f32.partialorder %v11433_v50, 0.0  ;;  %v1633_v18 = vmul.f32 %v7197_v33, %v1632_v2  ;;  %v510_v43 = vsub.f32 1.5, %v509_v35 }
 0x131   :  { %v293_v61 = vmul.f32 0.5, %v292_v34  ;;  %vm299_vm7 = vcmp.eq.f32.partialorder %v7582_v25, 0.0  ;;  %vm285_vm8 = vcmp.eq.f32.partialorder %v7588_v53, inf  ;;  %v1083_v31 = vmul.f32 %v11434_v16, %v1082_v1 }
 0x132   :  { %v923_v39 = vmul.f32 %v11441_v57, %v11440_v51  ;;  %v1673_v36 = vsel %vm7622_vm15, %v1672_v13, %v1668_v12  ;;  %v281_v55 = vmul.f32 0.5, %v280_v38  ;;  %v1088_v21 = vand.u32 2147483648, %v11433_v50 }
 0x133   :  { %vm1635_vm9 = vweird.f32 %v7098_v14  ;;  %v511_v24 = vmul.f32 %v5607_v11, %v510_v43  ;;  %v294_v2 = vsub.f32 1.5, %v293_v61  ;;  %v1084_v37 = vmul.f32 %v11433_v50, %v1083_v31  ;;  %v11442_v43 = vld [vmem:[#allocation43_spill] sm:$0xff] }
 0x134   :  { %vm1636_vm10 = vweird.f32 %v7197_v33  ;;  %v282_v58 = vsub.f32 1.5, %v281_v55  ;;  %v1641_v16 = vand.u32 2147483648, %v7098_v14  ;;  %v924_v29 = vmul.f32 %v11441_v57, %v923_v39 }
 0x135   :  { %v1436_v15 = vmul.f32 %v7121_v20, %v7064_v6  ;;  %v5617_v13 = vpop.eup %5616  ;;  %v512_v48 = vmul.f32 %v511_v24, %v7567_v63  ;;  %v295_v9 = vmul.f32 %v5611_v7, %v294_v2  ;;  %v1086_v11 = vsel %vm1085_vm5, %v11433_v50, %v1084_v37  ;;  %vm7686_vm11 = vmor %vm1635_vm9, %vm1636_vm10 }
 0x136   :  { %v1634_v19 = vadd.f32 %v7197_v33, %v1633_v18  ;;  %v1259_v12 = vmul.f32 0.6931472, %v5617_v13  ;;  %v283_v41 = vmul.f32 %v5613_v44, %v282_v58  ;;  %v1089_v35 = vsel %vm1087_vm6, %v1088_v21, %v1086_v11 }
 0x137   :  { %v925_v34 = vmul.f32 0.5, %v924_v29  ;;  %v514_v1 = vsel %vm513_vm1, %v7567_v63, %v512_v48  ;;  %v296_v38 = vmul.f32 %v295_v9, %v7582_v25  ;;  %v1198_v7 = vadd.f32 %v1089_v35, %v11442_v43  ;;  %v11447_v35 = vld [vmem:[#allocation41_spill] sm:$0xff] }
 0x138   :  { %v1437_v61 = vsub.f32 1.0, %v1436_v15  ;;  %v1674_v31 = vmul.f32 %v1673_v36, %v1259_v12  ;;  %v517_v39 = vsel %vm515_vm3, %v516_v5, %v514_v1  ;;  %v284_v18 = vmul.f32 %v283_v41, %v7588_v53  ;;  %v11446_v15 = vld [vmem:[#allocation76_spill] sm:$0xff] }
 0x139   :  { %v926_v44 = vsub.f32 1.5, %v925_v34  ;;  %v298_v50 = vsel %vm297_vm4, %v7582_v25, %v296_v38  ;;  %v288_v55 = vand.u32 2147483648, %v7588_v53  ;;  %5618 = vlog2.f32 %v1198_v7  ;;  %v7723_v38 = vpop.xlane.xlu0 %231 }
 0x13a   :  { %v1639_v63 = vand.u32 2147483647, %v7098_v14  ;;  %1882 = vperm.xlu1 %5419, %v1674_v31   ;;  %v301_v5 = vsel %vm299_vm7, %v300_v28, %v298_v50  ;;  %v286_v36 = vsel %vm285_vm8, %v7588_v53, %v284_v18  ;;  %v1638_v24 = vsel %vm7686_vm11, %v7197_v33, %v1634_v19  ;;  %v7728_v31 = vpop.xlane.xlu1 %234 }
 0x13b   :  { %v927_v2 = vmul.f32 %v11441_v57, %v926_v44  ;;  %v7700_v37 = vmax.f32 %v517_v39, 1e-15  ;;  %vm929_vm12 = vcmp.eq.f32.partialorder %v11440_v51, inf  ;;  %v932_v14 = vand.u32 2147483648, %v11440_v51  ;;  %v11445_v57 = vld [vmem:[#allocation57_spill] sm:$0xff] }
 0x13c   :  { %v1438_v58 = vmul.f32 %v7121_v20, %v1437_v61  ;;  %vm287_vm13 = vcmp.eq.f32.partialorder %v7588_v53, 0.0  ;;  %v1642_v25 = vor.u32 1.1754944e-38, %v1641_v16  ;;  %vm931_vm14 = vcmp.eq.f32.partialorder %v11440_v51, 0.0 }
 0x13d   :  { %v928_v28 = vmul.f32 %v11440_v51, %v927_v2  ;;  %v7708_v29 = vmax.f32 %v301_v5, 1e-15  ;;  %v289_v33 = vsel %vm287_vm13, %v288_v55, %v286_v36  ;;  %vm1640_vm15 = vcmp.eq.f32.partialorder %v1639_v63, 8.507059e+37  ;;  %v11450_v2 = vld [vmem:[#allocation62_spill] sm:$0xff] }
 0x13e   :  { %v899_v13 = vmul.f32 %v11446_v15, %v11445_v57  ;;  %5620 = vrcp.f32 %v7593_v8  ;;  %v1643_v48 = vsel %vm1640_vm15, %v1642_v25, %v1638_v24  ;;  %vm1441_vm1 = vweird.f32 %v7121_v20 }
 0x13f   :  { %v930_v9 = vsel %vm929_vm12, %v11440_v51, %v928_v28  ;;  %v5619_v53 = vpop.eup %5618  ;;  %5622 = vrcp.f32 %v7700_v37  ;;  %v1439_v11 = vadd.f32 %v7121_v20, %v1438_v58  ;;  %v7718_v12 = vmax.f32 %v289_v33, 1e-15 }
 0x140   :  { %v933_v16 = vsel %vm931_vm14, %v932_v14, %v930_v9  ;;  %v900_v19 = vmul.f32 %v11446_v15, %v899_v13  ;;  %v1255_v41 = vmul.f32 0.6931472, %v5619_v53  ;;  %v1406_v1 = vmul.f32 %v7202_v4, %v7156_v45  ;;  %v11451_v14 = vld [vmem:[#allocation84_spill] sm:$0xff] }
 0x141   :  { %v1185_v34 = vadd.f32 %v933_v16, %v11447_v35  ;;  %5624 = vrcp.f32 %v7708_v29  ;;  %vm1440_vm2 = vweird.f32 %v7064_v6  ;;  %v1446_v7 = vand.u32 2147483648, %v7064_v6 }
 0x142   :  { %v901_v51 = vmul.f32 0.5, %v900_v19  ;;  %v1644_v43 = vmul.f32 %v1643_v48, %v1255_v41  ;;  %v1407_v61 = vsub.f32 1.0, %v1406_v1  ;;  %vm7732_vm3 = vmor %vm1440_vm2, %vm1441_vm1  ;;  %v1444_v18 = vand.u32 2147483647, %v7064_v6 }
 0x143   :  { %5626 = vlog2.f32 %v1185_v34  ;;  %v1443_v55 = vsel %vm7732_vm3, %v7121_v20, %v1439_v11  ;;  %vm905_vm4 = vcmp.eq.f32.partialorder %v11445_v57, inf  ;;  %v1414_v6 = vand.u32 2147483647, %v7156_v45 }
 0x144   :  { %v902_v44 = vsub.f32 1.5, %v901_v51  ;;  %5628 = vrsqrt.f32 %v7723_v38  ;;  %v7738_v50 = vpop.eup %5620  ;;  %1872 = vperm.xlu0 %5418, %v1644_v43   ;;  %v1447_v5 = vor.u32 1.1754944e-38, %v1446_v7  ;;  %v908_v36 = vand.u32 2147483648, %v11445_v57  ;;  %v11454_v7 = vld [vmem:[#allocation44_spill] sm:$0xff] }
 0x145   :  { %5630 = vrcp.f32 %v7718_v12  ;;  %v7744_v21 = vpop.eup %5622  ;;  %v1408_v24 = vmul.f32 %v7202_v4, %v1407_v61  ;;  %v875_v58 = vmul.f32 %v11451_v14, %v11450_v2  ;;  %vm1445_vm5 = vcmp.eq.f32.partialorder %v1444_v18, 8.507059e+37 }
 0x146   :  { %v903_v63 = vmul.f32 %v11446_v15, %v902_v44  ;;  %5632 = vrsqrt.f32 %v7728_v31  ;;  %vm907_vm6 = vcmp.eq.f32.partialorder %v11445_v57, 0.0  ;;  %v1416_v28 = vand.u32 2147483648, %v7156_v45 }
 0x147   :  { %v7754_v25 = vpop.eup %5624  ;;  %v1448_v15 = vsel %vm1445_vm5, %v1447_v5, %v1443_v55  ;;  %vm1410_vm7 = vweird.f32 %v7156_v45  ;;  %vm1411_vm8 = vweird.f32 %v7202_v4  ;;  %v876_v13 = vmul.f32 %v11451_v14, %v875_v58  ;;  %v11457_v5 = vld [vmem:[#allocation58_spill] sm:$0xff] }
 0x148   :  { %v904_v20 = vmul.f32 %v11445_v57, %v903_v63  ;;  %vm7765_vm9 = vcmp.eq.f32.partialorder %v1414_v6, 8.507059e+37  ;;  %v1376_v11 = vmul.f32 %v7219_v32, %v7172_v60  ;;  %v1409_v35 = vadd.f32 %v7202_v4, %v1408_v24  ;;  %vm7783_vm11 = vmor %vm1410_vm7, %vm1411_vm8 }
 0x149   :  { %v5627_v33 = vpop.eup %5626  ;;  %v877_v1 = vmul.f32 0.5, %v876_v13  ;;  %vm477_vm10 = vcmp.eq.f32.partialorder %v7723_v38, inf  ;;  %v480_v18 = vand.u32 2147483648, %v7723_v38  ;;  %vm881_vm12 = vcmp.eq.f32.partialorder %v11450_v2, inf }
 0x14a   :  { %v5629_v48 = vpop.eup %5628  ;;  %v1229_v9 = vmul.f32 0.6931472, %v5627_v33  ;;  %v906_v53 = vsel %vm905_vm4, %v11445_v57, %v904_v20  ;;  %v1417_v57 = vor.u32 1.1754944e-38, %v1416_v28  ;;  %v1377_v6 = vsub.f32 1.0, %v1376_v11 }
 0x14b   :  { %v7771_v19 = vpop.eup %5630  ;;  %v909_v41 = vsel %vm907_vm6, %v908_v36, %v906_v53  ;;  %v471_v34 = vmul.f32 %v5629_v48, %v7723_v38  ;;  %v878_v55 = vsub.f32 1.5, %v877_v1  ;;  %v11458_v36 = vld [vmem:[#allocation79_spill] sm:$0xff]  ;;  %v1413_v58 = vsel %vm7783_vm11, %v7202_v4, %v1409_v35 }
 0x14c   :  { %v5633_v51 = vpop.eup %5632  ;;  %v1449_v43 = vmul.f32 %v1448_v15, %v1229_v9  ;;  %v1183_v61 = vadd.f32 %v909_v41, %v11454_v7  ;;  %v887_v24 = vmul.f32 %v11458_v36, %v11457_v5  ;;  %vm479_vm13 = vcmp.eq.f32.partialorder %v7723_v38, 0.0  ;;  %v11459_v41 = vld [vmem:[#allocation116_spill] sm:$0xff] }
 0x14d   :  { %v472_v39 = vmul.f32 %v5629_v48, %v471_v34  ;;  %v483_v44 = vmul.f32 %v5633_v51, %v7728_v31  ;;  %v879_v45 = vmul.f32 %v11451_v14, %v878_v55  ;;  %vm883_vm14 = vcmp.eq.f32.partialorder %v11450_v2, 0.0 }
 0x14e   :  { %1807 = vperm.xlu2 %5417, %v1449_v43   ;;  %5634 = vlog2.f32 %v1183_v61  ;;  %v884_v33 = vand.u32 2147483648, %v11450_v2  ;;  %vm1380_vm15 = vweird.f32 %v7172_v60  ;;  %v888_v15 = vmul.f32 %v11458_v36, %v887_v24 }
 0x14f   :  { %v473_v20 = vmul.f32 0.5, %v472_v39  ;;  %v484_v28 = vmul.f32 %v5633_v51, %v483_v44  ;;  %v880_v53 = vmul.f32 %v11450_v2, %v879_v45  ;;  %vm1381_vm1 = vweird.f32 %v7219_v32 }
 0x150   :  { %v1418_v4 = vsel %vm7765_vm9, %v1417_v57, %v1413_v58  ;;  %v1378_v11 = vmul.f32 %v7219_v32, %v1377_v6  ;;  %v889_v14 = vmul.f32 0.5, %v888_v15  ;;  %v1391_v35 = vmul.f32 %v11459_v41, %v7165_v26  ;;  %v11460_v6 = vld [vmem:[#allocation49_spill] sm:$0xff]  ;;  %vm7835_vm6 = vmor %vm1380_vm15, %vm1381_vm1 }
 0x151   :  { %v474_v13 = vsub.f32 1.5, %v473_v20  ;;  %v485_v9 = vmul.f32 0.5, %v484_v28  ;;  %vm489_vm2 = vcmp.eq.f32.partialorder %v7728_v31, inf  ;;  %v882_v43 = vsel %vm881_vm12, %v11450_v2, %v880_v53 }
 0x152   :  { %v1384_v7 = vand.u32 2147483647, %v7172_v60  ;;  %v885_v16 = vsel %vm883_vm14, %v884_v33, %v882_v43  ;;  %v1386_v57 = vand.u32 2147483648, %v7172_v60  ;;  %v890_v39 = vsub.f32 1.5, %v889_v14 }
 0x153   :  { %v475_v34 = vmul.f32 %v5629_v48, %v474_v13  ;;  %v486_v1 = vsub.f32 1.5, %v485_v9  ;;  %v1392_v44 = vsub.f32 1.0, %v1391_v35  ;;  %v1181_v24 = vadd.f32 %v885_v16, %v11460_v6  ;;  %v11461_v13 = vld [vmem:[#allocation65_spill] sm:$0xff] }
 0x154   :  { %v5635_v61 = vpop.eup %5634  ;;  %vm491_vm3 = vcmp.eq.f32.partialorder %v7728_v31, 0.0  ;;  %v1379_v58 = vadd.f32 %v7219_v32, %v1378_v11  ;;  %v891_v20 = vmul.f32 %v11458_v36, %v890_v39  ;;  %vm893_vm4 = vcmp.eq.f32.partialorder %v11457_v5, inf  ;;  %v11462_v36 = vld [vmem:[#allocation87_spill] sm:$0xff] }
 0x155   :  { %v1225_v55 = vmul.f32 0.6931472, %v5635_v61  ;;  %v476_v48 = vmul.f32 %v475_v34, %v7723_v38  ;;  %v487_v63 = vmul.f32 %v5633_v51, %v486_v1  ;;  %v896_v2 = vand.u32 2147483648, %v11457_v5 }
 0x156   :  { %5636 = vlog2.f32 %v1181_v24  ;;  %v1393_v51 = vmul.f32 %v11459_v41, %v1392_v44  ;;  %v892_v15 = vmul.f32 %v11457_v5, %v891_v20  ;;  %vm895_vm5 = vcmp.eq.f32.partialorder %v11457_v5, 0.0 }
 0x157   :  { %v1419_v28 = vmul.f32 %v1418_v4, %v1225_v55  ;;  %v478_v45 = vsel %vm477_vm10, %v7723_v38, %v476_v48  ;;  %v488_v33 = vmul.f32 %v487_v63, %v7728_v31  ;;  %v863_v9 = vmul.f32 %v11462_v36, %v11461_v13 }
 0x158   :  { %v492_v53 = vand.u32 2147483648, %v7728_v31  ;;  %vm7839_vm7 = vcmp.eq.f32.partialorder %v1384_v7, 8.507059e+37  ;;  %v1387_v14 = vor.u32 1.1754944e-38, %v1386_v57  ;;  %v1399_v35 = vand.u32 2147483647, %v7165_v26 }
 0x159   :  { %1797 = vperm.xlu1 %5419, %v1419_v28   ;;  %v481_v34 = vsel %vm479_vm13, %v480_v18, %v478_v45  ;;  %v1383_v1 = vsel %vm7835_vm6, %v7219_v32, %v1379_v58  ;;  %v894_v60 = vsel %vm893_vm4, %v11457_v5, %v892_v15  ;;  %v864_v43 = vmul.f32 %v11462_v36, %v863_v9  ;;  %v11467_v18 = vld [vmem:[#allocation46_spill] sm:$0xff]  ;;  %v11473_v28 = vld [vmem:[#allocation97_spill] sm:$0xff] }
 0x15a   :  { %v897_v7 = vsel %vm895_vm5, %v896_v2, %v894_v60  ;;  %v1394_v61 = vadd.f32 %v11459_v41, %v1393_v51  ;;  %vm1396_vm8 = vweird.f32 %v11459_v41  ;;  %v1401_v16 = vand.u32 2147483648, %v7165_v26 }
 0x15b   :  { %v490_v38 = vsel %vm489_vm2, %v7728_v31, %v488_v33  ;;  %v1182_v57 = vadd.f32 %v897_v7, %v11467_v18  ;;  %v865_v32 = vmul.f32 0.5, %v864_v43  ;;  %v1361_v39 = vmul.f32 %v7311_v30, %v7256_v52  ;;  %v11474_v7 = vld [vmem:[#allocation59_spill] sm:$0xff] }
 0x15c   :  { %v5637_v5 = vpop.eup %5636  ;;  %v7862_v44 = vmax.f32 %v481_v34, 1e-15  ;;  %v1388_v55 = vsel %vm7839_vm7, %v1387_v14, %v1383_v1  ;;  %vm1395_vm9 = vweird.f32 %v7165_v26  ;;  %vm7867_vm10 = vcmp.eq.f32.partialorder %v1399_v35, 8.507059e+37  ;;  %v11472_v26 = vld [vmem:[#allocation77_spill] sm:$0xff] }
 0x15d   :  { %v1221_v63 = vmul.f32 0.6931472, %v5637_v5  ;;  %5638 = vlog2.f32 %v1182_v57  ;;  %v866_v6 = vsub.f32 1.5, %v865_v32  ;;  %v1362_v24 = vsub.f32 1.0, %v1361_v39  ;;  %vm7875_vm11 = vmor %vm1395_vm9, %vm1396_vm8  ;;  %v11476_v39 = vld [vmem:[#allocation51_spill] sm:$0xff] }
 0x15e   :  { %v493_v58 = vsel %vm491_vm3, %v492_v53, %v490_v38  ;;  %v1402_v2 = vor.u32 1.1754944e-38, %v1401_v16  ;;  %vm869_vm12 = vcmp.eq.f32.partialorder %v11461_v13, inf  ;;  %v839_v45 = vmul.f32 %v11473_v28, %v11472_v26 }
 0x15f   :  { %v1389_v51 = vmul.f32 %v1388_v55, %v1221_v63  ;;  %v1398_v33 = vsel %vm7875_vm11, %v11459_v41, %v1394_v61  ;;  %v867_v31 = vmul.f32 %v11462_v36, %v866_v6  ;;  %vm871_vm13 = vcmp.eq.f32.partialorder %v11461_v13, 0.0  ;;  %v11475_v61 = vld [vmem:[#allocation82_spill] sm:$0xff] }
 0x160   :  { %v872_v15 = vand.u32 2147483648, %v11461_v13  ;;  %v1363_v9 = vmul.f32 %v7311_v30, %v1362_v24  ;;  %v840_v53 = vmul.f32 %v11473_v28, %v839_v45  ;;  %v1331_v4 = vmul.f32 %v7458_v10, %v7316_v59  ;;  %v11482_v45 = vld [vmem:[#allocation117_spill] sm:$0xff] }
 0x161   :  { %5640 = vrcp.f32 %v7862_v44  ;;  %v7893_v11 = vmax.f32 %v493_v58, 1e-15  ;;  %1787 = vperm.xlu0 %5418, %v1389_v51   ;;  %v868_v41 = vmul.f32 %v11461_v13, %v867_v31  ;;  %v1369_v36 = vand.u32 2147483647, %v7256_v52 }
 0x162   :  { %v1403_v14 = vsel %vm7867_vm10, %v1402_v2, %v1398_v33  ;;  %vm1365_vm14 = vweird.f32 %v7256_v52  ;;  %v841_v35 = vmul.f32 0.5, %v840_v53  ;;  %v1332_v34 = vsub.f32 1.0, %v1331_v4 }
 0x163   :  { %v5639_v1 = vpop.eup %5638  ;;  %v870_v60 = vsel %vm869_vm12, %v11461_v13, %v868_v41  ;;  %vm1366_vm15 = vweird.f32 %v7311_v30  ;;  %v1371_v43 = vand.u32 2147483648, %v7256_v52  ;;  %v1091_v16 = vmul.f32 %v11475_v61, %v11474_v7 }
 0x164   :  { %v1223_v38 = vmul.f32 0.6931472, %v5639_v1  ;;  %v873_v18 = vsel %vm871_vm13, %v872_v15, %v870_v60  ;;  %v1364_v57 = vadd.f32 %v7311_v30, %v1363_v9  ;;  %v842_v32 = vsub.f32 1.5, %v841_v35  ;;  %vm7926_vm4 = vmor %vm1365_vm14, %vm1366_vm15 }
 0x165   :  { %v1180_v5 = vadd.f32 %v873_v18, %v11476_v39  ;;  %vm7911_vm1 = vcmp.eq.f32.partialorder %v1369_v36, 8.507059e+37  ;;  %vm845_vm2 = vcmp.eq.f32.partialorder %v11472_v26, inf  ;;  %v1333_v48 = vmul.f32 %v7458_v10, %v1332_v34 }
 0x166   :  { %v1404_v63 = vmul.f32 %v1403_v14, %v1223_v38  ;;  %v843_v6 = vmul.f32 %v11473_v28, %v842_v32  ;;  %vm847_vm3 = vcmp.eq.f32.partialorder %v11472_v26, 0.0  ;;  %v1092_v13 = vmul.f32 %v11475_v61, %v1091_v16  ;;  %v11481_v28 = vld [vmem:[#allocation115_spill] sm:$0xff]  ;;  %v11483_v14 = vld [vmem:[#allocation70_spill] sm:$0xff] }
 0x167   :  { %v7920_v24 = vpop.eup %5640  ;;  %5642 = vlog2.f32 %v1180_v5  ;;  %v848_v20 = vand.u32 2147483648, %v11472_v26  ;;  %v1339_v2 = vand.u32 2147483647, %v7316_v59  ;;  %v1646_v51 = vmul.f32 %v11482_v45, %v11481_v28 }
 0x168   :  { %1792 = vperm.xlu2 %5417, %v1404_v63   ;;  %v1368_v33 = vsel %vm7926_vm4, %v7311_v30, %v1364_v57  ;;  %v1372_v31 = vor.u32 1.1754944e-38, %v1371_v43  ;;  %v844_v15 = vmul.f32 %v11472_v26, %v843_v6  ;;  %v1093_v52 = vmul.f32 0.5, %v1092_v13  ;;  %v11484_v30 = vld [vmem:[#allocation91_spill] sm:$0xff]  ;;  %v11487_v43 = vld [vmem:[#allocation60_spill] sm:$0xff] }
 0x169   :  { %v1334_v9 = vadd.f32 %v7458_v10, %v1333_v48  ;;  %vm1335_vm5 = vweird.f32 %v7316_v59  ;;  %vm1336_vm6 = vweird.f32 %v7458_v10  ;;  %v1647_v53 = vsub.f32 1.0, %v1646_v51 }
 0x16a   :  { %v846_v4 = vsel %vm845_vm2, %v11472_v26, %v844_v15  ;;  %v1341_v41 = vand.u32 2147483648, %v7316_v59  ;;  %v1094_v36 = vsub.f32 1.5, %v1093_v52  ;;  %v1067_v35 = vmul.f32 %v11484_v30, %v11483_v14  ;;  %vm7957_vm9 = vmor %vm1335_vm5, %vm1336_vm6  ;;  %v11490_v15 = vld [vmem:[#allocation48_spill] sm:$0xff] }
 0x16b   :  { %v1373_v34 = vsel %vm7911_vm1, %v1372_v31, %v1368_v33  ;;  %v849_v1 = vsel %vm847_vm3, %v848_v20, %v846_v4  ;;  %vm7951_vm7 = vcmp.eq.f32.partialorder %v1339_v2, 8.507059e+37  ;;  %vm1097_vm8 = vcmp.eq.f32.partialorder %v11474_v7, inf  ;;  %v11491_v4 = vld [vmem:[#allocation85_spill] sm:$0xff] }
 0x16c   :  { %v1178_v16 = vadd.f32 %v849_v1, %v11487_v43  ;;  %v1095_v38 = vmul.f32 %v11475_v61, %v1094_v36  ;;  %vm1099_vm10 = vcmp.eq.f32.partialorder %v11474_v7, 0.0  ;;  %v1068_v18 = vmul.f32 %v11484_v30, %v1067_v35 }
 0x16d   :  { %v5643_v26 = vpop.eup %5642  ;;  %v1338_v57 = vsel %vm7957_vm9, %v7458_v10, %v1334_v9  ;;  %v1100_v32 = vand.u32 2147483648, %v11474_v7  ;;  %v1648_v39 = vmul.f32 %v11482_v45, %v1647_v53  ;;  %v1616_v5 = vmul.f32 %v7341_v56, %v7292_v62 }
 0x16e   :  { %v1219_v55 = vmul.f32 0.6931472, %v5643_v26  ;;  %5644 = vlog2.f32 %v1178_v16  ;;  %v1096_v61 = vmul.f32 %v11474_v7, %v1095_v38  ;;  %v1069_v48 = vmul.f32 0.5, %v1068_v18 }
 0x16f   :  { %v1342_v63 = vor.u32 1.1754944e-38, %v1341_v41  ;;  %v1654_v6 = vand.u32 2147483647, %v11481_v28  ;;  %v1656_v13 = vand.u32 2147483648, %v11481_v28  ;;  %v1617_v58 = vsub.f32 1.0, %v1616_v5  ;;  %v11492_v41 = vld [vmem:[#allocation102_spill] sm:$0xff] }
 0x170   :  { %v1374_v20 = vmul.f32 %v1373_v34, %v1219_v55  ;;  %v1098_v10 = vsel %vm1097_vm8, %v11474_v7, %v1096_v61  ;;  %vm1650_vm11 = vweird.f32 %v11481_v28  ;;  %v1070_v2 = vsub.f32 1.5, %v1069_v48  ;;  %v11497_v55 = vld [vmem:[#allocation55_spill] sm:$0xff] }
 0x171   :  { %v1343_v51 = vsel %vm7951_vm7, %v1342_v63, %v1338_v57  ;;  %v1101_v33 = vsel %vm1099_vm10, %v1100_v32, %v1098_v10  ;;  %v1649_v31 = vadd.f32 %v11482_v45, %v1648_v39  ;;  %vm1651_vm12 = vweird.f32 %v11482_v45  ;;  %v11498_v63 = vld [vmem:[#allocation67_spill] sm:$0xff] }
 0x172   :  { %1782 = vperm.xlu1 %5419, %v1374_v20   ;;  %v1199_v52 = vadd.f32 %v1101_v33, %v11490_v15  ;;  %v1071_v9 = vmul.f32 %v11484_v30, %v1070_v2  ;;  %v1618_v53 = vmul.f32 %v7341_v56, %v1617_v58  ;;  %v1043_v36 = vmul.f32 %v11492_v41, %v11491_v4  ;;  %vm7997_vm15 = vmor %vm1650_vm11, %vm1651_vm12 }
 0x173   :  { %vm7989_vm13 = vcmp.eq.f32.partialorder %v1654_v6, 8.507059e+37  ;;  %v1657_v7 = vor.u32 1.1754944e-38, %v1656_v13  ;;  %vm1073_vm14 = vcmp.eq.f32.partialorder %v11483_v14, inf  ;;  %v1076_v34 = vand.u32 2147483648, %v11483_v14  ;;  %v11499_v6 = vld [vmem:[#allocation90_spill] sm:$0xff] }
 0x174   :  { %v5645_v1 = vpop.eup %5644  ;;  %5646 = vlog2.f32 %v1199_v52  ;;  %v1072_v60 = vmul.f32 %v11483_v14, %v1071_v9  ;;  %vm1075_vm1 = vcmp.eq.f32.partialorder %v11483_v14, 0.0  ;;  %v1044_v43 = vmul.f32 %v11492_v41, %v1043_v36 }
 0x175   :  { %v1215_v16 = vmul.f32 0.6931472, %v5645_v1  ;;  %v1653_v59 = vsel %vm7997_vm15, %v11482_v45, %v1649_v31  ;;  %v1626_v38 = vand.u32 2147483648, %v7292_v62  ;;  %v1586_v28 = vmul.f32 %v7603_v22, %v7466_v27 }
 0x176   :  { %v1074_v18 = vsel %vm1073_vm14, %v11483_v14, %v1072_v60  ;;  %v1619_v26 = vadd.f32 %v7341_v56, %v1618_v53  ;;  %vm1621_vm2 = vweird.f32 %v7341_v56  ;;  %v1045_v57 = vmul.f32 0.5, %v1044_v43 }
 0x177   :  { %v1344_v32 = vmul.f32 %v1343_v51, %v1215_v16  ;;  %v1077_v39 = vsel %vm1075_vm1, %v1076_v34, %v1074_v18  ;;  %vm1620_vm3 = vweird.f32 %v7292_v62  ;;  %v1587_v5 = vsub.f32 1.0, %v1586_v28  ;;  %v11502_v16 = vld [vmem:[#allocation80_spill] sm:$0xff] }
 0x178   :  { %v1197_v61 = vadd.f32 %v1077_v39, %v11497_v55  ;;  %v1624_v45 = vand.u32 2147483647, %v7292_v62  ;;  %v1046_v48 = vsub.f32 1.5, %v1045_v57  ;;  %v1055_v13 = vmul.f32 %v11499_v6, %v11498_v63  ;;  %vm8021_vm4 = vmor %vm1620_vm3, %vm1621_vm2  ;;  %v11504_v18 = vld [vmem:[#allocation68_spill] sm:$0xff] }
 0x179   :  { %5648 = vrcp.f32 %v7893_v11  ;;  %1772 = vperm.xlu0 %5418, %v1344_v32   ;;  %v1658_v14 = vsel %vm7989_vm13, %v1657_v7, %v1653_v59  ;;  %v1627_v20 = vor.u32 1.1754944e-38, %v1626_v38  ;;  %vm1049_vm5 = vcmp.eq.f32.partialorder %v11491_v4, inf  ;;  %v11503_v59 = vld [vmem:[#allocation98_spill] sm:$0xff] }
 0x17a   :  { %v5647_v10 = vpop.eup %5646  ;;  %5650 = vlog2.f32 %v1197_v61  ;;  %v1623_v62 = vsel %vm8021_vm4, %v7341_v56, %v1619_v26  ;;  %v1047_v2 = vmul.f32 %v11492_v41, %v1046_v48  ;;  %v1056_v51 = vmul.f32 %v11499_v6, %v1055_v13 }
 0x17b   :  { %v1257_v33 = vmul.f32 0.6931472, %v5647_v10  ;;  %v1052_v31 = vand.u32 2147483648, %v11491_v4  ;;  %v1588_v15 = vmul.f32 %v7603_v22, %v1587_v5  ;;  %v1601_v52 = vmul.f32 %v7330_v17, %v7281_v3 }
 0x17c   :  { %vm1625_vm6 = vcmp.eq.f32.partialorder %v1624_v45, 8.507059e+37  ;;  %v1048_v9 = vmul.f32 %v11491_v4, %v1047_v2  ;;  %vm1051_vm7 = vcmp.eq.f32.partialorder %v11491_v4, 0.0  ;;  %v1057_v53 = vmul.f32 0.5, %v1056_v51 }
 0x17d   :  { %v1659_v36 = vmul.f32 %v1658_v14, %v1257_v33  ;;  %v1628_v56 = vsel %vm1625_vm6, %v1627_v20, %v1623_v62  ;;  %vm1590_vm8 = vweird.f32 %v7466_v27  ;;  %v1602_v41 = vsub.f32 1.0, %v1601_v52  ;;  %v11509_v52 = vld [vmem:[#allocation103_spill] sm:$0xff] }
 0x17e   :  { %v1050_v35 = vsel %vm1049_vm5, %v11491_v4, %v1048_v9  ;;  %vm1591_vm9 = vweird.f32 %v7603_v22  ;;  %v1596_v7 = vand.u32 2147483648, %v7466_v27  ;;  %v1058_v34 = vsub.f32 1.5, %v1057_v53 }
 0x17f   :  { %v8043_v1 = vpop.eup %5648  ;;  %1877 = vperm.xlu2 %5417, %v1659_v36   ;;  %v1053_v30 = vsel %vm1051_vm7, %v1052_v31, %v1050_v35  ;;  %v1589_v60 = vadd.f32 %v7603_v22, %v1588_v15  ;;  %v1594_v43 = vand.u32 2147483647, %v7466_v27  ;;  %v1031_v38 = vmul.f32 %v11503_v59, %v11502_v16  ;;  %vm8060_vm12 = vmor %vm1590_vm8, %vm1591_vm9  ;;  %v11508_v15 = vld [vmem:[#allocation88_spill] sm:$0xff] }
 0x180   :  { %v5651_v28 = vpop.eup %5650  ;;  %v1195_v26 = vadd.f32 %v1053_v30, %v11504_v18  ;;  %v1059_v4 = vmul.f32 %v11499_v6, %v1058_v34  ;;  %vm1061_vm10 = vcmp.eq.f32.partialorder %v11498_v63, inf  ;;  %v1603_v57 = vmul.f32 %v7330_v17, %v1602_v41 }
 0x181   :  { %v1253_v32 = vmul.f32 0.6931472, %v5651_v28  ;;  %vm1063_vm11 = vcmp.eq.f32.partialorder %v11498_v63, 0.0  ;;  %v1064_v39 = vand.u32 2147483648, %v11498_v63  ;;  %v1032_v5 = vmul.f32 %v11503_v59, %v1031_v38 }
 0x182   :  { %5652 = vlog2.f32 %v1195_v26  ;;  %v1597_v61 = vor.u32 1.1754944e-38, %v1596_v7  ;;  %v1060_v45 = vmul.f32 %v11498_v63, %v1059_v4  ;;  %v1571_v48 = vmul.f32 %v7488_v46, %v7439_v40 }
 0x183   :  { %v1629_v6 = vmul.f32 %v1628_v56, %v1253_v32  ;;  %v1593_v13 = vsel %vm8060_vm12, %v7603_v22, %v1589_v60  ;;  %v1611_v14 = vand.u32 2147483648, %v7281_v3  ;;  %v1033_v58 = vmul.f32 0.5, %v1032_v5  ;;  %v11507_v22 = vld [vmem:[#allocation53_spill] sm:$0xff]  ;;  %v11512_v32 = vld [vmem:[#allocation63_spill] sm:$0xff] }
 0x184   :  { %v1062_v27 = vsel %vm1061_vm10, %v11498_v63, %v1060_v45  ;;  %v1604_v20 = vadd.f32 %v7330_v17, %v1603_v57  ;;  %vm1606_vm13 = vweird.f32 %v7330_v17  ;;  %v1572_v10 = vsub.f32 1.0, %v1571_v48  ;;  %v11514_v45 = vld [vmem:[#allocation100_spill] sm:$0xff] }
 0x185   :  { %1867 = vperm.xlu1 %5419, %v1629_v6   ;;  %vm1595_vm14 = vcmp.eq.f32.partialorder %v1594_v43, 8.507059e+37  ;;  %v1065_v62 = vsel %vm1063_vm11, %v1064_v39, %v1062_v27  ;;  %vm1605_vm15 = vweird.f32 %v7281_v3  ;;  %v1034_v2 = vsub.f32 1.5, %v1033_v58 }
 0x186   :  { %v1598_v51 = vsel %vm1595_vm14, %v1597_v61, %v1593_v13  ;;  %v1196_v33 = vadd.f32 %v1065_v62, %v11507_v22  ;;  %v1609_v31 = vand.u32 2147483647, %v7281_v3  ;;  %v1007_v9 = vmul.f32 %v11509_v52, %v11508_v15  ;;  %vm8081_vm1 = vmor %vm1605_vm15, %vm1606_vm13  ;;  %v11513_v61 = vld [vmem:[#allocation83_spill] sm:$0xff] }
 0x187   :  { %v1612_v36 = vor.u32 1.1754944e-38, %v1611_v14  ;;  %v1035_v56 = vmul.f32 %v11503_v59, %v1034_v2  ;;  %vm1037_vm2 = vcmp.eq.f32.partialorder %v11502_v16, inf  ;;  %v1040_v63 = vand.u32 2147483648, %v11502_v16 }
 0x188   :  { %v5653_v41 = vpop.eup %5652  ;;  %5654 = vlog2.f32 %v1196_v33  ;;  %v1608_v3 = vsel %vm8081_vm1, %v7330_v17, %v1604_v20  ;;  %v1573_v35 = vmul.f32 %v7488_v46, %v1572_v10  ;;  %v1008_v7 = vmul.f32 %v11509_v52, %v1007_v9 }
 0x189   :  { %v1249_v34 = vmul.f32 0.6931472, %v5653_v41  ;;  %v1036_v30 = vmul.f32 %v11502_v16, %v1035_v56  ;;  %vm1039_vm3 = vcmp.eq.f32.partialorder %v11502_v16, 0.0  ;;  %v1541_v60 = vmul.f32 %v7614_v42, %v7560_v49  ;;  %v11519_v56 = vld [vmem:[#allocation93_spill] sm:$0xff] }
 0x18a   :  { %vm1610_vm4 = vcmp.eq.f32.partialorder %v1609_v31, 8.507059e+37  ;;  %vm1575_vm5 = vweird.f32 %v7439_v40  ;;  %v1579_v43 = vand.u32 2147483647, %v7439_v40  ;;  %v1009_v59 = vmul.f32 0.5, %v1008_v7 }
 0x18b   :  { %v1599_v38 = vmul.f32 %v1598_v51, %v1249_v34  ;;  %v1613_v17 = vsel %vm1610_vm4, %v1612_v36, %v1608_v3  ;;  %v1038_v28 = vsel %vm1037_vm2, %v11502_v16, %v1036_v30  ;;  %v1542_v18 = vsub.f32 1.0, %v1541_v60  ;;  %v11525_v16 = vld [vmem:[#allocation107_spill] sm:$0xff] }
 0x18c   :  { %v1041_v26 = vsel %vm1039_vm3, %v1040_v63, %v1038_v28  ;;  %v1574_v4 = vadd.f32 %v7488_v46, %v1573_v35  ;;  %vm1576_vm6 = vweird.f32 %v7488_v46  ;;  %v1010_v57 = vsub.f32 1.5, %v1009_v59  ;;  %v11520_v63 = vld [vmem:[#allocation105_spill] sm:$0xff]  ;;  %v11521_v35 = vld [vmem:[#allocation71_spill] sm:$0xff] }
 0x18d   :  { %1857 = vperm.xlu0 %5418, %v1599_v38   ;;  %v1194_v39 = vadd.f32 %v1041_v26, %v11512_v32  ;;  %v1581_v5 = vand.u32 2147483648, %v7439_v40  ;;  %v1543_v55 = vmul.f32 %v7614_v42, %v1542_v18  ;;  %v851_v48 = vmul.f32 %v11514_v45, %v11513_v61  ;;  %vm8118_vm10 = vmor %vm1575_vm5, %vm1576_vm6 }
 0x18e   :  { %v5655_v6 = vpop.eup %5654  ;;  %vm8109_vm7 = vcmp.eq.f32.partialorder %v1579_v43, 8.507059e+37  ;;  %v1011_v13 = vmul.f32 %v11509_v52, %v1010_v57  ;;  %vm1013_vm8 = vcmp.eq.f32.partialorder %v11508_v15, inf  ;;  %vm1015_vm9 = vcmp.eq.f32.partialorder %v11508_v15, 0.0 }
 0x18f   :  { %v1251_v14 = vmul.f32 0.6931472, %v5655_v6  ;;  %5656 = vlog2.f32 %v1194_v39  ;;  %v1016_v27 = vand.u32 2147483648, %v11508_v15  ;;  %v852_v20 = vmul.f32 %v11514_v45, %v851_v48  ;;  %v11524_v6 = vld [vmem:[#allocation94_spill] sm:$0xff] }
 0x190   :  { %v1578_v10 = vsel %vm8118_vm10, %v7488_v46, %v1574_v4  ;;  %v1012_v62 = vmul.f32 %v11508_v15, %v1011_v13  ;;  %v1551_v2 = vand.u32 2147483648, %v7560_v49  ;;  %v1346_v51 = vmul.f32 %v7497_v0, %v7442_v23 }
 0x191   :  { %v1614_v40 = vmul.f32 %v1613_v17, %v1251_v14  ;;  %v1544_v22 = vadd.f32 %v7614_v42, %v1543_v55  ;;  %vm1546_vm11 = vweird.f32 %v7614_v42  ;;  %v853_v33 = vmul.f32 0.5, %v852_v20  ;;  %v11526_v14 = vld [vmem:[#allocation66_spill] sm:$0xff] }
 0x192   :  { %v1582_v31 = vor.u32 1.1754944e-38, %v1581_v5  ;;  %v1014_v52 = vsel %vm1013_vm8, %v11508_v15, %v1012_v62  ;;  %vm1545_vm12 = vweird.f32 %v7560_v49  ;;  %v1347_v46 = vsub.f32 1.0, %v1346_v51 }
 0x193   :  { %1862 = vperm.xlu2 %5417, %v1614_v40   ;;  %v1017_v9 = vsel %vm1015_vm9, %v1016_v27, %v1014_v52  ;;  %v1549_v53 = vand.u32 2147483647, %v7560_v49  ;;  %v854_v36 = vsub.f32 1.5, %v853_v33  ;;  %v827_v41 = vmul.f32 %v11520_v63, %v11519_v56  ;;  %vm8145_vm13 = vmor %vm1545_vm12, %vm1546_vm11 }
 0x194   :  { %v1583_v3 = vsel %vm8109_vm7, %v1582_v31, %v1578_v10  ;;  %v1192_v7 = vadd.f32 %v1017_v9, %v11521_v35  ;;  %v1552_v30 = vor.u32 1.1754944e-38, %v1551_v2  ;;  %vm857_vm14 = vcmp.eq.f32.partialorder %v11513_v61, inf  ;;  %v11531_v35 = vld [vmem:[#allocation75_spill] sm:$0xff] }
 0x195   :  { %v5657_v15 = vpop.eup %5656  ;;  %v1548_v49 = vsel %vm8145_vm13, %v7614_v42, %v1544_v22  ;;  %v855_v60 = vmul.f32 %v11514_v45, %v854_v36  ;;  %v860_v43 = vand.u32 2147483648, %v11513_v61  ;;  %v828_v59 = vmul.f32 %v11520_v63, %v827_v41 }
 0x196   :  { %v1247_v38 = vmul.f32 0.6931472, %v5657_v15  ;;  %5658 = vlog2.f32 %v1192_v7  ;;  %v1348_v17 = vmul.f32 %v7497_v0, %v1347_v46  ;;  %v1316_v28 = vmul.f32 %v7642_v54, %v7591_v47  ;;  %v11533_v15 = vld [vmem:[#allocation109_spill] sm:$0xff] }
 0x197   :  { %v856_v18 = vmul.f32 %v11513_v61, %v855_v60  ;;  %vm859_vm15 = vcmp.eq.f32.partialorder %v11513_v61, 0.0  ;;  %v1354_v26 = vand.u32 2147483647, %v7442_v23  ;;  %v829_v42 = vmul.f32 0.5, %v828_v59 }
 0x198   :  { %v1584_v4 = vmul.f32 %v1583_v3, %v1247_v38  ;;  %vm1550_vm1 = vcmp.eq.f32.partialorder %v1549_v53, 8.507059e+37  ;;  %vm1350_vm2 = vweird.f32 %v7442_v23  ;;  %v1317_v57 = vsub.f32 1.0, %v1316_v28 }
 0x199   :  { %v1553_v32 = vsel %vm1550_vm1, %v1552_v30, %v1548_v49  ;;  %v858_v39 = vsel %vm857_vm14, %v11513_v61, %v856_v18  ;;  %vm1351_vm3 = vweird.f32 %v7497_v0  ;;  %v830_v5 = vsub.f32 1.5, %v829_v42  ;;  %v11532_v30 = vld [vmem:[#allocation99_spill] sm:$0xff] }
 0x19a   :  { %1852 = vperm.xlu1 %5419, %v1584_v4   ;;  %v861_v55 = vsel %vm859_vm15, %v860_v43, %v858_v39  ;;  %v1349_v45 = vadd.f32 %v7497_v0, %v1348_v17  ;;  %v1356_v48 = vand.u32 2147483648, %v7442_v23  ;;  %v815_v13 = vmul.f32 %v11525_v16, %v11524_v6  ;;  %vm8186_vm7 = vmor %vm1350_vm2, %vm1351_vm3 }
 0x19b   :  { %v1179_v58 = vadd.f32 %v861_v55, %v11526_v14  ;;  %vm8172_vm4 = vcmp.eq.f32.partialorder %v1354_v26, 8.507059e+37  ;;  %v831_v61 = vmul.f32 %v11520_v63, %v830_v5  ;;  %vm833_vm5 = vcmp.eq.f32.partialorder %v11519_v56, inf }
 0x19c   :  { %v5659_v20 = vpop.eup %5658  ;;  %vm835_vm6 = vcmp.eq.f32.partialorder %v11519_v56, 0.0  ;;  %v836_v10 = vand.u32 2147483648, %v11519_v56  ;;  %v1318_v62 = vmul.f32 %v7642_v54, %v1317_v57  ;;  %v816_v2 = vmul.f32 %v11525_v16, %v815_v13  ;;  %v11538_v13 = vld [vmem:[#allocation78_spill] sm:$0xff] }
 0x19d   :  { %v1243_v51 = vmul.f32 0.6931472, %v5659_v20  ;;  %5660 = vlog2.f32 %v1179_v58  ;;  %v832_v22 = vmul.f32 %v11519_v56, %v831_v61  ;;  %v1301_v33 = vmul.f32 %v7738_v50, %v7593_v8  ;;  %v11539_v61 = vld [vmem:[#allocation101_spill] sm:$0xff]  ;;  %v11540_v20 = vld [vmem:[#allocation110_spill] sm:$0xff] }
 0x19e   :  { %v1353_v31 = vsel %vm8186_vm7, %v7497_v0, %v1349_v45  ;;  %v1357_v52 = vor.u32 1.1754944e-38, %v1356_v48  ;;  %v1324_v46 = vand.u32 2147483647, %v7591_v47  ;;  %v817_v9 = vmul.f32 0.5, %v816_v2 }
 0x19f   :  { %v1554_v53 = vmul.f32 %v1553_v32, %v1243_v51  ;;  %v834_v23 = vsel %vm833_vm5, %v11519_v56, %v832_v22  ;;  %vm1320_vm8 = vweird.f32 %v7591_v47  ;;  %v1302_v36 = vsub.f32 1.0, %v1301_v33 }
 0x1a0   :  { %v837_v63 = vsel %vm835_vm6, %v836_v10, %v834_v23  ;;  %v1319_v41 = vadd.f32 %v7642_v54, %v1318_v62  ;;  %vm1321_vm9 = vweird.f32 %v7642_v54  ;;  %v818_v0 = vsub.f32 1.5, %v817_v9 }
 0x1a1   :  { %1842 = vperm.xlu0 %5418, %v1554_v53   ;;  %v1358_v3 = vsel %vm8172_vm4, %v1357_v52, %v1353_v31  ;;  %v1177_v7 = vadd.f32 %v837_v63, %v11531_v35  ;;  %v1326_v34 = vand.u32 2147483648, %v7591_v47  ;;  %v803_v49 = vmul.f32 %v11533_v15, %v11532_v30  ;;  %vm8220_vm13 = vmor %vm1320_vm8, %vm1321_vm9  ;;  %v11545_v35 = vld [vmem:[#allocation95_spill] sm:$0xff] }
 0x1a2   :  { %vm8211_vm10 = vcmp.eq.f32.partialorder %v1324_v46, 8.507059e+37  ;;  %v819_v56 = vmul.f32 %v11525_v16, %v818_v0  ;;  %vm821_vm11 = vcmp.eq.f32.partialorder %v11524_v6, inf  ;;  %vm823_vm12 = vcmp.eq.f32.partialorder %v11524_v6, 0.0 }
 0x1a3   :  { %v5661_v43 = vpop.eup %5660  ;;  %5662 = vlog2.f32 %v1177_v7  ;;  %v824_v38 = vand.u32 2147483648, %v11524_v6  ;;  %v1303_v17 = vmul.f32 %v7738_v50, %v1302_v36  ;;  %v804_v28 = vmul.f32 %v11533_v15, %v803_v49  ;;  %v11546_v7 = vld [vmem:[#allocation108_spill] sm:$0xff]  ;;  %v11547_v49 = vld [vmem:[#allocation86_spill] sm:$0xff] }
 0x1a4   :  { %v1217_v18 = vmul.f32 0.6931472, %v5661_v43  ;;  %v1323_v26 = vsel %vm8220_vm13, %v7642_v54, %v1319_v41  ;;  %v820_v42 = vmul.f32 %v11524_v6, %v819_v56  ;;  %v1286_v47 = vmul.f32 %v7754_v25, %v7708_v29 }
 0x1a5   :  { %v1327_v4 = vor.u32 1.1754944e-38, %v1326_v34  ;;  %vm1305_vm14 = vweird.f32 %v7593_v8  ;;  %v1309_v57 = vand.u32 2147483647, %v7593_v8  ;;  %v805_v32 = vmul.f32 0.5, %v804_v28 }
 0x1a6   :  { %v1359_v39 = vmul.f32 %v1358_v3, %v1217_v18  ;;  %v822_v5 = vsel %vm821_vm11, %v11524_v6, %v820_v42  ;;  %vm1306_vm15 = vweird.f32 %v7738_v50  ;;  %v1287_v55 = vsub.f32 1.0, %v1286_v47 }
 0x1a7   :  { %v1328_v54 = vsel %vm8211_vm10, %v1327_v4, %v1323_v26  ;;  %v825_v45 = vsel %vm823_vm12, %v824_v38, %v822_v5  ;;  %v1304_v48 = vadd.f32 %v7738_v50, %v1303_v17  ;;  %v806_v16 = vsub.f32 1.5, %v805_v32  ;;  %vm8260_vm4 = vmor %vm1305_vm14, %vm1306_vm15 }
 0x1a8   :  { %1777 = vperm.xlu2 %5417, %v1359_v39   ;;  %v1176_v14 = vadd.f32 %v825_v45, %v11538_v13  ;;  %v1311_v58 = vand.u32 2147483648, %v7593_v8  ;;  %v1288_v27 = vmul.f32 %v7754_v25, %v1287_v55  ;;  %v791_v10 = vmul.f32 %v11540_v20, %v11539_v61 }
 0x1a9   :  { %v5663_v62 = vpop.eup %5662  ;;  %vm8249_vm1 = vcmp.eq.f32.partialorder %v1309_v57, 8.507059e+37  ;;  %v807_v6 = vmul.f32 %v11533_v15, %v806_v16  ;;  %vm809_vm2 = vcmp.eq.f32.partialorder %v11532_v30, inf  ;;  %vm811_vm3 = vcmp.eq.f32.partialorder %v11532_v30, 0.0  ;;  %v11551_v16 = vld [vmem:[#allocation113_spill] sm:$0xff] }
 0x1aa   :  { %v1213_v51 = vmul.f32 0.6931472, %v5663_v62  ;;  %5664 = vlog2.f32 %v1176_v14  ;;  %v812_v22 = vand.u32 2147483648, %v11532_v30  ;;  %v792_v33 = vmul.f32 %v11540_v20, %v791_v10  ;;  %v11552_v14 = vld [vmem:[#allocation89_spill] sm:$0xff] }
 0x1ab   :  { %v1308_v31 = vsel %vm8260_vm4, %v7738_v50, %v1304_v48  ;;  %v808_v52 = vmul.f32 %v11532_v30, %v807_v6  ;;  %v1296_v46 = vand.u32 2147483648, %v7708_v29  ;;  %v1271_v9 = vmul.f32 %v7771_v19, %v7718_v12  ;;  %v11550_v48 = vld [vmem:[#allocation106_spill] sm:$0xff]  ;;  %v1823_v6 = vpop.permute.xlu2 %1822 }
 0x1ac   :  { %v1329_v8 = vmul.f32 %v1328_v54, %v1213_v51  ;;  %v1289_v53 = vadd.f32 %v7754_v25, %v1288_v27  ;;  %vm1291_vm5 = vweird.f32 %v7754_v25  ;;  %v793_v23 = vmul.f32 0.5, %v792_v33  ;;  %v1903_v51 = vpop.permute.xlu1 %1902 }
 0x1ad   :  { %v1312_v36 = vor.u32 1.1754944e-38, %v1311_v58  ;;  %v810_v63 = vsel %vm809_vm2, %v11532_v30, %v808_v52  ;;  %vm1290_vm6 = vweird.f32 %v7708_v29  ;;  %v1272_v50 = vsub.f32 1.0, %v1271_v9  ;;  %v1828_v52 = vpop.permute.xlu0 %1827 }
 0x1ae   :  { %1767 = vperm.xlu1 %5419, %v1329_v8   ;;  %v813_v41 = vsel %vm811_vm3, %v812_v22, %v810_v63  ;;  %v1294_v0 = vand.u32 2147483647, %v7708_v29  ;;  %v794_v3 = vsub.f32 1.5, %v793_v23  ;;  %v1019_v34 = vmul.f32 %v11546_v7, %v11545_v35  ;;  %vm8287_vm7 = vmor %vm1290_vm6, %vm1291_vm5 }
 0x1af   :  { %v1313_v15 = vsel %vm8249_vm1, %v1312_v36, %v1308_v31  ;;  %v1175_v60 = vadd.f32 %v813_v41, %v11547_v49  ;;  %v1297_v43 = vor.u32 1.1754944e-38, %v1296_v46  ;;  %vm797_vm8 = vcmp.eq.f32.partialorder %v11539_v61, inf }
 0x1b0   :  { %v5665_v30 = vpop.eup %5664  ;;  %v1293_v29 = vsel %vm8287_vm7, %v7754_v25, %v1289_v53  ;;  %v795_v59 = vmul.f32 %v11540_v20, %v794_v3  ;;  %v800_v38 = vand.u32 2147483648, %v11539_v61  ;;  %v1020_v17 = vmul.f32 %v11546_v7, %v1019_v34  ;;  %v11558_v34 = vld [vmem:[#allocation104_spill] sm:$0xff] }
 0x1b1   :  { %v1211_v28 = vmul.f32 0.6931472, %v5665_v30  ;;  %5666 = vlog2.f32 %v1175_v60  ;;  %v1273_v18 = vmul.f32 %v7771_v19, %v1272_v50  ;;  %v1556_v26 = vmul.f32 %v7744_v21, %v7700_v37 }
 0x1b2   :  { %v796_v42 = vmul.f32 %v11539_v61, %v795_v59  ;;  %vm799_vm9 = vcmp.eq.f32.partialorder %v11539_v61, 0.0  ;;  %v1279_v47 = vand.u32 2147483647, %v7718_v12  ;;  %v1021_v25 = vmul.f32 0.5, %v1020_v17 }
 0x1b3   :  { %v1314_v4 = vmul.f32 %v1313_v15, %v1211_v28  ;;  %vm1295_vm10 = vcmp.eq.f32.partialorder %v1294_v0, 8.507059e+37  ;;  %vm1275_vm11 = vweird.f32 %v7718_v12  ;;  %v1557_v57 = vsub.f32 1.0, %v1556_v26  ;;  %v11557_v0 = vld [vmem:[#allocation81_spill] sm:$0xff]  ;;  %v11559_v15 = vld [vmem:[#allocation111_spill] sm:$0xff] }
 0x1b4   :  { %v1298_v32 = vsel %vm1295_vm10, %v1297_v43, %v1293_v29  ;;  %v798_v39 = vsel %vm797_vm8, %v11539_v61, %v796_v42  ;;  %vm1276_vm12 = vweird.f32 %v7771_v19  ;;  %v1022_v5 = vsub.f32 1.5, %v1021_v25  ;;  %v1818_v26 = vpop.permute.xlu1 %1817 }
 0x1b5   :  { %1762 = vperm.xlu2 %5417, %v1314_v4   ;;  %v801_v55 = vsel %vm799_vm9, %v800_v38, %v798_v39  ;;  %v1274_v54 = vadd.f32 %v7771_v19, %v1273_v18  ;;  %v1281_v45 = vand.u32 2147483648, %v7718_v12  ;;  %v995_v13 = vmul.f32 %v11551_v16, %v11550_v48  ;;  %vm8328_vm1 = vmor %vm1275_vm11, %vm1276_vm12  ;;  %v1908_v18 = vpop.permute.xlu2 %1907 }
 0x1b6   :  { %v1174_v58 = vadd.f32 %v801_v55, %v11552_v14  ;;  %vm8314_vm13 = vcmp.eq.f32.partialorder %v1279_v47, 8.507059e+37  ;;  %v1023_v61 = vmul.f32 %v11546_v7, %v1022_v5  ;;  %v1558_v20 = vmul.f32 %v7744_v21, %v1557_v57  ;;  %v8379_v5 = vpop.permute.xlu0 %1802  ;;  %v11562_v55 = vld [vmem:[#allocation96_spill] sm:$0xff] }
 0x1b7   :  { %v5667_v10 = vpop.eup %5666  ;;  %vm1025_vm14 = vcmp.eq.f32.partialorder %v11545_v35, inf  ;;  %vm1027_vm15 = vcmp.eq.f32.partialorder %v11545_v35, 0.0  ;;  %v1028_v62 = vand.u32 2147483648, %v11545_v35  ;;  %v996_v2 = vmul.f32 %v11551_v16, %v995_v13  ;;  %v11563_v13 = vld [vmem:[#allocation6_spill] sm:$0xff] }
 0x1b8   :  { %v1209_v40 = vmul.f32 0.6931472, %v5667_v10  ;;  %5668 = vlog2.f32 %v1174_v58  ;;  %v1024_v33 = vmul.f32 %v11545_v35, %v1023_v61  ;;  %v1526_v31 = vmul.f32 %v8043_v1, %v7893_v11 }
 0x1b9   :  { %v1278_v46 = vsel %vm8328_vm1, %v7771_v19, %v1274_v54  ;;  %v1282_v9 = vor.u32 1.1754944e-38, %v1281_v45  ;;  %v1566_v8 = vand.u32 2147483648, %v7700_v37  ;;  %v997_v53 = vmul.f32 0.5, %v996_v2 }
 0x1ba   :  { %v1299_v23 = vmul.f32 %v1298_v32, %v1209_v40  ;;  %v1026_v12 = vsel %vm1025_vm14, %v11545_v35, %v1024_v33  ;;  %v1559_v36 = vadd.f32 %v7744_v21, %v1558_v20  ;;  %vm1561_vm2 = vweird.f32 %v7744_v21  ;;  %v11565_v20 = vld [vmem:[#allocation5_spill] sm:$0xff] }
 0x1bb   :  { %v1029_v63 = vsel %vm1027_vm15, %v1028_v62, %v1026_v12  ;;  %vm1560_vm3 = vweird.f32 %v7700_v37  ;;  %v998_v50 = vsub.f32 1.5, %v997_v53  ;;  %v1527_v19 = vsub.f32 1.0, %v1526_v31  ;;  %v11566_v62 = vld [vmem:[#allocation9_spill] sm:$0xff] }
 0x1bc   :  { %1757 = vperm.xlu0 %5418, %v1299_v23   ;;  %v1283_v41 = vsel %vm8314_vm13, %v1282_v9, %v1278_v46  ;;  %v1193_v3 = vadd.f32 %v1029_v63, %v11557_v0  ;;  %v1564_v7 = vand.u32 2147483647, %v7700_v37  ;;  %v983_v49 = vmul.f32 %v11559_v15, %v11558_v34  ;;  %vm8353_vm4 = vmor %vm1560_vm3, %vm1561_vm2  ;;  %v11567_v46 = vld [vmem:[#allocation10_spill] sm:$0xff]  ;;  %v1898_v23 = vpop.permute.xlu1 %1897  ;;  %v11570_v63 = vld [vmem:[#allocation7_spill] sm:$0xff] }
 0x1bd   :  { %v1567_v35 = vor.u32 1.1754944e-38, %v1566_v8  ;;  %v999_v56 = vmul.f32 %v11551_v16, %v998_v50  ;;  %vm1001_vm5 = vcmp.eq.f32.partialorder %v11550_v48, inf  ;;  %vm1003_vm6 = vcmp.eq.f32.partialorder %v11550_v48, 0.0  ;;  %v1813_v53 = vpop.permute.xlu2 %1812 }
 0x1be   :  { %v5669_v43 = vpop.eup %5668  ;;  %5670 = vlog2.f32 %v1193_v3  ;;  %v1563_v37 = vsel %vm8353_vm4, %v7744_v21, %v1559_v36  ;;  %v1004_v30 = vand.u32 2147483648, %v11550_v48  ;;  %v984_v29 = vmul.f32 %v11559_v15, %v983_v49 }
 0x1bf   :  { %v1207_v59 = vmul.f32 0.6931472, %v5669_v43  ;;  %v1000_v38 = vmul.f32 %v11550_v48, %v999_v56  ;;  %v1528_v17 = vmul.f32 %v8043_v1, %v1527_v19  ;;  %v1511_v28 = vmul.f32 %v7920_v24, %v7862_v44  ;;  %v11572_v43 = vld [vmem:[#allocation11_spill] sm:$0xff] }
 0x1c0   :  { %vm1565_vm7 = vcmp.eq.f32.partialorder %v1564_v7, 8.507059e+37  ;;  %vm1530_vm8 = vweird.f32 %v7893_v11  ;;  %vm1531_vm9 = vweird.f32 %v8043_v1  ;;  %v985_v21 = vmul.f32 0.5, %v984_v29 }
 0x1c1   :  { %v1284_v42 = vmul.f32 %v1283_v41, %v1207_v59  ;;  %v1568_v47 = vsel %vm1565_vm7, %v1567_v35, %v1563_v37  ;;  %v1002_v25 = vsel %vm1001_vm5, %v11550_v48, %v1000_v38  ;;  %v1534_v4 = vand.u32 2147483647, %v7893_v11  ;;  %v11564_v48 = vld [vmem:[#allocation8_spill] sm:$0xff]  ;;  %vm8396_vm12 = vmor %vm1530_vm8, %vm1531_vm9  ;;  %v1888_v35 = vpop.permute.xlu0 %1887 }
 0x1c2   :  { %v1005_v57 = vsel %vm1003_vm6, %v1004_v30, %v1002_v25  ;;  %v1536_v32 = vand.u32 2147483648, %v7893_v11  ;;  %v986_v39 = vsub.f32 1.5, %v985_v21  ;;  %vm989_vm10 = vcmp.eq.f32.partialorder %v11558_v34, inf  ;;  %v11571_v41 = vld [vmem:[#allocation92_spill] sm:$0xff]  ;;  %v11575_v21 = vld [vmem:[#allocation14_spill] sm:$0xff] }
 0x1c3   :  { %1752 = vperm.xlu1 %5419, %v1284_v42   ;;  %v1191_v54 = vadd.f32 %v1005_v57, %v11562_v55  ;;  %v1529_v45 = vadd.f32 %v8043_v1, %v1528_v17  ;;  %v1512_v16 = vsub.f32 1.0, %v1511_v28  ;;  %v1924_v14 = vmul.f32 %v1823_v6, %v11563_v13  ;;  %v11573_v17 = vld [vmem:[#allocation12_spill] sm:$0xff] }
 0x1c4   :  { %v5671_v58 = vpop.eup %5670  ;;  %v987_v27 = vmul.f32 %v11559_v15, %v986_v39  ;;  %v1941_v61 = vmul.f32 %v1908_v18, %v11564_v48  ;;  %v1940_v10 = vmul.f32 %v1903_v51, %v11565_v20  ;;  %v1925_v2 = vmul.f32 %v1828_v52, %v11566_v62  ;;  %v1883_v59 = vpop.permute.xlu1 %1882  ;;  %v11574_v18 = vld [vmem:[#allocation16_spill] sm:$0xff]  ;;  %v11576_v39 = vld [vmem:[#allocation13_spill] sm:$0xff] }
 0x1c5   :  { %v1245_v40 = vmul.f32 0.6931472, %v5671_v58  ;;  %5672 = vlog2.f32 %v1191_v54  ;;  %vm991_vm11 = vcmp.eq.f32.partialorder %v11558_v34, 0.0  ;;  %v992_v22 = vand.u32 2147483648, %v11558_v34  ;;  %v1893_v29 = vpop.permute.xlu2 %1892  ;;  %v11578_v58 = vld [vmem:[#allocation17_spill] sm:$0xff] }
 0x1c6   :  { %v988_v33 = vmul.f32 %v11558_v34, %v987_v27  ;;  %v2025_v31 = vpack.c.bf16 %v1941_v61, %v1940_v10  ;;  %v1923_v6 = vmul.f32 %v1818_v26, %v11567_v46  ;;  %v2017_v9 = vpack.c.bf16 %v1925_v2, %v1924_v14  ;;  %v11579_v61 = vld [vmem:[#allocation19_spill] sm:$0xff]  ;;  %v11580_v2 = vld [vmem:[#allocation22_spill] sm:$0xff] }
 0x1c7   :  { %v1569_v8 = vmul.f32 %v1568_v47, %v1245_v40  ;;  %v1513_v52 = vmul.f32 %v7920_v24, %v1512_v16  ;;  %v1533_v12 = vsel %vm8396_vm12, %v8043_v1, %v1529_v45  ;;  %v1922_v50 = vmul.f32 %v1813_v53, %v11570_v63  ;;  %v11577_v45 = vld [vmem:[#allocation15_spill] sm:$0xff] }
 0x1c8   :  { %v990_v36 = vsel %vm989_vm10, %v11558_v34, %v988_v33  ;;  %2275 = vmatpush.bf16.msra.mxu1 %v2025_v31  ;;  %2186 = vmatpush.bf16.msra.mxu0 %v2017_v9  ;;  %v1537_v11 = vor.u32 1.1754944e-38, %v1536_v32  ;;  %vm1535_vm13 = vcmp.eq.f32.partialorder %v1534_v4, 8.507059e+37  ;;  %vm1516_vm14 = vweird.f32 %v7920_v24  ;;  %v11582_v31 = vld [vmem:[#allocation18_spill] sm:$0xff]  ;;  %v11585_v63 = vld [vmem:[#allocation23_spill] sm:$0xff] }
 0x1c9   :  { %1847 = vperm.xlu2 %5417, %v1569_v8   ;;  %v993_v19 = vsel %vm991_vm11, %v992_v22, %v990_v36  ;;  %v2016_v3 = vpack.c.bf16 %v1923_v6, %v1922_v50  ;;  %v1514_v1 = vadd.f32 %v7920_v24, %v1513_v52  ;;  %v1521_v60 = vand.u32 2147483648, %v7862_v44  ;;  %v1873_v55 = vpop.permute.xlu0 %1872  ;;  %v11581_v22 = vld [vmem:[#allocation20_spill] sm:$0xff]  ;;  %v11583_v8 = vld [vmem:[#allocation21_spill] sm:$0xff] }
 0x1ca   :  { %v1190_v0 = vadd.f32 %v993_v19, %v11571_v41  ;;  %v1538_v15 = vsel %vm1535_vm13, %v1537_v11, %v1533_v12  ;;  %vm1515_vm15 = vweird.f32 %v7862_v44  ;;  %v1519_v34 = vand.u32 2147483647, %v7862_v44  ;;  %v11584_v12 = vld [vmem:[#allocation24_spill] sm:$0xff]  ;;  %v11586_v41 = vld [vmem:[#allocation25_spill] sm:$0xff] }
 0x1cb   :  { %v5673_v7 = vpop.eup %5672  ;;  %vm1517_vm1 = vmor %vm1515_vm15, %vm1516_vm14  ;;  %v1939_v37 = vmul.f32 %v1898_v23, %v11572_v43  ;;  %v1522_v38 = vor.u32 1.1754944e-38, %v1521_v60  ;;  %v1938_v28 = vmul.f32 %v1893_v29, %v11573_v17  ;;  %v1937_v26 = vmul.f32 %v1888_v35, %v11574_v18  ;;  %v11588_v60 = vld [vmem:[#allocation28_spill] sm:$0xff] }
 0x1cc   :  { %v1241_v49 = vmul.f32 0.6931472, %v5673_v7  ;;  %5674 = vlog2.f32 %v1190_v0  ;;  %2187 = vmatpush.bf16.msra.mxu0 %v2016_v3  ;;  %v1518_v30 = vsel %vm1517_vm1, %v7920_v24, %v1514_v1  ;;  %v1936_v42 = vmul.f32 %v1883_v59, %v11575_v21  ;;  %v1798_v14 = vpop.permute.xlu1 %1797  ;;  %v11587_v7 = vld [vmem:[#allocation27_spill] sm:$0xff] }
 0x1cd   :  { %vm1520_vm2 = vcmp.eq.f32.partialorder %v1519_v34, 8.507059e+37  ;;  %v2024_v44 = vpack.c.bf16 %v1939_v37, %v1938_v28  ;;  %v1920_v24 = vmul.f32 %v8379_v5, %v11576_v39  ;;  %v1808_v54 = vpop.permute.xlu2 %1807  ;;  %v1919_v27 = vmul.f32 %v1798_v14, %v11578_v58  ;;  %v11591_v28 = vld [vmem:[#allocation29_spill] sm:$0xff] }
 0x1ce   :  { %v1539_v56 = vmul.f32 %v1538_v15, %v1241_v49  ;;  %v1523_v25 = vsel %vm1520_vm2, %v1522_v38, %v1518_v30  ;;  %v2023_v57 = vpack.c.bf16 %v1937_v26, %v1936_v42  ;;  %v1921_v16 = vmul.f32 %v1808_v54, %v11577_v45  ;;  %v11590_v38 = vld [vmem:[#allocation30_spill] sm:$0xff]  ;;  %v11592_v26 = vld [vmem:[#allocation31_spill] sm:$0xff]  ;;  %v5097_v45 = vld [vmem:[%s11116_s1] sm:$0xf] }
 0x1cf   :  { %2276 = vmatpush.bf16.msra.mxu1 %v2024_v44  ;;  %v1934_v46 = vmul.f32 %v1873_v55, %v11582_v31  ;;  %v11595_v55 = vld [vmem:[#allocation32_spill] sm:$0xff] }
 0x1d0   :  { %1837 = vperm.xlu1 %5419, %v1539_v56   ;;  %v2015_v13 = vpack.c.bf16 %v1921_v16, %v1920_v24  ;;  %v11589_v56 = vld [vmem:[#allocation26_spill] sm:$0xff]  ;;  %v5352_v16 = vld [vmem:[%s11116_s1 + $0x4] sm:$0xf0] }
 0x1d1   :  { %v5098_v14 = vor.u32 %v5352_v16, %v5097_v45  ;;  %v5169_v45 = vld [vmem:[%s11116_s1 + $0x90] sm:$0xf]  ;;  %v5370_v16 = vld [vmem:[%s11116_s1 + $0x94] sm:$0xf0] }
 0x1d2   :  { %v5675_v47 = vpop.eup %5674  ;;  %2188 = vmatpush.bf16.msra.mxu0 %v2015_v13 }
 0x1d3   :  { %v1239_v4 = vmul.f32 0.6931472, %v5675_v47  ;;  %2277 = vmatpush.bf16.msra.mxu1 %v2023_v57  ;;  %v1788_v10 = vpop.permute.xlu0 %1787 }
 0x1d4   :  { %v1917_v40 = vmul.f32 %v1788_v10, %v11580_v2  ;;  %v5099_v2 = vld [vmem:[%s11116_s1 + $0x8] sm:$0xf0] }
 0x1d5   :  { %v1524_v32 = vmul.f32 %v1523_v25, %v1239_v4  ;;  %v1793_v48 = vpop.permute.xlu2 %1792  ;;  %v11593_v25 = vld [vmem:[#allocation33_spill] sm:$0xff] }
 0x1d6   :  { %v1918_v20 = vmul.f32 %v1793_v48, %v11579_v61  ;;  %v11596_v48 = vld [vmem:[#allocation36_spill] sm:$0xff] }
 0x1d7   :  { %1832 = vperm.xlu2 %5417, %v1524_v32   ;;  %v11594_v32 = vld [vmem:[#allocation34_spill] sm:$0xff] }
 0x1d8   :  { %v2014_v62 = vpack.c.bf16 %v1919_v27, %v1918_v20  ;;  %v11597_v20 = vld [vmem:[#allocation35_spill] sm:$0xff] }
 0x1da   :  { %2189 = vmatpush.bf16.msra.mxu0 %v2014_v62  ;;  %v5351_v62 = vld [vmem:[%s11116_s1 + $0x4] sm:$0xf] }
 0x1dd   :  { %v1878_v6 = vpop.permute.xlu2 %1877 }
 0x1de   :  { %v1935_v51 = vmul.f32 %v1878_v6, %v11583_v8  ;;  %v5107_v6 = vld [vmem:[%s11116_s1 + $0x18] sm:$0xf0]  ;;  %v5113_v8 = vld [vmem:[%s11116_s1 + $0x20] sm:$0xf] }
 0x1e0   :  { %v2022_v52 = vpack.c.bf16 %v1935_v51, %v1934_v46  ;;  %v5353_v46 = vld [vmem:[%s11116_s1 + $0x14] sm:$0xf]  ;;  %v5356_v51 = vld [vmem:[%s11116_s1 + $0x24] sm:$0xf0] }
 0x1e2   :  { %2278 = vmatpush.bf16.msra.mxu1 %v2022_v52  ;;  %v5114_v52 = vor.u32 %v5356_v51, %v5113_v8 }
 0x1e4   :  { %v1783_v5 = vpop.permute.xlu1 %1782 }
 0x1e5   :  { %v1916_v33 = vmul.f32 %v1783_v5, %v11581_v22  ;;  %v5102_v5 = vor.u32 %v5351_v62, %v5099_v2  ;;  %v5105_v22 = vld [vmem:[%s11116_s1 + $0x10] sm:$0xf] }
 0x1e7   :  { %v2013_v9 = vpack.c.bf16 %v1917_v40, %v1916_v33  ;;  %v5354_v33 = vld [vmem:[%s11116_s1 + $0x14] sm:$0xf0] }
 0x1e8   :  { %v5106_v31 = vor.u32 %v5354_v33, %v5105_v22  ;;  %v5171_v22 = vld [vmem:[%s11116_s1 + $0x98] sm:$0xf0] }
 0x1e9   :  { %2190 = vmatpush.bf16.msra.mxu0 %v2013_v9  ;;  %v5110_v9 = vor.u32 %v5353_v46, %v5107_v6  ;;  %v5372_v46 = vld [vmem:[%s11116_s1 + $0xa4] sm:$0xf0]  ;;  %v1980_v6 = vld [vmem:[#allocation3 + $0x10] sm:$0xff] }
 0x1eb   :  { %v1773_v19 = vpop.permute.xlu0 %1772 }
 0x1ec   :  { %v1914_v0 = vmul.f32 %v1773_v19, %v11586_v41  ;;  %v5123_v19 = vld [vmem:[%s11116_s1 + $0x38] sm:$0xf0] }
 0x1ed   :  { %v1863_v53 = vpop.permute.xlu2 %1862 }
 0x1ee   :  { %v1932_v36 = vmul.f32 %v1863_v53, %v11584_v12  ;;  %v5355_v53 = vld [vmem:[%s11116_s1 + $0x24] sm:$0xf] }
 0x1f7   :  { %v1868_v23 = vpop.permute.xlu1 %1867 }
 0x1f8   :  { %v1933_v50 = vmul.f32 %v1868_v23, %v11585_v63  ;;  %v5115_v23 = vld [vmem:[%s11116_s1 + $0x28] sm:$0xf0]  ;;  %v5358_v63 = vld [vmem:[%s11116_s1 + $0x34] sm:$0xf0] }
 0x1f9   :  { %v5118_v12 = vor.u32 %v5355_v53, %v5115_v23  ;;  %v1981_v23 = vld [vmem:[#allocation3 + $0x18] sm:$0xff] }
 0x1fa   :  { %v2021_v11 = vpack.c.bf16 %v1933_v50, %v1932_v36  ;;  %v5121_v36 = vld [vmem:[%s11116_s1 + $0x30] sm:$0xf] }
 0x1fb   :  { %v5122_v50 = vor.u32 %v5358_v63, %v5121_v36 }
 0x1fc   :  { %2279 = vmatpush.bf16.msra.mxu1 %v2021_v11  ;;  %v5357_v11 = vld [vmem:[%s11116_s1 + $0x34] sm:$0xf] }
 0x1fd   :  { %v5126_v41 = vor.u32 %v5357_v11, %v5123_v19  ;;  %v5371_v11 = vld [vmem:[%s11116_s1 + $0xa4] sm:$0xf]  ;;  %v5179_v19 = vld [vmem:[%s11116_s1 + $0xa8] sm:$0xf0] }
 0x1ff   :  { %v1858_v49 = vpop.permute.xlu0 %1857 }
 0x200   :  { %v1931_v35 = vmul.f32 %v1858_v49, %v11588_v60  ;;  %v5137_v60 = vld [vmem:[%s11116_s1 + $0x50] sm:$0xf] }
 0x202   :  { %v1778_v3 = vpop.permute.xlu2 %1777 }
 0x203   :  { %v1915_v15 = vmul.f32 %v1778_v3, %v11587_v7  ;;  %v5360_v3 = vld [vmem:[%s11116_s1 + $0x44] sm:$0xf0] }
 0x205   :  { %v2012_v1 = vpack.c.bf16 %v1915_v15, %v1914_v0  ;;  %v5129_v0 = vld [vmem:[%s11116_s1 + $0x40] sm:$0xf]  ;;  %v5359_v15 = vld [vmem:[%s11116_s1 + $0x44] sm:$0xf] }
 0x206   :  { %v5130_v7 = vor.u32 %v5360_v3, %v5129_v0  ;;  %v5185_v0 = vld [vmem:[%s11116_s1 + $0xb0] sm:$0xf]  ;;  %v5374_v3 = vld [vmem:[%s11116_s1 + $0xb4] sm:$0xf0] }
 0x207   :  { %2191 = vmatpush.bf16.msra.mxu0 %v2012_v1  ;;  %v5131_v1 = vld [vmem:[%s11116_s1 + $0x48] sm:$0xf0] }
 0x208   :  { %v5134_v49 = vor.u32 %v5359_v15, %v5131_v1 }
 0x20c   :  { %v1853_v34 = vpop.permute.xlu1 %1852 }
 0x20d   :  { %v1930_v43 = vmul.f32 %v1853_v34, %v11589_v56  ;;  %v5361_v56 = vld [vmem:[%s11116_s1 + $0x54] sm:$0xf] }
 0x20f   :  { %v2020_v37 = vpack.c.bf16 %v1931_v35, %v1930_v43  ;;  %v1763_v30 = vpop.permute.xlu2 %1762  ;;  %v5362_v35 = vld [vmem:[%s11116_s1 + $0x54] sm:$0xf0]  ;;  %v5139_v43 = vld [vmem:[%s11116_s1 + $0x58] sm:$0xf0] }
 0x210   :  { %v1912_v17 = vmul.f32 %v1763_v30, %v11590_v38  ;;  %v5138_v34 = vor.u32 %v5362_v35, %v5137_v60  ;;  %v5145_v30 = vld [vmem:[%s11116_s1 + $0x60] sm:$0xf]  ;;  %v5363_v38 = vld [vmem:[%s11116_s1 + $0x64] sm:$0xf] }
 0x211   :  { %2280 = vmatpush.bf16.msra.mxu1 %v2020_v37  ;;  %v5142_v37 = vor.u32 %v5361_v56, %v5139_v43 }
 0x213   :  { %v1843_v29 = vpop.permute.xlu0 %1842 }
 0x214   :  { %v1928_v21 = vmul.f32 %v1843_v29, %v11592_v26  ;;  %v5364_v29 = vld [vmem:[%s11116_s1 + $0x64] sm:$0xf0]  ;;  %v5366_v26 = vld [vmem:[%s11116_s1 + $0x74] sm:$0xf0] }
 0x220   :  { %v1768_v59 = vpop.permute.xlu1 %1767 }
 0x221   :  { %v1913_v18 = vmul.f32 %v1768_v59, %v11591_v28  ;;  %v5146_v59 = vor.u32 %v5364_v29, %v5145_v30  ;;  %v5373_v29 = vld [vmem:[%s11116_s1 + $0xb4] sm:$0xf] }
 0x223   :  { %v1848_v42 = vpop.permute.xlu2 %1847  ;;  %v2011_v47 = vpack.c.bf16 %v1913_v18, %v1912_v17  ;;  %v5147_v17 = vld [vmem:[%s11116_s1 + $0x68] sm:$0xf0]  ;;  %v5153_v18 = vld [vmem:[%s11116_s1 + $0x70] sm:$0xf] }
 0x224   :  { %v1929_v44 = vmul.f32 %v1848_v42, %v11593_v25  ;;  %v5150_v28 = vor.u32 %v5363_v38, %v5147_v17  ;;  %v5365_v42 = vld [vmem:[%s11116_s1 + $0x74] sm:$0xf]  ;;  %v5193_v17 = vld [vmem:[%s11116_s1 + $0xc0] sm:$0xf] }
 0x225   :  { %2192 = vmatpush.bf16.msra.mxu0 %v2011_v47  ;;  %v5155_v47 = vld [vmem:[%s11116_s1 + $0x78] sm:$0xf0] }
 0x226   :  { %v2019_v4 = vpack.c.bf16 %v1929_v44, %v1928_v21  ;;  %v5154_v21 = vor.u32 %v5366_v26, %v5153_v18  ;;  %v5158_v25 = vor.u32 %v5365_v42, %v5155_v47  ;;  %v5161_v44 = vld [vmem:[%s11116_s1 + $0x80] sm:$0xf]  ;;  %v1984_v18 = vld [vmem:[#allocation3 + $0x30] sm:$0xff] }
 0x228   :  { %2281 = vmatpush.bf16.msra.mxu1 %v2019_v4  ;;  %v5368_v4 = vld [vmem:[%s11116_s1 + $0x84] sm:$0xf0] }
 0x22e   :  { %v1758_v57 = vpop.permute.xlu0 %1757 }
 0x22f   :  { %v1911_v39 = vmul.f32 %v1758_v57, %v11594_v32  ;;  %v5162_v57 = vor.u32 %v5368_v4, %v5161_v44  ;;  %v1985_v44 = vld [vmem:[#allocation3 + $0x38] sm:$0xff] }
 0x231   :  { %v1833_v58 = vpop.permute.xlu2 %1832 }
 0x232   :  { %v1926_v61 = vmul.f32 %v1833_v58, %v11596_v48 }
 0x235   :  { %v1753_v24 = vpop.permute.xlu1 %1752 }
 0x236   :  { %v1910_v54 = vmul.f32 %v1753_v24, %v11595_v55  ;;  %v5367_v24 = vld [vmem:[%s11116_s1 + $0x84] sm:$0xf]  ;;  %v5163_v55 = vld [vmem:[%s11116_s1 + $0x88] sm:$0xf0] }
 0x238   :  { %v2010_v13 = vpack.c.bf16 %v1911_v39, %v1910_v54  ;;  %v5166_v54 = vor.u32 %v5367_v24, %v5163_v55  ;;  %v5375_v24 = vld [vmem:[%s11116_s1 + $0xc4] sm:$0xf]  ;;  %v5195_v55 = vld [vmem:[%s11116_s1 + $0xc8] sm:$0xf0] }
 0x23a   :  { %2193 = vmatpush.bf16.msra.mxu0 %v2010_v13  ;;  %v1978_v13 = vld [vmem:[#allocation3] sm:$0xff] }
 0x23d   :  { %2194 = vmatmul.bf16.vlgmr.msra.gmra.mxu0 %v5098_v14 }
 0x242   :  { %v1838_v27 = vpop.permute.xlu1 %1837 }
 0x243   :  { %v1927_v10 = vmul.f32 %v1838_v27, %v11597_v20  ;;  %v5170_v27 = vor.u32 %v5370_v16, %v5169_v45  ;;  %v1979_v20 = vld [vmem:[#allocation3 + $0x8] sm:$0xff]  ;;  %v5201_v45 = vld [vmem:[%s11116_s1 + $0xd0] sm:$0xf]  ;;  %v5378_v16 = vld [vmem:[%s11116_s1 + $0xd4] sm:$0xf0] }
 0x245   :  { %v2018_v40 = vpack.c.bf16 %v1927_v10, %v1926_v61 }
 0x247   :  { %2282 = vmatpush.bf16.msra.mxu1 %v2018_v40 }
 0x24a   :  { %2283 = vmatmul.bf16.vlgmr.msra.gmra.mxu1 %v5102_v5  ;;  %v5369_v5 = vld [vmem:[%s11116_s1 + $0x94] sm:$0xf] }
 0x24b   :  { %v5174_v33 = vor.u32 %v5369_v5, %v5171_v22  ;;  %v5377_v5 = vld [vmem:[%s11116_s1 + $0xd4] sm:$0xf]  ;;  %v5203_v22 = vld [vmem:[%s11116_s1 + $0xd8] sm:$0xf0] }
 0x24d   :  { %2199 = vmatmul.bf16.gmra.mxu0 %v5106_v31  ;;  %v5177_v31 = vld [vmem:[%s11116_s1 + $0xa0] sm:$0xf] }
 0x24e   :  { %v5178_v51 = vor.u32 %v5372_v46, %v5177_v31  ;;  %v5209_v31 = vld [vmem:[%s11116_s1 + $0xe0] sm:$0xf]  ;;  %v5380_v46 = vld [vmem:[%s11116_s1 + $0xe4] sm:$0xf0] }
 0x25a   :  { %2288 = vmatmul.bf16.gmra.mxu1 %v5110_v9 }
 0x25d   :  { %2204 = vmatmul.bf16.gmra.mxu0 %v5114_v52 }
 0x26a   :  { %2293 = vmatmul.bf16.gmra.mxu1 %v5118_v12 }
 0x26d   :  { %2209 = vmatmul.bf16.gmra.mxu0 %v5122_v50 }
 0x27a   :  { %2298 = vmatmul.bf16.gmra.mxu1 %v5126_v41  ;;  %v5182_v41 = vor.u32 %v5371_v11, %v5179_v19  ;;  %v5379_v11 = vld [vmem:[%s11116_s1 + $0xe4] sm:$0xf]  ;;  %v5211_v19 = vld [vmem:[%s11116_s1 + $0xe8] sm:$0xf0] }
 0x27d   :  { %2214 = vmatmul.bf16.gmra.mxu0 %v5130_v7  ;;  %v1982_v7 = vld [vmem:[#allocation3 + $0x20] sm:$0xff] }
 0x28a   :  { %2303 = vmatmul.bf16.gmra.mxu1 %v5134_v49  ;;  %v5186_v49 = vor.u32 %v5374_v3, %v5185_v0  ;;  %v5217_v0 = vld [vmem:[%s11116_s1 + $0xf0] sm:$0xf]  ;;  %v5382_v3 = vld [vmem:[%s11116_s1 + $0xf4] sm:$0xf0] }
 0x28d   :  { %2219 = vmatmul.bf16.gmra.mxu0 %v5138_v34  ;;  %v1983_v34 = vld [vmem:[#allocation3 + $0x28] sm:$0xff] }
 0x29a   :  { %2308 = vmatmul.bf16.gmra.mxu1 %v5142_v37 }
 0x29d   :  { %2224 = vmatmul.bf16.gmra.mxu0 %v5146_v59  ;;  %v5187_v59 = vld [vmem:[%s11116_s1 + $0xb8] sm:$0xf0] }
 0x29e   :  { %v5190_v38 = vor.u32 %v5373_v29, %v5187_v59  ;;  %v5381_v29 = vld [vmem:[%s11116_s1 + $0xf4] sm:$0xf]  ;;  %v5219_v59 = vld [vmem:[%s11116_s1 + $0xf8] sm:$0xf0] }
 0x2aa   :  { %2313 = vmatmul.bf16.gmra.mxu1 %v5150_v28  ;;  %v5376_v28 = vld [vmem:[%s11116_s1 + $0xc4] sm:$0xf0] }
 0x2ab   :  { %v5194_v42 = vor.u32 %v5376_v28, %v5193_v17  ;;  %v1992_v17 = vld [vmem:[#allocation3 + $0x70] sm:$0xff] }
 0x2ad   :  { %2229 = vmatmul.bf16.gmra.mxu0 %v5154_v21 }
 0x2ba   :  { %2318 = vmatmul.bf16.gmra.mxu1 %v5158_v25  ;;  %v2195_v32 = vpop.f32.mrf.mxu0 }
 0x2bd   :  { %2234 = vmatmul.bf16.gmra.mxu0 %v5162_v57 }
 0x2c2   :  { %v2197_v39 = vpop.f32.mrf.mxu0 }
 0x2c7   :  { %v2284_v14 = vpop.f32.mrf.mxu1 }
 0x2c8   :  { %v2285_v58 = vadd.f32 %v2284_v14, %v2195_v32 }
 0x2ca   :  { %v2364_v48 = vadd.f32 %v2285_v58, %v1978_v13  ;;  %2323 = vmatmul.bf16.gmra.mxu1 %v5166_v54  ;;  %v2200_v61 = vpop.f32.mrf.mxu0  ;;  %v5198_v54 = vor.u32 %v5375_v24, %v5195_v55  ;;  %v1986_v13 = vld [vmem:[#allocation3 + $0x40] sm:$0xff] }
 0x2cc   :  { %2396 = vst.msk [vmem:[#allocation3] sm:$0xff] %vm181_vm0, %v2364_v48 }
 0x2cd   :  { %2239 = vmatmul.bf16.gmra.mxu0 %v5170_v27  ;;  %v5202_v27 = vor.u32 %v5378_v16, %v5201_v45 }
 0x2cf   :  { %v2286_v10 = vpop.f32.mrf.mxu1 }
 0x2d0   :  { %v2287_v62 = vadd.f32 %v2286_v10, %v2197_v39 }
 0x2d2   :  { %v2365_v2 = vadd.f32 %v2287_v62, %v1979_v20  ;;  %v2202_v40 = vpop.f32.mrf.mxu0  ;;  %v1987_v20 = vld [vmem:[#allocation3 + $0x48] sm:$0xff] }
 0x2d4   :  { %2397 = vst.msk [vmem:[#allocation3 + $0x8] sm:$0xff] %vm181_vm0, %v2365_v2 }
 0x2d7   :  { %v2289_v9 = vpop.f32.mrf.mxu1 }
 0x2d8   :  { %v2290_v8 = vadd.f32 %v2289_v9, %v2200_v61 }
 0x2da   :  { %v2366_v52 = vadd.f32 %v2290_v8, %v1980_v6  ;;  %2328 = vmatmul.bf16.gmra.mxu1 %v5174_v33  ;;  %v2205_v53 = vpop.f32.mrf.mxu0  ;;  %v5206_v33 = vor.u32 %v5377_v5, %v5203_v22  ;;  %v1988_v6 = vld [vmem:[#allocation3 + $0x50] sm:$0xff] }
 0x2db   :  { %v1996_v22 = vld [vmem:[#allocation3 + $0x90] sm:$0xff] }
 0x2dc   :  { %2398 = vst.msk [vmem:[#allocation3 + $0x10] sm:$0xff] %vm181_vm0, %v2366_v52 }
 0x2dd   :  { %2244 = vmatmul.bf16.gmra.mxu0 %v5178_v51  ;;  %v5210_v51 = vor.u32 %v5380_v46, %v5209_v31 }
 0x2df   :  { %v2291_v12 = vpop.f32.mrf.mxu1 }
 0x2e0   :  { %v2292_v36 = vadd.f32 %v2291_v12, %v2202_v40 }
 0x2e2   :  { %v2367_v63 = vadd.f32 %v2292_v36, %v1981_v23  ;;  %v2207_v50 = vpop.f32.mrf.mxu0  ;;  %v1989_v23 = vld [vmem:[#allocation3 + $0x58] sm:$0xff] }
 0x2e4   :  { %2399 = vst.msk [vmem:[#allocation3 + $0x18] sm:$0xff] %vm181_vm0, %v2367_v63 }
 0x2e7   :  { %v2294_v15 = vpop.f32.mrf.mxu1 }
 0x2e8   :  { %v2295_v1 = vadd.f32 %v2294_v15, %v2205_v53 }
 0x2ea   :  { %v2368_v60 = vadd.f32 %v2295_v1, %v1982_v7  ;;  %2333 = vmatmul.bf16.gmra.mxu1 %v5182_v41  ;;  %v2210_v35 = vpop.f32.mrf.mxu0  ;;  %v5214_v41 = vor.u32 %v5379_v11, %v5211_v19  ;;  %v1990_v7 = vld [vmem:[#allocation3 + $0x60] sm:$0xff] }
 0x2eb   :  { %v8691_v19 = vld [vmem:[#allocation3 + $0x18] sm:$0xff] }
 0x2ec   :  { %2400 = vst.msk [vmem:[#allocation3 + $0x20] sm:$0xff] %vm181_vm0, %v2368_v60 }
 0x2ed   :  { %2249 = vmatmul.bf16.gmra.mxu0 %v5186_v49  ;;  %v5218_v49 = vor.u32 %v5382_v3, %v5217_v0  ;;  %v8693_v3 = vld [vmem:[#allocation3 + $0x10] sm:$0xff] }
 0x2ef   :  { %v2296_v56 = vpop.f32.mrf.mxu1 }
 0x2f0   :  { %v2297_v43 = vadd.f32 %v2296_v56, %v2207_v50 }
 0x2f2   :  { %v2369_v37 = vadd.f32 %v2297_v43, %v1983_v34  ;;  %v2212_v30 = vpop.f32.mrf.mxu0  ;;  %v1991_v34 = vld [vmem:[#allocation3 + $0x68] sm:$0xff] }
 0x2f4   :  { %2401 = vst.msk [vmem:[#allocation3 + $0x28] sm:$0xff] %vm181_vm0, %v2369_v37 }
 0x2f7   :  { %v2299_v26 = vpop.f32.mrf.mxu1 }
 0x2f8   :  { %v2300_v21 = vadd.f32 %v2299_v26, %v2210_v35 }
 0x2fa   :  { %v2370_v47 = vadd.f32 %v2300_v21, %v1984_v18  ;;  %2338 = vmatmul.bf16.gmra.mxu1 %v5190_v38  ;;  %v2215_v25 = vpop.f32.mrf.mxu0  ;;  %v5222_v38 = vor.u32 %v5381_v29, %v5219_v59 }
 0x2fc   :  { %2402 = vst.msk [vmem:[#allocation3 + $0x30] sm:$0xff] %vm181_vm0, %v2370_v47 }
 0x2fd   :  { %2254 = vmatmul.bf16.gmra.mxu0 %v5194_v42  ;;  %v1993_v42 = vld [vmem:[#allocation3 + $0x78] sm:$0xff] }
 0x2ff   :  { %v2301_v4 = vpop.f32.mrf.mxu1 }
 0x300   :  { %v2302_v57 = vadd.f32 %v2301_v4, %v2212_v30 }
 0x302   :  { %v2371_v32 = vadd.f32 %v2302_v57, %v1985_v44  ;;  %v2217_v39 = vpop.f32.mrf.mxu0  ;;  %v1994_v57 = vld [vmem:[#allocation3 + $0x80] sm:$0xff] }
 0x304   :  { %2403 = vst.msk [vmem:[#allocation3 + $0x38] sm:$0xff] %vm181_vm0, %v2371_v32 }
 0x307   :  { %v2304_v14 = vpop.f32.mrf.mxu1 }
 0x308   :  { %v2305_v58 = vadd.f32 %v2304_v14, %v2215_v25  ;;  %v1995_v14 = vld [vmem:[#allocation3 + $0x88] sm:$0xff] }
 0x30a   :  { %v2372_v48 = vadd.f32 %v2305_v58, %v1986_v13  ;;  %2343 = vmatmul.bf16.gmra.mxu1 %v5198_v54  ;;  %v2220_v61 = vpop.f32.mrf.mxu0 }
 0x30c   :  { %2404 = vst.msk [vmem:[#allocation3 + $0x40] sm:$0xff] %vm181_vm0, %v2372_v48 }
 0x30d   :  { %2259 = vmatmul.bf16.gmra.mxu0 %v5202_v27 }
 0x30f   :  { %v2306_v10 = vpop.f32.mrf.mxu1 }
 0x310   :  { %v2307_v62 = vadd.f32 %v2306_v10, %v2217_v39 }
 0x312   :  { %v2373_v2 = vadd.f32 %v2307_v62, %v1987_v20  ;;  %v2222_v40 = vpop.f32.mrf.mxu0 }
 0x313   :  { %v8674_v31 = vld [vmem:[#allocation3 + $0x40] sm:$0xff] }
 0x314   :  { %2405 = vst.msk [vmem:[#allocation3 + $0x48] sm:$0xff] %vm181_vm0, %v2373_v2 }
 0x317   :  { %v2309_v9 = vpop.f32.mrf.mxu1 }
 0x318   :  { %v2310_v8 = vadd.f32 %v2309_v9, %v2220_v61  ;;  %v8678_v9 = vld [vmem:[#allocation3 + $0x38] sm:$0xff] }
 0x31a   :  { %v2374_v52 = vadd.f32 %v2310_v8, %v1988_v6  ;;  %2348 = vmatmul.bf16.gmra.mxu1 %v5206_v33  ;;  %v2225_v53 = vpop.f32.mrf.mxu0 }
 0x31b   :  { %v8672_v5 = vld [vmem:[#allocation3 + $0x48] sm:$0xff] }
 0x31c   :  { %2406 = vst.msk [vmem:[#allocation3 + $0x50] sm:$0xff] %vm181_vm0, %v2374_v52  ;;  %v2499_v6 = vpack.c.bf16 %v8672_v5, %v8674_v31  ;;  %v8680_v52 = vld [vmem:[#allocation3 + $0x30] sm:$0xff] }
 0x31d   :  { %2264 = vmatmul.bf16.gmra.mxu0 %v5210_v51 }
 0x31f   :  { %v2311_v12 = vpop.f32.mrf.mxu1 }
 0x320   :  { %v2312_v36 = vadd.f32 %v2311_v12, %v2222_v40  ;;  %v1997_v12 = vld [vmem:[#allocation3 + $0x98] sm:$0xff] }
 0x322   :  { %v2375_v63 = vadd.f32 %v2312_v36, %v1989_v23  ;;  %v2227_v50 = vpop.f32.mrf.mxu0  ;;  %v8685_v23 = vld [vmem:[#allocation3 + $0x28] sm:$0xff] }
 0x323   :  { %v8667_v2 = vld [vmem:[#allocation3 + $0x50] sm:$0xff] }
 0x324   :  { %2407 = vst.msk [vmem:[#allocation3 + $0x58] sm:$0xff] %vm181_vm0, %v2375_v63  ;;  %v8687_v63 = vld [vmem:[#allocation3 + $0x20] sm:$0xff] }
 0x325   :  { %v2497_v11 = vpack.c.bf16 %v8685_v23, %v8687_v63 }
 0x327   :  { %v2314_v15 = vpop.f32.mrf.mxu1 }
 0x328   :  { %v2315_v1 = vadd.f32 %v2314_v15, %v2225_v53  ;;  %v2498_v53 = vpack.c.bf16 %v8678_v9, %v8680_v52  ;;  %v8698_v15 = vld [vmem:[#allocation3 + $0x8] sm:$0xff] }
 0x32a   :  { %v2376_v60 = vadd.f32 %v2315_v1, %v1990_v7  ;;  %2353 = vmatmul.bf16.gmra.mxu1 %v5214_v41  ;;  %v2230_v35 = vpop.f32.mrf.mxu0  ;;  %v2496_v7 = vpack.c.bf16 %v8691_v19, %v8693_v3  ;;  %v1998_v1 = vld [vmem:[#allocation3 + $0xa0] sm:$0xff] }
 0x32b   :  { %v8665_v20 = vld [vmem:[#allocation3 + $0x58] sm:$0xff] }
 0x32c   :  { %2408 = vst.msk [vmem:[#allocation3 + $0x60] sm:$0xff] %vm181_vm0, %v2376_v60  ;;  %v2500_v40 = vpack.c.bf16 %v8665_v20, %v8667_v2  ;;  %v8700_v60 = vld [vmem:[#allocation3] sm:$0xff] }
 0x32d   :  { %2269 = vmatmul.bf16.gmra.mxu0 %v5218_v49 }
 0x32f   :  { %v2316_v56 = vpop.f32.mrf.mxu1 }
 0x330   :  { %v2317_v43 = vadd.f32 %v2316_v56, %v2227_v50 }
 0x332   :  { %v2377_v37 = vadd.f32 %v2317_v43, %v1991_v34  ;;  %v2232_v30 = vpop.f32.mrf.mxu0  ;;  %v2495_v34 = vpack.c.bf16 %v8698_v15, %v8700_v60 }
 0x333   :  { %v8661_v27 = vld [vmem:[#allocation3 + $0x60] sm:$0xff] }
 0x334   :  { %2409 = vst.msk [vmem:[#allocation3 + $0x68] sm:$0xff] %vm181_vm0, %v2377_v37  ;;  %v1999_v37 = vld [vmem:[#allocation3 + $0xa8] sm:$0xff] }
 0x337   :  { %v2319_v28 = vpop.f32.mrf.mxu1 }
 0x338   :  { %v2320_v18 = vadd.f32 %v2319_v28, %v2230_v35 }
 0x33a   :  { %v2378_v26 = vadd.f32 %v2320_v18, %v1992_v17  ;;  %2358 = vmatmul.bf16.gmra.mxu1 %v5222_v38  ;;  %v2235_v21 = vpop.f32.mrf.mxu0  ;;  %v2000_v17 = vld [vmem:[#allocation3 + $0xb0] sm:$0xff] }
 0x33b   :  { %v8659_v13 = vld [vmem:[#allocation3 + $0x68] sm:$0xff] }
 0x33c   :  { %2410 = vst.msk [vmem:[#allocation3 + $0x70] sm:$0xff] %vm181_vm0, %v2378_v26  ;;  %v2501_v61 = vpack.c.bf16 %v8659_v13, %v8661_v27 }
 0x33f   :  { %v2321_v47 = vpop.f32.mrf.mxu1 }
 0x340   :  { %v2322_v25 = vadd.f32 %v2321_v47, %v2232_v30 }
 0x342   :  { %v2379_v44 = vadd.f32 %v2322_v25, %v1993_v42  ;;  %v2237_v4 = vpop.f32.mrf.mxu0  ;;  %v2001_v42 = vld [vmem:[#allocation3 + $0xb8] sm:$0xff] }
 0x343   :  { %v8652_v54 = vld [vmem:[#allocation3 + $0x70] sm:$0xff] }
 0x344   :  { %2411 = vst.msk [vmem:[#allocation3 + $0x78] sm:$0xff] %vm181_vm0, %v2379_v44 }
 0x347   :  { %v2324_v32 = vpop.f32.mrf.mxu1 }
 0x348   :  { %v2325_v39 = vadd.f32 %v2324_v32, %v2235_v21 }
 0x34a   :  { %v2380_v24 = vadd.f32 %v2325_v39, %v1994_v57  ;;  %v2240_v55 = vpop.f32.mrf.mxu0  ;;  %v2002_v57 = vld [vmem:[#allocation3 + $0xc0] sm:$0xff] }
 0x34b   :  { %v8654_v45 = vld [vmem:[#allocation3 + $0x78] sm:$0xff] }
 0x34c   :  { %2412 = vst.msk [vmem:[#allocation3 + $0x80] sm:$0xff] %vm181_vm0, %v2380_v24  ;;  %v2502_v16 = vpack.c.bf16 %v8654_v45, %v8652_v54 }
 0x34e   :  { %2671 = vmatpush.bf16.msra.mxu2 %v2502_v16  ;;  %v2003_v16 = vld [vmem:[#allocation3 + $0xc8] sm:$0xff] }
 0x34f   :  { %v2326_v58 = vpop.f32.mrf.mxu1 }
 0x350   :  { %v2327_v48 = vadd.f32 %v2326_v58, %v2237_v4 }
 0x352   :  { %v2381_v10 = vadd.f32 %v2327_v48, %v1995_v14  ;;  %2672 = vmatpush.bf16.msra.mxu2 %v2501_v61  ;;  %v2242_v62 = vpop.f32.mrf.mxu0 }
 0x354   :  { %2413 = vst.msk [vmem:[#allocation3 + $0x88] sm:$0xff] %vm181_vm0, %v2381_v10  ;;  %v2004_v10 = vld [vmem:[#allocation3 + $0xd0] sm:$0xff] }
 0x356   :  { %2673 = vmatpush.bf16.msra.mxu2 %v2500_v40 }
 0x357   :  { %v2329_v33 = vpop.f32.mrf.mxu1 }
 0x358   :  { %v2330_v46 = vadd.f32 %v2329_v33, %v2240_v55  ;;  %v2005_v33 = vld [vmem:[#allocation3 + $0xd8] sm:$0xff] }
 0x35a   :  { %v2382_v8 = vadd.f32 %v2330_v46, %v1996_v22  ;;  %2674 = vmatpush.bf16.msra.mxu2 %v2499_v6  ;;  %v2245_v51 = vpop.f32.mrf.mxu0 }
 0x35c   :  { %2414 = vst.msk [vmem:[#allocation3 + $0x90] sm:$0xff] %vm181_vm0, %v2382_v8 }
 0x35e   :  { %2675 = vmatpush.bf16.msra.mxu2 %v2498_v53  ;;  %v2006_v53 = vld [vmem:[#allocation3 + $0xe0] sm:$0xff] }
 0x35f   :  { %v2331_v36 = vpop.f32.mrf.mxu1 }
 0x360   :  { %v2332_v50 = vadd.f32 %v2331_v36, %v2242_v62 }
 0x362   :  { %v2383_v41 = vadd.f32 %v2332_v50, %v1997_v12  ;;  %2676 = vmatpush.bf16.msra.mxu2 %v2497_v11  ;;  %v2247_v0 = vpop.f32.mrf.mxu0 }
 0x364   :  { %2415 = vst.msk [vmem:[#allocation3 + $0x98] sm:$0xff] %vm181_vm0, %v2383_v41  ;;  %v2007_v41 = vld [vmem:[#allocation3 + $0xe8] sm:$0xff] }
 0x366   :  { %2677 = vmatpush.bf16.msra.mxu2 %v2496_v7 }
 0x367   :  { %v2334_v49 = vpop.f32.mrf.mxu1 }
 0x368   :  { %v2335_v35 = vadd.f32 %v2334_v49, %v2245_v51 }
 0x36a   :  { %v2384_v56 = vadd.f32 %v2335_v35, %v1998_v1  ;;  %2678 = vmatpush.bf16.msra.mxu2 %v2495_v34  ;;  %v2250_v43 = vpop.f32.mrf.mxu0  ;;  %v2008_v35 = vld [vmem:[#allocation3 + $0xf0] sm:$0xff] }
 0x36c   :  { %2416 = vst.msk [vmem:[#allocation3 + $0xa0] sm:$0xff] %vm181_vm0, %v2384_v56 }
 0x36f   :  { %v2336_v30 = vpop.f32.mrf.mxu1 }
 0x370   :  { %v2337_v29 = vadd.f32 %v2336_v30, %v2247_v0  ;;  %v2009_v30 = vld [vmem:[#allocation3 + $0xf8] sm:$0xff] }
 0x372   :  { %v2385_v59 = vadd.f32 %v2337_v29, %v1999_v37  ;;  %v2252_v38 = vpop.f32.mrf.mxu0 }
 0x374   :  { %2417 = vst.msk [vmem:[#allocation3 + $0xa8] sm:$0xff] %vm181_vm0, %v2385_v59 }
 0x377   :  { %v2339_v28 = vpop.f32.mrf.mxu1 }
 0x378   :  { %v2340_v18 = vadd.f32 %v2339_v28, %v2250_v43 }
 0x37a   :  { %v2386_v26 = vadd.f32 %v2340_v18, %v2000_v17  ;;  %v2255_v21 = vpop.f32.mrf.mxu0  ;;  %v13_v17 = vld [vmem:[%s11116_s1 + $0x8] sm:$0xff] }
 0x37b   :  { %48 = vst [vmem:[#allocation2 + $0x8] sm:$0xff] %v13_v17 }
 0x37c   :  { %2418 = vst.msk [vmem:[#allocation3 + $0xb0] sm:$0xff] %vm181_vm0, %v2386_v26 }
 0x37f   :  { %v2341_v47 = vpop.f32.mrf.mxu1 }
 0x380   :  { %v2342_v25 = vadd.f32 %v2341_v47, %v2252_v38  ;;  %v12_v38 = vld [vmem:[%s11116_s1] sm:$0xff] }
 0x381   :  { %47 = vst [vmem:[#allocation2] sm:$0xff] %v12_v38 }
 0x382   :  { %v2387_v44 = vadd.f32 %v2342_v25, %v2001_v42  ;;  %v2257_v4 = vpop.f32.mrf.mxu0  ;;  %v5384_v26 = vld [vmem:[#allocation2 + $0x4] sm:$0xf0] }
 0x384   :  { %2419 = vst.msk [vmem:[#allocation3 + $0xb8] sm:$0xff] %vm181_vm0, %v2387_v44 }
 0x387   :  { %v2344_v32 = vpop.f32.mrf.mxu1 }
 0x388   :  { %v2345_v39 = vadd.f32 %v2344_v32, %v2255_v21  ;;  %v5225_v18 = vld [vmem:[#allocation2] sm:$0xf] }
 0x389   :  { %v5226_v47 = vor.u32 %v5384_v26, %v5225_v18  ;;  %v20_v18 = vld [vmem:[%s11116_s1 + $0x40] sm:$0xff]  ;;  %v21_v26 = vld [vmem:[%s11116_s1 + $0x48] sm:$0xff] }
 0x38a   :  { %v2388_v24 = vadd.f32 %v2345_v39, %v2002_v57  ;;  %v2260_v55 = vpop.f32.mrf.mxu0  ;;  %v15_v57 = vld [vmem:[%s11116_s1 + $0x18] sm:$0xff]  ;;  %55 = vst [vmem:[#allocation2 + $0x40] sm:$0xff] %v20_v18 }
 0x38b   :  { %2679 = vmatmul.bf16.vlgmr.msra.gmra.mxu2 %v5226_v47  ;;  %50 = vst [vmem:[#allocation2 + $0x18] sm:$0xff] %v15_v57  ;;  %v22_v57 = vld [vmem:[%s11116_s1 + $0x50] sm:$0xff] }
 0x38c   :  { %2420 = vst.msk [vmem:[#allocation3 + $0xc0] sm:$0xff] %vm181_vm0, %v2388_v24 }
 0x38d   :  { %56 = vst [vmem:[#allocation2 + $0x48] sm:$0xff] %v21_v26  ;;  %v30_v26 = vld [vmem:[%s11116_s1 + $0x90] sm:$0xff] }
 0x38e   :  { %57 = vst [vmem:[#allocation2 + $0x50] sm:$0xff] %v22_v57 }
 0x38f   :  { %v2346_v14 = vpop.f32.mrf.mxu1  ;;  %65 = vst [vmem:[#allocation2 + $0x90] sm:$0xff] %v30_v26 }
 0x390   :  { %v2347_v58 = vadd.f32 %v2346_v14, %v2257_v4  ;;  %v14_v4 = vld [vmem:[%s11116_s1 + $0x10] sm:$0xff] }
 0x391   :  { %49 = vst [vmem:[#allocation2 + $0x10] sm:$0xff] %v14_v4  ;;  %v5257_v47 = vld [vmem:[#allocation2 + $0x40] sm:$0xf] }
 0x392   :  { %v2389_v48 = vadd.f32 %v2347_v58, %v2003_v16  ;;  %v2262_v61 = vpop.f32.mrf.mxu0 }
 0x394   :  { %2421 = vst.msk [vmem:[#allocation3 + $0xc8] sm:$0xff] %vm181_vm0, %v2389_v48  ;;  %v5386_v48 = vld [vmem:[#allocation2 + $0x14] sm:$0xf0] }
 0x397   :  { %v2349_v62 = vpop.f32.mrf.mxu1 }
 0x398   :  { %v2350_v40 = vadd.f32 %v2349_v62, %v2260_v55  ;;  %v5233_v58 = vld [vmem:[#allocation2 + $0x10] sm:$0xf]  ;;  %v8728_v62 = vld [vmem:[#allocation3 + $0xb8] sm:$0xff] }
 0x39a   :  { %v2390_v22 = vadd.f32 %v2350_v40, %v2004_v10  ;;  %v2265_v8 = vpop.f32.mrf.mxu0  ;;  %v5234_v40 = vor.u32 %v5386_v48, %v5233_v58  ;;  %v24_v48 = vld [vmem:[%s11116_s1 + $0x60] sm:$0xff] }
 0x39b   :  { %v2456_v14 = vld [vmem:[#allocation3 + $0xc8] sm:$0xff]  ;;  %59 = vst [vmem:[#allocation2 + $0x60] sm:$0xff] %v24_v48 }
 0x39c   :  { %2422 = vst.msk [vmem:[#allocation3 + $0xd0] sm:$0xff] %vm181_vm0, %v2390_v22  ;;  %v8730_v22 = vld [vmem:[#allocation3 + $0xb0] sm:$0xff]  ;;  %2684 = vmatmul.bf16.gmra.mxu2 %v5234_v40  ;;  %v5259_v40 = vld [vmem:[#allocation2 + $0x48] sm:$0xf0] }
 0x39f   :  { %v2351_v46 = vpop.f32.mrf.mxu1 }
 0x3a0   :  { %v2352_v6 = vadd.f32 %v2351_v46, %v2262_v61  ;;  %v2455_v61 = vld [vmem:[#allocation3 + $0xc0] sm:$0xff]  ;;  %v8734_v46 = vld [vmem:[#allocation3 + $0xa8] sm:$0xff] }
 0x3a1   :  { %v2507_v10 = vpack.c.bf16 %v2456_v14, %v2455_v61  ;;  %v25_v61 = vld [vmem:[%s11116_s1 + $0x68] sm:$0xff] }
 0x3a2   :  { %v2391_v51 = vadd.f32 %v2352_v6, %v2005_v33  ;;  %v2267_v11 = vpop.f32.mrf.mxu0  ;;  %v2506_v33 = vpack.c.bf16 %v8728_v62, %v8730_v22  ;;  %v16_v6 = vld [vmem:[%s11116_s1 + $0x20] sm:$0xff]  ;;  %60 = vst [vmem:[#allocation2 + $0x68] sm:$0xff] %v25_v61 }
 0x3a3   :  { %v2457_v55 = vld [vmem:[#allocation3 + $0xd0] sm:$0xff]  ;;  %51 = vst [vmem:[#allocation2 + $0x20] sm:$0xff] %v16_v6 }
 0x3a4   :  { %2423 = vst.msk [vmem:[#allocation3 + $0xd8] sm:$0xff] %vm181_vm0, %v2391_v51  ;;  %v8742_v51 = vld [vmem:[#allocation3 + $0xa0] sm:$0xff] }
 0x3a7   :  { %v2354_v12 = vpop.f32.mrf.mxu1 }
 0x3a8   :  { %v2355_v36 = vadd.f32 %v2354_v12, %v2265_v8  ;;  %v17_v8 = vld [vmem:[%s11116_s1 + $0x28] sm:$0xff]  ;;  %v8746_v12 = vld [vmem:[#allocation3 + $0x98] sm:$0xff] }
 0x3a9   :  { %52 = vst [vmem:[#allocation2 + $0x28] sm:$0xff] %v17_v8  ;;  %v5396_v6 = vld [vmem:[#allocation2 + $0x64] sm:$0xf0] }
 0x3aa   :  { %v2392_v50 = vadd.f32 %v2355_v36, %v2006_v53  ;;  %v2270_v49 = vpop.f32.mrf.mxu0  ;;  %v2505_v53 = vpack.c.bf16 %v8734_v46, %v8742_v51  ;;  %v8748_v36 = vld [vmem:[#allocation3 + $0x90] sm:$0xff] }
 0x3ab   :  { %v2458_v24 = vld [vmem:[#allocation3 + $0xd8] sm:$0xff] }
 0x3ac   :  { %2424 = vst.msk [vmem:[#allocation3 + $0xe0] sm:$0xff] %vm181_vm0, %v2392_v50  ;;  %v2508_v16 = vpack.c.bf16 %v2458_v24, %v2457_v55  ;;  %v2504_v50 = vpack.c.bf16 %v8746_v12, %v8748_v36  ;;  %v5265_v55 = vld [vmem:[#allocation2 + $0x50] sm:$0xf] }
 0x3af   :  { %v2356_v0 = vpop.f32.mrf.mxu1 }
 0x3b0   :  { %v2357_v7 = vadd.f32 %v2356_v0, %v2267_v11  ;;  %v8752_v11 = vld [vmem:[#allocation3 + $0x88] sm:$0xff] }
 0x3b1   :  { %v5227_v0 = vld [vmem:[#allocation2 + $0x8] sm:$0xf0] }
 0x3b2   :  { %v2393_v1 = vadd.f32 %v2357_v7, %v2007_v41  ;;  %v2272_v37 = vpop.f32.mrf.mxu0  ;;  %v5383_v41 = vld [vmem:[#allocation2 + $0x4] sm:$0xf]  ;;  %v5241_v7 = vld [vmem:[#allocation2 + $0x20] sm:$0xf] }
 0x3b3   :  { %v2459_v32 = vld [vmem:[#allocation3 + $0xe0] sm:$0xff] }
 0x3b4   :  { %2425 = vst.msk [vmem:[#allocation3 + $0xe8] sm:$0xff] %vm181_vm0, %v2393_v1  ;;  %v5388_v1 = vld [vmem:[#allocation2 + $0x24] sm:$0xf0] }
 0x3b7   :  { %v2359_v34 = vpop.f32.mrf.mxu1 }
 0x3b8   :  { %v2360_v56 = vadd.f32 %v2359_v34, %v2270_v49  ;;  %v8754_v49 = vld [vmem:[#allocation3 + $0x80] sm:$0xff]  ;;  %v5230_v34 = vor.u32 %v5383_v41, %v5227_v0  ;;  %v27_v41 = vld [vmem:[%s11116_s1 + $0x78] sm:$0xff]  ;;  %v5393_v0 = vld [vmem:[#allocation2 + $0x54] sm:$0xf] }
 0x3b9   :  { %62 = vst [vmem:[#allocation2 + $0x78] sm:$0xff] %v27_v41 }
 0x3ba   :  { %v2394_v43 = vadd.f32 %v2360_v56, %v2008_v35  ;;  %v2503_v35 = vpack.c.bf16 %v8752_v11, %v8754_v49  ;;  %v5242_v56 = vor.u32 %v5388_v1, %v5241_v7 }
 0x3bb   :  { %v2460_v44 = vld [vmem:[#allocation3 + $0xe8] sm:$0xff] }
 0x3bc   :  { %2426 = vst.msk [vmem:[#allocation3 + $0xf0] sm:$0xff] %vm181_vm0, %v2394_v43  ;;  %v2509_v39 = vpack.c.bf16 %v2460_v44, %v2459_v32  ;;  %2689 = vmatmul.bf16.gmra.mxu2 %v5242_v56  ;;  %v18_v43 = vld [vmem:[%s11116_s1 + $0x30] sm:$0xff]  ;;  %v23_v32 = vld [vmem:[%s11116_s1 + $0x58] sm:$0xff] }
 0x3bd   :  { %53 = vst [vmem:[#allocation2 + $0x30] sm:$0xff] %v18_v43  ;;  %v28_v43 = vld [vmem:[%s11116_s1 + $0x80] sm:$0xff] }
 0x3be   :  { %58 = vst [vmem:[#allocation2 + $0x58] sm:$0xff] %v23_v32 }
 0x3bf   :  { %v2361_v29 = vpop.f32.mrf.mxu1  ;;  %63 = vst [vmem:[#allocation2 + $0x80] sm:$0xff] %v28_v43 }
 0x3c0   :  { %v2362_v59 = vadd.f32 %v2361_v29, %v2272_v37  ;;  %v19_v37 = vld [vmem:[%s11116_s1 + $0x38] sm:$0xff] }
 0x3c1   :  { %54 = vst [vmem:[#allocation2 + $0x38] sm:$0xff] %v19_v37  ;;  %v5235_v29 = vld [vmem:[#allocation2 + $0x18] sm:$0xf0]  ;;  %v29_v37 = vld [vmem:[%s11116_s1 + $0x88] sm:$0xff] }
 0x3c2   :  { %v2395_v28 = vadd.f32 %v2362_v59, %v2009_v30  ;;  %v5385_v30 = vld [vmem:[#allocation2 + $0x14] sm:$0xf]  ;;  %64 = vst [vmem:[#allocation2 + $0x88] sm:$0xff] %v29_v37 }
 0x3c3   :  { %v2461_v21 = vld [vmem:[#allocation3 + $0xf0] sm:$0xff]  ;;  %v5238_v17 = vor.u32 %v5385_v30, %v5235_v29  ;;  %v5395_v30 = vld [vmem:[#allocation2 + $0x64] sm:$0xf]  ;;  %v5275_v29 = vld [vmem:[#allocation2 + $0x68] sm:$0xf0] }
 0x3c4   :  { %2427 = vst.msk [vmem:[#allocation3 + $0xf8] sm:$0xff] %vm181_vm0, %v2395_v28  ;;  %v5249_v59 = vld [vmem:[#allocation2 + $0x30] sm:$0xf] }
 0x3c5   :  { %v5267_v7 = vld [vmem:[#allocation2 + $0x58] sm:$0xf0] }
 0x3c8   :  { %v5390_v38 = vld [vmem:[#allocation2 + $0x34] sm:$0xf0]  ;;  %v5251_v24 = vld [vmem:[#allocation2 + $0x38] sm:$0xf0] }
 0x3c9   :  { %v5250_v28 = vor.u32 %v5390_v38, %v5249_v59  ;;  %v5289_v59 = vld [vmem:[#allocation2 + $0x80] sm:$0xf]  ;;  %v5400_v38 = vld [vmem:[#allocation2 + $0x84] sm:$0xf0] }
 0x3cb   :  { %v2462_v42 = vld [vmem:[#allocation3 + $0xf8] sm:$0xff] }
 0x3cc   :  { %v2510_v25 = vpack.c.bf16 %v2462_v42, %v2461_v21  ;;  %2694 = vmatmul.bf16.gmra.mxu2 %v5250_v28  ;;  %v5387_v21 = vld [vmem:[#allocation2 + $0x24] sm:$0xf]  ;;  %v5243_v42 = vld [vmem:[#allocation2 + $0x28] sm:$0xf0]  ;;  %v5290_v28 = vor.u32 %v5400_v38, %v5289_v59 }
 0x3cd   :  { %v5246_v44 = vor.u32 %v5387_v21, %v5243_v42  ;;  %v31_v21 = vld [vmem:[%s11116_s1 + $0x98] sm:$0xff] }
 0x3ce   :  { %2760 = vmatpush.bf16.msra.mxu3 %v2510_v25  ;;  %v5392_v25 = vld [vmem:[#allocation2 + $0x44] sm:$0xf0]  ;;  %66 = vst [vmem:[#allocation2 + $0x98] sm:$0xff] %v31_v21 }
 0x3cf   :  { %v5258_v4 = vor.u32 %v5392_v25, %v5257_v47  ;;  %v5283_v47 = vld [vmem:[#allocation2 + $0x78] sm:$0xf0] }
 0x3d2   :  { %2761 = vmatpush.bf16.msra.mxu3 %v2509_v39  ;;  %v5389_v39 = vld [vmem:[#allocation2 + $0x34] sm:$0xf] }
 0x3d3   :  { %v5254_v14 = vor.u32 %v5389_v39, %v5251_v24  ;;  %v32_v24 = vld [vmem:[%s11116_s1 + $0xa0] sm:$0xff] }
 0x3d4   :  { %67 = vst [vmem:[#allocation2 + $0xa0] sm:$0xff] %v32_v24 }
 0x3d5   :  { %v5402_v57 = vld [vmem:[#allocation2 + $0x94] sm:$0xf0] }
 0x3d6   :  { %2762 = vmatpush.bf16.msra.mxu3 %v2508_v16  ;;  %v5394_v16 = vld [vmem:[#allocation2 + $0x54] sm:$0xf0] }
 0x3d7   :  { %v5266_v58 = vor.u32 %v5394_v16, %v5265_v55  ;;  %v33_v55 = vld [vmem:[%s11116_s1 + $0xa8] sm:$0xff]  ;;  %v5399_v16 = vld [vmem:[#allocation2 + $0x84] sm:$0xf] }
 0x3d8   :  { %68 = vst [vmem:[#allocation2 + $0xa8] sm:$0xff] %v33_v55 }
 0x3da   :  { %2763 = vmatpush.bf16.msra.mxu3 %v2507_v10  ;;  %v5391_v10 = vld [vmem:[#allocation2 + $0x44] sm:$0xf] }
 0x3db   :  { %v5262_v8 = vor.u32 %v5391_v10, %v5259_v40  ;;  %v5305_v61 = vld [vmem:[#allocation2 + $0xa0] sm:$0xf] }
 0x3dc   :  { %2699 = vmatmul.bf16.gmra.mxu2 %v5258_v4  ;;  %v5297_v4 = vld [vmem:[#allocation2 + $0x90] sm:$0xf] }
 0x3dd   :  { %v5298_v32 = vor.u32 %v5402_v57, %v5297_v4  ;;  %v5403_v57 = vld [vmem:[#allocation2 + $0xa4] sm:$0xf] }
 0x3de   :  { %2764 = vmatpush.bf16.msra.mxu3 %v2506_v33  ;;  %v5273_v33 = vld [vmem:[#allocation2 + $0x60] sm:$0xf] }
 0x3df   :  { %v5404_v10 = vld [vmem:[#allocation2 + $0xa4] sm:$0xf0] }
 0x3e0   :  { %v5306_v40 = vor.u32 %v5404_v10, %v5305_v61 }
 0x3e2   :  { %2765 = vmatpush.bf16.msra.mxu3 %v2505_v53  ;;  %v5274_v53 = vor.u32 %v5396_v6, %v5273_v33 }
 0x3e6   :  { %2766 = vmatpush.bf16.msra.mxu3 %v2504_v50  ;;  %v26_v50 = vld [vmem:[%s11116_s1 + $0x70] sm:$0xff] }
 0x3e7   :  { %61 = vst [vmem:[#allocation2 + $0x70] sm:$0xff] %v26_v50  ;;  %v35_v50 = vld [vmem:[%s11116_s1 + $0xb8] sm:$0xff] }
 0x3e8   :  { %70 = vst [vmem:[#allocation2 + $0xb8] sm:$0xff] %v35_v50 }
 0x3ea   :  { %2767 = vmatpush.bf16.msra.mxu3 %v2503_v35  ;;  %v5398_v35 = vld [vmem:[#allocation2 + $0x74] sm:$0xf0] }
 0x3ec   :  { %2704 = vmatmul.bf16.gmra.mxu2 %v5266_v58 }
 0x3ed   :  { %2768 = vmatmul.bf16.vlgmr.msra.gmra.mxu3 %v5230_v34  ;;  %v5270_v34 = vor.u32 %v5393_v0, %v5267_v7  ;;  %v11598_v0 = vld [vmem:[#allocation4_spill] sm:$0xff] }
 0x3ee   :  { %v5281_v1 = vld [vmem:[#allocation2 + $0x70] sm:$0xf]  ;;  %v5397_v42 = vld [vmem:[#allocation2 + $0x74] sm:$0xf] }
 0x3ef   :  { %v5282_v56 = vor.u32 %v5398_v35, %v5281_v1  ;;  %v5401_v1 = vld [vmem:[#allocation2 + $0x94] sm:$0xf]  ;;  %v5299_v35 = vld [vmem:[#allocation2 + $0x98] sm:$0xf0]  ;;  %v5406_v38 = vld [vmem:[#allocation2 + $0xb4] sm:$0xf0] }
 0x3fc   :  { %2709 = vmatmul.bf16.gmra.mxu2 %v5274_v53  ;;  %v34_v53 = vld [vmem:[%s11116_s1 + $0xb0] sm:$0xff] }
 0x3fd   :  { %2773 = vmatmul.bf16.gmra.mxu3 %v5238_v17  ;;  %v5278_v17 = vor.u32 %v5395_v30, %v5275_v29  ;;  %69 = vst [vmem:[#allocation2 + $0xb0] sm:$0xff] %v34_v53  ;;  %v5302_v29 = vor.u32 %v5401_v1, %v5299_v35  ;;  %v38_v1 = vld [vmem:[%s11116_s1 + $0xd0] sm:$0xff] }
 0x3fe   :  { %73 = vst [vmem:[#allocation2 + $0xd0] sm:$0xff] %v38_v1 }
 0x404   :  { %v5313_v59 = vld [vmem:[#allocation2 + $0xb0] sm:$0xf] }
 0x40c   :  { %2714 = vmatmul.bf16.gmra.mxu2 %v5282_v56 }
 0x40d   :  { %2778 = vmatmul.bf16.gmra.mxu3 %v5246_v44  ;;  %v5286_v44 = vor.u32 %v5397_v42, %v5283_v47 }
 0x40e   :  { %v2680_v18 = vpop.f32.mrf.mxu2 }
 0x416   :  { %v2682_v25 = vpop.f32.mrf.mxu2 }
 0x41c   :  { %2719 = vmatmul.bf16.gmra.mxu2 %v5290_v28 }
 0x41d   :  { %2783 = vmatmul.bf16.gmra.mxu3 %v5254_v14  ;;  %v5291_v14 = vld [vmem:[#allocation2 + $0x88] sm:$0xf0] }
 0x41e   :  { %v5294_v48 = vor.u32 %v5399_v16, %v5291_v14 }
 0x41f   :  { %v2685_v39 = vpop.f32.mrf.mxu2 }
 0x427   :  { %v2687_v58 = vpop.f32.mrf.mxu2 }
 0x42c   :  { %2724 = vmatmul.bf16.gmra.mxu2 %v5298_v32  ;;  %v5307_v32 = vld [vmem:[#allocation2 + $0xa8] sm:$0xf0] }
 0x42d   :  { %2788 = vmatmul.bf16.gmra.mxu3 %v5262_v8 }
 0x43c   :  { %2729 = vmatmul.bf16.gmra.mxu2 %v5306_v40 }
 0x43d   :  { %2793 = vmatmul.bf16.gmra.mxu3 %v5270_v34 }
 0x43f   :  { %v2690_v6 = vpop.f32.mrf.mxu2 }
 0x447   :  { %v2692_v43 = vpop.f32.mrf.mxu2 }
 0x44d   :  { %2798 = vmatmul.bf16.gmra.mxu3 %v5278_v17  ;;  %v5314_v17 = vor.u32 %v5406_v38, %v5313_v59 }
 0x44f   :  { %2734 = vmatmul.bf16.gmra.mxu2 %v5314_v17  ;;  %v2695_v21 = vpop.f32.mrf.mxu2  ;;  %v5329_v17 = vld [vmem:[#allocation2 + $0xd0] sm:$0xf] }
 0x457   :  { %v2697_v55 = vpop.f32.mrf.mxu2 }
 0x45d   :  { %2803 = vmatmul.bf16.gmra.mxu3 %v5286_v44 }
 0x45f   :  { %v2700_v50 = vpop.f32.mrf.mxu2 }
 0x46d   :  { %2808 = vmatmul.bf16.gmra.mxu3 %v5294_v48  ;;  %v5310_v48 = vor.u32 %v5403_v57, %v5307_v32  ;;  %v40_v57 = vld [vmem:[%s11116_s1 + $0xe0] sm:$0xff] }
 0x46e   :  { %75 = vst [vmem:[#allocation2 + $0xe0] sm:$0xff] %v40_v57 }
 0x470   :  { %v2769_v33 = vpop.f32.mrf.mxu3 }
 0x471   :  { %v2770_v8 = vadd.f32 %v2769_v33, %v2680_v18 }
 0x473   :  { %v2849_v41 = vadd.f32 %v2770_v8, %v8700_v60 }
 0x475   :  { %v8814_v7 = vmul.f32 %v11598_v0, %v2849_v41 }
 0x477   :  { %v2913_v34 = vmul.f32 %v8814_v7, %v8814_v7 }
 0x478   :  { %v2771_v56 = vpop.f32.mrf.mxu3 }
 0x479   :  { %v2772_v37 = vadd.f32 %v2771_v56, %v2682_v25  ;;  %v2945_v30 = vsel %vm181_vm0, %v2913_v34, 0.0  ;;  %v36_v25 = vld [vmem:[%s11116_s1 + $0xc0] sm:$0xff]  ;;  %v5405_v56 = vld [vmem:[#allocation2 + $0xb4] sm:$0xf] }
 0x47a   :  { %2946 = vadd.xlane.f32.xlu0 %v2945_v30  ;;  %71 = vst [vmem:[#allocation2 + $0xc0] sm:$0xff] %v36_v25 }
 0x47b   :  { %v2850_v60 = vadd.f32 %v2772_v37, %v8698_v15  ;;  %v37_v15 = vld [vmem:[%s11116_s1 + $0xc8] sm:$0xff] }
 0x47c   :  { %72 = vst [vmem:[#allocation2 + $0xc8] sm:$0xff] %v37_v15 }
 0x47d   :  { %2813 = vmatmul.bf16.gmra.mxu3 %v5302_v29  ;;  %v8821_v28 = vmul.f32 %v11598_v0, %v2850_v60  ;;  %v2702_v29 = vpop.f32.mrf.mxu2 }
 0x47f   :  { %v2914_v18 = vmul.f32 %v8821_v28, %v8821_v28 }
 0x480   :  { %v2774_v26 = vpop.f32.mrf.mxu3 }
 0x481   :  { %v2775_v42 = vadd.f32 %v2774_v26, %v2685_v39  ;;  %v2948_v47 = vsel %vm181_vm0, %v2914_v18, 0.0  ;;  %v5321_v61 = vld [vmem:[#allocation2 + $0xc0] sm:$0xf] }
 0x482   :  { %2949 = vadd.xlane.f32.xlu2 %v2948_v47 }
 0x483   :  { %v2851_v44 = vadd.f32 %v2775_v42, %v8693_v3  ;;  %v5408_v10 = vld [vmem:[#allocation2 + $0xc4] sm:$0xf0] }
 0x484   :  { %v5322_v40 = vor.u32 %v5408_v10, %v5321_v61 }
 0x485   :  { %v8834_v4 = vmul.f32 %v11598_v0, %v2851_v44  ;;  %v2705_v15 = vpop.f32.mrf.mxu2 }
 0x486   :  { %2739 = vmatmul.bf16.gmra.mxu2 %v5322_v40  ;;  %v5337_v40 = vld [vmem:[#allocation2 + $0xe0] sm:$0xf] }
 0x487   :  { %v2915_v39 = vmul.f32 %v8834_v4, %v8834_v4 }
 0x488   :  { %v2776_v24 = vpop.f32.mrf.mxu3 }
 0x489   :  { %v2777_v16 = vadd.f32 %v2776_v24, %v2687_v58  ;;  %v2951_v14 = vsel %vm181_vm0, %v2915_v39, 0.0  ;;  %v5407_v24 = vld [vmem:[#allocation2 + $0xc4] sm:$0xf] }
 0x48a   :  { %2952 = vadd.xlane.f32.xlu1 %v2951_v14 }
 0x48b   :  { %v2852_v3 = vadd.f32 %v2777_v16, %v8691_v19  ;;  %v39_v19 = vld [vmem:[%s11116_s1 + $0xd8] sm:$0xff] }
 0x48c   :  { %74 = vst [vmem:[#allocation2 + $0xd8] sm:$0xff] %v39_v19 }
 0x48d   :  { %2818 = vmatmul.bf16.gmra.mxu3 %v5310_v48  ;;  %v8841_v33 = vmul.f32 %v11598_v0, %v2852_v3  ;;  %v2707_v48 = vpop.f32.mrf.mxu2 }
 0x48f   :  { %v2916_v8 = vmul.f32 %v8841_v33, %v8841_v33 }
 0x490   :  { %v2779_v53 = vpop.f32.mrf.mxu3 }
 0x491   :  { %v2780_v58 = vadd.f32 %v2779_v53, %v2690_v6  ;;  %v2954_v41 = vsel %vm181_vm0, %v2916_v8, 0.0  ;;  %v5315_v6 = vld [vmem:[#allocation2 + $0xb8] sm:$0xf0] }
 0x492   :  { %2955 = vadd.xlane.f32.xlu2 %v2954_v41  ;;  %v5318_v60 = vor.u32 %v5405_v56, %v5315_v6  ;;  %v42_v56 = vld [vmem:[%s11116_s1 + $0xf0] sm:$0xff] }
 0x493   :  { %v2853_v35 = vadd.f32 %v2780_v58, %v8687_v63  ;;  %v5410_v18 = vld [vmem:[#allocation2 + $0xd4] sm:$0xf0]  ;;  %77 = vst [vmem:[#allocation2 + $0xf0] sm:$0xff] %v42_v56 }
 0x494   :  { %v5330_v26 = vor.u32 %v5410_v18, %v5329_v17 }
 0x495   :  { %v8854_v34 = vmul.f32 %v11598_v0, %v2853_v35  ;;  %v2710_v19 = vpop.f32.mrf.mxu2 }
 0x496   :  { %2744 = vmatmul.bf16.gmra.mxu2 %v5330_v26 }
 0x497   :  { %v2917_v37 = vmul.f32 %v8854_v34, %v8854_v34 }
 0x498   :  { %v2781_v30 = vpop.f32.mrf.mxu3 }
 0x499   :  { %v2782_v59 = vadd.f32 %v2781_v30, %v2692_v43  ;;  %v2957_v38 = vsel %vm181_vm0, %v2917_v37, 0.0  ;;  %v5409_v30 = vld [vmem:[#allocation2 + $0xd4] sm:$0xf] }
 0x49a   :  { %2958 = vadd.xlane.f32.xlu0 %v2957_v38  ;;  %v5345_v26 = vld [vmem:[#allocation2 + $0xf0] sm:$0xf]  ;;  %v5413_v56 = vld [vmem:[#allocation2 + $0xf4] sm:$0xf] }
 0x49b   :  { %v2854_v63 = vadd.f32 %v2782_v59, %v8685_v23  ;;  %v41_v23 = vld [vmem:[%s11116_s1 + $0xe8] sm:$0xff] }
 0x49c   :  { %76 = vst [vmem:[#allocation2 + $0xe8] sm:$0xff] %v41_v23 }
 0x49d   :  { %2823 = vmatmul.bf16.gmra.mxu3 %v5318_v60  ;;  %v8861_v42 = vmul.f32 %v11598_v0, %v2854_v63  ;;  %v2712_v60 = vpop.f32.mrf.mxu2 }
 0x49f   :  { %v2918_v47 = vmul.f32 %v8861_v42, %v8861_v42 }
 0x4a0   :  { %v2784_v25 = vpop.f32.mrf.mxu3 }
 0x4a1   :  { %v2785_v43 = vadd.f32 %v2784_v25, %v2695_v21  ;;  %v2960_v44 = vsel %vm181_vm0, %v2918_v47, 0.0  ;;  %v5323_v21 = vld [vmem:[#allocation2 + $0xc8] sm:$0xf0] }
 0x4a2   :  { %2961 = vadd.xlane.f32.xlu1 %v2960_v44  ;;  %v5326_v3 = vor.u32 %v5407_v24, %v5323_v21 }
 0x4a3   :  { %v2855_v32 = vadd.f32 %v2785_v43, %v8680_v52  ;;  %v5412_v8 = vld [vmem:[#allocation2 + $0xe4] sm:$0xf0] }
 0x4a4   :  { %v5338_v53 = vor.u32 %v5412_v8, %v5337_v40 }
 0x4a5   :  { %v8874_v39 = vmul.f32 %v11598_v0, %v2855_v32  ;;  %v2715_v23 = vpop.f32.mrf.mxu2 }
 0x4a6   :  { %2749 = vmatmul.bf16.gmra.mxu2 %v5338_v53 }
 0x4a7   :  { %v2919_v16 = vmul.f32 %v8874_v39, %v8874_v39 }
 0x4a8   :  { %v2786_v14 = vpop.f32.mrf.mxu3 }
 0x4a9   :  { %v2787_v61 = vadd.f32 %v2786_v14, %v2697_v55  ;;  %v2963_v10 = vsel %vm181_vm0, %v2919_v16, 0.0  ;;  %v5339_v16 = vld [vmem:[#allocation2 + $0xe8] sm:$0xf0] }
 0x4aa   :  { %2964 = vadd.xlane.f32.xlu2 %v2963_v10 }
 0x4ab   :  { %v2856_v52 = vadd.f32 %v2787_v61, %v8678_v9  ;;  %v43_v9 = vld [vmem:[%s11116_s1 + $0xf8] sm:$0xff] }
 0x4ac   :  { %78 = vst [vmem:[#allocation2 + $0xf8] sm:$0xff] %v43_v9 }
 0x4ad   :  { %2828 = vmatmul.bf16.gmra.mxu3 %v5326_v3  ;;  %v8881_v58 = vmul.f32 %v11598_v0, %v2856_v52  ;;  %v2717_v10 = vpop.f32.mrf.mxu2 }
 0x4af   :  { %v2920_v41 = vmul.f32 %v8881_v58, %v8881_v58 }
 0x4b0   :  { %v2789_v1 = vpop.f32.mrf.mxu3 }
 0x4b1   :  { %v2790_v55 = vadd.f32 %v2789_v1, %v2700_v50  ;;  %v2966_v35 = vsel %vm181_vm0, %v2920_v41, 0.0  ;;  %v5331_v50 = vld [vmem:[#allocation2 + $0xd8] sm:$0xf0] }
 0x4b2   :  { %2967 = vadd.xlane.f32.xlu0 %v2966_v35  ;;  %v5334_v63 = vor.u32 %v5409_v30, %v5331_v50 }
 0x4b3   :  { %v2857_v6 = vadd.f32 %v2790_v55, %v8674_v31  ;;  %v5414_v47 = vld [vmem:[#allocation2 + $0xf4] sm:$0xf0] }
 0x4b4   :  { %v5346_v25 = vor.u32 %v5414_v47, %v5345_v26 }
 0x4b5   :  { %v8894_v37 = vmul.f32 %v11598_v0, %v2857_v6  ;;  %v2720_v55 = vpop.f32.mrf.mxu2 }
 0x4b6   :  { %2754 = vmatmul.bf16.gmra.mxu2 %v5346_v25 }
 0x4b7   :  { %v2921_v59 = vmul.f32 %v8894_v37, %v8894_v37 }
 0x4b8   :  { %v2791_v38 = vpop.f32.mrf.mxu3 }
 0x4b9   :  { %v2792_v17 = vadd.f32 %v2791_v38, %v2702_v29  ;;  %v2969_v18 = vsel %vm181_vm0, %v2921_v59, 0.0 }
 0x4ba   :  { %2970 = vadd.xlane.f32.xlu1 %v2969_v18 }
 0x4bb   :  { %v2858_v31 = vadd.f32 %v2792_v17, %v8672_v5  ;;  %v5411_v5 = vld [vmem:[#allocation2 + $0xe4] sm:$0xf] }
 0x4bc   :  { %v5342_v8 = vor.u32 %v5411_v5, %v5339_v16 }
 0x4bd   :  { %2833 = vmatmul.bf16.gmra.mxu3 %v5334_v63  ;;  %v8901_v43 = vmul.f32 %v11598_v0, %v2858_v31  ;;  %v2722_v38 = vpop.f32.mrf.mxu2 }
 0x4bf   :  { %v2922_v44 = vmul.f32 %v8901_v43, %v8901_v43 }
 0x4c0   :  { %v2794_v57 = vpop.f32.mrf.mxu3 }
 0x4c1   :  { %v2795_v29 = vadd.f32 %v2794_v57, %v2705_v15  ;;  %v2972_v32 = vsel %vm181_vm0, %v2922_v44, 0.0 }
 0x4c2   :  { %2973 = vadd.xlane.f32.xlu2 %v2972_v32 }
 0x4c3   :  { %v2859_v24 = vadd.f32 %v2795_v29, %v8667_v2 }
 0x4c5   :  { %v8908_v21 = vmul.f32 %v11598_v0, %v2859_v24  ;;  %v2725_v31 = vpop.f32.mrf.mxu2 }
 0x4c7   :  { %v2923_v14 = vmul.f32 %v8908_v21, %v8908_v21 }
 0x4c8   :  { %v2796_v61 = vpop.f32.mrf.mxu3 }
 0x4c9   :  { %v2797_v3 = vadd.f32 %v2796_v61, %v2707_v48  ;;  %v2975_v40 = vsel %vm181_vm0, %v2923_v14, 0.0 }
 0x4ca   :  { %2976 = vadd.xlane.f32.xlu0 %v2975_v40 }
 0x4cb   :  { %v2860_v15 = vadd.f32 %v2797_v3, %v8665_v20  ;;  %v5347_v20 = vld [vmem:[#allocation2 + $0xf8] sm:$0xf0] }
 0x4cc   :  { %v5350_v59 = vor.u32 %v5413_v56, %v5347_v20 }
 0x4cd   :  { %2838 = vmatmul.bf16.gmra.mxu3 %v5342_v8  ;;  %v8915_v2 = vmul.f32 %v11598_v0, %v2860_v15  ;;  %v2727_v5 = vpop.f32.mrf.mxu2 }
 0x4cf   :  { %v2924_v52 = vmul.f32 %v8915_v2, %v8915_v2 }
 0x4d0   :  { %v2799_v53 = vpop.f32.mrf.mxu3 }
 0x4d1   :  { %v2800_v41 = vadd.f32 %v2799_v53, %v2710_v19  ;;  %v2978_v1 = vsel %vm181_vm0, %v2924_v52, 0.0 }
 0x4d2   :  { %2979 = vadd.xlane.f32.xlu1 %v2978_v1 }
 0x4d3   :  { %v2861_v48 = vadd.f32 %v2800_v41, %v8661_v27 }
 0x4d5   :  { %v8922_v35 = vmul.f32 %v11598_v0, %v2861_v48 }
 0x4d7   :  { %v2925_v9 = vmul.f32 %v8922_v35, %v8922_v35 }
 0x4d8   :  { %v2801_v6 = vpop.f32.mrf.mxu3 }
 0x4d9   :  { %v2802_v30 = vadd.f32 %v2801_v6, %v2712_v60  ;;  %v2981_v50 = vsel %vm181_vm0, %v2925_v9, 0.0 }
 0x4da   :  { %2982 = vadd.xlane.f32.xlu2 %v2981_v50 }
 0x4db   :  { %v2862_v19 = vadd.f32 %v2802_v30, %v8659_v13 }
 0x4dd   :  { %2843 = vmatmul.bf16.gmra.mxu3 %v5350_v59  ;;  %v8929_v27 = vmul.f32 %v11598_v0, %v2862_v19 }
 0x4df   :  { %v2926_v17 = vmul.f32 %v8929_v27, %v8929_v27 }
 0x4e0   :  { %v2804_v18 = vpop.f32.mrf.mxu3 }
 0x4e1   :  { %v2805_v63 = vadd.f32 %v2804_v18, %v2715_v23  ;;  %v2984_v26 = vsel %vm181_vm0, %v2926_v17, 0.0 }
 0x4e2   :  { %2985 = vadd.xlane.f32.xlu0 %v2984_v26 }
 0x4e3   :  { %v2863_v60 = vadd.f32 %v2805_v63, %v8652_v54 }
 0x4e5   :  { %v8936_v47 = vmul.f32 %v11598_v0, %v2863_v60 }
 0x4e7   :  { %v2927_v13 = vmul.f32 %v8936_v47, %v8936_v47 }
 0x4e8   :  { %v2806_v25 = vpop.f32.mrf.mxu3 }
 0x4e9   :  { %v2807_v44 = vadd.f32 %v2806_v25, %v2717_v10  ;;  %v2987_v57 = vsel %vm181_vm0, %v2927_v13, 0.0 }
 0x4ea   :  { %2988 = vadd.xlane.f32.xlu1 %v2987_v57 }
 0x4eb   :  { %v2864_v29 = vadd.f32 %v2807_v44, %v8654_v45 }
 0x4ed   :  { %v2947_v23 = vpop.xlane.xlu0 %2946  ;;  %v8943_v32 = vmul.f32 %v11598_v0, %v2864_v29 }
 0x4ee   :  { %5676 = vrsqrt.f32 %v2947_v23  ;;  %vm3048_vm3 = vcmp.eq.f32.partialorder %v2947_v23, inf  ;;  %v3051_v18 = vand.u32 2147483648, %v2947_v23  ;;  %vm3050_vm4 = vcmp.eq.f32.partialorder %v2947_v23, 0.0 }
 0x4ef   :  { %v2928_v54 = vmul.f32 %v8943_v32, %v8943_v32 }
 0x4f0   :  { %v2809_v24 = vpop.f32.mrf.mxu3 }
 0x4f1   :  { %v2810_v16 = vadd.f32 %v2809_v24, %v2720_v55  ;;  %v2990_v14 = vsel %vm181_vm0, %v2928_v54, 0.0 }
 0x4f2   :  { %2991 = vadd.xlane.f32.xlu2 %v2990_v14 }
 0x4f3   :  { %v2865_v61 = vadd.f32 %v2810_v16, %v8754_v49  ;;  %v2730_v49 = vpop.f32.mrf.mxu2 }
 0x4f4   :  { %v5677_v10 = vpop.eup %5676 }
 0x4f5   :  { %v3042_v3 = vmul.f32 %v5677_v10, %v2947_v23  ;;  %v8949_v40 = vpop.xlane.xlu2 %2949  ;;  %v8952_v45 = vmul.f32 %v11598_v0, %v2865_v61 }
 0x4f6   :  { %5678 = vrsqrt.f32 %v8949_v40  ;;  %vm3060_vm5 = vcmp.eq.f32.partialorder %v8949_v40, inf  ;;  %vm3062_vm6 = vcmp.eq.f32.partialorder %v8949_v40, 0.0 }
 0x4f7   :  { %v3043_v8 = vmul.f32 %v5677_v10, %v3042_v3  ;;  %v2929_v15 = vmul.f32 %v8952_v45, %v8952_v45 }
 0x4f8   :  { %v2811_v52 = vpop.f32.mrf.mxu3 }
 0x4f9   :  { %v3044_v53 = vmul.f32 0.5, %v3043_v8  ;;  %v2812_v41 = vadd.f32 %v2811_v52, %v2722_v38  ;;  %v2993_v1 = vsel %vm181_vm0, %v2929_v15, 0.0 }
 0x4fa   :  { %2994 = vadd.xlane.f32.xlu0 %v2993_v1 }
 0x4fb   :  { %v3045_v55 = vsub.f32 1.5, %v3044_v53  ;;  %v2866_v48 = vadd.f32 %v2812_v41, %v8752_v11  ;;  %v2732_v25 = vpop.f32.mrf.mxu2 }
 0x4fc   :  { %v5679_v56 = vpop.eup %5678 }
 0x4fd   :  { %v3046_v20 = vmul.f32 %v5677_v10, %v3045_v55  ;;  %v8959_v9 = vpop.xlane.xlu1 %2952  ;;  %v8962_v6 = vmul.f32 %v11598_v0, %v2866_v48  ;;  %v3054_v30 = vmul.f32 %v5679_v56, %v8949_v40 }
 0x4fe   :  { %5680 = vrsqrt.f32 %v8959_v9  ;;  %vm3072_vm9 = vcmp.eq.f32.partialorder %v8959_v9, inf  ;;  %vm3074_vm10 = vcmp.eq.f32.partialorder %v8959_v9, 0.0 }
 0x4ff   :  { %v3047_v50 = vmul.f32 %v3046_v20, %v2947_v23  ;;  %v2930_v59 = vmul.f32 %v8962_v6, %v8962_v6  ;;  %v3055_v63 = vmul.f32 %v5679_v56, %v3054_v30 }
 0x500   :  { %v2814_v19 = vpop.f32.mrf.mxu3 }
 0x501   :  { %v3049_v38 = vsel %vm3048_vm3, %v2947_v23, %v3047_v50  ;;  %v2815_v17 = vadd.f32 %v2814_v19, %v2725_v31  ;;  %v2996_v11 = vsel %vm181_vm0, %v2930_v59, 0.0  ;;  %v3056_v29 = vmul.f32 0.5, %v3055_v63 }
 0x502   :  { %2997 = vadd.xlane.f32.xlu1 %v2996_v11  ;;  %v3052_v13 = vsel %vm3050_vm4, %v3051_v18, %v3049_v38 }
 0x503   :  { %v2867_v26 = vadd.f32 %v2815_v17, %v8748_v36  ;;  %v8976_v31 = vmax.f32 %v3052_v13, 1e-15  ;;  %v3057_v14 = vsub.f32 1.5, %v3056_v29  ;;  %v8991_v41 = vpop.f32.mrf.mxu2 }
 0x504   :  { %v5681_v60 = vpop.eup %5680 }
 0x505   :  { %v8970_v44 = vpop.xlane.xlu2 %2955  ;;  %v8973_v57 = vmul.f32 %v11598_v0, %v2867_v26  ;;  %v3066_v54 = vmul.f32 %v5681_v60, %v8959_v9  ;;  %v3457_v8 = vmin.f32 %v8976_v31, 85.0  ;;  %vm3814_vm12 = vweird.f32 %v8976_v31 }
 0x506   :  { %5682 = vrsqrt.f32 %v8970_v44  ;;  %vm3084_vm7 = vcmp.eq.f32.partialorder %v8970_v44, inf  ;;  %vm3086_vm8 = vcmp.eq.f32.partialorder %v8970_v44, 0.0  ;;  %vm4289_vm2 = vcmp.lt.f32.partialorder %v8976_v31, 0.0001 }
 0x507   :  { %11599 = vst [vmem:[#allocation112_spill] sm:$0xff] %v8973_v57  ;;  %v2931_v23 = vmul.f32 %v8973_v57, %v8973_v57  ;;  %5684 = vrcp.f32 %v8976_v31  ;;  %v3067_v61 = vmul.f32 %v5681_v60, %v3066_v54  ;;  %v3649_v20 = vsub.f32 0.0, %v3457_v8 }
 0x508   :  { %v2816_v24 = vpop.f32.mrf.mxu3 }
 0x509   :  { %v2817_v36 = vadd.f32 %v2816_v24, %v2727_v5  ;;  %v2999_v16 = vsel %vm181_vm0, %v2931_v23, 0.0  ;;  %v3058_v5 = vmul.f32 %v5679_v56, %v3057_v14  ;;  %v3068_v1 = vmul.f32 0.5, %v3067_v61 }
 0x50a   :  { %3000 = vadd.xlane.f32.xlu2 %v2999_v16  ;;  %v3681_v18 = vmul.f32 1.442695, %v3649_v20  ;;  %v3585_v16 = vmul.f32 1.442695, %v3457_v8  ;;  %v3087_v14 = vand.u32 2147483648, %v8970_v44 }
 0x50b   :  { %v2868_v10 = vadd.f32 %v2817_v36, %v8746_v12  ;;  %v3059_v38 = vmul.f32 %v3058_v5, %v8949_v40  ;;  %v3069_v56 = vsub.f32 1.5, %v3068_v1 }
 0x50c   :  { %v5683_v3 = vpop.eup %5682 }
 0x50d   :  { %v3078_v15 = vmul.f32 %v5683_v3, %v8970_v44  ;;  %v8986_v52 = vpop.xlane.xlu0 %2958  ;;  %v8989_v53 = vmul.f32 %v11598_v0, %v2868_v10  ;;  %v8996_v30 = vpop.eup %5684  ;;  %v3061_v54 = vsel %vm3060_vm5, %v8949_v40, %v3059_v38  ;;  %v3070_v23 = vmul.f32 %v5681_v60, %v3069_v56 }
 0x50e   :  { %5686 = vrsqrt.f32 %v8986_v52  ;;  %v3810_v63 = vmul.f32 %v8996_v30, %v8976_v31  ;;  %v9020_v10 = vpop.f32.mrf.mxu2  ;;  %v3489_v38 = vmul.f32 %v8976_v31, %v8976_v31  ;;  %vm3815_vm11 = vweird.f32 %v8996_v30 }
 0x50f   :  { %11600 = vst [vmem:[#allocation114_spill] sm:$0xff] %v8989_v53  ;;  %v3079_v55 = vmul.f32 %v5683_v3, %v3078_v15  ;;  %v2932_v48 = vmul.f32 %v8989_v53, %v8989_v53  ;;  %vm9072_vm13 = vmor %vm3814_vm12, %vm3815_vm11  ;;  %vm3096_vm15 = vcmp.eq.f32.partialorder %v8986_v52, inf  ;;  %vm3098_vm1 = vcmp.eq.f32.partialorder %v8986_v52, 0.0 }
 0x510   :  { %v2819_v12 = vpop.f32.mrf.mxu3 }
 0x511   :  { %v3080_v50 = vmul.f32 0.5, %v3079_v55  ;;  %v2820_v59 = vadd.f32 %v2819_v12, %v2730_v49  ;;  %v3002_v19 = vsel %vm181_vm0, %v2932_v48, 0.0  ;;  %v3071_v55 = vmul.f32 %v3070_v23, %v8959_v9 }
 0x512   :  { %3003 = vadd.xlane.f32.xlu0 %v3002_v19 }
 0x513   :  { %v3081_v17 = vsub.f32 1.5, %v3080_v50  ;;  %v2869_v11 = vadd.f32 %v2820_v59, %v8742_v51  ;;  %v3063_v51 = vand.u32 2147483648, %v8949_v40  ;;  %v3073_v56 = vsel %vm3072_vm9, %v8959_v9, %v3071_v55 }
 0x514   :  { %v9009_v29 = vpop.eup %5686 }
 0x515   :  { %v3082_v26 = vmul.f32 %v5683_v3, %v3081_v17  ;;  %v9004_v13 = vpop.xlane.xlu1 %2961  ;;  %v9007_v49 = vmul.f32 %v11598_v0, %v2869_v11  ;;  %v3811_v3 = vsub.f32 1.0, %v3810_v63  ;;  %v3090_v60 = vmul.f32 %v9009_v29, %v8986_v52 }
 0x516   :  { %5688 = vrsqrt.f32 %v9004_v13  ;;  %v3064_v8 = vsel %vm3062_vm6, %v3063_v51, %v3061_v54  ;;  %v3075_v63 = vand.u32 2147483648, %v8959_v9  ;;  %v3820_v51 = vand.u32 2147483648, %v8976_v31 }
 0x517   :  { %11601 = vst [vmem:[#allocation39_spill] sm:$0xff] %v9007_v49  ;;  %v3083_v24 = vmul.f32 %v3082_v26, %v8970_v44  ;;  %v2933_v36 = vmul.f32 %v9007_v49, %v9007_v49  ;;  %5690 = vpow2.f32 %v3681_v18  ;;  %v3812_v50 = vmul.f32 %v8996_v30, %v3811_v3 }
 0x518   :  { %v2821_v61 = vpop.f32.mrf.mxu3  ;;  %5692 = vpow2.f32 %v3585_v16  ;;  %v3091_v40 = vmul.f32 %v9009_v29, %v3090_v60  ;;  %v9042_v19 = vmax.f32 %v3064_v8, 1e-15  ;;  %v3818_v18 = vand.u32 2147483647, %v8976_v31 }
 0x519   :  { %v3085_v15 = vsel %vm3084_vm7, %v8970_v44, %v3083_v24  ;;  %v2822_v5 = vadd.f32 %v2821_v61, %v2732_v25  ;;  %v3005_v1 = vsel %vm181_vm0, %v2933_v36, 0.0  ;;  %v3813_v54 = vadd.f32 %v8996_v30, %v3812_v50  ;;  %v9065_v61 = vpop.f32.mrf.mxu2 }
 0x51a   :  { %3006 = vadd.xlane.f32.xlu1 %v3005_v1  ;;  %v3088_v48 = vsel %vm3086_vm8, %v3087_v14, %v3085_v15  ;;  %v3092_v24 = vmul.f32 0.5, %v3091_v40  ;;  %v3076_v14 = vsel %vm3074_vm10, %v3075_v63, %v3073_v56  ;;  %v3458_v15 = vmin.f32 %v9042_v19, 85.0 }
 0x51b   :  { %v2870_v12 = vadd.f32 %v2822_v5, %v8734_v46  ;;  %v9044_v46 = vmax.f32 %v3088_v48, 1e-15  ;;  %vm9076_vm14 = vcmp.eq.f32.partialorder %v3818_v18, 8.507059e+37  ;;  %v3817_v55 = vsel %vm9072_vm13, %v8996_v30, %v3813_v54 }
 0x51c   :  { %v9031_v20 = vpop.eup %5688  ;;  %v3821_v48 = vor.u32 1.1754944e-38, %v3820_v51  ;;  %v3093_v50 = vsub.f32 1.5, %v3092_v24  ;;  %v3650_v30 = vsub.f32 0.0, %v3458_v15  ;;  %v3099_v51 = vand.u32 2147483648, %v8986_v52 }
 0x51d   :  { %v9037_v25 = vpop.xlane.xlu2 %2964  ;;  %v9040_v44 = vmul.f32 %v11598_v0, %v2870_v12  ;;  %v5691_v59 = vpop.eup %5690  ;;  %v3102_v17 = vmul.f32 %v9031_v20, %v9004_v13  ;;  %v9086_v12 = vmax.f32 %v3076_v14, 1e-15  ;;  %vm3108_vm3 = vcmp.eq.f32.partialorder %v9004_v13, inf }
 0x51e   :  { %5694 = vrsqrt.f32 %v9037_v25  ;;  %v5693_v23 = vpop.eup %5692  ;;  %v3094_v14 = vmul.f32 %v9009_v29, %v3093_v50  ;;  %vm3110_vm4 = vcmp.eq.f32.partialorder %v9004_v13, 0.0  ;;  %vm3120_vm5 = vcmp.eq.f32.partialorder %v9037_v25, inf }
 0x51f   :  { %11602 = vst [vmem:[#allocation45_spill] sm:$0xff] %v9040_v44  ;;  %v2934_v11 = vmul.f32 %v9040_v44, %v9040_v44  ;;  %5696 = vrcp.f32 %v9044_v46  ;;  %v3745_v3 = vsub.f32 %v5693_v23, %v5691_v59  ;;  %v3103_v60 = vmul.f32 %v9031_v20, %v3102_v17 }
 0x520   :  { %v2824_v26 = vpop.f32.mrf.mxu3  ;;  %5698 = vrcp.f32 %v9042_v19  ;;  %v3460_v17 = vmin.f32 %v9044_v46, 85.0  ;;  %vm3122_vm7 = vcmp.eq.f32.partialorder %v9037_v25, 0.0  ;;  %vm3829_vm8 = vweird.f32 %v9042_v19 }
 0x521   :  { %v2825_v36 = vadd.f32 %v2824_v26, %v8991_v41  ;;  %v3008_v16 = vsel %vm181_vm0, %v2934_v11, 0.0  ;;  %v3521_v41 = vmul.f32 0.16666667, %v3489_v38  ;;  %v3777_v56 = vmul.f32 0.5, %v3745_v3 }
 0x522   :  { %3009 = vadd.xlane.f32.xlu2 %v3008_v16  ;;  %v3104_v11 = vmul.f32 0.5, %v3103_v60  ;;  %v3822_v26 = vsel %vm9076_vm14, %v3821_v48, %v3817_v55  ;;  %v3587_v16 = vmul.f32 1.442695, %v3458_v15  ;;  %v3652_v55 = vsub.f32 0.0, %v3460_v17 }
 0x523   :  { %v2871_v5 = vadd.f32 %v2825_v36, %v8730_v22  ;;  %v3490_v22 = vmul.f32 %v9042_v19, %v9042_v19  ;;  %v3553_v24 = vadd.f32 1.0, %v3521_v41  ;;  %v3823_v9 = vmul.f32 %v3822_v26, %v3777_v56 }
 0x524   :  { %v5695_v8 = vpop.eup %5694  ;;  %v3683_v48 = vmul.f32 1.442695, %v3650_v30  ;;  %v3105_v41 = vsub.f32 1.5, %v3104_v11  ;;  %v3095_v30 = vmul.f32 %v3094_v14, %v8986_v52  ;;  %vm3859_vm9 = vweird.f32 %v9044_v46 }
 0x525   :  { %v3114_v40 = vmul.f32 %v5695_v8, %v9037_v25  ;;  %v9089_v59 = vpop.xlane.xlu0 %2967  ;;  %v9092_v38 = vmul.f32 %v11598_v0, %v2871_v5  ;;  %v9100_v54 = vpop.eup %5696  ;;  %v3522_v36 = vmul.f32 0.16666667, %v3490_v22  ;;  %v4321_v31 = vsel %vm4289_vm2, %v3553_v24, %v3823_v9 }
 0x526   :  { %5700 = vrsqrt.f32 %v9089_v59  ;;  %v9107_v1 = vpop.eup %5698  ;;  %v3855_v29 = vmul.f32 %v9100_v54, %v9044_v46  ;;  %v9147_v9 = vmul.f32 %v4321_v31, %v8814_v7  ;;  %v3123_v31 = vand.u32 2147483648, %v9037_v25 }
 0x527   :  { %11607 = vst [vmem:[#allocation61_spill] sm:$0xff] %v9092_v38  ;;  %v3115_v18 = vmul.f32 %v5695_v8, %v3114_v40  ;;  %v2935_v63 = vmul.f32 %v9092_v38, %v9092_v38  ;;  %5702 = vrcp.f32 %v9086_v12  ;;  %v9117_v40 = vpop.f32.mrf.mxu2  ;;  %v9120_v56 = vadd.f32 1.0, %v3522_v36 }
 0x528   :  { %v2826_v23 = vpop.f32.mrf.mxu3  ;;  %5704 = vpow2.f32 %v3587_v16  ;;  %v3106_v36 = vmul.f32 %v9031_v20, %v3105_v41  ;;  %v3856_v14 = vsub.f32 1.0, %v3855_v29  ;;  %11609 = vst [vmem:[#allocation73_spill] sm:$0xff] %v9147_v9  ;;  %vm3830_vm6 = vweird.f32 %v9107_v1 }
 0x529   :  { %v3116_v3 = vmul.f32 0.5, %v3115_v18  ;;  %v2827_v60 = vadd.f32 %v2826_v23, %v9020_v10  ;;  %v3011_v5 = vsel %vm181_vm0, %v2935_v63, 0.0  ;;  %v3825_v63 = vmul.f32 %v9107_v1, %v9042_v19  ;;  %vm9238_vm13 = vmor %vm3829_vm8, %vm3830_vm6 }
 0x52a   :  { %3012 = vadd.xlane.f32.xlu0 %v3011_v5  ;;  %v3687_v23 = vmul.f32 1.442695, %v3652_v55  ;;  %v3857_v29 = vmul.f32 %v9100_v54, %v3856_v14  ;;  %vm3860_vm10 = vweird.f32 %v9100_v54  ;;  %v3865_v10 = vand.u32 2147483648, %v9044_v46 }
 0x52b   :  { %v3117_v22 = vsub.f32 1.5, %v3116_v3  ;;  %v2872_v15 = vadd.f32 %v2827_v60, %v8728_v62  ;;  %v3826_v41 = vsub.f32 1.0, %v3825_v63  ;;  %vm9208_vm11 = vmor %vm3859_vm9, %vm3860_vm10  ;;  %vm4292_vm2 = vcmp.lt.f32.partialorder %v9044_v46, 0.0001 }
 0x52c   :  { %v9113_v50 = vpop.eup %5700 }
 0x52d   :  { %v3126_v62 = vmul.f32 %v9113_v50, %v9089_v59  ;;  %v9125_v11 = vpop.xlane.xlu1 %2970  ;;  %v9128_v18 = vmul.f32 %v11598_v0, %v2872_v15  ;;  %v3118_v26 = vmul.f32 %v5695_v8, %v3117_v22  ;;  %v9137_v3 = vpop.eup %5702  ;;  %v3591_v15 = vmul.f32 1.442695, %v3460_v17  ;;  %v5996_v22 = vld [vmem:[#allocation3 + $0xc0] sm:$0xff] }
 0x52e   :  { %5706 = vrsqrt.f32 %v9125_v11  ;;  %v9149_v55 = vpop.eup %5704  ;;  %v3097_v17 = vsel %vm3096_vm15, %v8986_v52, %v3095_v30  ;;  %v4385_v52 = vmul.f32 %v9147_v9, %v9147_v9  ;;  %vm3132_vm15 = vcmp.eq.f32.partialorder %v9089_v59, inf }
 0x52f   :  { %11608 = vst [vmem:[#allocation54_spill] sm:$0xff] %v9128_v18  ;;  %v2936_v16 = vmul.f32 %v9128_v18, %v9128_v18  ;;  %5708 = vpow2.f32 %v3683_v48  ;;  %v3127_v60 = vmul.f32 %v9113_v50, %v3126_v62  ;;  %v3119_v48 = vmul.f32 %v3118_v26, %v9037_v25 }
 0x530   :  { %v2829_v5 = vpop.f32.mrf.mxu3  ;;  %5710 = vpow2.f32 %v3687_v23  ;;  %v3492_v26 = vmul.f32 %v9044_v46, %v9044_v46  ;;  %v3100_v23 = vsel %vm3098_vm1, %v3099_v51, %v3097_v17  ;;  %v3827_v51 = vmul.f32 %v9107_v1, %v3826_v41 }
 0x531   :  { %v2830_v20 = vadd.f32 %v2829_v5, %v9065_v61  ;;  %v3014_v24 = vsel %vm181_vm0, %v2936_v16, 0.0  ;;  %v3107_v61 = vmul.f32 %v3106_v36, %v9004_v13  ;;  %v3128_v30 = vmul.f32 0.5, %v3127_v60  ;;  %v2745_v5 = vpop.f32.mrf.mxu2 }
 0x532   :  { %3015 = vadd.xlane.f32.xlu1 %v3014_v24  ;;  %5712 = vpow2.f32 %v3591_v15  ;;  %v3121_v60 = vsel %vm3120_vm5, %v9037_v25, %v3119_v48  ;;  %v3858_v24 = vadd.f32 %v9100_v54, %v3857_v29  ;;  %v3524_v8 = vmul.f32 0.16666667, %v3492_v26  ;;  %v5997_v26 = vld [vmem:[#allocation3 + $0xc8] sm:$0xff] }
 0x533   :  { %v2873_v7 = vadd.f32 %v5996_v22, %v2830_v20  ;;  %v3109_v15 = vsel %vm3108_vm3, %v9004_v13, %v3107_v61  ;;  %v3129_v48 = vsub.f32 1.5, %v3128_v30  ;;  %v3124_v41 = vsel %vm3122_vm7, %v3123_v31, %v3121_v60 }
 0x534   :  { %v9159_v62 = vpop.eup %5706  ;;  %v9198_v18 = vmax.f32 %v3100_v23, 1e-15  ;;  %v11611_v30 = vand.u32 2147483648, %v9004_v13  ;;  %v3828_v31 = vadd.f32 %v9107_v1, %v3827_v51  ;;  %v9215_v60 = vsel %vm181_vm0, %v4385_v52, 0.0 }
 0x535   :  { %v5709_v63 = vpop.eup %5708  ;;  %v3138_v36 = vmul.f32 %v9159_v62, %v9125_v11  ;;  %v9171_v16 = vpop.xlane.xlu2 %2973  ;;  %v9174_v14 = vmul.f32 %v11598_v0, %v2873_v7  ;;  %vm3134_vm1 = vcmp.eq.f32.partialorder %v9089_v59, 0.0  ;;  %vm3144_vm3 = vcmp.eq.f32.partialorder %v9125_v11, inf }
 0x536   :  { %5714 = vrsqrt.f32 %v9171_v16  ;;  %v5711_v17 = vpop.eup %5710  ;;  %vm4290_vm5 = vcmp.lt.f32.partialorder %v9042_v19, 0.0001  ;;  %vm3156_vm6 = vcmp.eq.f32.partialorder %v9171_v16, inf  ;;  %vm3158_vm7 = vcmp.eq.f32.partialorder %v9171_v16, 0.0 }
 0x537   :  { %11610 = vst [vmem:[#allocation37_spill] sm:$0xff] %v9174_v14  ;;  %v2937_v20 = vmul.f32 %v9174_v14, %v9174_v14  ;;  %v3139_v22 = vmul.f32 %v9159_v62, %v3138_v36  ;;  %v3863_v14 = vand.u32 2147483647, %v9044_v46  ;;  %v3112_v36 = vsel %vm3110_vm4, %v11611_v30, %v3109_v15 }
 0x538   :  { %v2831_v7 = vpop.f32.mrf.mxu3  ;;  %v5713_v29 = vpop.eup %5712  ;;  %vm3146_vm4 = vcmp.eq.f32.partialorder %v9125_v11, 0.0 }
 0x539   :  { %v2832_v61 = vadd.f32 %v2831_v7, %v9117_v40  ;;  %v3017_v9 = vsel %vm181_vm0, %v2937_v20, 0.0  ;;  %v3746_v40 = vsub.f32 %v9149_v55, %v5709_v63  ;;  %v3748_v13 = vsub.f32 %v5713_v29, %v5711_v17 }
 0x53a   :  { %3018 = vadd.xlane.f32.xlu2 %v3017_v9  ;;  %v3862_v9 = vsel %vm9208_vm11, %v9100_v54, %v3858_v24  ;;  %v9222_v20 = vmax.f32 %v3124_v41, 1e-15  ;;  %v3130_v7 = vmul.f32 %v9113_v50, %v3129_v48  ;;  %v3140_v30 = vmul.f32 0.5, %v3139_v22 }
 0x53b   :  { %v2874_v23 = vadd.f32 %v5997_v26, %v2832_v61  ;;  %v3866_v55 = vor.u32 1.1754944e-38, %v3865_v10  ;;  %v9225_v63 = vmax.f32 %v3112_v36, 1e-15  ;;  %vm3864_vm12 = vcmp.eq.f32.partialorder %v3863_v14, 8.507059e+37 }
 0x53c   :  { %v9220_v15 = vpop.eup %5714  ;;  %v3778_v10 = vmul.f32 0.5, %v3746_v40  ;;  %v3832_v24 = vsel %vm9238_vm13, %v9107_v1, %v3828_v31  ;;  %v3780_v14 = vmul.f32 0.5, %v3748_v13  ;;  %v11617_v22 = vand.u32 2147483647, %v9042_v19  ;;  %v2747_v40 = vpop.f32.mrf.mxu2 }
 0x53d   :  { %v3150_v51 = vmul.f32 %v9220_v15, %v9171_v16  ;;  %v9229_v52 = vpop.xlane.xlu0 %2976  ;;  %v9232_v17 = vmul.f32 %v11598_v0, %v2874_v23  ;;  %v3867_v50 = vsel %vm3864_vm12, %v3866_v55, %v3862_v9  ;;  %v11618_v41 = vand.u32 2147483648, %v9042_v19 }
 0x53e   :  { %5716 = vrsqrt.f32 %v9229_v52  ;;  %vm3834_vm14 = vcmp.eq.f32.partialorder %v11617_v22, 8.507059e+37  ;;  %v3131_v29 = vmul.f32 %v3130_v7, %v9089_v59  ;;  %v3141_v36 = vsub.f32 1.5, %v3140_v30  ;;  %v5998_v30 = vld [vmem:[#allocation3 + $0xd0] sm:$0xff] }
 0x53f   :  { %11614 = vst [vmem:[#allocation47_spill] sm:$0xff] %v9232_v17  ;;  %v2938_v48 = vmul.f32 %v9232_v17, %v9232_v17  ;;  %v3836_v61 = vor.u32 1.1754944e-38, %v11618_v41  ;;  %5718 = vrcp.f32 %v9222_v20  ;;  %v3151_v25 = vmul.f32 %v9220_v15, %v3150_v51 }
 0x540   :  { %v2834_v26 = vpop.f32.mrf.mxu3  ;;  %v3463_v13 = vmin.f32 %v9222_v20, 85.0  ;;  %5720 = vrcp.f32 %v9198_v18  ;;  %v3556_v9 = vadd.f32 1.0, %v3524_v8  ;;  %v3135_v7 = vand.u32 2147483648, %v9089_v59 }
 0x541   :  { %v2835_v1 = vadd.f32 %v2834_v26, %v2745_v5  ;;  %v3020_v31 = vsel %vm181_vm0, %v2938_v48, 0.0  ;;  %v3837_v23 = vsel %vm3834_vm14, %v3836_v61, %v3832_v24  ;;  %v3868_v51 = vmul.f32 %v3867_v50, %v3780_v14 }
 0x542   :  { %3021 = vadd.xlane.f32.xlu0 %v3020_v31  ;;  %v3133_v54 = vsel %vm3132_vm15, %v9089_v59, %v3131_v29  ;;  %v3142_v24 = vmul.f32 %v9159_v62, %v3141_v36  ;;  %v3152_v48 = vmul.f32 0.5, %v3151_v25  ;;  %v3838_v22 = vmul.f32 %v3837_v23, %v3778_v10 }
 0x543   :  { %v2875_v55 = vadd.f32 %v5998_v30, %v2835_v1  ;;  %5722 = vrcp.f32 %v9225_v63  ;;  %v3655_v50 = vsub.f32 0.0, %v3463_v13  ;;  %v3461_v62 = vmin.f32 %v9198_v18, 85.0 }
 0x544   :  { %v9262_v5 = vpop.eup %5716  ;;  %v3493_v10 = vmul.f32 %v9198_v18, %v9198_v18  ;;  %v3136_v29 = vsel %vm3134_vm1, %v3135_v7, %v3133_v54  ;;  %v3147_v36 = vand.u32 2147483648, %v9125_v11  ;;  %v3143_v1 = vmul.f32 %v3142_v24, %v9125_v11  ;;  %v2750_v38 = vpop.f32.mrf.mxu2 }
 0x545   :  { %v9268_v8 = vpop.xlane.xlu1 %2979  ;;  %v9271_v41 = vmul.f32 %v11598_v0, %v2875_v55  ;;  %v9273_v14 = vpop.eup %5718  ;;  %v3162_v61 = vmul.f32 %v9262_v5, %v9229_v52  ;;  %v3153_v31 = vsub.f32 1.5, %v3152_v48  ;;  %v4324_v30 = vsel %vm4292_vm2, %v3556_v9, %v3868_v51 }
 0x546   :  { %5724 = vrsqrt.f32 %v9268_v8  ;;  %v9288_v26 = vpop.eup %5720  ;;  %v4322_v59 = vsel %vm4290_vm5, %v9120_v56, %v3838_v22  ;;  %v3693_v54 = vmul.f32 1.442695, %v3655_v50  ;;  %v3525_v24 = vmul.f32 0.16666667, %v3493_v10  ;;  %v5999_v56 = vld [vmem:[#allocation3 + $0xd8] sm:$0xff] }
 0x547   :  { %11619 = vst [vmem:[#allocation64_spill] sm:$0xff] %v9271_v41  ;;  %v2939_v25 = vmul.f32 %v9271_v41, %v9271_v41  ;;  %v3900_v41 = vmul.f32 %v9273_v14, %v9222_v20  ;;  %v3163_v17 = vmul.f32 %v9262_v5, %v3162_v61  ;;  %v9299_v48 = vmul.f32 1.442695, %v3461_v62 }
 0x548   :  { %v2836_v23 = vpop.f32.mrf.mxu3  ;;  %v9303_v9 = vmax.f32 %v3136_v29, 1e-15  ;;  %v9306_v51 = vmul.f32 %v4324_v30, %v8841_v33  ;;  %v3495_v22 = vmul.f32 %v9222_v20, %v9222_v20  ;;  %v3145_v61 = vsel %vm3144_vm3, %v9125_v11, %v3143_v1 }
 0x549   :  { %v2837_v7 = vadd.f32 %v2836_v23, %v2747_v40  ;;  %v3023_v55 = vsel %vm181_vm0, %v2939_v25, 0.0  ;;  %v9301_v46 = vpop.eup %5722  ;;  %v9317_v10 = vmul.f32 %v4322_v59, %v8821_v28  ;;  %v3597_v29 = vmul.f32 1.442695, %v3463_v13 }
 0x54a   :  { %3024 = vadd.xlane.f32.xlu1 %v3023_v55  ;;  %11620 = vst [vmem:[#allocation42_spill] sm:$0xff] %v9306_v51  ;;  %v3653_v25 = vsub.f32 0.0, %v3461_v62  ;;  %v3154_v23 = vmul.f32 %v9220_v15, %v3153_v31  ;;  %5726 = vpow2.f32 %v3693_v54  ;;  %v3164_v55 = vmul.f32 0.5, %v3163_v17 }
 0x54b   :  { %v2876_v40 = vadd.f32 %v5999_v56, %v2837_v7  ;;  %11621 = vst [vmem:[#allocation38_spill] sm:$0xff] %v9317_v10  ;;  %v3901_v7 = vsub.f32 1.0, %v3900_v41  ;;  %v9328_v56 = vadd.f32 1.0, %v3525_v24  ;;  %v4388_v15 = vmul.f32 %v9306_v51, %v9306_v51 }
 0x54c   :  { %v9310_v50 = vpop.eup %5724  ;;  %v3527_v13 = vmul.f32 0.16666667, %v3495_v22  ;;  %v3148_v17 = vsel %vm3146_vm4, %v3147_v36, %v3145_v61  ;;  %v4386_v62 = vmul.f32 %v9317_v10, %v9317_v10  ;;  %vm3904_vm8 = vweird.f32 %v9222_v20 }
 0x54d   :  { %v9320_v33 = vpop.xlane.xlu2 %2982  ;;  %v9323_v30 = vmul.f32 %v11598_v0, %v2876_v40  ;;  %v3174_v1 = vmul.f32 %v9310_v50, %v9268_v8  ;;  %v3155_v31 = vmul.f32 %v3154_v23, %v9171_v16  ;;  %v3902_v24 = vmul.f32 %v9273_v14, %v3901_v7 }
 0x54e   :  { %5728 = vrsqrt.f32 %v9320_v33  ;;  %v3165_v40 = vsub.f32 1.5, %v3164_v55  ;;  %v3870_v36 = vmul.f32 %v9288_v26, %v9198_v18  ;;  %v3689_v23 = vmul.f32 1.442695, %v3653_v25  ;;  %v2752_v55 = vpop.f32.mrf.mxu2 }
 0x54f   :  { %11622 = vst [vmem:[#allocation50_spill] sm:$0xff] %v9323_v30  ;;  %5730 = vrcp.f32 %v9303_v9  ;;  %v2940_v28 = vmul.f32 %v9323_v30, %v9323_v30  ;;  %v3175_v11 = vmul.f32 %v9310_v50, %v3174_v1  ;;  %v9349_v30 = vsel %vm181_vm0, %v4388_v15, 0.0 }
 0x550   :  { %v2839_v41 = vpop.f32.mrf.mxu3  ;;  %5732 = vpow2.f32 %v3597_v29  ;;  %v5727_v61 = vpop.eup %5726  ;;  %v6000_v29 = vld [vmem:[#allocation3 + $0xe0] sm:$0xff]  ;;  %v9355_v7 = vmax.f32 %v3148_v17, 1e-15  ;;  %v9358_v1 = vsel %vm181_vm0, %v4386_v62, 0.0  ;;  %vm3905_vm9 = vweird.f32 %v9273_v14 }
 0x551   :  { %v2840_v59 = vadd.f32 %v2839_v41, %v2750_v38  ;;  %v3026_v54 = vsel %vm181_vm0, %v2940_v28, 0.0  ;;  %v9351_v38 = vadd.f32 1.0, %v3527_v13  ;;  %v3910_v41 = vand.u32 2147483648, %v9222_v20  ;;  %vm9392_vm11 = vmor %vm3904_vm8, %vm3905_vm9 }
 0x552   :  { %3027 = vadd.xlane.f32.xlu2 %v3026_v54  ;;  %v3157_v15 = vsel %vm3156_vm6, %v9171_v16, %v3155_v31  ;;  %vm3168_vm10 = vcmp.eq.f32.partialorder %v9229_v52, inf  ;;  %v3903_v62 = vadd.f32 %v9273_v14, %v3902_v24  ;;  %v3176_v22 = vmul.f32 0.5, %v3175_v11 }
 0x553   :  { %v2877_v19 = vadd.f32 %v6000_v29, %v2840_v59  ;;  %v3166_v29 = vmul.f32 %v9262_v5, %v3165_v40  ;;  %v3871_v10 = vsub.f32 1.0, %v3870_v36  ;;  %v3908_v44 = vand.u32 2147483647, %v9222_v20 }
 0x554   :  { %v9353_v28 = vpop.eup %5728  ;;  %vm3170_vm12 = vcmp.eq.f32.partialorder %v9229_v52, 0.0  ;;  %vm4295_vm13 = vcmp.lt.f32.partialorder %v9222_v20, 0.0001  ;;  %vm3874_vm15 = vweird.f32 %v9198_v18  ;;  %vm3875_vm1 = vweird.f32 %v9288_v26 }
 0x555   :  { %v9362_v54 = vpop.eup %5730  ;;  %v3186_v25 = vmul.f32 %v9353_v28, %v9320_v33  ;;  %v9370_v13 = vpop.xlane.xlu0 %2985  ;;  %v9373_v17 = vmul.f32 %v11598_v0, %v2877_v19  ;;  %v11624_v19 = vand.u32 2147483648, %v9171_v16  ;;  %v3907_v16 = vsel %vm9392_vm11, %v9273_v14, %v3903_v62  ;;  %vm9441_vm3 = vmor %vm3874_vm15, %vm3875_vm1 }
 0x556   :  { %v5733_v59 = vpop.eup %5732  ;;  %5734 = vrsqrt.f32 %v9370_v13  ;;  %vm3909_vm14 = vcmp.eq.f32.partialorder %v3908_v44, 8.507059e+37  ;;  %v3840_v44 = vmul.f32 %v9137_v3, %v9086_v12  ;;  %vm3180_vm2 = vcmp.eq.f32.partialorder %v9268_v8, inf  ;;  %v2755_v36 = vpop.f32.mrf.mxu2 }
 0x557   :  { %11623 = vst [vmem:[#allocation69_spill] sm:$0xff] %v9373_v17  ;;  %v2941_v31 = vmul.f32 %v9373_v17, %v9373_v17  ;;  %v3751_v51 = vsub.f32 %v5733_v59, %v5727_v61  ;;  %5736 = vpow2.f32 %v3689_v23  ;;  %v3160_v24 = vsel %vm3158_vm7, %v11624_v19, %v3157_v15 }
 0x558   :  { %5738 = vrcp.f32 %v9355_v7  ;;  %v3187_v40 = vmul.f32 %v9353_v28, %v3186_v25  ;;  %v2841_v11 = vpop.f32.mrf.mxu3  ;;  %v3167_v15 = vmul.f32 %v3166_v29, %v9229_v52  ;;  %v3177_v25 = vsub.f32 1.5, %v3176_v22 }
 0x559   :  { %v2842_v61 = vadd.f32 %v2841_v11, %v2752_v55  ;;  %v3029_v23 = vsel %vm181_vm0, %v2941_v31, 0.0  ;;  %5740 = vpow2.f32 %v9299_v48  ;;  %v3911_v59 = vor.u32 1.1754944e-38, %v3910_v41  ;;  %v6001_v55 = vld [vmem:[#allocation3 + $0xe8] sm:$0xff] }
 0x55a   :  { %3030 = vadd.xlane.f32.xlu0 %v3029_v23  ;;  %v3872_v19 = vmul.f32 %v9288_v26, %v3871_v10  ;;  %v9405_v5 = vmax.f32 %v3160_v24, 1e-15  ;;  %v3783_v31 = vmul.f32 0.5, %v3751_v51  ;;  %v3188_v14 = vmul.f32 0.5, %v3187_v40 }
 0x55b   :  { %v2878_v11 = vadd.f32 %v6001_v55, %v2842_v61  ;;  %v3912_v62 = vsel %vm3909_vm14, %v3911_v59, %v3907_v16  ;;  %v3459_v48 = vmin.f32 %v9086_v12, 85.0  ;;  %v3169_v24 = vsel %vm3168_vm10, %v9229_v52, %v3167_v15 }
 0x55c   :  { %v9407_v17 = vpop.eup %5734  ;;  %v3178_v40 = vmul.f32 %v9310_v50, %v3177_v25  ;;  %v3873_v61 = vadd.f32 %v9288_v26, %v3872_v19  ;;  %v3913_v55 = vmul.f32 %v3912_v62, %v3783_v31  ;;  %v3189_v49 = vsub.f32 1.5, %v3188_v14 }
 0x55d   :  { %v5737_v22 = vpop.eup %5736  ;;  %v3198_v41 = vmul.f32 %v9407_v17, %v9370_v13  ;;  %v9413_v29 = vpop.xlane.xlu1 %2988  ;;  %v9416_v10 = vmul.f32 %v11598_v0, %v2878_v11  ;;  %v3880_v11 = vand.u32 2147483648, %v9198_v18  ;;  %v3878_v50 = vand.u32 2147483647, %v9198_v18 }
 0x55e   :  { %v9421_v51 = vpop.eup %5738  ;;  %5742 = vrsqrt.f32 %v9413_v29  ;;  %v3651_v25 = vsub.f32 0.0, %v3459_v48  ;;  %v3841_v31 = vsub.f32 1.0, %v3840_v44  ;;  %v11630_v14 = vand.u32 2147483648, %v9229_v52 }
 0x55f   :  { %11627 = vst [vmem:[#allocation56_spill] sm:$0xff] %v9416_v10  ;;  %v5741_v23 = vpop.eup %5740  ;;  %v3199_v16 = vmul.f32 %v9407_v17, %v3198_v41  ;;  %v2942_v59 = vmul.f32 %v9416_v10, %v9416_v10  ;;  %5744 = vrcp.f32 %v9405_v5  ;;  %vm3182_vm4 = vcmp.eq.f32.partialorder %v9268_v8, 0.0 }
 0x560   :  { %v2844_v15 = vpop.f32.mrf.mxu3  ;;  %v3749_v53 = vsub.f32 %v5741_v23, %v5737_v22  ;;  %v3172_v62 = vsel %vm3170_vm12, %v11630_v14, %v3169_v24  ;;  %v3179_v22 = vmul.f32 %v3178_v40, %v9268_v8  ;;  %v3877_v23 = vsel %vm9441_vm3, %v9288_v26, %v3873_v61 }
 0x561   :  { %v2845_v57 = vadd.f32 %v2844_v15, %v2755_v36  ;;  %v3032_v19 = vsel %vm181_vm0, %v2942_v59, 0.0  ;;  %v3200_v36 = vmul.f32 0.5, %v3199_v16  ;;  %vm3192_vm5 = vcmp.eq.f32.partialorder %v9320_v33, inf  ;;  %v6002_v59 = vld [vmem:[#allocation3 + $0xf0] sm:$0xff] }
 0x562   :  { %3033 = vadd.xlane.f32.xlu1 %v3032_v19  ;;  %v4327_v44 = vsel %vm4295_vm13, %v9351_v38, %v3913_v55  ;;  %v3881_v52 = vor.u32 1.1754944e-38, %v3880_v11  ;;  %v3589_v24 = vmul.f32 1.442695, %v3459_v48  ;;  %v3190_v40 = vmul.f32 %v9353_v28, %v3189_v49 }
 0x563   :  { %v2879_v15 = vadd.f32 %v6002_v59, %v2845_v57  ;;  %v3781_v16 = vmul.f32 0.5, %v3749_v53  ;;  %vm3879_vm6 = vcmp.eq.f32.partialorder %v3878_v50, 8.507059e+37  ;;  %v3685_v19 = vmul.f32 1.442695, %v3651_v25  ;;  %v2757_v25 = vpop.f32.mrf.mxu2 }
 0x564   :  { %v9458_v14 = vpop.eup %5742  ;;  %v3882_v41 = vsel %vm3879_vm6, %v3881_v52, %v3877_v23  ;;  %v3842_v20 = vmul.f32 %v9137_v3, %v3841_v31  ;;  %v9469_v38 = vmax.f32 %v3172_v62, 1e-15  ;;  %v3201_v48 = vsub.f32 1.5, %v3200_v36 }
 0x565   :  { %v3210_v26 = vmul.f32 %v9458_v14, %v9413_v29  ;;  %v9463_v61 = vpop.xlane.xlu2 %2991  ;;  %v9466_v57 = vmul.f32 %v11598_v0, %v2879_v15  ;;  %v9473_v53 = vmul.f32 %v4327_v44, %v8874_v39  ;;  %v9475_v49 = vpop.eup %5744  ;;  %v3181_v28 = vsel %vm3180_vm2, %v9268_v8, %v3179_v22 }
 0x566   :  { %5746 = vrsqrt.f32 %v9463_v61  ;;  %vm3194_vm7 = vcmp.eq.f32.partialorder %v9320_v33, 0.0  ;;  %v3191_v50 = vmul.f32 %v3190_v40, %v9320_v33  ;;  %v3883_v39 = vmul.f32 %v3882_v41, %v3781_v16  ;;  %v6003_v16 = vld [vmem:[#allocation3 + $0xf8] sm:$0xff] }
 0x567   :  { %11631 = vst [vmem:[#allocation74_spill] sm:$0xff] %v9466_v57  ;;  %v3211_v55 = vmul.f32 %v9458_v14, %v3210_v26  ;;  %v2943_v11 = vmul.f32 %v9466_v57, %v9466_v57  ;;  %5748 = vpow2.f32 %v3589_v24  ;;  %vm3845_vm8 = vweird.f32 %v9137_v3 }
 0x568   :  { %11632 = vst [vmem:[#allocation40_spill] sm:$0xff] %v9473_v53  ;;  %v2846_v31 = vpop.f32.mrf.mxu3  ;;  %5750 = vpow2.f32 %v3685_v19  ;;  %v3843_v23 = vadd.f32 %v9137_v3, %v3842_v20  ;;  %v3195_v59 = vand.u32 2147483648, %v9320_v33  ;;  %v3202_v15 = vmul.f32 %v9407_v17, %v3201_v48 }
 0x569   :  { %v3212_v62 = vmul.f32 0.5, %v3211_v55  ;;  %v2847_v36 = vadd.f32 %v2846_v31, %v2757_v25  ;;  %v3035_v22 = vsel %vm181_vm0, %v2943_v11, 0.0  ;;  %v3491_v44 = vmul.f32 %v9086_v12, %v9086_v12 }
 0x56a   :  { %4418 = vadd.xlane.f32.xlu1 %v9215_v60  ;;  %3036 = vadd.xlane.f32.xlu2 %v3035_v22  ;;  %v3850_v52 = vand.u32 2147483648, %v9086_v12  ;;  %v11633_v24 = vand.u32 2147483648, %v9268_v8  ;;  %vm3844_vm9 = vweird.f32 %v9086_v12  ;;  %v3848_v26 = vand.u32 2147483647, %v9086_v12 }
 0x56b   :  { %v2880_v19 = vadd.f32 %v6003_v16, %v2847_v36  ;;  %5752 = vrcp.f32 %v9469_v38  ;;  %v3193_v60 = vsel %vm3192_vm5, %v9320_v33, %v3191_v50  ;;  %v4391_v41 = vmul.f32 %v9473_v53, %v9473_v53  ;;  %vm9511_vm11 = vmor %vm3844_vm9, %vm3845_vm8 }
 0x56c   :  { %v3184_v40 = vsel %vm3182_vm4, %v11633_v24, %v3181_v28  ;;  %v9500_v17 = vpop.eup %5746  ;;  %vm4293_vm10 = vcmp.lt.f32.partialorder %v9198_v18, 0.0001  ;;  %v3213_v48 = vsub.f32 1.5, %v3212_v62  ;;  %v3847_v50 = vsel %vm9511_vm11, %v9137_v3, %v3843_v23 }
 0x56d   :  { %v5749_v20 = vpop.eup %5748  ;;  %v9515_v28 = vpop.xlane.xlu0 %2994  ;;  %v9518_v55 = vmul.f32 %v11598_v0, %v2880_v19  ;;  %v4325_v11 = vsel %vm4293_vm10, %v9328_v56, %v3883_v39  ;;  %v9524_v25 = vmax.f32 %v3184_v40, 1e-15  ;;  %v3203_v31 = vmul.f32 %v3202_v15, %v9370_v13 }
 0x56e   :  { %v5751_v18 = vpop.eup %5750  ;;  %v3523_v36 = vmul.f32 0.16666667, %v3491_v44  ;;  %v3851_v22 = vor.u32 1.1754944e-38, %v3850_v52  ;;  %v3222_v62 = vmul.f32 %v9500_v17, %v9463_v61  ;;  %vm3849_vm12 = vcmp.eq.f32.partialorder %v3848_v26, 8.507059e+37 }
 0x56f   :  { %11636 = vst [vmem:[#allocation52_spill] sm:$0xff] %v9518_v55  ;;  %v2944_v24 = vmul.f32 %v9518_v55, %v9518_v55  ;;  %v3747_v16 = vsub.f32 %v5749_v20, %v5751_v18  ;;  %v3196_v56 = vsel %vm3194_vm7, %v3195_v59, %v3193_v60  ;;  %5754 = vrsqrt.f32 %v9515_v28 }
 0x570   :  { %v9535_v3 = vmul.f32 %v4325_v11, %v8854_v34  ;;  %v3852_v39 = vsel %vm3849_vm12, %v3851_v22, %v3847_v50  ;;  %vm3204_vm13 = vcmp.eq.f32.partialorder %v9370_v13, inf  ;;  %v3214_v23 = vmul.f32 %v9458_v14, %v3213_v48 }
 0x571   :  { %v3038_v15 = vsel %vm181_vm0, %v2944_v24, 0.0  ;;  %v3779_v44 = vmul.f32 0.5, %v3747_v16  ;;  %v9540_v52 = vpop.eup %5752  ;;  %v3205_v40 = vsel %vm3204_vm13, %v9370_v13, %v3203_v31  ;;  %vm3206_vm14 = vcmp.eq.f32.partialorder %v9370_v13, 0.0 }
 0x572   :  { %11637 = vst [vmem:[#allocation72_spill] sm:$0xff] %v9535_v3  ;;  %v3207_v33 = vand.u32 2147483648, %v9370_v13  ;;  %4427 = vadd.xlane.f32.xlu1 %v9349_v30  ;;  %4421 = vadd.xlane.f32.xlu2 %v9358_v1  ;;  %v4435_v34 = vsel %vm181_vm0, %v4391_v41, 0.0  ;;  %v9548_v59 = vmax.f32 %v3196_v56, 1e-15  ;;  %v3223_v14 = vmul.f32 %v9500_v17, %v3222_v62 }
 0x573   :  { %3039 = vadd.xlane.f32.xlu0 %v3038_v15  ;;  %v3555_v19 = vadd.f32 1.0, %v3523_v36  ;;  %v3853_v26 = vmul.f32 %v3852_v39, %v3779_v44  ;;  %5756 = vrcp.f32 %v9524_v25  ;;  %v4389_v60 = vmul.f32 %v9535_v3, %v9535_v3 }
 0x574   :  { %vm4291_vm15 = vcmp.lt.f32.partialorder %v9086_v12, 0.0001  ;;  %v3494_v30 = vmul.f32 %v9225_v63, %v9225_v63  ;;  %v3208_v1 = vsel %vm3206_vm14, %v3207_v33, %v3205_v40  ;;  %v3215_v13 = vmul.f32 %v3214_v23, %v9413_v29 }
 0x575   :  { %v9558_v41 = vpop.xlane.xlu1 %2997  ;;  %v4323_v8 = vsel %vm4291_vm15, %v3555_v19, %v3853_v26  ;;  %v3462_v20 = vmin.f32 %v9225_v63, 85.0  ;;  %v9561_v48 = vpop.eup %5754  ;;  %vm3216_vm1 = vcmp.eq.f32.partialorder %v9413_v29, inf  ;;  %vm3218_vm2 = vcmp.eq.f32.partialorder %v9413_v29, 0.0 }
 0x576   :  { %v3219_v11 = vand.u32 2147483648, %v9413_v29  ;;  %5758 = vrsqrt.f32 %v9558_v41  ;;  %v3224_v12 = vmul.f32 0.5, %v3223_v14  ;;  %v9569_v50 = vmul.f32 %v4323_v8, %v8834_v4 }
 0x577   :  { %5760 = vrcp.f32 %v9548_v59  ;;  %v3466_v18 = vmin.f32 %v9405_v5, 85.0  ;;  %v9572_v31 = vmax.f32 %v3208_v1, 1e-15  ;;  %v4429_v36 = vsel %vm181_vm0, %v4389_v60, 0.0 }
 0x578   :  { %11638 = vst [vmem:[#allocation43_spill] sm:$0xff] %v9569_v50  ;;  %v3945_v22 = vmul.f32 %v9475_v49, %v9405_v5  ;;  %v3526_v62 = vmul.f32 0.16666667, %v3494_v30  ;;  %v3217_v24 = vsel %vm3216_vm1, %v9413_v29, %v3215_v13  ;;  %v3234_v16 = vmul.f32 %v9561_v48, %v9515_v28 }
 0x579   :  { %v4387_v56 = vmul.f32 %v9569_v50, %v9569_v50  ;;  %v3595_v4 = vmul.f32 1.442695, %v3462_v20  ;;  %v9582_v39 = vpop.eup %5756  ;;  %v3603_v23 = vmul.f32 1.442695, %v3466_v18  ;;  %v3658_v15 = vsub.f32 0.0, %v3466_v18 }
 0x57a   :  { %4436 = vadd.xlane.f32.xlu1 %v4435_v34  ;;  %4430 = vadd.xlane.f32.xlu2 %v4429_v36  ;;  %v3946_v44 = vsub.f32 1.0, %v3945_v22  ;;  %v3654_v40 = vsub.f32 0.0, %v3462_v20  ;;  %v3225_v33 = vsub.f32 1.5, %v3224_v12  ;;  %v9588_v26 = vmul.f32 %v9301_v46, %v9225_v63 }
 0x57b   :  { %v4423_v19 = vsel %vm181_vm0, %v4387_v56, 0.0  ;;  %5762 = vrcp.f32 %v9572_v31  ;;  %v3220_v34 = vsel %vm3218_vm2, %v3219_v11, %v3217_v24  ;;  %v3699_v30 = vmul.f32 1.442695, %v3658_v15 }
 0x57c   :  { %v9590_v60 = vpop.eup %5758  ;;  %4424 = vadd.xlane.f32.xlu0 %v4423_v19  ;;  %v3947_v1 = vmul.f32 %v9475_v49, %v3946_v44  ;;  %v3235_v8 = vmul.f32 %v9561_v48, %v3234_v16  ;;  %v3464_v12 = vmin.f32 %v9303_v9, 85.0  ;;  %5764 = vpow2.f32 %v3595_v4 }
 0x57d   :  { %v9596_v13 = vpop.eup %5760  ;;  %v3246_v18 = vmul.f32 %v9590_v60, %v9558_v41  ;;  %5766 = vpow2.f32 %v3603_v23  ;;  %v9603_v36 = vadd.f32 1.0, %v3526_v62  ;;  %v3691_v29 = vmul.f32 1.442695, %v3654_v40  ;;  %v9616_v23 = vpop.xlane.xlu2 %3000 }
 0x57e   :  { %v9605_v11 = vmax.f32 %v3220_v34, 1e-15  ;;  %v3226_v22 = vmul.f32 %v9500_v17, %v3225_v33  ;;  %5768 = vpow2.f32 %v3699_v30  ;;  %v3886_v24 = vsub.f32 1.0, %v9588_v26 }
 0x57f   :  { %vm3228_vm3 = vcmp.eq.f32.partialorder %v9463_v61, inf  ;;  %v3498_v16 = vmul.f32 %v9405_v5, %v9405_v5  ;;  %v3948_v56 = vadd.f32 %v9475_v49, %v3947_v1  ;;  %vm3950_vm4 = vweird.f32 %v9475_v49 }
 0x580   :  { %v3496_v62 = vmul.f32 %v9303_v9, %v9303_v9  ;;  %v3236_v4 = vmul.f32 0.5, %v3235_v8  ;;  %v3955_v17 = vand.u32 2147483648, %v9405_v5  ;;  %v3599_v15 = vmul.f32 1.442695, %v3464_v12 }
 0x581   :  { %vm3919_vm5 = vweird.f32 %v9303_v9  ;;  %v9620_v44 = vpop.eup %5762  ;;  %v3247_v40 = vmul.f32 %v9590_v60, %v3246_v18  ;;  %vm3949_vm6 = vweird.f32 %v9405_v5  ;;  %v3953_v33 = vand.u32 2147483647, %v9405_v5 }
 0x582   :  { %v3656_v19 = vsub.f32 0.0, %v3464_v12  ;;  %v9625_v26 = vpop.eup %5764  ;;  %5770 = vrcp.f32 %v9605_v11  ;;  %v3227_v34 = vmul.f32 %v3226_v22, %v9463_v61  ;;  %vm9631_vm7 = vmor %vm3949_vm6, %vm3950_vm4  ;;  %v3915_v1 = vmul.f32 %v9362_v54, %v9303_v9 }
 0x583   :  { %v3923_v8 = vand.u32 2147483647, %v9303_v9  ;;  %v5767_v18 = vpop.eup %5766  ;;  %5772 = vrsqrt.f32 %v9616_v23  ;;  %v3530_v12 = vmul.f32 0.16666667, %v3498_v16  ;;  %v3952_v20 = vsel %vm9631_vm7, %v9475_v49, %v3948_v56 }
 0x584   :  { %v3695_v22 = vmul.f32 1.442695, %v3656_v19  ;;  %v5769_v14 = vpop.eup %5768  ;;  %v3237_v55 = vsub.f32 1.5, %v3236_v4  ;;  %v3956_v57 = vor.u32 1.1754944e-38, %v3955_v17  ;;  %5774 = vpow2.f32 %v3599_v15 }
 0x585   :  { %v3916_v10 = vsub.f32 1.0, %v3915_v1  ;;  %v3248_v50 = vmul.f32 0.5, %v3247_v40  ;;  %v3754_v3 = vsub.f32 %v5767_v18, %v5769_v14  ;;  %vm3954_vm8 = vcmp.eq.f32.partialorder %v3953_v33, 8.507059e+37 }
 0x586   :  { %5776 = vpow2.f32 %v3695_v22  ;;  %vm3230_vm9 = vcmp.eq.f32.partialorder %v9463_v61, 0.0  ;;  %v3957_v53 = vsel %vm3954_vm8, %v3956_v57, %v3952_v20  ;;  %vm3920_vm10 = vweird.f32 %v9362_v54 }
 0x587   :  { %v3917_v0 = vmul.f32 %v9362_v54, %v3916_v10  ;;  %5778 = vpow2.f32 %v3691_v29  ;;  %v3786_v16 = vmul.f32 0.5, %v3754_v3  ;;  %v3925_v49 = vand.u32 2147483648, %v9303_v9  ;;  %vm9659_vm13 = vmor %vm3919_vm5, %vm3920_vm10 }
 0x588   :  { %v3887_v56 = vmul.f32 %v9301_v46, %v3886_v24  ;;  %vm3890_vm11 = vweird.f32 %v9301_v46  ;;  %v9648_v4 = vpop.eup %5770  ;;  %v3229_v14 = vsel %vm3228_vm3, %v9463_v61, %v3227_v34  ;;  %v3562_v17 = vadd.f32 1.0, %v3530_v12 }
 0x589   :  { %v3918_v57 = vadd.f32 %v9362_v54, %v3917_v0  ;;  %vm3889_vm12 = vweird.f32 %v9225_v63  ;;  %v9655_v10 = vpop.eup %5772  ;;  %v3958_v3 = vmul.f32 %v3957_v53, %v3786_v16  ;;  %v3893_v24 = vand.u32 2147483647, %v9225_v63 }
 0x58a   :  { %v3888_v29 = vadd.f32 %v9301_v46, %v3887_v56  ;;  %v3895_v15 = vand.u32 2147483648, %v9225_v63  ;;  %v5775_v40 = vpop.eup %5774  ;;  %v3238_v0 = vmul.f32 %v9561_v48, %v3237_v55  ;;  %vm3240_vm14 = vcmp.eq.f32.partialorder %v9515_v28, inf  ;;  %vm9674_vm1 = vmor %vm3889_vm12, %vm3890_vm11 }
 0x58b   :  { %v3249_v33 = vsub.f32 1.5, %v3248_v50  ;;  %vm4298_vm15 = vcmp.lt.f32.partialorder %v9405_v5, 0.0001  ;;  %v3922_v53 = vsel %vm9659_vm13, %v9362_v54, %v3918_v57  ;;  %v3528_v1 = vmul.f32 0.16666667, %v3496_v62 }
 0x58c   :  { %v5777_v34 = vpop.eup %5776  ;;  %v4330_v30 = vsel %vm4298_vm15, %v3562_v17, %v3958_v3  ;;  %v3926_v18 = vor.u32 1.1754944e-38, %v3925_v49  ;;  %v3892_v55 = vsel %vm9674_vm1, %v9301_v46, %v3888_v29  ;;  %vm3924_vm2 = vcmp.eq.f32.partialorder %v3923_v8, 8.507059e+37 }
 0x58d   :  { %v5779_v48 = vpop.eup %5778  ;;  %v9682_v5 = vmul.f32 %v4330_v30, %v8901_v43  ;;  %v3752_v50 = vsub.f32 %v5775_v40, %v5777_v34  ;;  %v3896_v54 = vor.u32 1.1754944e-38, %v3895_v15  ;;  %vm3242_vm3 = vcmp.eq.f32.partialorder %v9515_v28, 0.0 }
 0x58e   :  { %vm3252_vm4 = vcmp.eq.f32.partialorder %v9558_v41, inf  ;;  %v3927_v12 = vsel %vm3924_vm2, %v3926_v18, %v3922_v53  ;;  %v3750_v22 = vsub.f32 %v9625_v26, %v5779_v48  ;;  %vm3894_vm5 = vcmp.eq.f32.partialorder %v3893_v24, 8.507059e+37 }
 0x58f   :  { %v3250_v62 = vmul.f32 %v9590_v60, %v3249_v33  ;;  %v4394_v46 = vmul.f32 %v9682_v5, %v9682_v5  ;;  %v3784_v16 = vmul.f32 0.5, %v3752_v50  ;;  %v3897_v49 = vsel %vm3894_vm5, %v3896_v54, %v3892_v55 }
 0x590   :  { %v11645_v43 = vand.u32 2147483648, %v9463_v61  ;;  %v3239_v56 = vmul.f32 %v3238_v0, %v9515_v28  ;;  %v3782_v17 = vmul.f32 0.5, %v3750_v22  ;;  %v3469_v57 = vmin.f32 %v9548_v59, 85.0 }
 0x591   :  { %v3258_v26 = vmul.f32 %v9655_v10, %v9616_v23  ;;  %v4444_v60 = vsel %vm181_vm0, %v4394_v46, 0.0  ;;  %v3560_v3 = vadd.f32 1.0, %v3528_v1  ;;  %v3928_v20 = vmul.f32 %v3927_v12, %v3784_v16  ;;  %v9735_v12 = vpop.xlane.xlu0 %3003 }
 0x592   :  { %v3232_v8 = vsel %vm3230_vm9, %v11645_v43, %v3229_v14  ;;  %4445 = vadd.xlane.f32.xlu1 %v4444_v60  ;;  %vm4296_vm6 = vcmp.lt.f32.partialorder %v9303_v9, 0.0001  ;;  %v3898_v29 = vmul.f32 %v3897_v49, %v3782_v17  ;;  %v3609_v24 = vmul.f32 1.442695, %v3469_v57 }
 0x593   :  { %v3661_v15 = vsub.f32 0.0, %v3469_v57  ;;  %v3251_v61 = vmul.f32 %v3250_v62, %v9558_v41  ;;  %v4328_v14 = vsel %vm4296_vm6, %v3560_v3, %v3928_v20  ;;  %vm4294_vm7 = vcmp.lt.f32.partialorder %v9225_v63, 0.0001 }
 0x594   :  { %v3990_v40 = vmul.f32 %v9596_v13, %v9548_v59  ;;  %v3241_v0 = vsel %vm3240_vm14, %v9515_v28, %v3239_v56  ;;  %v9708_v33 = vmul.f32 %v4328_v14, %v8881_v58  ;;  %v4326_v9 = vsel %vm4294_vm7, %v9603_v36, %v3898_v29 }
 0x595   :  { %v3705_v53 = vmul.f32 1.442695, %v3661_v15  ;;  %vm3254_vm8 = vcmp.eq.f32.partialorder %v9558_v41, 0.0  ;;  %v3255_v19 = vand.u32 2147483648, %v9558_v41  ;;  %v9714_v34 = vmul.f32 %v4326_v9, %v8861_v42 }
 0x596   :  { %5780 = vpow2.f32 %v3609_v24  ;;  %v9716_v63 = vmax.f32 %v3232_v8, 1e-15  ;;  %v4392_v30 = vmul.f32 %v9708_v33, %v9708_v33  ;;  %v3991_v1 = vsub.f32 1.0, %v3990_v40 }
 0x597   :  { %5782 = vpow2.f32 %v3705_v53  ;;  %v11646_v58 = vand.u32 2147483648, %v9515_v28  ;;  %v3253_v18 = vsel %vm3252_vm4, %v9558_v41, %v3251_v61  ;;  %v3259_v42 = vmul.f32 %v9655_v10, %v3258_v26 }
 0x598   :  { %v4390_v55 = vmul.f32 %v9714_v34, %v9714_v34  ;;  %v4438_v48 = vsel %vm181_vm0, %v4392_v30, 0.0  ;;  %v3992_v50 = vmul.f32 %v9596_v13, %v3991_v1  ;;  %vm3995_vm9 = vweird.f32 %v9596_v13 }
 0x599   :  { %v3244_v36 = vsel %vm3242_vm3, %v11646_v58, %v3241_v0  ;;  %v4000_v54 = vand.u32 2147483648, %v9548_v59  ;;  %4439 = vadd.xlane.f32.xlu2 %v4438_v48  ;;  %v3501_v22 = vmul.f32 %v9548_v59, %v9548_v59  ;;  %v3998_v62 = vand.u32 2147483647, %v9548_v59 }
 0x59a   :  { %v4432_v28 = vsel %vm181_vm0, %v4390_v55, 0.0  ;;  %v3467_v46 = vmin.f32 %v9469_v38, 85.0  ;;  %v9741_v16 = vmax.f32 %v3244_v36, 1e-15  ;;  %v3993_v49 = vadd.f32 %v9596_v13, %v3992_v50 }
 0x59b   :  { %4433 = vadd.xlane.f32.xlu0 %v4432_v28  ;;  %vm3994_vm10 = vweird.f32 %v9548_v59  ;;  %v3960_v43 = vmul.f32 %v9540_v52, %v9469_v38  ;;  %v3256_v56 = vsel %vm3254_vm8, %v3255_v19, %v3253_v18  ;;  %v3260_v17 = vmul.f32 0.5, %v3259_v42 }
 0x59c   :  { %v5781_v8 = vpop.eup %5780  ;;  %vm3996_vm11 = vmor %vm3994_vm10, %vm3995_vm9  ;;  %v3605_v57 = vmul.f32 1.442695, %v3467_v46  ;;  %v3659_v26 = vsub.f32 0.0, %v3467_v46  ;;  %5784 = vrsqrt.f32 %v9735_v12  ;;  %v4001_v20 = vor.u32 1.1754944e-38, %v4000_v54 }
 0x59d   :  { %v5783_v60 = vpop.eup %5782  ;;  %v3997_v3 = vsel %vm3996_vm11, %v9596_v13, %v3993_v49  ;;  %v3961_v29 = vsub.f32 1.0, %v3960_v43  ;;  %5786 = vrcp.f32 %v9716_v63  ;;  %v3533_v24 = vmul.f32 0.16666667, %v3501_v22 }
 0x59e   :  { %v3757_v15 = vsub.f32 %v5781_v8, %v5783_v60  ;;  %vm3999_vm12 = vcmp.eq.f32.partialorder %v3998_v62, 8.507059e+37  ;;  %5788 = vrcp.f32 %v9741_v16  ;;  %v3701_v61 = vmul.f32 1.442695, %v3659_v26 }
 0x59f   :  { %v4002_v41 = vsel %vm3999_vm12, %v4001_v20, %v3997_v3  ;;  %v3962_v14 = vmul.f32 %v9540_v52, %v3961_v29  ;;  %v9756_v40 = vmax.f32 %v3256_v56, 1e-15  ;;  %v3261_v0 = vsub.f32 1.5, %v3260_v17 }
 0x5a0   :  { %v3789_v9 = vmul.f32 0.5, %v3757_v15  ;;  %5790 = vpow2.f32 %v3605_v57  ;;  %vm3965_vm13 = vweird.f32 %v9540_v52  ;;  %v3465_v53 = vmin.f32 %v9355_v7, 85.0 }
 0x5a1   :  { %5792 = vpow2.f32 %v3701_v61  ;;  %v3963_v13 = vadd.f32 %v9540_v52, %v3962_v14  ;;  %v3565_v19 = vadd.f32 1.0, %v3533_v24  ;;  %vm4301_vm14 = vcmp.lt.f32.partialorder %v9548_v59, 0.0001 }
 0x5a2   :  { %v4003_v30 = vmul.f32 %v4002_v41, %v3789_v9  ;;  %v3970_v1 = vand.u32 2147483648, %v9469_v38  ;;  %v9763_v58 = vpop.eup %5784  ;;  %vm3964_vm15 = vweird.f32 %v9469_v38  ;;  %v3968_v36 = vand.u32 2147483647, %v9469_v38 }
 0x5a3   :  { %v3601_v18 = vmul.f32 1.442695, %v3465_v53  ;;  %v3657_v42 = vsub.f32 0.0, %v3465_v53  ;;  %v9767_v55 = vpop.eup %5786  ;;  %5794 = vrcp.f32 %v9756_v40  ;;  %v3499_v50 = vmul.f32 %v9469_v38, %v9469_v38  ;;  %vm9774_vm1 = vmor %vm3964_vm15, %vm3965_vm13 }
 0x5a4   :  { %v4333_v48 = vsel %vm4301_vm14, %v3565_v19, %v4003_v30  ;;  %v9778_v54 = vpop.eup %5788  ;;  %v3967_v22 = vsel %vm9774_vm1, %v9540_v52, %v3963_v13  ;;  %v3930_v46 = vmul.f32 %v9421_v51, %v9355_v7  ;;  %v3262_v43 = vmul.f32 %v9655_v10, %v3261_v0 }
 0x5a5   :  { %v9781_v28 = vmul.f32 %v4333_v48, %v8922_v35  ;;  %v3697_v62 = vmul.f32 1.442695, %v3657_v42  ;;  %v3270_v8 = vmul.f32 %v9763_v58, %v9735_v12  ;;  %v3971_v56 = vor.u32 1.1754944e-38, %v3970_v1 }
 0x5a6   :  { %v5791_v49 = vpop.eup %5790  ;;  %5796 = vpow2.f32 %v3601_v18  ;;  %vm3264_vm2 = vcmp.eq.f32.partialorder %v9616_v23, inf  ;;  %vm3969_vm3 = vcmp.eq.f32.partialorder %v3968_v36, 8.507059e+37  ;;  %v3931_v52 = vsub.f32 1.0, %v3930_v46  ;;  %v9813_v36 = vpop.xlane.xlu1 %3006 }
 0x5a7   :  { %v5793_v17 = vpop.eup %5792  ;;  %v4397_v35 = vmul.f32 %v9781_v28, %v9781_v28  ;;  %5798 = vpow2.f32 %v3697_v62  ;;  %v3531_v57 = vmul.f32 0.16666667, %v3499_v50  ;;  %v3972_v60 = vsel %vm3969_vm3, %v3971_v56, %v3967_v22 }
 0x5a8   :  { %v3755_v26 = vsub.f32 %v5791_v49, %v5793_v17  ;;  %v3497_v10 = vmul.f32 %v9355_v7, %v9355_v7  ;;  %v3932_v20 = vmul.f32 %v9421_v51, %v3931_v52  ;;  %vm3935_vm4 = vweird.f32 %v9421_v51 }
 0x5a9   :  { %v4453_v3 = vsel %vm181_vm0, %v4397_v35, 0.0  ;;  %v3940_v29 = vand.u32 2147483648, %v9355_v7  ;;  %v9800_v24 = vpop.eup %5794  ;;  %v3263_v15 = vmul.f32 %v3262_v43, %v9616_v23  ;;  %v3271_v41 = vmul.f32 %v9763_v58, %v3270_v8 }
 0x5aa   :  { %4454 = vadd.xlane.f32.xlu1 %v4453_v3  ;;  %v3787_v61 = vmul.f32 0.5, %v3755_v26  ;;  %v3938_v14 = vand.u32 2147483647, %v9355_v7  ;;  %v3933_v0 = vadd.f32 %v9421_v51, %v3932_v20  ;;  %vm3934_vm5 = vweird.f32 %v9355_v7 }
 0x5ab   :  { %v3470_v9 = vmin.f32 %v9572_v31, 85.0  ;;  %v4005_v13 = vmul.f32 %v9620_v44, %v9572_v31  ;;  %v3563_v19 = vadd.f32 1.0, %v3531_v57  ;;  %vm4299_vm6 = vcmp.lt.f32.partialorder %v9469_v38, 0.0001  ;;  %vm3936_vm7 = vmor %vm3934_vm5, %vm3935_vm4 }
 0x5ac   :  { %v5797_v53 = vpop.eup %5796  ;;  %v3973_v30 = vmul.f32 %v3972_v60, %v3787_v61  ;;  %v3529_v1 = vmul.f32 0.16666667, %v3497_v10  ;;  %vm3266_vm8 = vcmp.eq.f32.partialorder %v9616_v23, 0.0  ;;  %v3937_v42 = vsel %vm3936_vm7, %v9421_v51, %v3933_v0 }
 0x5ad   :  { %v5799_v18 = vpop.eup %5798  ;;  %v3941_v48 = vor.u32 1.1754944e-38, %v3940_v29  ;;  %v3611_v50 = vmul.f32 1.442695, %v3470_v9  ;;  %v3662_v59 = vsub.f32 0.0, %v3470_v9  ;;  %vm3939_vm9 = vcmp.eq.f32.partialorder %v3938_v14, 8.507059e+37 }
 0x5ae   :  { %v4331_v22 = vsel %vm4299_vm6, %v3563_v19, %v3973_v30  ;;  %v3753_v62 = vsub.f32 %v5797_v53, %v5799_v18  ;;  %v4006_v46 = vsub.f32 1.0, %v4005_v13  ;;  %v3267_v38 = vand.u32 2147483648, %v9616_v23 }
 0x5af   :  { %v9819_v49 = vmul.f32 %v4331_v22, %v8908_v21  ;;  %v3942_v43 = vsel %vm3939_vm9, %v3941_v48, %v3937_v42  ;;  %5800 = vrsqrt.f32 %v9813_v36  ;;  %v3265_v8 = vsel %vm3264_vm2, %v9616_v23, %v3263_v15 }
 0x5b0   :  { %v3785_v51 = vmul.f32 0.5, %v3753_v62  ;;  %v3707_v56 = vmul.f32 1.442695, %v3662_v59  ;;  %v4007_v17 = vmul.f32 %v9620_v44, %v4006_v46  ;;  %v3272_v35 = vmul.f32 0.5, %v3271_v41 }
 0x5b1   :  { %v4395_v52 = vmul.f32 %v9819_v49, %v9819_v49  ;;  %v3561_v57 = vadd.f32 1.0, %v3529_v1  ;;  %5802 = vpow2.f32 %v3611_v50  ;;  %vm4297_vm10 = vcmp.lt.f32.partialorder %v9355_v7, 0.0001 }
 0x5b2   :  { %v3943_v26 = vmul.f32 %v3942_v43, %v3785_v51  ;;  %5804 = vpow2.f32 %v3707_v56  ;;  %v3468_v21 = vmin.f32 %v9524_v25, 85.0  ;;  %v3502_v10 = vmul.f32 %v9572_v31, %v9572_v31 }
 0x5b3   :  { %v4447_v60 = vsel %vm181_vm0, %v4395_v52, 0.0  ;;  %v4008_v3 = vadd.f32 %v9620_v44, %v4007_v17  ;;  %vm4010_vm11 = vweird.f32 %v9620_v44  ;;  %v4015_v29 = vand.u32 2147483648, %v9572_v31 }
 0x5b4   :  { %4448 = vadd.xlane.f32.xlu2 %v4447_v60  ;;  %v4329_v20 = vsel %vm4297_vm10, %v3561_v57, %v3943_v26  ;;  %v3607_v15 = vmul.f32 1.442695, %v3468_v21  ;;  %v3660_v41 = vsub.f32 0.0, %v3468_v21  ;;  %v3279_v7 = vand.u32 2147483648, %v9735_v12  ;;  %v9870_v57 = vpop.xlane.xlu2 %3009 }
 0x5b5   :  { %v9836_v61 = vpop.eup %5800  ;;  %v9840_v14 = vmul.f32 %v4329_v20, %v8894_v37  ;;  %vm4009_vm12 = vweird.f32 %v9572_v31  ;;  %v4013_v0 = vand.u32 2147483647, %v9572_v31  ;;  %v3268_v9 = vsel %vm3266_vm8, %v3267_v38, %v3265_v8 }
 0x5b6   :  { %v3273_v13 = vsub.f32 1.5, %v3272_v35  ;;  %vm9846_vm13 = vmor %vm4009_vm12, %vm4010_vm11  ;;  %v3703_v19 = vmul.f32 1.442695, %v3660_v41  ;;  %v3975_v30 = vmul.f32 %v9582_v39, %v9524_v25  ;;  %v3534_v18 = vmul.f32 0.16666667, %v3502_v10 }
 0x5b7   :  { %v5803_v1 = vpop.eup %5802  ;;  %v4393_v37 = vmul.f32 %v9840_v14, %v9840_v14  ;;  %v4012_v42 = vsel %vm9846_vm13, %v9620_v44, %v4008_v3  ;;  %5806 = vpow2.f32 %v3607_v15  ;;  %v3282_v48 = vmul.f32 %v9836_v61, %v9813_v36 }
 0x5b8   :  { %v5805_v23 = vpop.eup %5804  ;;  %v4016_v50 = vor.u32 1.1754944e-38, %v4015_v29  ;;  %5808 = vpow2.f32 %v3703_v19  ;;  %v3976_v59 = vsub.f32 1.0, %v3975_v30  ;;  %vm4014_vm14 = vcmp.eq.f32.partialorder %v4013_v0, 8.507059e+37 }
 0x5b9   :  { %v4441_v22 = vsel %vm181_vm0, %v4393_v37, 0.0  ;;  %v3758_v62 = vsub.f32 %v5803_v1, %v5805_v23  ;;  %v3500_v46 = vmul.f32 %v9524_v25, %v9524_v25  ;;  %vm3980_vm15 = vweird.f32 %v9582_v39 }
 0x5ba   :  { %4442 = vadd.xlane.f32.xlu0 %v4441_v22  ;;  %v4017_v38 = vsel %vm4014_vm14, %v4016_v50, %v4012_v42  ;;  %v3977_v43 = vmul.f32 %v9582_v39, %v3976_v59  ;;  %v3985_v44 = vand.u32 2147483648, %v9524_v25  ;;  %v3274_v8 = vmul.f32 %v9763_v58, %v3273_v13 }
 0x5bb   :  { %v3566_v51 = vadd.f32 1.0, %v3534_v18  ;;  %v3790_v56 = vmul.f32 0.5, %v3758_v62  ;;  %v3983_v17 = vand.u32 2147483647, %v9524_v25  ;;  %v3283_v35 = vmul.f32 %v9836_v61, %v3282_v48 }
 0x5bc   :  { %v3978_v52 = vadd.f32 %v9582_v39, %v3977_v43  ;;  %vm3979_vm1 = vweird.f32 %v9524_v25  ;;  %v3472_v26 = vmin.f32 %v9716_v63, 85.0  ;;  %vm4302_vm2 = vcmp.lt.f32.partialorder %v9572_v31, 0.0001 }
 0x5bd   :  { %v5807_v21 = vpop.eup %5806  ;;  %v4018_v60 = vmul.f32 %v4017_v38, %v3790_v56  ;;  %v3532_v10 = vmul.f32 0.16666667, %v3500_v46  ;;  %vm3981_vm3 = vmor %vm3979_vm1, %vm3980_vm15  ;;  %v4035_v58 = vmul.f32 %v9767_v55, %v9716_v63  ;;  %vm3276_vm4 = vcmp.eq.f32.partialorder %v9735_v12, inf }
 0x5be   :  { %v5809_v3 = vpop.eup %5808  ;;  %v3982_v20 = vsel %vm3981_vm3, %v9582_v39, %v3978_v52  ;;  %v3986_v29 = vor.u32 1.1754944e-38, %v3985_v44  ;;  %v3615_v15 = vmul.f32 1.442695, %v3472_v26  ;;  %v3664_v41 = vsub.f32 0.0, %v3472_v26 }
 0x5bf   :  { %v4334_v0 = vsel %vm4302_vm2, %v3566_v51, %v4018_v60  ;;  %v3756_v13 = vsub.f32 %v5807_v21, %v5809_v3  ;;  %vm3984_vm5 = vcmp.eq.f32.partialorder %v3983_v17, 8.507059e+37  ;;  %5810 = vrsqrt.f32 %v9870_v57 }
 0x5c0   :  { %v9881_v31 = vmax.f32 %v3268_v9, 1e-15  ;;  %v9884_v53 = vmul.f32 %v4334_v0, %v8929_v27  ;;  %v3987_v19 = vsel %vm3984_vm5, %v3986_v29, %v3982_v20  ;;  %v3711_v30 = vmul.f32 1.442695, %v3664_v41 }
 0x5c1   :  { %v3275_v1 = vmul.f32 %v3274_v8, %v9735_v12  ;;  %vm3278_vm6 = vcmp.eq.f32.partialorder %v9735_v12, 0.0  ;;  %v3788_v39 = vmul.f32 0.5, %v3756_v13  ;;  %5812 = vpow2.f32 %v3615_v15  ;;  %v9923_v15 = vpop.xlane.xlu0 %3012 }
 0x5c2   :  { %v4036_v37 = vsub.f32 1.0, %v4035_v58  ;;  %v3284_v18 = vmul.f32 0.5, %v3283_v35  ;;  %v4398_v42 = vmul.f32 %v9884_v53, %v9884_v53  ;;  %v3564_v23 = vadd.f32 1.0, %v3532_v10 }
 0x5c3   :  { %5814 = vpow2.f32 %v3711_v30  ;;  %v3988_v9 = vmul.f32 %v3987_v19, %v3788_v39  ;;  %vm4300_vm7 = vcmp.lt.f32.partialorder %v9524_v25, 0.0001  ;;  %vm4040_vm8 = vweird.f32 %v9767_v55 }
 0x5c4   :  { %v4037_v27 = vmul.f32 %v9767_v55, %v4036_v37  ;;  %v4456_v48 = vsel %vm181_vm0, %v4398_v42, 0.0  ;;  %v3504_v50 = vmul.f32 %v9716_v63, %v9716_v63  ;;  %v4045_v59 = vand.u32 2147483648, %v9716_v63 }
 0x5c5   :  { %v3471_v22 = vmin.f32 %v9605_v11, 85.0  ;;  %v9898_v62 = vpop.eup %5810  ;;  %4457 = vadd.xlane.f32.xlu2 %v4456_v48  ;;  %v4332_v46 = vsel %vm4300_vm7, %v3564_v23, %v3988_v9  ;;  %vm4039_vm9 = vweird.f32 %v9716_v63  ;;  %v4043_v25 = vand.u32 2147483647, %v9716_v63 }
 0x5c6   :  { %v4038_v38 = vadd.f32 %v9767_v55, %v4037_v27  ;;  %5816 = vrcp.f32 %v9881_v31  ;;  %v9905_v43 = vmul.f32 %v4332_v46, %v8915_v2  ;;  %vm9907_vm10 = vmor %vm4039_vm9, %vm4040_vm8  ;;  %v3277_v17 = vsel %vm3276_vm4, %v9735_v12, %v3275_v1 }
 0x5c7   :  { %v3613_v8 = vmul.f32 1.442695, %v3471_v22  ;;  %v3663_v51 = vsub.f32 0.0, %v3471_v22  ;;  %v5813_v56 = vpop.eup %5812  ;;  %v3285_v35 = vsub.f32 1.5, %v3284_v18  ;;  %v4020_v2 = vmul.f32 %v9648_v4, %v9605_v11 }
 0x5c8   :  { %v4042_v52 = vsel %vm9907_vm10, %v9767_v55, %v4038_v38  ;;  %v4396_v21 = vmul.f32 %v9905_v43, %v9905_v43  ;;  %v3294_v60 = vmul.f32 %v9898_v62, %v9870_v57  ;;  %v3536_v10 = vmul.f32 0.16666667, %v3504_v50 }
 0x5c9   :  { %v5815_v26 = vpop.eup %5814  ;;  %v4046_v58 = vor.u32 1.1754944e-38, %v4045_v59  ;;  %vm4044_vm11 = vcmp.eq.f32.partialorder %v4043_v25, 8.507059e+37  ;;  %v3709_v20 = vmul.f32 1.442695, %v3663_v51  ;;  %v4021_v29 = vsub.f32 1.0, %v4020_v2 }
 0x5ca   :  { %v3760_v3 = vsub.f32 %v5813_v56, %v5815_v26  ;;  %v3280_v55 = vsel %vm3278_vm6, %v3279_v7, %v3277_v17  ;;  %v4450_v41 = vsel %vm181_vm0, %v4396_v21, 0.0  ;;  %5818 = vpow2.f32 %v3613_v8 }
 0x5cb   :  { %v4047_v0 = vsel %vm4044_vm11, %v4046_v58, %v4042_v52  ;;  %v3286_v13 = vmul.f32 %v9836_v61, %v3285_v35  ;;  %4451 = vadd.xlane.f32.xlu0 %v4450_v41  ;;  %5820 = vpow2.f32 %v3709_v20  ;;  %v4022_v30 = vmul.f32 %v9648_v4, %v4021_v29 }
 0x5cc   :  { %v3792_v19 = vmul.f32 0.5, %v3760_v3  ;;  %v9932_v1 = vpop.eup %5816  ;;  %v3295_v39 = vmul.f32 %v9898_v62, %v3294_v60  ;;  %v3568_v37 = vadd.f32 1.0, %v3536_v10  ;;  %vm4025_vm12 = vweird.f32 %v9648_v4  ;;  %v9970_v60 = vpop.xlane.xlu1 %3015 }
 0x5cd   :  { %5822 = vrsqrt.f32 %v9923_v15  ;;  %v3503_v7 = vmul.f32 %v9605_v11, %v9605_v11  ;;  %v4023_v61 = vadd.f32 %v9648_v4, %v4022_v30  ;;  %v4030_v18 = vand.u32 2147483648, %v9605_v11 }
 0x5ce   :  { %v4048_v12 = vmul.f32 %v4047_v0, %v3792_v19  ;;  %v9941_v42 = vmax.f32 %v3280_v55, 1e-15  ;;  %vm4304_vm13 = vcmp.lt.f32.partialorder %v9716_v63, 0.0001  ;;  %vm4024_vm14 = vweird.f32 %v9605_v11 }
 0x5cf   :  { %v4028_v23 = vand.u32 2147483647, %v9605_v11  ;;  %v3287_v9 = vmul.f32 %v3286_v13, %v9813_v36  ;;  %vm3288_vm15 = vcmp.eq.f32.partialorder %v9813_v36, inf  ;;  %vm9948_vm1 = vmor %vm4024_vm14, %vm4025_vm12  ;;  %v3473_v50 = vmin.f32 %v9741_v16, 85.0 }
 0x5d0   :  { %v4336_v27 = vsel %vm4304_vm13, %v3568_v37, %v4048_v12  ;;  %v5819_v59 = vpop.eup %5818  ;;  %v3296_v22 = vmul.f32 0.5, %v3295_v39  ;;  %v4027_v63 = vsel %vm9948_vm1, %v9648_v4, %v4023_v61  ;;  %v4050_v38 = vmul.f32 %v9778_v54, %v9741_v16 }
 0x5d1   :  { %v9954_v46 = vmul.f32 %v4336_v27, %v8943_v32  ;;  %v5821_v25 = vpop.eup %5820  ;;  %v3535_v44 = vmul.f32 0.16666667, %v3503_v7  ;;  %v4031_v8 = vor.u32 1.1754944e-38, %v4030_v18  ;;  %v3617_v51 = vmul.f32 1.442695, %v3473_v50 }
 0x5d2   :  { %v3665_v56 = vsub.f32 0.0, %v3473_v50  ;;  %v3759_v52 = vsub.f32 %v5819_v59, %v5821_v25  ;;  %vm4029_vm2 = vcmp.eq.f32.partialorder %v4028_v23, 8.507059e+37  ;;  %v4051_v32 = vsub.f32 1.0, %v4050_v38 }
 0x5d3   :  { %v9961_v17 = vpop.eup %5822  ;;  %v4400_v35 = vmul.f32 %v9954_v46, %v9954_v46  ;;  %v3289_v4 = vsel %vm3288_vm15, %v9813_v36, %v3287_v9  ;;  %v4032_v2 = vsel %vm4029_vm2, %v4031_v8, %v4027_v63  ;;  %5824 = vpow2.f32 %v3617_v51 }
 0x5d4   :  { %v3306_v26 = vmul.f32 %v9961_v17, %v9923_v15  ;;  %v3713_v21 = vmul.f32 1.442695, %v3665_v56  ;;  %v3791_v58 = vmul.f32 0.5, %v3759_v52  ;;  %v4052_v3 = vmul.f32 %v9778_v54, %v4051_v32 }
 0x5d5   :  { %v4462_v10 = vsel %vm181_vm0, %v4400_v35, 0.0  ;;  %v3297_v20 = vsub.f32 1.5, %v3296_v22  ;;  %v3567_v29 = vadd.f32 1.0, %v3535_v44  ;;  %vm4055_vm3 = vweird.f32 %v9778_v54 }
 0x5d6   :  { %4463 = vadd.xlane.f32.xlu1 %v4462_v10  ;;  %5826 = vpow2.f32 %v3713_v21  ;;  %v4033_v55 = vmul.f32 %v4032_v2, %v3791_v58  ;;  %v3307_v41 = vmul.f32 %v9961_v17, %v3306_v26  ;;  %v4053_v0 = vadd.f32 %v9778_v54, %v4052_v3  ;;  %v10019_v21 = vpop.xlane.xlu2 %3018 }
 0x5d7   :  { %5828 = vrsqrt.f32 %v9970_v60  ;;  %vm3290_vm4 = vcmp.eq.f32.partialorder %v9813_v36, 0.0  ;;  %v3291_v13 = vand.u32 2147483648, %v9813_v36  ;;  %vm4303_vm5 = vcmp.lt.f32.partialorder %v9605_v11, 0.0001 }
 0x5d8   :  { %v4060_v19 = vand.u32 2147483648, %v9741_v16  ;;  %v4335_v30 = vsel %vm4303_vm5, %v3567_v29, %v4033_v55  ;;  %v3505_v39 = vmul.f32 %v9741_v16, %v9741_v16  ;;  %vm4054_vm6 = vweird.f32 %v9741_v16 }
 0x5d9   :  { %v4058_v37 = vand.u32 2147483647, %v9741_v16  ;;  %5830 = vrcp.f32 %v9941_v42  ;;  %v3292_v12 = vsel %vm3290_vm4, %v3291_v13, %v3289_v4  ;;  %v9988_v7 = vmul.f32 %v4335_v30, %v8936_v47  ;;  %vm9992_vm7 = vmor %vm4054_vm6, %vm4055_vm3  ;;  %v5825_v61 = vpop.eup %5824 }
 0x5da   :  { %v3474_v36 = vmin.f32 %v9756_v40, 85.0  ;;  %v3298_v18 = vmul.f32 %v9898_v62, %v3297_v20  ;;  %v3308_v23 = vmul.f32 0.5, %v3307_v41  ;;  %v4057_v9 = vsel %vm9992_vm7, %v9778_v54, %v4053_v0 }
 0x5db   :  { %v4065_v47 = vmul.f32 %v9800_v24, %v9756_v40  ;;  %v4399_v48 = vmul.f32 %v9988_v7, %v9988_v7  ;;  %v4061_v50 = vor.u32 1.1754944e-38, %v4060_v19  ;;  %v3537_v38 = vmul.f32 0.16666667, %v3505_v39 }
 0x5dc   :  { %v5827_v27 = vpop.eup %5826  ;;  %v3619_v59 = vmul.f32 1.442695, %v3474_v36  ;;  %v3666_v22 = vsub.f32 0.0, %v3474_v36  ;;  %vm4059_vm8 = vcmp.eq.f32.partialorder %v4058_v37, 8.507059e+37  ;;  %vm3300_vm9 = vcmp.eq.f32.partialorder %v9870_v57, inf }
 0x5dd   :  { %v10005_v63 = vpop.eup %5828  ;;  %v3761_v25 = vsub.f32 %v5825_v61, %v5827_v27  ;;  %v4066_v62 = vsub.f32 1.0, %v4065_v47  ;;  %v4459_v54 = vsel %vm181_vm0, %v4399_v48, 0.0  ;;  %v4062_v44 = vsel %vm4059_vm8, %v4061_v50, %v4057_v9 }
 0x5de   :  { %v3318_v8 = vmul.f32 %v10005_v63, %v9970_v60  ;;  %4460 = vadd.xlane.f32.xlu0 %v4459_v54  ;;  %v3309_v51 = vsub.f32 1.5, %v3308_v23  ;;  %v3715_v35 = vmul.f32 1.442695, %v3666_v22  ;;  %v10014_v4 = vmax.f32 %v3292_v12, 1e-15 }
 0x5df   :  { %v3793_v56 = vmul.f32 0.5, %v3761_v25  ;;  %v4067_v52 = vmul.f32 %v9800_v24, %v4066_v62  ;;  %v10012_v32 = vpop.eup %5830  ;;  %v3299_v2 = vmul.f32 %v3298_v18, %v9870_v57  ;;  %vm3302_vm10 = vcmp.eq.f32.partialorder %v9870_v57, 0.0 }
 0x5e0   :  { %v3303_v26 = vand.u32 2147483648, %v9870_v57  ;;  %5832 = vpow2.f32 %v3619_v59  ;;  %v3569_v10 = vadd.f32 1.0, %v3537_v38  ;;  %v3319_v3 = vmul.f32 %v10005_v63, %v3318_v8 }
 0x5e1   :  { %v4063_v58 = vmul.f32 %v4062_v44, %v3793_v56  ;;  %5834 = vpow2.f32 %v3715_v35  ;;  %vm4305_vm11 = vcmp.lt.f32.partialorder %v9741_v16, 0.0001  ;;  %v3506_v20 = vmul.f32 %v9756_v40, %v9756_v40 }
 0x5e2   :  { %v4068_v29 = vadd.f32 %v9800_v24, %v4067_v52  ;;  %vm4070_vm12 = vweird.f32 %v9800_v24  ;;  %v3310_v55 = vmul.f32 %v9961_v17, %v3309_v51  ;;  %v4075_v0 = vand.u32 2147483648, %v9756_v40  ;;  %v10063_v51 = vpop.xlane.xlu0 %3021 }
 0x5e3   :  { %v4337_v41 = vsel %vm4305_vm11, %v3569_v10, %v4063_v58  ;;  %5836 = vrsqrt.f32 %v10019_v21  ;;  %vm4069_vm13 = vweird.f32 %v9756_v40  ;;  %v4073_v16 = vand.u32 2147483647, %v9756_v40 }
 0x5e4   :  { %5838 = vrcp.f32 %v10014_v4  ;;  %v10032_v13 = vmul.f32 %v4337_v41, %v8952_v45  ;;  %v3301_v19 = vsel %vm3300_vm9, %v9870_v57, %v3299_v2  ;;  %vm3312_vm14 = vcmp.eq.f32.partialorder %v9923_v15, inf  ;;  %vm10040_vm15 = vmor %vm4069_vm13, %vm4070_vm12 }
 0x5e5   :  { %v3320_v17 = vmul.f32 0.5, %v3319_v3  ;;  %v3475_v39 = vmin.f32 %v9881_v31, 85.0  ;;  %v3538_v12 = vmul.f32 0.16666667, %v3506_v20  ;;  %v4072_v11 = vsel %vm10040_vm15, %v9800_v24, %v4068_v29 }
 0x5e6   :  { %v5833_v37 = vpop.eup %5832  ;;  %v4401_v45 = vmul.f32 %v10032_v13, %v10032_v13  ;;  %v4080_v36 = vmul.f32 %v9932_v1, %v9881_v31  ;;  %v3311_v18 = vmul.f32 %v3310_v55, %v9923_v15  ;;  %v4076_v23 = vor.u32 1.1754944e-38, %v4075_v0 }
 0x5e7   :  { %v5835_v61 = vpop.eup %5834  ;;  %v3621_v9 = vmul.f32 1.442695, %v3475_v39  ;;  %v3667_v47 = vsub.f32 0.0, %v3475_v39  ;;  %vm4074_vm1 = vcmp.eq.f32.partialorder %v4073_v16, 8.507059e+37  ;;  %v3304_v22 = vsel %vm3302_vm10, %v3303_v26, %v3301_v19 }
 0x5e8   :  { %v4465_v27 = vsel %vm181_vm0, %v4401_v45, 0.0  ;;  %v3762_v48 = vsub.f32 %v5833_v37, %v5835_v61  ;;  %v4081_v50 = vsub.f32 1.0, %v4080_v36  ;;  %v3321_v24 = vsub.f32 1.5, %v3320_v17 }
 0x5e9   :  { %v10054_v59 = vpop.eup %5836  ;;  %4466 = vadd.xlane.f32.xlu2 %v4465_v27  ;;  %v4077_v38 = vsel %vm4074_vm1, %v4076_v23, %v4072_v11  ;;  %v3717_v25 = vmul.f32 1.442695, %v3667_v47  ;;  %5840 = vpow2.f32 %v3621_v9  ;;  %v3313_v57 = vsel %vm3312_vm14, %v9923_v15, %v3311_v18 }
 0x5ea   :  { %v10058_v62 = vpop.eup %5838  ;;  %v3794_v54 = vmul.f32 0.5, %v3762_v48  ;;  %v3330_v44 = vmul.f32 %v10054_v59, %v10019_v21  ;;  %v4082_v8 = vmul.f32 %v9932_v1, %v4081_v50  ;;  %v3315_v56 = vand.u32 2147483648, %v9923_v15 }
 0x5eb   :  { %v3570_v35 = vadd.f32 1.0, %v3538_v12  ;;  %5842 = vpow2.f32 %v3717_v25  ;;  %vm4306_vm2 = vcmp.lt.f32.partialorder %v9756_v40, 0.0001  ;;  %vm4085_vm3 = vweird.f32 %v9932_v1  ;;  %v10113_v25 = vpop.xlane.xlu1 %3024 }
 0x5ec   :  { %v4078_v52 = vmul.f32 %v4077_v38, %v3794_v54  ;;  %v4083_v2 = vadd.f32 %v9932_v1, %v4082_v8  ;;  %v3322_v26 = vmul.f32 %v10005_v63, %v3321_v24  ;;  %v3507_v10 = vmul.f32 %v9881_v31, %v9881_v31 }
 0x5ed   :  { %v4090_v58 = vand.u32 2147483648, %v9881_v31  ;;  %5844 = vrsqrt.f32 %v10063_v51  ;;  %v3331_v20 = vmul.f32 %v10054_v59, %v3330_v44  ;;  %vm4084_vm4 = vweird.f32 %v9881_v31 }
 0x5ee   :  { %v4338_v3 = vsel %vm4306_vm2, %v3570_v35, %v4078_v52  ;;  %v4088_v40 = vand.u32 2147483647, %v9881_v31  ;;  %v10080_v29 = vmax.f32 %v3304_v22, 1e-15  ;;  %vm3314_vm5 = vcmp.eq.f32.partialorder %v9923_v15, 0.0  ;;  %vm10087_vm7 = vmor %vm4084_vm4, %vm4085_vm3 }
 0x5ef   :  { %vm3324_vm6 = vcmp.eq.f32.partialorder %v9970_v60, inf  ;;  %v10085_v63 = vmul.f32 %v4338_v3, %v8962_v6  ;;  %v5841_v41 = vpop.eup %5840  ;;  %v3316_v0 = vsel %vm3314_vm5, %v3315_v56, %v3313_v57  ;;  %vm3326_vm8 = vcmp.eq.f32.partialorder %v9970_v60, 0.0 }
 0x5f0   :  { %v4087_v16 = vsel %vm10087_vm7, %v9932_v1, %v4083_v2  ;;  %v3476_v19 = vmin.f32 %v9941_v42, 85.0  ;;  %v4095_v15 = vmul.f32 %v10012_v32, %v9941_v42  ;;  %v3323_v6 = vmul.f32 %v3322_v26, %v9970_v60  ;;  %v11661_v26 = vld [vmem:[#allocation112_spill] sm:$0xff] }
 0x5f1   :  { %v5843_v17 = vpop.eup %5842  ;;  %v4402_v30 = vmul.f32 %v10085_v63, %v10085_v63  ;;  %v3539_v39 = vmul.f32 0.16666667, %v3507_v10  ;;  %v4091_v37 = vor.u32 1.1754944e-38, %v4090_v58  ;;  %v3332_v45 = vmul.f32 0.5, %v3331_v20 }
 0x5f2   :  { %v3763_v12 = vsub.f32 %v5841_v41, %v5843_v17  ;;  %vm4089_vm9 = vcmp.eq.f32.partialorder %v4088_v40, 8.507059e+37  ;;  %v3623_v11 = vmul.f32 1.442695, %v3476_v19  ;;  %v3668_v18 = vsub.f32 0.0, %v3476_v19 }
 0x5f3   :  { %v10101_v36 = vpop.eup %5844  ;;  %v4468_v1 = vsel %vm181_vm0, %v4402_v30, 0.0  ;;  %v4092_v61 = vsel %vm4089_vm9, %v4091_v37, %v4087_v16  ;;  %v4096_v23 = vsub.f32 1.0, %v4095_v15  ;;  %v10104_v9 = vmax.f32 %v3316_v0, 1e-15 }
 0x5f4   :  { %v3327_v47 = vand.u32 2147483648, %v9970_v60  ;;  %4469 = vadd.xlane.f32.xlu0 %v4468_v1  ;;  %v3795_v27 = vmul.f32 0.5, %v3763_v12  ;;  %v3342_v48 = vmul.f32 %v10101_v36, %v10063_v51  ;;  %v3325_v50 = vsel %vm3324_vm6, %v9970_v60, %v3323_v6 }
 0x5f5   :  { %v3571_v22 = vadd.f32 1.0, %v3539_v39  ;;  %v3719_v24 = vmul.f32 1.442695, %v3668_v18  ;;  %v4097_v38 = vmul.f32 %v10012_v32, %v4096_v23  ;;  %v3333_v54 = vsub.f32 1.5, %v3332_v45 }
 0x5f6   :  { %v4093_v44 = vmul.f32 %v4092_v61, %v3795_v27  ;;  %v3343_v8 = vmul.f32 %v10101_v36, %v3342_v48  ;;  %5846 = vpow2.f32 %v3623_v11  ;;  %vm4307_vm10 = vcmp.lt.f32.partialorder %v9881_v31, 0.0001 }
 0x5f7   :  { %v3508_v57 = vmul.f32 %v9941_v42, %v9941_v42  ;;  %5848 = vpow2.f32 %v3719_v24  ;;  %vm4100_vm11 = vweird.f32 %v10012_v32  ;;  %v4098_v52 = vadd.f32 %v10012_v32, %v4097_v38  ;;  %v10166_v24 = vpop.xlane.xlu2 %3027 }
 0x5f8   :  { %v4339_v56 = vsel %vm4307_vm10, %v3571_v22, %v4093_v44  ;;  %v3344_v35 = vmul.f32 0.5, %v3343_v8  ;;  %5850 = vrsqrt.f32 %v10113_v25  ;;  %v3328_v2 = vsel %vm3326_vm8, %v3327_v47, %v3325_v50 }
 0x5f9   :  { %5852 = vrcp.f32 %v10080_v29  ;;  %v10126_v10 = vmul.f32 %v4339_v56, %v11661_v26  ;;  %v4105_v31 = vand.u32 2147483648, %v9941_v42  ;;  %v3334_v58 = vmul.f32 %v10054_v59, %v3333_v54  ;;  %v11664_v26 = vld [vmem:[#allocation114_spill] sm:$0xff] }
 0x5fa   :  { %5854 = vrcp.f32 %v10104_v9  ;;  %vm3336_vm12 = vcmp.eq.f32.partialorder %v10019_v21, inf  ;;  %vm4099_vm13 = vweird.f32 %v9941_v42  ;;  %v4103_v3 = vand.u32 2147483647, %v9941_v42 }
 0x5fb   :  { %v3339_v20 = vand.u32 2147483648, %v10019_v21  ;;  %v4403_v60 = vmul.f32 %v10126_v10, %v10126_v10  ;;  %vm10139_vm14 = vmor %vm4099_vm13, %vm4100_vm11  ;;  %v3477_v55 = vmin.f32 %v10014_v4, 85.0  ;;  %v4110_v59 = vmul.f32 %v10058_v62, %v10014_v4 }
 0x5fc   :  { %v5847_v41 = vpop.eup %5846  ;;  %v10146_v0 = vmax.f32 %v3328_v2, 1e-15  ;;  %v3345_v16 = vsub.f32 1.5, %v3344_v35  ;;  %v3540_v19 = vmul.f32 0.16666667, %v3508_v57  ;;  %v4102_v15 = vsel %vm10139_vm14, %v10012_v32, %v4098_v52 }
 0x5fd   :  { %v5849_v17 = vpop.eup %5848  ;;  %vm3338_vm15 = vcmp.eq.f32.partialorder %v10019_v21, 0.0  ;;  %v4471_v6 = vsel %vm181_vm0, %v4403_v60, 0.0  ;;  %v4106_v30 = vor.u32 1.1754944e-38, %v4105_v31  ;;  %v3625_v39 = vmul.f32 1.442695, %v3477_v55 }
 0x5fe   :  { %v3669_v37 = vsub.f32 0.0, %v3477_v55  ;;  %v10153_v45 = vpop.eup %5850  ;;  %v3335_v12 = vmul.f32 %v3334_v58, %v10019_v21  ;;  %4472 = vadd.xlane.f32.xlu1 %v4471_v6  ;;  %v3764_v11 = vsub.f32 %v5847_v41, %v5849_v17  ;;  %vm4104_vm1 = vcmp.eq.f32.partialorder %v4103_v3, 8.507059e+37 }
 0x5ff   :  { %v4111_v1 = vsub.f32 1.0, %v4110_v59  ;;  %v10156_v61 = vpop.eup %5852  ;;  %v4107_v18 = vsel %vm4104_vm1, %v4106_v30, %v4102_v15  ;;  %v3354_v32 = vmul.f32 %v10153_v45, %v10113_v25  ;;  %v3509_v23 = vmul.f32 %v10014_v4, %v10014_v4 }
 0x600   :  { %v3721_v47 = vmul.f32 1.442695, %v3669_v37  ;;  %v10162_v27 = vpop.eup %5854  ;;  %v3346_v48 = vmul.f32 %v10101_v36, %v3345_v16  ;;  %v3796_v50 = vmul.f32 0.5, %v3764_v11  ;;  %5856 = vpow2.f32 %v3625_v39 }
 0x601   :  { %v4112_v22 = vmul.f32 %v10058_v62, %v4111_v1  ;;  %vm3348_vm2 = vcmp.eq.f32.partialorder %v10063_v51, inf  ;;  %v3572_v38 = vadd.f32 1.0, %v3540_v19  ;;  %v3355_v54 = vmul.f32 %v10153_v45, %v3354_v32 }
 0x602   :  { %5858 = vpow2.f32 %v3721_v47  ;;  %v4108_v44 = vmul.f32 %v4107_v18, %v3796_v50  ;;  %vm4115_vm3 = vweird.f32 %v10058_v62  ;;  %v4118_v57 = vand.u32 2147483647, %v10014_v4 }
 0x603   :  { %v4113_v8 = vadd.f32 %v10058_v62, %v4112_v22  ;;  %v3337_v36 = vsel %vm3336_vm12, %v10019_v21, %v3335_v12  ;;  %vm4308_vm4 = vcmp.lt.f32.partialorder %v9941_v42, 0.0001  ;;  %v4120_v56 = vand.u32 2147483648, %v10014_v4 }
 0x604   :  { %5860 = vrsqrt.f32 %v10166_v24  ;;  %v3347_v35 = vmul.f32 %v3346_v48, %v10063_v51  ;;  %v4340_v52 = vsel %vm4308_vm4, %v3572_v38, %v4108_v44  ;;  %v3541_v2 = vmul.f32 0.16666667, %v3509_v23  ;;  %v10208_v23 = vpop.xlane.xlu0 %3030 }
 0x605   :  { %vm4114_vm5 = vweird.f32 %v10014_v4  ;;  %5862 = vrcp.f32 %v10146_v0  ;;  %v10183_v31 = vmul.f32 %v4340_v52, %v11664_v26  ;;  %v3356_v58 = vmul.f32 0.5, %v3355_v54 }
 0x606   :  { %vm10185_vm6 = vmor %vm4114_vm5, %vm4115_vm3  ;;  %v3478_v42 = vmin.f32 %v10080_v29, 85.0  ;;  %v5857_v60 = vpop.eup %5856  ;;  %v3340_v40 = vsel %vm3338_vm15, %v3339_v20, %v3337_v36  ;;  %vm4119_vm7 = vcmp.eq.f32.partialorder %v4118_v57, 8.507059e+37  ;;  %v4125_v59 = vmul.f32 %v10156_v61, %v10080_v29 }
 0x607   :  { %v4117_v55 = vsel %vm10185_vm6, %v10058_v62, %v4113_v8  ;;  %v4404_v16 = vmul.f32 %v10183_v31, %v10183_v31  ;;  %v4121_v19 = vor.u32 1.1754944e-38, %v4120_v56  ;;  %v3349_v21 = vsel %vm3348_vm2, %v10063_v51, %v3347_v35  ;;  %v11670_v56 = vld [vmem:[#allocation45_spill] sm:$0xff] }
 0x608   :  { %v5859_v41 = vpop.eup %5858  ;;  %v3627_v15 = vmul.f32 1.442695, %v3478_v42  ;;  %v3670_v17 = vsub.f32 0.0, %v3478_v42  ;;  %v3573_v20 = vadd.f32 1.0, %v3541_v2  ;;  %v4126_v30 = vsub.f32 1.0, %v4125_v59 }
 0x609   :  { %v3765_v6 = vsub.f32 %v5857_v60, %v5859_v41  ;;  %v4474_v62 = vsel %vm181_vm0, %v4404_v16, 0.0  ;;  %v3357_v37 = vsub.f32 1.5, %v3356_v58  ;;  %v4122_v12 = vsel %vm4119_vm7, %v4121_v19, %v4117_v55 }
 0x60a   :  { %v10202_v39 = vpop.eup %5860  ;;  %v3723_v11 = vmul.f32 1.442695, %v3670_v17  ;;  %4475 = vadd.xlane.f32.xlu2 %v4474_v62  ;;  %5864 = vpow2.f32 %v3627_v15  ;;  %v4127_v32 = vmul.f32 %v10156_v61, %v4126_v30  ;;  %vm4309_vm8 = vcmp.lt.f32.partialorder %v10014_v4, 0.0001 }
 0x60b   :  { %v3797_v1 = vmul.f32 0.5, %v3765_v6  ;;  %v3366_v18 = vmul.f32 %v10202_v39, %v10166_v24  ;;  %v10210_v47 = vpop.eup %5862  ;;  %v3510_v48 = vmul.f32 %v10080_v29, %v10080_v29  ;;  %vm4130_vm9 = vweird.f32 %v10156_v61 }
 0x60c   :  { %5866 = vpow2.f32 %v3723_v11  ;;  %v4128_v38 = vadd.f32 %v10156_v61, %v4127_v32  ;;  %v4135_v54 = vand.u32 2147483648, %v10080_v29  ;;  %v3358_v44 = vmul.f32 %v10153_v45, %v3357_v37  ;;  %v11669_v45 = vld [vmem:[#allocation39_spill] sm:$0xff] }
 0x60d   :  { %v4123_v50 = vmul.f32 %v4122_v12, %v3797_v1  ;;  %v3367_v22 = vmul.f32 %v10202_v39, %v3366_v18  ;;  %vm4129_vm10 = vweird.f32 %v10080_v29  ;;  %v4133_v8 = vand.u32 2147483647, %v10080_v29 }
 0x60e   :  { %5868 = vrsqrt.f32 %v10208_v23  ;;  %v10223_v4 = vmax.f32 %v3340_v40, 1e-15  ;;  %vm3350_vm11 = vcmp.eq.f32.partialorder %v10063_v51, 0.0  ;;  %v3351_v57 = vand.u32 2147483648, %v10063_v51  ;;  %vm10227_vm12 = vmor %vm4129_vm10, %vm4130_vm9 }
 0x60f   :  { %v4341_v36 = vsel %vm4309_vm8, %v3573_v20, %v4123_v50  ;;  %vm3360_vm13 = vcmp.eq.f32.partialorder %v10113_v25, inf  ;;  %v3368_v52 = vmul.f32 0.5, %v3367_v22  ;;  %v4132_v2 = vsel %vm10227_vm12, %v10156_v61, %v4128_v38  ;;  %v10257_v22 = vpop.xlane.xlu1 %3033 }
 0x610   :  { %v10233_v35 = vmul.f32 %v4341_v36, %v11669_v45  ;;  %v5865_v26 = vpop.eup %5864  ;;  %v3352_v58 = vsel %vm3350_vm11, %v3351_v57, %v3349_v21  ;;  %vm3362_vm14 = vcmp.eq.f32.partialorder %v10113_v25, 0.0  ;;  %v3542_v51 = vmul.f32 0.16666667, %v3510_v48 }
 0x611   :  { %v4136_v3 = vor.u32 1.1754944e-38, %v4135_v54  ;;  %v3479_v42 = vmin.f32 %v10104_v9, 85.0  ;;  %v3359_v40 = vmul.f32 %v3358_v44, %v10113_v25  ;;  %vm4134_vm15 = vcmp.eq.f32.partialorder %v4133_v8, 8.507059e+37 }
 0x612   :  { %v5867_v60 = vpop.eup %5866  ;;  %v4405_v55 = vmul.f32 %v10233_v35, %v10233_v35  ;;  %v4140_v59 = vmul.f32 %v10162_v27, %v10104_v9  ;;  %5870 = vrcp.f32 %v10223_v4  ;;  %v3369_v17 = vsub.f32 1.5, %v3368_v52 }
 0x613   :  { %v3766_v61 = vsub.f32 %v5865_v26, %v5867_v60  ;;  %v4137_v41 = vsel %vm4134_vm15, %v4136_v3, %v4132_v2  ;;  %v3629_v16 = vmul.f32 1.442695, %v3479_v42  ;;  %v3671_v21 = vsub.f32 0.0, %v3479_v42 }
 0x614   :  { %v5869_v19 = vpop.eup %5868  ;;  %v4477_v15 = vsel %vm181_vm0, %v4405_v55, 0.0  ;;  %v4141_v20 = vsub.f32 1.0, %v4140_v59  ;;  %v10247_v6 = vmax.f32 %v3352_v58, 1e-15  ;;  %v3363_v30 = vand.u32 2147483648, %v10113_v25 }
 0x615   :  { %4478 = vadd.xlane.f32.xlu0 %v4477_v15  ;;  %v3798_v62 = vmul.f32 0.5, %v3766_v61  ;;  %v3378_v37 = vmul.f32 %v5869_v19, %v10208_v23  ;;  %v3361_v12 = vsel %vm3360_vm13, %v10113_v25, %v3359_v40  ;;  %v3574_v11 = vadd.f32 1.0, %v3542_v51 }
 0x616   :  { %v3725_v1 = vmul.f32 1.442695, %v3671_v21  ;;  %v4142_v18 = vmul.f32 %v10162_v27, %v4141_v20  ;;  %v3511_v50 = vmul.f32 %v10104_v9, %v10104_v9  ;;  %5872 = vpow2.f32 %v3629_v16 }
 0x617   :  { %v4138_v32 = vmul.f32 %v4137_v41, %v3798_v62  ;;  %v3379_v48 = vmul.f32 %v5869_v19, %v3378_v37  ;;  %v3370_v38 = vmul.f32 %v10202_v39, %v3369_v17  ;;  %vm3372_vm1 = vcmp.eq.f32.partialorder %v10166_v24, inf }
 0x618   :  { %vm4310_vm2 = vcmp.lt.f32.partialorder %v10080_v29, 0.0001  ;;  %5874 = vpow2.f32 %v3725_v1  ;;  %v10262_v54 = vpop.eup %5870  ;;  %v4143_v57 = vadd.f32 %v10162_v27, %v4142_v18  ;;  %vm4145_vm3 = vweird.f32 %v10162_v27 }
 0x619   :  { %v4342_v44 = vsel %vm4310_vm2, %v3574_v11, %v4138_v32  ;;  %v3380_v8 = vmul.f32 0.5, %v3379_v48  ;;  %v3364_v36 = vsel %vm3362_vm14, %v3363_v30, %v3361_v12  ;;  %v4150_v39 = vand.u32 2147483648, %v10104_v9  ;;  %v4419_v48 = vpop.xlane.xlu1 %4418 }
 0x61a   :  { %v10269_v45 = vmul.f32 %v4342_v44, %v11670_v56  ;;  %5876 = vrsqrt.f32 %v10257_v22  ;;  %v3543_v29 = vmul.f32 0.16666667, %v3511_v50  ;;  %vm4144_vm4 = vweird.f32 %v10104_v9  ;;  %v10302_v50 = vpop.xlane.xlu2 %3036 }
 0x61b   :  { %5878 = vrcp.f32 %v10247_v6  ;;  %v4148_v52 = vand.u32 2147483647, %v10104_v9  ;;  %v3371_v2 = vmul.f32 %v3370_v38, %v10166_v24  ;;  %v3381_v26 = vsub.f32 1.5, %v3380_v8  ;;  %vm10279_vm5 = vmor %vm4144_vm4, %vm4145_vm3 }
 0x61c   :  { %v4406_v25 = vmul.f32 %v10269_v45, %v10269_v45  ;;  %v3480_v51 = vmin.f32 %v10146_v0, 85.0  ;;  %v5873_v3 = vpop.eup %5872  ;;  %v10284_v42 = vmax.f32 %v3364_v36, 1e-15  ;;  %v3375_v60 = vand.u32 2147483648, %v10166_v24 }
 0x61d   :  { %v4147_v40 = vsel %vm10279_vm5, %v10162_v27, %v4143_v57  ;;  %v4155_v55 = vmul.f32 %v10210_v47, %v10146_v0  ;;  %vm3374_vm6 = vcmp.eq.f32.partialorder %v10166_v24, 0.0  ;;  %v4151_v41 = vor.u32 1.1754944e-38, %v4150_v39 }
 0x61e   :  { %v5875_v59 = vpop.eup %5874  ;;  %v4480_v61 = vsel %vm181_vm0, %v4406_v25, 0.0  ;;  %v3631_v16 = vmul.f32 1.442695, %v3480_v51  ;;  %v3672_v15 = vsub.f32 0.0, %v3480_v51  ;;  %v3575_v17 = vadd.f32 1.0, %v3543_v29 }
 0x61f   :  { %4481 = vadd.xlane.f32.xlu1 %v4480_v61  ;;  %v3767_v21 = vsub.f32 %v5873_v3, %v5875_v59  ;;  %vm4149_vm7 = vcmp.eq.f32.partialorder %v4148_v52, 8.507059e+37  ;;  %v4156_v20 = vsub.f32 1.0, %v4155_v55  ;;  %v3373_v27 = vsel %vm3372_vm1, %v10166_v24, %v3371_v2  ;;  %v11675_v2 = vld [vmem:[#allocation61_spill] sm:$0xff] }
 0x620   :  { %v5877_v30 = vpop.eup %5876  ;;  %v3382_v62 = vmul.f32 %v5869_v19, %v3381_v26  ;;  %vm3384_vm8 = vcmp.eq.f32.partialorder %v10208_v23, inf  ;;  %v4152_v37 = vsel %vm4149_vm7, %v4151_v41, %v4147_v40  ;;  %v3727_v12 = vmul.f32 1.442695, %v3672_v15 }
 0x621   :  { %v10298_v11 = vpop.eup %5878  ;;  %v3799_v1 = vmul.f32 0.5, %v3767_v21  ;;  %v3390_v18 = vmul.f32 %v5877_v30, %v10257_v22  ;;  %5880 = vpow2.f32 %v3631_v16  ;;  %v4157_v32 = vmul.f32 %v10210_v47, %v4156_v20 }
 0x622   :  { %vm4311_vm9 = vcmp.lt.f32.partialorder %v10104_v9, 0.0001  ;;  %v3512_v19 = vmul.f32 %v10146_v0, %v10146_v0  ;;  %5882 = vpow2.f32 %v3727_v12  ;;  %vm4160_vm10 = vweird.f32 %v10210_v47 }
 0x623   :  { %v4153_v38 = vmul.f32 %v4152_v37, %v3799_v1  ;;  %v3391_v44 = vmul.f32 %v5877_v30, %v3390_v18  ;;  %v4158_v8 = vadd.f32 %v10210_v47, %v4157_v32  ;;  %v4165_v57 = vand.u32 2147483648, %v10146_v0 }
 0x624   :  { %vm4159_vm11 = vweird.f32 %v10146_v0  ;;  %v4163_v36 = vand.u32 2147483647, %v10146_v0  ;;  %v4513_v56 = vadd.f32 1.0, %v4419_v48  ;;  %5884 = vrsqrt.f32 %v10302_v50 }
 0x625   :  { %5886 = vrcp.f32 %v10284_v42  ;;  %v3383_v9 = vmul.f32 %v3382_v62, %v10208_v23  ;;  %v4343_v39 = vsel %vm4311_vm9, %v3575_v17, %v4153_v38  ;;  %v3392_v29 = vmul.f32 0.5, %v3391_v44  ;;  %vm10315_vm12 = vmor %vm4159_vm11, %vm4160_vm10 }
 0x626   :  { %vm3386_vm13 = vcmp.eq.f32.partialorder %v10208_v23, 0.0  ;;  %v10321_v25 = vmul.f32 %v4343_v39, %v11675_v2  ;;  %v4162_v26 = vsel %vm10315_vm12, %v10210_v47, %v4158_v8  ;;  %v10326_v58 = vmax.f32 %v4513_v56, 1e-07 }
 0x627   :  { %v5881_v51 = vpop.eup %5880  ;;  %v3376_v3 = vsel %vm3374_vm6, %v3375_v60, %v3373_v27  ;;  %v3393_v40 = vsub.f32 1.5, %v3392_v29  ;;  %v4166_v55 = vor.u32 1.1754944e-38, %v4165_v57  ;;  %v3481_v59 = vmin.f32 %v10223_v4, 85.0 }
 0x628   :  { %v5883_v61 = vpop.eup %5882  ;;  %v4407_v41 = vmul.f32 %v10321_v25, %v10321_v25  ;;  %v3544_v16 = vmul.f32 0.16666667, %v3512_v19  ;;  %vm4164_vm14 = vcmp.eq.f32.partialorder %v4163_v36, 8.507059e+37  ;;  %5888 = vrsqrt.f32 %v10326_v58 }
 0x629   :  { %v3385_v47 = vsel %vm3384_vm8, %v10208_v23, %v3383_v9  ;;  %v3394_v15 = vmul.f32 %v5877_v30, %v3393_v40  ;;  %v3768_v17 = vsub.f32 %v5881_v51, %v5883_v61  ;;  %v4167_v24 = vsel %vm4164_vm14, %v4166_v55, %v4162_v26  ;;  %v10369_v61 = vpop.xlane.xlu0 %3039 }
 0x62a   :  { %v10337_v60 = vpop.eup %5884  ;;  %v4483_v21 = vsel %vm181_vm0, %v4407_v41, 0.0  ;;  %v3633_v20 = vmul.f32 1.442695, %v3481_v59  ;;  %v3673_v27 = vsub.f32 0.0, %v3481_v59  ;;  %v4170_v62 = vmul.f32 %v10262_v54, %v10223_v4 }
 0x62b   :  { %v10342_v37 = vpop.eup %5886  ;;  %v10344_v12 = vmax.f32 %v3376_v3, 1e-15  ;;  %v3387_v1 = vand.u32 2147483648, %v10208_v23  ;;  %4484 = vadd.xlane.f32.xlu2 %v4483_v21  ;;  %v3800_v18 = vmul.f32 0.5, %v3768_v17  ;;  %v3402_v30 = vmul.f32 %v10337_v60, %v10302_v50  ;;  %v11676_v23 = vld [vmem:[#allocation54_spill] sm:$0xff]  ;;  %v4422_v3 = vpop.xlane.xlu2 %4421 }
 0x62c   :  { %vm3396_vm15 = vcmp.eq.f32.partialorder %v10257_v22, inf  ;;  %v3576_v32 = vadd.f32 1.0, %v3544_v16  ;;  %v3729_v48 = vmul.f32 1.442695, %v3673_v27  ;;  %v4171_v19 = vsub.f32 1.0, %v4170_v62 }
 0x62d   :  { %v3388_v38 = vsel %vm3386_vm13, %v3387_v1, %v3385_v47  ;;  %vm3398_vm1 = vcmp.eq.f32.partialorder %v10257_v22, 0.0  ;;  %v4168_v44 = vmul.f32 %v4167_v24, %v3800_v18  ;;  %v3403_v8 = vmul.f32 %v10337_v60, %v3402_v30 }
 0x62e   :  { %5890 = vpow2.f32 %v3633_v20  ;;  %v5889_v57 = vpop.eup %5888  ;;  %v3395_v36 = vmul.f32 %v3394_v15, %v10257_v22  ;;  %vm4312_vm2 = vcmp.lt.f32.partialorder %v10146_v0, 0.0001  ;;  %v4172_v56 = vmul.f32 %v10262_v54, %v4171_v19  ;;  %v4428_v0 = vpop.xlane.xlu1 %4427 }
 0x62f   :  { %5892 = vpow2.f32 %v3729_v48  ;;  %v4344_v9 = vsel %vm4312_vm2, %v3576_v32, %v4168_v44  ;;  %v4578_v39 = vmul.f32 %v5889_v57, %v10326_v58  ;;  %v3404_v29 = vmul.f32 0.5, %v3403_v8 }
 0x630   :  { %vm4175_vm3 = vweird.f32 %v10262_v54  ;;  %v10360_v52 = vmul.f32 %v4344_v9, %v11676_v23  ;;  %v3513_v2 = vmul.f32 %v10223_v4, %v10223_v4  ;;  %v4173_v26 = vadd.f32 %v10262_v54, %v4172_v56 }
 0x631   :  { %v4180_v51 = vand.u32 2147483648, %v10223_v4  ;;  %v3399_v40 = vand.u32 2147483648, %v10257_v22  ;;  %v4579_v55 = vmul.f32 %v5889_v57, %v4578_v39  ;;  %vm4174_vm4 = vweird.f32 %v10223_v4  ;;  %v11679_v39 = vld [vmem:[#allocation4_spill] sm:$0xff] }
 0x632   :  { %v4178_v59 = vand.u32 2147483647, %v10223_v4  ;;  %v10371_v41 = vmax.f32 %v3388_v38, 1e-15  ;;  %v3397_v16 = vsel %vm3396_vm15, %v10257_v22, %v3395_v36  ;;  %v4408_v47 = vmul.f32 %v10360_v52, %v10360_v52  ;;  %vm10380_vm5 = vmor %vm4174_vm4, %vm4175_vm3 }
 0x633   :  { %v3405_v15 = vsub.f32 1.5, %v3404_v29  ;;  %v4580_v21 = vmul.f32 0.5, %v4579_v55  ;;  %v4177_v20 = vsel %vm10380_vm5, %v10262_v54, %v4173_v26  ;;  %v4516_v27 = vadd.f32 1.0, %v4428_v0 }
 0x634   :  { %v5891_v24 = vpop.eup %5890  ;;  %v4514_v62 = vadd.f32 1.0, %v4422_v3  ;;  %v4486_v18 = vsel %vm181_vm0, %v4408_v47, 0.0  ;;  %v3545_v30 = vmul.f32 0.16666667, %v3513_v2  ;;  %v4181_v32 = vor.u32 1.1754944e-38, %v4180_v51  ;;  %v11680_v47 = vld [vmem:[#allocation37_spill] sm:$0xff] }
 0x635   :  { %v5893_v1 = vpop.eup %5892  ;;  %5894 = vrsqrt.f32 %v10369_v61  ;;  %4487 = vadd.xlane.f32.xlu0 %v4486_v18  ;;  %v4581_v48 = vsub.f32 1.5, %v4580_v21  ;;  %vm4179_vm6 = vcmp.eq.f32.partialorder %v4178_v59, 8.507059e+37  ;;  %v10389_v38 = vmax.f32 %v4516_v27, 1e-07 }
 0x636   :  { %v3769_v19 = vsub.f32 %v5891_v24, %v5893_v1  ;;  %5896 = vrcp.f32 %v10344_v12  ;;  %v3400_v54 = vsel %vm3398_vm1, %v3399_v40, %v3397_v16  ;;  %v4182_v44 = vsel %vm4179_vm6, %v4181_v32, %v4177_v20  ;;  %v11681_v32 = vld [vmem:[#allocation73_spill] sm:$0xff] }
 0x637   :  { %v10394_v8 = vmax.f32 %v4514_v62, 1e-07  ;;  %v4582_v36 = vmul.f32 %v5889_v57, %v4581_v48  ;;  %v3406_v56 = vmul.f32 %v10337_v60, %v3405_v15  ;;  %5898 = vrsqrt.f32 %v10389_v38 }
 0x638   :  { %v3801_v9 = vmul.f32 0.5, %v3769_v19  ;;  %5900 = vrcp.f32 %v10371_v41  ;;  %v10400_v29 = vsub.f32 1.0, %v11679_v39  ;;  %vm4584_vm7 = vcmp.eq.f32.partialorder %v10326_v58, inf  ;;  %v4437_v39 = vpop.xlane.xlu1 %4436 }
 0x639   :  { %v3482_v23 = vmin.f32 %v10247_v6, 85.0  ;;  %v4583_v22 = vmul.f32 %v4582_v36, %v10326_v58  ;;  %v3577_v2 = vadd.f32 1.0, %v3545_v30  ;;  %5902 = vrsqrt.f32 %v10394_v8 }
 0x63a   :  { %v4183_v26 = vmul.f32 %v4182_v44, %v3801_v9  ;;  %v10408_v60 = vmax.f32 %v3400_v54, 1e-15  ;;  %vm4586_vm8 = vcmp.eq.f32.partialorder %v10326_v58, 0.0  ;;  %v4587_v51 = vand.u32 2147483648, %v10326_v58 }
 0x63b   :  { %v10406_v57 = vpop.eup %5894  ;;  %vm4313_vm9 = vcmp.lt.f32.partialorder %v10223_v4, 0.0001  ;;  %v4585_v0 = vsel %vm4584_vm7, %v10326_v58, %v4583_v22  ;;  %v3407_v3 = vmul.f32 %v3406_v56, %v10302_v50  ;;  %vm3408_vm10 = vcmp.eq.f32.partialorder %v10302_v50, inf }
 0x63c   :  { %v4345_v40 = vsel %vm4313_vm9, %v3577_v2, %v4183_v26  ;;  %v3414_v55 = vmul.f32 %v10406_v57, %v10369_v61  ;;  %v10417_v59 = vpop.eup %5896  ;;  %v4588_v16 = vsel %vm4586_vm8, %v4587_v51, %v4585_v0  ;;  %v3635_v17 = vmul.f32 1.442695, %v3482_v23  ;;  %v4431_v51 = vpop.xlane.xlu2 %4430 }
 0x63d   :  { %v10421_v15 = vmul.f32 %v4345_v40, %v11680_v47  ;;  %v5899_v24 = vpop.eup %5898  ;;  %v4962_v4 = vmul.f32 %v10400_v29, %v4588_v16  ;;  %v3674_v21 = vsub.f32 0.0, %v3482_v23  ;;  %v4185_v20 = vmul.f32 %v10298_v11, %v10247_v6  ;;  %v4425_v16 = vpop.xlane.xlu0 %4424 }
 0x63e   :  { %v3415_v58 = vmul.f32 %v10406_v57, %v3414_v55  ;;  %v10427_v27 = vpop.eup %5900  ;;  %5904 = vrcp.f32 %v10408_v60  ;;  %v3411_v62 = vand.u32 2147483648, %v10302_v50  ;;  %v4614_v18 = vmul.f32 %v5899_v24, %v10389_v38 }
 0x63f   :  { %v4409_v1 = vmul.f32 %v10421_v15, %v10421_v15  ;;  %v5903_v30 = vpop.eup %5902  ;;  %v4994_v48 = vadd.f32 %v4962_v4, %v11681_v32  ;;  %v10438_v19 = vsel %vm3408_vm10, %v10302_v50, %v3407_v3  ;;  %v3731_v54 = vmul.f32 1.442695, %v3674_v21 }
 0x640   :  { %v4186_v44 = vsub.f32 1.0, %v4185_v20  ;;  %v4615_v56 = vmul.f32 %v5899_v24, %v4614_v18  ;;  %v4590_v9 = vmul.f32 %v5903_v30, %v10394_v8  ;;  %5906 = vpow2.f32 %v3635_v17 }
 0x641   :  { %v4489_v36 = vsel %vm181_vm0, %v4409_v1, 0.0  ;;  %5026 = vst.msk [vmem:[%s11117_s2] sm:$0xff] %vm181_vm0, %v4994_v48  ;;  %vm4620_vm11 = vcmp.eq.f32.partialorder %v10389_v38, inf  ;;  %v3416_v23 = vmul.f32 0.5, %v3415_v58  ;;  %5908 = vpow2.f32 %v3731_v54 }
 0x642   :  { %4490 = vadd.xlane.f32.xlu1 %v4489_v36  ;;  %v4187_v22 = vmul.f32 %v10298_v11, %v4186_v44  ;;  %v4616_v2 = vmul.f32 0.5, %v4615_v56  ;;  %vm4622_vm12 = vcmp.eq.f32.partialorder %v10389_v38, 0.0  ;;  %v4591_v26 = vmul.f32 %v5903_v30, %v4590_v9 }
 0x643   :  { %vm4190_vm13 = vweird.f32 %v10298_v11  ;;  %v3514_v0 = vmul.f32 %v10247_v6, %v10247_v6  ;;  %v4195_v40 = vand.u32 2147483648, %v10247_v6  ;;  %v4519_v55 = vadd.f32 1.0, %v4437_v39 }
 0x644   :  { %v4188_v3 = vadd.f32 %v10298_v11, %v4187_v22  ;;  %v10454_v47 = vpop.eup %5904  ;;  %v4617_v17 = vsub.f32 1.5, %v4616_v2  ;;  %v4592_v4 = vmul.f32 0.5, %v4591_v26  ;;  %vm4189_vm14 = vweird.f32 %v10247_v6 }
 0x645   :  { %v4193_v58 = vand.u32 2147483647, %v10247_v6  ;;  %v4623_v21 = vand.u32 2147483648, %v10389_v38  ;;  %v3417_v20 = vsub.f32 1.5, %v3416_v23  ;;  %vm10459_vm15 = vmor %vm4189_vm14, %vm4190_vm13  ;;  %v10463_v18 = vmax.f32 %v4519_v55, 1e-07 }
 0x646   :  { %v4517_v32 = vadd.f32 1.0, %v4431_v51  ;;  %v5907_v48 = vpop.eup %5906  ;;  %vm3410_vm1 = vcmp.eq.f32.partialorder %v10302_v50, 0.0  ;;  %v4618_v54 = vmul.f32 %v5899_v24, %v4617_v17  ;;  %v4593_v44 = vsub.f32 1.5, %v4592_v4 }
 0x647   :  { %v4192_v36 = vsel %vm10459_vm15, %v10298_v11, %v4188_v3  ;;  %v4515_v56 = vadd.f32 1.0, %v4425_v16  ;;  %v5909_v9 = vpop.eup %5908  ;;  %vm4596_vm2 = vcmp.eq.f32.partialorder %v10394_v8, inf  ;;  %v3546_v39 = vmul.f32 0.16666667, %v3514_v0 }
 0x648   :  { %v4196_v23 = vor.u32 1.1754944e-38, %v4195_v40  ;;  %5910 = vrsqrt.f32 %v10463_v18  ;;  %v4619_v22 = vmul.f32 %v4618_v54, %v10389_v38  ;;  %v4594_v2 = vmul.f32 %v5903_v30, %v4593_v44 }
 0x649   :  { %v3770_v26 = vsub.f32 %v5907_v48, %v5909_v9  ;;  %vm4194_vm3 = vcmp.eq.f32.partialorder %v4193_v58, 8.507059e+37  ;;  %vm4598_vm4 = vcmp.eq.f32.partialorder %v10394_v8, 0.0  ;;  %v3418_v24 = vmul.f32 %v10406_v57, %v3417_v20 }
 0x64a   :  { %v4197_v51 = vsel %vm4194_vm3, %v4196_v23, %v4192_v36  ;;  %v10474_v55 = vmax.f32 %v4517_v32, 1e-07  ;;  %v4621_v11 = vsel %vm4620_vm11, %v10389_v38, %v4619_v22  ;;  %v4595_v0 = vmul.f32 %v4594_v2, %v10394_v8 }
 0x64b   :  { %v3802_v3 = vmul.f32 0.5, %v3770_v26  ;;  %v10480_v40 = vmax.f32 %v4515_v56, 1e-07  ;;  %v4624_v30 = vsel %vm4622_vm12, %v4623_v21, %v4621_v11  ;;  %v4599_v16 = vand.u32 2147483648, %v10394_v8  ;;  %v11684_v21 = vld [vmem:[#allocation42_spill] sm:$0xff]  ;;  %v11685_v56 = vld [vmem:[#allocation47_spill] sm:$0xff] }
 0x64c   :  { %v3578_v17 = vadd.f32 1.0, %v3546_v39  ;;  %v3483_v57 = vmin.f32 %v10284_v42, 85.0  ;;  %v4965_v4 = vmul.f32 %v10400_v29, %v4624_v30  ;;  %v4597_v58 = vsel %vm4596_vm2, %v10394_v8, %v4595_v0  ;;  %v11686_v39 = vld [vmem:[#allocation38_spill] sm:$0xff] }
 0x64d   :  { %v4198_v20 = vmul.f32 %v4197_v51, %v3802_v3  ;;  %5912 = vrsqrt.f32 %v10474_v55  ;;  %v4600_v32 = vsel %vm4598_vm4, %v4599_v16, %v4597_v58  ;;  %v3419_v38 = vmul.f32 %v3418_v24, %v10369_v61 }
 0x64e   :  { %v5911_v1 = vpop.eup %5910  ;;  %vm4314_vm5 = vcmp.lt.f32.partialorder %v10247_v6, 0.0001  ;;  %5914 = vrsqrt.f32 %v10480_v40  ;;  %v4997_v48 = vadd.f32 %v4965_v4, %v11684_v21  ;;  %v4963_v54 = vmul.f32 %v10400_v29, %v4600_v32  ;;  %v4446_v4 = vpop.xlane.xlu1 %4445 }
 0x64f   :  { %v4346_v44 = vsel %vm4314_vm5, %v3578_v17, %v4198_v20  ;;  %v4650_v36 = vmul.f32 %v5911_v1, %v10463_v18  ;;  %v10504_v8 = vsel %vm3410_vm1, %v3411_v62, %v10438_v19  ;;  %vm3420_vm6 = vcmp.eq.f32.partialorder %v10369_v61, inf }
 0x650   :  { %v3423_v6 = vand.u32 2147483648, %v10369_v61  ;;  %v10509_v9 = vmul.f32 %v4346_v44, %v11685_v56  ;;  %5029 = vst.msk [vmem:[%s11117_s2 + $0x18] sm:$0xff] %vm181_vm0, %v4997_v48  ;;  %v4995_v23 = vadd.f32 %v4963_v54, %v11686_v39  ;;  %v3637_v2 = vmul.f32 1.442695, %v3483_v57 }
 0x651   :  { %v4651_v22 = vmul.f32 %v5911_v1, %v4650_v36  ;;  %v3675_v26 = vsub.f32 0.0, %v3483_v57  ;;  %v10517_v50 = vsel %vm3420_vm6, %v10369_v61, %v3419_v38  ;;  %vm4656_vm7 = vcmp.eq.f32.partialorder %v10463_v18, inf  ;;  %v4440_v38 = vpop.xlane.xlu2 %4439 }
 0x652   :  { %v4410_v62 = vmul.f32 %v10509_v9, %v10509_v9  ;;  %v4200_v19 = vmul.f32 %v10342_v37, %v10284_v42  ;;  %5027 = vst.msk [vmem:[%s11117_s2 + $0x8] sm:$0xff] %vm181_vm0, %v4995_v23  ;;  %vm4658_vm8 = vcmp.eq.f32.partialorder %v10463_v18, 0.0  ;;  %v4659_v11 = vand.u32 2147483648, %v10463_v18 }
 0x653   :  { %v5913_v24 = vpop.eup %5912  ;;  %v4652_v51 = vmul.f32 0.5, %v4651_v22  ;;  %v4635_v0 = vand.u32 2147483648, %v10474_v55  ;;  %v3733_v3 = vmul.f32 1.442695, %v3675_v26  ;;  %5916 = vpow2.f32 %v3637_v2 }
 0x654   :  { %v5915_v30 = vpop.eup %5914  ;;  %v4492_v16 = vsel %vm181_vm0, %v4410_v62, 0.0  ;;  %v4626_v17 = vmul.f32 %v5913_v24, %v10474_v55  ;;  %v4201_v57 = vsub.f32 1.0, %v4200_v19  ;;  %v3515_v32 = vmul.f32 %v10284_v42, %v10284_v42 }
 0x655   :  { %4493 = vadd.xlane.f32.xlu2 %v4492_v16  ;;  %v4653_v58 = vsub.f32 1.5, %v4652_v51  ;;  %v4602_v20 = vmul.f32 %v5915_v30, %v10480_v40  ;;  %5918 = vpow2.f32 %v3733_v3  ;;  %vm4205_vm9 = vweird.f32 %v10342_v37  ;;  %v4434_v3 = vpop.xlane.xlu0 %4433 }
 0x656   :  { %v4627_v21 = vmul.f32 %v5913_v24, %v4626_v17  ;;  %v4202_v48 = vmul.f32 %v10342_v37, %v4201_v57  ;;  %v4208_v54 = vand.u32 2147483647, %v10284_v42  ;;  %vm4632_vm10 = vcmp.eq.f32.partialorder %v10474_v55, inf }
 0x657   :  { %v4654_v44 = vmul.f32 %v5911_v1, %v4653_v58  ;;  %v4603_v36 = vmul.f32 %v5915_v30, %v4602_v20  ;;  %v4210_v56 = vand.u32 2147483648, %v10284_v42  ;;  %v4522_v39 = vadd.f32 1.0, %v4446_v4 }
 0x658   :  { %v4628_v23 = vmul.f32 0.5, %v4627_v21  ;;  %vm4634_vm11 = vcmp.eq.f32.partialorder %v10474_v55, 0.0  ;;  %v4203_v22 = vadd.f32 %v10342_v37, %v4202_v48  ;;  %vm4204_vm12 = vweird.f32 %v10284_v42 }
 0x659   :  { %v4520_v2 = vadd.f32 1.0, %v4440_v38  ;;  %v4655_v26 = vmul.f32 %v4654_v44, %v10463_v18  ;;  %v4604_v62 = vmul.f32 0.5, %v4603_v36  ;;  %v3547_v19 = vmul.f32 0.16666667, %v3515_v32  ;;  %vm10547_vm13 = vmor %vm4204_vm12, %vm4205_vm9  ;;  %v5917_v16 = vpop.eup %5916 }
 0x65a   :  { %v10551_v51 = vmax.f32 %v4522_v39, 1e-07  ;;  %v4629_v17 = vsub.f32 1.5, %v4628_v23  ;;  %v4207_v57 = vsel %vm10547_vm13, %v10342_v37, %v4203_v22  ;;  %vm4209_vm14 = vcmp.eq.f32.partialorder %v4208_v54, 8.507059e+37 }
 0x65b   :  { %v10556_v4 = vmax.f32 %v4520_v2, 1e-07  ;;  %v5919_v58 = vpop.eup %5918  ;;  %vm3422_vm15 = vcmp.eq.f32.partialorder %v10369_v61, 0.0  ;;  %v4657_v20 = vsel %vm4656_vm7, %v10463_v18, %v4655_v26  ;;  %v4605_v32 = vsub.f32 1.5, %v4604_v62 }
 0x65c   :  { %v4211_v38 = vor.u32 1.1754944e-38, %v4210_v56  ;;  %5920 = vrsqrt.f32 %v10551_v51  ;;  %v4660_v21 = vsel %vm4658_vm8, %v4659_v11, %v4657_v20  ;;  %v4630_v48 = vmul.f32 %v5913_v24, %v4629_v17  ;;  %v11689_v56 = vld [vmem:[#allocation40_spill] sm:$0xff] }
 0x65d   :  { %v3771_v44 = vsub.f32 %v5917_v16, %v5919_v58  ;;  %v4518_v37 = vadd.f32 1.0, %v4434_v3  ;;  %v4968_v54 = vmul.f32 %v10400_v29, %v4660_v21  ;;  %v4606_v36 = vmul.f32 %v5915_v30, %v4605_v32  ;;  %v11690_v21 = vld [vmem:[#allocation64_spill] sm:$0xff] }
 0x65e   :  { %v4212_v39 = vsel %vm4209_vm14, %v4211_v38, %v4207_v57  ;;  %v3484_v23 = vmin.f32 %v10344_v12, 85.0  ;;  %v4631_v22 = vmul.f32 %v4630_v48, %v10474_v55  ;;  %vm4608_vm1 = vcmp.eq.f32.partialorder %v10480_v40, inf }
 0x65f   :  { %v3803_v2 = vmul.f32 0.5, %v3771_v44  ;;  %5922 = vrsqrt.f32 %v10556_v4  ;;  %v5000_v26 = vadd.f32 %v4968_v54, %v11689_v56  ;;  %v4607_v18 = vmul.f32 %v4606_v36, %v10480_v40  ;;  %v11691_v44 = vld [vmem:[#allocation72_spill] sm:$0xff]  ;;  %v11692_v36 = vld [vmem:[#allocation43_spill] sm:$0xff] }
 0x660   :  { %vm4610_vm2 = vcmp.eq.f32.partialorder %v10480_v40, 0.0  ;;  %v4611_v24 = vand.u32 2147483648, %v10480_v40  ;;  %v4633_v11 = vsel %vm4632_vm10, %v10474_v55, %v4631_v22  ;;  %v3579_v30 = vadd.f32 1.0, %v3547_v19 }
 0x661   :  { %v4213_v62 = vmul.f32 %v4212_v39, %v3803_v2  ;;  %v10577_v1 = vmax.f32 %v4518_v37, 1e-07  ;;  %5032 = vst.msk [vmem:[%s11117_s2 + $0x30] sm:$0xff] %vm181_vm0, %v5000_v26  ;;  %v4636_v16 = vsel %vm4634_vm11, %v4635_v0, %v4633_v11  ;;  %v4609_v17 = vsel %vm4608_vm1, %v10480_v40, %v4607_v18  ;;  %v4455_v26 = vpop.xlane.xlu1 %4454 }
 0x662   :  { %v5921_v3 = vpop.eup %5920  ;;  %vm4315_vm3 = vcmp.lt.f32.partialorder %v10284_v42, 0.0001  ;;  %v3676_v57 = vsub.f32 0.0, %v3484_v23  ;;  %v4966_v19 = vmul.f32 %v10400_v29, %v4636_v16  ;;  %v4612_v58 = vsel %vm4610_vm2, %v4611_v24, %v4609_v17 }
 0x663   :  { %v4347_v20 = vsel %vm4315_vm3, %v3579_v30, %v4213_v62  ;;  %v4686_v32 = vmul.f32 %v5921_v3, %v10551_v51  ;;  %v4964_v38 = vmul.f32 %v10400_v29, %v4612_v58  ;;  %5924 = vrsqrt.f32 %v10577_v1  ;;  %v4449_v30 = vpop.xlane.xlu2 %4448 }
 0x664   :  { %v10593_v48 = vmul.f32 %v4347_v20, %v11690_v21  ;;  %v3639_v55 = vmul.f32 1.442695, %v3484_v23  ;;  %v10597_v40 = vmax.f32 %v10504_v8, 1e-15  ;;  %v10604_v42 = vsel %vm3422_vm15, %v3423_v6, %v10517_v50 }
 0x665   :  { %v5923_v0 = vpop.eup %5922  ;;  %v4998_v37 = vadd.f32 %v4966_v19, %v11691_v44  ;;  %v4687_v54 = vmul.f32 %v5921_v3, %v4686_v32  ;;  %v4996_v39 = vadd.f32 %v4964_v38, %v11692_v36  ;;  %vm4692_vm4 = vcmp.eq.f32.partialorder %v10551_v51, inf }
 0x666   :  { %v4411_v22 = vmul.f32 %v10593_v48, %v10593_v48  ;;  %v4662_v8 = vmul.f32 %v5923_v0, %v10556_v4  ;;  %vm4694_vm5 = vcmp.eq.f32.partialorder %v10551_v51, 0.0  ;;  %v3735_v6 = vmul.f32 1.442695, %v3676_v57 }
 0x667   :  { %5030 = vst.msk [vmem:[%s11117_s2 + $0x20] sm:$0xff] %vm181_vm0, %v4998_v37  ;;  %v4688_v61 = vmul.f32 0.5, %v4687_v54  ;;  %v4215_v50 = vmul.f32 %v10417_v59, %v10344_v12  ;;  %v4695_v2 = vand.u32 2147483648, %v10551_v51  ;;  %5926 = vpow2.f32 %v3639_v55 }
 0x668   :  { %5028 = vst.msk [vmem:[%s11117_s2 + $0x10] sm:$0xff] %vm181_vm0, %v4996_v39  ;;  %v4495_v23 = vsel %vm181_vm0, %v4411_v22, 0.0  ;;  %v4663_v56 = vmul.f32 %v5923_v0, %v4662_v8  ;;  %vm4668_vm6 = vcmp.eq.f32.partialorder %v10556_v4, inf  ;;  %v4671_v24 = vand.u32 2147483648, %v10556_v4 }
 0x669   :  { %4496 = vadd.xlane.f32.xlu0 %v4495_v23  ;;  %v4689_v18 = vsub.f32 1.5, %v4688_v61  ;;  %5928 = vpow2.f32 %v3735_v6  ;;  %v4216_v11 = vsub.f32 1.0, %v4215_v50  ;;  %v5925_v62 = vpop.eup %5924  ;;  %vm4670_vm7 = vcmp.eq.f32.partialorder %v10556_v4, 0.0  ;;  %v4443_v50 = vpop.xlane.xlu0 %4442 }
 0x66a   :  { %v4664_v16 = vmul.f32 0.5, %v4663_v56  ;;  %v3516_v17 = vmul.f32 %v10344_v12, %v10344_v12  ;;  %vm4220_vm8 = vweird.f32 %v10417_v59  ;;  %v4225_v57 = vand.u32 2147483648, %v10344_v12 }
 0x66b   :  { %v4690_v19 = vmul.f32 %v5921_v3, %v4689_v18  ;;  %v4638_v58 = vmul.f32 %v5925_v62, %v10577_v1  ;;  %v4217_v20 = vmul.f32 %v10417_v59, %v4216_v11  ;;  %v4525_v32 = vadd.f32 1.0, %v4455_v26 }
 0x66c   :  { %v4665_v38 = vsub.f32 1.5, %v4664_v16  ;;  %vm4219_vm9 = vweird.f32 %v10344_v12  ;;  %v4223_v21 = vand.u32 2147483647, %v10344_v12  ;;  %v4523_v55 = vadd.f32 1.0, %v4449_v30 }
 0x66d   :  { %v4691_v44 = vmul.f32 %v4690_v19, %v10551_v51  ;;  %v4639_v37 = vmul.f32 %v5925_v62, %v4638_v58  ;;  %v4218_v54 = vadd.f32 %v10417_v59, %v4217_v20  ;;  %v10638_v36 = vmax.f32 %v4525_v32, 1e-07  ;;  %v5927_v39 = vpop.eup %5926  ;;  %vm10642_vm10 = vmor %vm4219_vm9, %vm4220_vm8 }
 0x66e   :  { %v4666_v3 = vmul.f32 %v5923_v0, %v4665_v38  ;;  %v3548_v22 = vmul.f32 0.16666667, %v3516_v17  ;;  %v4226_v61 = vor.u32 1.1754944e-38, %v4225_v57  ;;  %v10646_v6 = vmax.f32 %v4523_v55, 1e-07 }
 0x66f   :  { %v5929_v23 = vpop.eup %5928  ;;  %v4693_v56 = vsel %vm4692_vm4, %v10551_v51, %v4691_v44  ;;  %v4640_v26 = vmul.f32 0.5, %v4639_v37  ;;  %v4222_v0 = vsel %vm10642_vm10, %v10417_v59, %v4218_v54  ;;  %5930 = vrsqrt.f32 %v10638_v36 }
 0x670   :  { %v4696_v18 = vsel %vm4694_vm5, %v4695_v2, %v4693_v56  ;;  %v4667_v11 = vmul.f32 %v4666_v3, %v10556_v4  ;;  %v3772_v30 = vsub.f32 %v5927_v39, %v5929_v23  ;;  %vm4224_vm11 = vcmp.eq.f32.partialorder %v4223_v21, 8.507059e+37 }
 0x671   :  { %v4971_v16 = vmul.f32 %v10400_v29, %v4696_v18  ;;  %v4641_v17 = vsub.f32 1.5, %v4640_v26  ;;  %v4227_v57 = vsel %vm4224_vm11, %v4226_v61, %v4222_v0  ;;  %v4521_v19 = vadd.f32 1.0, %v4443_v50 }
 0x672   :  { %v4669_v58 = vsel %vm4668_vm6, %v10556_v4, %v4667_v11  ;;  %v3804_v20 = vmul.f32 0.5, %v3772_v30  ;;  %5932 = vrsqrt.f32 %v10646_v6  ;;  %v3485_v59 = vmin.f32 %v10371_v41, 85.0 }
 0x673   :  { %v5003_v51 = vadd.f32 %v4971_v16, %v9682_v5  ;;  %v4672_v2 = vsel %vm4670_vm7, %v4671_v24, %v4669_v58  ;;  %v4642_v32 = vmul.f32 %v5925_v62, %v4641_v17  ;;  %vm4644_vm12 = vcmp.eq.f32.partialorder %v10577_v1, inf }
 0x674   :  { %v4969_v38 = vmul.f32 %v10400_v29, %v4672_v2  ;;  %vm4646_vm13 = vcmp.eq.f32.partialorder %v10577_v1, 0.0  ;;  %v3580_v21 = vadd.f32 1.0, %v3548_v22  ;;  %v4228_v55 = vmul.f32 %v4227_v57, %v3804_v20  ;;  %v11695_v22 = vld [vmem:[#allocation50_spill] sm:$0xff]  ;;  %v4458_v20 = vpop.xlane.xlu2 %4457 }
 0x675   :  { %v5931_v44 = vpop.eup %5930  ;;  %5035 = vst.msk [vmem:[%s11117_s2 + $0x48] sm:$0xff] %vm181_vm0, %v5003_v51  ;;  %v4643_v5 = vmul.f32 %v4642_v32, %v10577_v1  ;;  %v4647_v4 = vand.u32 2147483648, %v10577_v1  ;;  %vm4316_vm14 = vcmp.lt.f32.partialorder %v10344_v12, 0.0001  ;;  %v10677_v24 = vmax.f32 %v4521_v19, 1e-07 }
 0x676   :  { %v5001_v62 = vadd.f32 %v4969_v38, %v9708_v33  ;;  %v4348_v37 = vsel %vm4316_vm14, %v3580_v21, %v4228_v55  ;;  %v4722_v54 = vmul.f32 %v5931_v44, %v10638_v36  ;;  %v3677_v39 = vsub.f32 0.0, %v3485_v59  ;;  %v4452_v38 = vpop.xlane.xlu0 %4451 }
 0x677   :  { %v4645_v3 = vsel %vm4644_vm12, %v10577_v1, %v4643_v5  ;;  %v10683_v8 = vmul.f32 %v4348_v37, %v11695_v22  ;;  %5934 = vrsqrt.f32 %v10677_v24  ;;  %v3641_v61 = vmul.f32 1.442695, %v3485_v59 }
 0x678   :  { %v5933_v50 = vpop.eup %5932  ;;  %5936 = vrcp.f32 %v10597_v40  ;;  %v10688_v12 = vmax.f32 %v10604_v42, 1e-15  ;;  %5033 = vst.msk [vmem:[%s11117_s2 + $0x38] sm:$0xff] %vm181_vm0, %v5001_v62  ;;  %v4648_v33 = vsel %vm4646_vm13, %v4647_v4, %v4645_v3  ;;  %v4723_v23 = vmul.f32 %v5931_v44, %v4722_v54 }
 0x679   :  { %v4967_v56 = vmul.f32 %v10400_v29, %v4648_v33  ;;  %v4412_v26 = vmul.f32 %v10683_v8, %v10683_v8  ;;  %vm4728_vm15 = vcmp.eq.f32.partialorder %v10638_v36, inf  ;;  %v4731_v0 = vand.u32 2147483648, %v10638_v36 }
 0x67a   :  { %v4698_v42 = vmul.f32 %v5933_v50, %v10646_v6  ;;  %v4724_v18 = vmul.f32 0.5, %v4723_v23  ;;  %vm4730_vm1 = vcmp.eq.f32.partialorder %v10638_v36, 0.0  ;;  %v3517_v11 = vmul.f32 %v10371_v41, %v10371_v41 }
 0x67b   :  { %v3737_v1 = vmul.f32 1.442695, %v3677_v39  ;;  %v4230_v30 = vmul.f32 %v10427_v27, %v10371_v41  ;;  %v4999_v16 = vadd.f32 %v4967_v56, %v9714_v34  ;;  %v4498_v17 = vsel %vm181_vm0, %v4412_v26, 0.0 }
 0x67c   :  { %v4699_v57 = vmul.f32 %v5933_v50, %v4698_v42  ;;  %5938 = vpow2.f32 %v3641_v61  ;;  %4499 = vadd.xlane.f32.xlu1 %v4498_v17  ;;  %v4725_v19 = vsub.f32 1.5, %v4724_v18  ;;  %vm4704_vm2 = vcmp.eq.f32.partialorder %v10646_v6, inf }
 0x67d   :  { %5940 = vpow2.f32 %v3737_v1  ;;  %v4231_v58 = vsub.f32 1.0, %v4230_v30  ;;  %v5935_v59 = vpop.eup %5934  ;;  %5031 = vst.msk [vmem:[%s11117_s2 + $0x28] sm:$0xff] %vm181_vm0, %v4999_v16  ;;  %v4707_v34 = vand.u32 2147483648, %v10646_v6  ;;  %v4238_v2 = vand.u32 2147483647, %v10371_v41 }
 0x67e   :  { %v4700_v51 = vmul.f32 0.5, %v4699_v57  ;;  %v4240_v32 = vand.u32 2147483648, %v10371_v41  ;;  %v10717_v21 = vpop.eup %5936  ;;  %v4726_v55 = vmul.f32 %v5931_v44, %v4725_v19  ;;  %v4674_v5 = vmul.f32 %v5935_v59, %v10677_v24 }
 0x67f   :  { %v4232_v4 = vmul.f32 %v10427_v27, %v4231_v58  ;;  %vm4235_vm3 = vweird.f32 %v10427_v27  ;;  %v3549_v37 = vmul.f32 0.16666667, %v3517_v11  ;;  %vm4234_vm4 = vweird.f32 %v10371_v41 }
 0x680   :  { %v4701_v62 = vsub.f32 1.5, %v4700_v51  ;;  %v4526_v54 = vadd.f32 1.0, %v4458_v20  ;;  %v4727_v39 = vmul.f32 %v4726_v55, %v10638_v36  ;;  %v4675_v3 = vmul.f32 %v5935_v59, %v4674_v5  ;;  %vm10725_vm5 = vmor %vm4234_vm4, %vm4235_vm3 }
 0x681   :  { %v4233_v22 = vadd.f32 %v10427_v27, %v4232_v4  ;;  %v4524_v61 = vadd.f32 1.0, %v4452_v38  ;;  %vm4239_vm6 = vcmp.eq.f32.partialorder %v4238_v2, 8.507059e+37  ;;  %v4241_v56 = vor.u32 1.1754944e-38, %v4240_v32 }
 0x682   :  { %v5939_v33 = vpop.eup %5938  ;;  %v4702_v23 = vmul.f32 %v5933_v50, %v4701_v62  ;;  %v10729_v26 = vmax.f32 %v4526_v54, 1e-07  ;;  %v4729_v18 = vsel %vm4728_vm15, %v10638_v36, %v4727_v39  ;;  %v4676_v11 = vmul.f32 0.5, %v4675_v3  ;;  %v11698_v39 = vld [vmem:[#allocation69_spill] sm:$0xff] }
 0x683   :  { %v5941_v42 = vpop.eup %5940  ;;  %v4237_v1 = vsel %vm10725_vm5, %v10427_v27, %v4233_v22  ;;  %v10737_v30 = vmax.f32 %v4524_v61, 1e-07  ;;  %v4732_v50 = vsel %vm4730_vm1, %v4731_v0, %v4729_v18  ;;  %v3486_v57 = vmin.f32 %v10408_v60, 85.0 }
 0x684   :  { %v4703_v16 = vmul.f32 %v4702_v23, %v10646_v6  ;;  %v3773_v17 = vsub.f32 %v5939_v33, %v5941_v42  ;;  %v4974_v19 = vmul.f32 %v10400_v29, %v4732_v50  ;;  %v4677_v58 = vsub.f32 1.5, %v4676_v11  ;;  %v4461_v50 = vpop.xlane.xlu0 %4460 }
 0x685   :  { %v4242_v20 = vsel %vm4239_vm6, %v4241_v56, %v4237_v1  ;;  %5942 = vrsqrt.f32 %v10729_v26  ;;  %vm4706_vm7 = vcmp.eq.f32.partialorder %v10646_v6, 0.0  ;;  %vm4680_vm8 = vcmp.eq.f32.partialorder %v10677_v24, inf  ;;  %v4464_v1 = vpop.xlane.xlu1 %4463 }
 0x686   :  { %5944 = vrcp.f32 %v10688_v12  ;;  %v4705_v27 = vsel %vm4704_vm2, %v10646_v6, %v4703_v16  ;;  %v3805_v36 = vmul.f32 0.5, %v3773_v17  ;;  %v5006_v0 = vadd.f32 %v4974_v19, %v9781_v28 }
 0x687   :  { %v4708_v51 = vsel %vm4706_vm7, %v4707_v34, %v4705_v27  ;;  %v4678_v2 = vmul.f32 %v5935_v59, %v4677_v58  ;;  %5946 = vrsqrt.f32 %v10737_v30  ;;  %v3581_v38 = vadd.f32 1.0, %v3549_v37 }
 0x688   :  { %v4972_v32 = vmul.f32 %v10400_v29, %v4708_v51  ;;  %v4243_v55 = vmul.f32 %v4242_v20, %v3805_v36  ;;  %5038 = vst.msk [vmem:[%s11117_s2 + $0x60] sm:$0xff] %vm181_vm0, %v5006_v0  ;;  %v4683_v5 = vand.u32 2147483648, %v10677_v24  ;;  %vm4317_vm9 = vcmp.lt.f32.partialorder %v10371_v41, 0.0001  ;;  %v11701_v36 = vld [vmem:[#allocation56_spill] sm:$0xff] }
 0x689   :  { %v4679_v6 = vmul.f32 %v4678_v2, %v10677_v24  ;;  %v3643_v28 = vmul.f32 1.442695, %v3486_v57  ;;  %v3678_v4 = vsub.f32 0.0, %v3486_v57  ;;  %v4245_v62 = vmul.f32 %v10454_v47, %v10408_v60 }
 0x68a   :  { %v5004_v59 = vadd.f32 %v4972_v32, %v9819_v49  ;;  %v4349_v34 = vsel %vm4317_vm9, %v3581_v38, %v4243_v55  ;;  %vm4682_vm10 = vcmp.eq.f32.partialorder %v10677_v24, 0.0  ;;  %v3518_v22 = vmul.f32 %v10408_v60, %v10408_v60 }
 0x68b   :  { %v5943_v37 = vpop.eup %5942  ;;  %v4681_v54 = vsel %vm4680_vm8, %v10677_v24, %v4679_v6  ;;  %v10767_v3 = vmul.f32 %v4349_v34, %v11698_v39  ;;  %v3739_v33 = vmul.f32 1.442695, %v3678_v4  ;;  %v4246_v23 = vsub.f32 1.0, %v4245_v62 }
 0x68c   :  { %v10771_v41 = vpop.eup %5944  ;;  %5036 = vst.msk [vmem:[%s11117_s2 + $0x50] sm:$0xff] %vm181_vm0, %v5004_v59  ;;  %v4684_v49 = vsel %vm4682_vm10, %v4683_v5, %v4681_v54  ;;  %v4734_v61 = vmul.f32 %v5943_v37, %v10729_v26  ;;  %5948 = vpow2.f32 %v3643_v28  ;;  %vm4250_vm11 = vweird.f32 %v10454_v47 }
 0x68d   :  { %v5947_v44 = vpop.eup %5946  ;;  %v4970_v24 = vmul.f32 %v10400_v29, %v4684_v49  ;;  %v4413_v56 = vmul.f32 %v10767_v3, %v10767_v3  ;;  %5950 = vpow2.f32 %v3739_v33  ;;  %v4247_v11 = vmul.f32 %v10454_v47, %v4246_v23 }
 0x68e   :  { %v4735_v42 = vmul.f32 %v5943_v37, %v4734_v61  ;;  %v4710_v18 = vmul.f32 %v5947_v44, %v10737_v30  ;;  %vm4740_vm12 = vcmp.eq.f32.partialorder %v10729_v26, inf  ;;  %vm4249_vm13 = vweird.f32 %v10408_v60 }
 0x68f   :  { %v5002_v16 = vadd.f32 %v4970_v24, %v9840_v14  ;;  %v4501_v17 = vsel %vm181_vm0, %v4413_v56, 0.0  ;;  %v4255_v57 = vand.u32 2147483648, %v10408_v60  ;;  %v4248_v20 = vadd.f32 %v10454_v47, %v4247_v11  ;;  %vm10798_vm15 = vmor %vm4249_vm13, %vm4250_vm11 }
 0x690   :  { %4502 = vadd.xlane.f32.xlu2 %v4501_v17  ;;  %v4736_v19 = vmul.f32 0.5, %v4735_v42  ;;  %v4711_v58 = vmul.f32 %v5947_v44, %v4710_v18  ;;  %v4253_v27 = vand.u32 2147483647, %v10408_v60  ;;  %vm4742_vm14 = vcmp.eq.f32.partialorder %v10729_v26, 0.0 }
 0x691   :  { %5034 = vst.msk [vmem:[%s11117_s2 + $0x40] sm:$0xff] %vm181_vm0, %v5002_v16  ;;  %v3550_v14 = vmul.f32 0.16666667, %v3518_v22  ;;  %v4528_v0 = vadd.f32 1.0, %v4464_v1  ;;  %v4527_v51 = vadd.f32 1.0, %v4461_v50  ;;  %v4252_v38 = vsel %vm10798_vm15, %v10454_v47, %v4248_v20 }
 0x692   :  { %v4737_v2 = vsub.f32 1.5, %v4736_v19  ;;  %v4712_v32 = vmul.f32 0.5, %v4711_v58  ;;  %v3487_v55 = vmin.f32 %v10597_v40, 85.0  ;;  %v5949_v6 = vpop.eup %5948  ;;  %v4743_v5 = vand.u32 2147483648, %v10729_v26 }
 0x693   :  { %v4256_v28 = vor.u32 1.1754944e-38, %v4255_v57  ;;  %v10807_v59 = vmax.f32 %v4528_v0, 1e-07  ;;  %v10809_v34 = vmax.f32 %v4527_v51, 1e-07  ;;  %v5951_v4 = vpop.eup %5950  ;;  %vm4716_vm1 = vcmp.eq.f32.partialorder %v10737_v30, inf }
 0x694   :  { %v4738_v62 = vmul.f32 %v5943_v37, %v4737_v2  ;;  %v4713_v54 = vsub.f32 1.5, %v4712_v32  ;;  %vm4254_vm2 = vcmp.eq.f32.partialorder %v4253_v27, 8.507059e+37  ;;  %v3774_v39 = vsub.f32 %v5949_v6, %v5951_v4 }
 0x695   :  { %v4257_v22 = vsel %vm4254_vm2, %v4256_v28, %v4252_v38  ;;  %5952 = vrsqrt.f32 %v10807_v59  ;;  %v3679_v47 = vsub.f32 0.0, %v3487_v55  ;;  %v3645_v33 = vmul.f32 1.442695, %v3487_v55  ;;  %v4467_v38 = vpop.xlane.xlu2 %4466 }
 0x696   :  { %v4739_v49 = vmul.f32 %v4738_v62, %v10729_v26  ;;  %v4714_v61 = vmul.f32 %v5947_v44, %v4713_v54  ;;  %5954 = vrsqrt.f32 %v10809_v34  ;;  %vm4718_vm3 = vcmp.eq.f32.partialorder %v10737_v30, 0.0 }
 0x697   :  { %v4719_v23 = vand.u32 2147483648, %v10737_v30  ;;  %v3582_v37 = vadd.f32 1.0, %v3550_v14  ;;  %v3806_v24 = vmul.f32 0.5, %v3774_v39  ;;  %vm4318_vm4 = vcmp.lt.f32.partialorder %v10408_v60, 0.0001 }
 0x698   :  { %v4741_v56 = vsel %vm4740_vm12, %v10729_v26, %v4739_v49  ;;  %v4715_v42 = vmul.f32 %v4714_v61, %v10737_v30  ;;  %v3519_v44 = vmul.f32 %v10597_v40, %v10597_v40  ;;  %v3741_v1 = vmul.f32 1.442695, %v3679_v47 }
 0x699   :  { %v4744_v18 = vsel %vm4742_vm14, %v4743_v5, %v4741_v56  ;;  %v4258_v11 = vmul.f32 %v4257_v22, %v3806_v24  ;;  %v4260_v50 = vmul.f32 %v10717_v21, %v10597_v40  ;;  %v4767_v57 = vand.u32 2147483648, %v10807_v59 }
 0x69a   :  { %v4975_v16 = vmul.f32 %v10400_v29, %v4744_v18  ;;  %v4717_v17 = vsel %vm4716_vm1, %v10737_v30, %v4715_v42  ;;  %5956 = vpow2.f32 %v3645_v33  ;;  %vm4265_vm5 = vweird.f32 %v10717_v21 }
 0x69b   :  { %v5953_v60 = vpop.eup %5952  ;;  %v4720_v19 = vsel %vm4718_vm3, %v4719_v23, %v4717_v17  ;;  %v4350_v26 = vsel %vm4318_vm4, %v3582_v37, %v4258_v11  ;;  %5958 = vpow2.f32 %v3741_v1  ;;  %v4261_v58 = vsub.f32 1.0, %v4260_v50 }
 0x69c   :  { %v5955_v20 = vpop.eup %5954  ;;  %v5007_v27 = vadd.f32 %v4975_v16, %v9884_v53  ;;  %v4973_v14 = vmul.f32 %v10400_v29, %v4720_v19  ;;  %v10838_v0 = vmul.f32 %v4350_v26, %v11701_v36  ;;  %v4758_v51 = vmul.f32 %v5953_v60, %v10807_v59  ;;  %v4470_v26 = vpop.xlane.xlu0 %4469 }
 0x69d   :  { %v4746_v2 = vmul.f32 %v5955_v20, %v10809_v34  ;;  %v4262_v32 = vmul.f32 %v10717_v21, %v4261_v58  ;;  %v4268_v30 = vand.u32 2147483647, %v10597_v40  ;;  %v4270_v5 = vand.u32 2147483648, %v10597_v40 }
 0x69e   :  { %5039 = vst.msk [vmem:[%s11117_s2 + $0x68] sm:$0xff] %vm181_vm0, %v5007_v27  ;;  %v5005_v53 = vadd.f32 %v4973_v14, %v9905_v43  ;;  %v4414_v55 = vmul.f32 %v10838_v0, %v10838_v0  ;;  %v4759_v6 = vmul.f32 %v5953_v60, %v4758_v51  ;;  %vm4764_vm6 = vcmp.eq.f32.partialorder %v10807_v59, inf }
 0x69f   :  { %v4747_v28 = vmul.f32 %v5955_v20, %v4746_v2  ;;  %v3551_v4 = vmul.f32 0.16666667, %v3519_v44  ;;  %v4263_v62 = vadd.f32 %v10717_v21, %v4262_v32  ;;  %vm4264_vm7 = vweird.f32 %v10597_v40 }
 0x6a0   :  { %v5957_v54 = vpop.eup %5956  ;;  %5037 = vst.msk [vmem:[%s11117_s2 + $0x58] sm:$0xff] %vm181_vm0, %v5005_v53  ;;  %v4504_v43 = vsel %vm181_vm0, %v4414_v55, 0.0  ;;  %v4760_v39 = vmul.f32 0.5, %v4759_v6  ;;  %vm4766_vm8 = vcmp.eq.f32.partialorder %v10807_v59, 0.0  ;;  %vm4266_vm9 = vmor %vm4264_vm7, %vm4265_vm5  ;;  %vm4269_vm10 = vcmp.eq.f32.partialorder %v4268_v30, 8.507059e+37  ;;  %v11702_v30 = vld [vmem:[#allocation74_spill] sm:$0xff]  ;;  %v4473_v55 = vpop.xlane.xlu1 %4472 }
 0x6a1   :  { %v4529_v22 = vadd.f32 1.0, %v4467_v38  ;;  %v5959_v47 = vpop.eup %5958  ;;  %4505 = vadd.xlane.f32.xlu0 %v4504_v43  ;;  %v4748_v49 = vmul.f32 0.5, %v4747_v28  ;;  %v4267_v61 = vsel %vm4266_vm9, %v10717_v21, %v4263_v62  ;;  %v4271_v33 = vor.u32 1.1754944e-38, %v4270_v5 }
 0x6a2   :  { %v3488_v23 = vmin.f32 %v10688_v12, 85.0  ;;  %v4761_v37 = vsub.f32 1.5, %v4760_v39  ;;  %v3775_v24 = vsub.f32 %v5957_v54, %v5959_v47  ;;  %v3520_v42 = vmul.f32 %v10688_v12, %v10688_v12  ;;  %v4476_v47 = vpop.xlane.xlu2 %4475 }
 0x6a3   :  { %v10866_v56 = vmax.f32 %v4529_v22, 1e-07  ;;  %v4749_v44 = vsub.f32 1.5, %v4748_v49  ;;  %v4272_v18 = vsel %vm4269_vm10, %v4271_v33, %v4267_v61  ;;  %vm4752_vm11 = vcmp.eq.f32.partialorder %v10809_v34, inf }
 0x6a4   :  { %v3647_v11 = vmul.f32 1.442695, %v3488_v23  ;;  %v3680_v1 = vsub.f32 0.0, %v3488_v23  ;;  %v4762_v50 = vmul.f32 %v5953_v60, %v4761_v37  ;;  %v3807_v16 = vmul.f32 0.5, %v3775_v24  ;;  %v4479_v24 = vpop.xlane.xlu0 %4478 }
 0x6a5   :  { %5960 = vrsqrt.f32 %v10866_v56  ;;  %v4750_v21 = vmul.f32 %v5955_v20, %v4749_v44  ;;  %vm4754_vm12 = vcmp.eq.f32.partialorder %v10809_v34, 0.0  ;;  %v4755_v17 = vand.u32 2147483648, %v10809_v34 }
 0x6a6   :  { %v3583_v19 = vadd.f32 1.0, %v3551_v4  ;;  %v4763_v58 = vmul.f32 %v4762_v50, %v10807_v59  ;;  %v4273_v27 = vmul.f32 %v4272_v18, %v3807_v16  ;;  %vm4319_vm13 = vcmp.lt.f32.partialorder %v10597_v40, 0.0001 }
 0x6a7   :  { %v3743_v14 = vmul.f32 1.442695, %v3680_v1  ;;  %v4751_v60 = vmul.f32 %v4750_v21, %v10809_v34  ;;  %v3552_v36 = vmul.f32 0.16666667, %v3520_v42  ;;  %5962 = vpow2.f32 %v3647_v11 }
 0x6a8   :  { %v4275_v51 = vmul.f32 %v10771_v41, %v10688_v12  ;;  %v4765_v20 = vsel %vm4764_vm6, %v10807_v59, %v4763_v58  ;;  %v4351_v2 = vsel %vm4319_vm13, %v3583_v19, %v4273_v27  ;;  %vm4280_vm14 = vweird.f32 %v10771_v41 }
 0x6a9   :  { %5964 = vpow2.f32 %v3743_v14  ;;  %v4768_v40 = vsel %vm4766_vm8, %v4767_v57, %v4765_v20  ;;  %v4753_v32 = vsel %vm4752_vm11, %v10809_v34, %v4751_v60  ;;  %v10891_v38 = vmul.f32 %v4351_v2, %v11702_v30  ;;  %v11703_v30 = vld [vmem:[#allocation52_spill] sm:$0xff] }
 0x6aa   :  { %v4276_v53 = vsub.f32 1.0, %v4275_v51  ;;  %v4977_v5 = vmul.f32 %v10400_v29, %v4768_v40  ;;  %v4756_v28 = vsel %vm4754_vm12, %v4755_v17, %v4753_v32  ;;  %v4283_v4 = vand.u32 2147483647, %v10688_v12  ;;  %v4485_v40 = vpop.xlane.xlu2 %4484 }
 0x6ab   :  { %v5961_v6 = vpop.eup %5960  ;;  %v4285_v59 = vand.u32 2147483648, %v10688_v12  ;;  %v4976_v57 = vmul.f32 %v10400_v29, %v4756_v28  ;;  %v4415_v62 = vmul.f32 %v10891_v38, %v10891_v38  ;;  %vm4279_vm15 = vweird.f32 %v10688_v12 }
 0x6ac   :  { %v4770_v54 = vmul.f32 %v5961_v6, %v10866_v56  ;;  %v4277_v43 = vmul.f32 %v10771_v41, %v4276_v53  ;;  %v5009_v39 = vadd.f32 %v4977_v5, %v9954_v46  ;;  %v4530_v34 = vadd.f32 1.0, %v4470_v26  ;;  %vm4281_vm1 = vmor %vm4279_vm15, %vm4280_vm14  ;;  %v4482_v26 = vpop.xlane.xlu1 %4481 }
 0x6ad   :  { %v4286_v22 = vor.u32 1.1754944e-38, %v4285_v59  ;;  %v5963_v49 = vpop.eup %5962  ;;  %v5008_v61 = vadd.f32 %v4976_v57, %v9988_v7  ;;  %v4507_v33 = vsel %vm181_vm0, %v4415_v62, 0.0  ;;  %v4531_v44 = vadd.f32 1.0, %v4473_v55  ;;  %v4488_v55 = vpop.xlane.xlu0 %4487 }
 0x6ae   :  { %v4771_v23 = vmul.f32 %v5961_v6, %v4770_v54  ;;  %v4278_v37 = vadd.f32 %v10771_v41, %v4277_v43  ;;  %5041 = vst.msk [vmem:[%s11117_s2 + $0x78] sm:$0xff] %vm181_vm0, %v5009_v39  ;;  %4508 = vadd.xlane.f32.xlu1 %v4507_v33  ;;  %v10914_v46 = vmax.f32 %v4530_v34, 1e-07  ;;  %v4532_v7 = vadd.f32 1.0, %v4476_v47 }
 0x6af   :  { %v5965_v42 = vpop.eup %5964  ;;  %v4533_v18 = vadd.f32 1.0, %v4479_v24  ;;  %5040 = vst.msk [vmem:[%s11117_s2 + $0x70] sm:$0xff] %vm181_vm0, %v5008_v61  ;;  %vm4284_vm2 = vcmp.eq.f32.partialorder %v4283_v4, 8.507059e+37  ;;  %v10922_v19 = vmax.f32 %v4531_v44, 1e-07  ;;  %v3584_v58 = vadd.f32 1.0, %v3552_v36 }
 0x6b0   :  { %v4772_v11 = vmul.f32 0.5, %v4771_v23  ;;  %v3776_v1 = vsub.f32 %v5963_v49, %v5965_v42  ;;  %v4282_v50 = vsel %vm4281_vm1, %v10771_v41, %v4278_v37  ;;  %5966 = vrsqrt.f32 %v10914_v46 }
 0x6b1   :  { %v4287_v16 = vsel %vm4284_vm2, %v4286_v22, %v4282_v50  ;;  %v10924_v27 = vmax.f32 %v4532_v7, 1e-07  ;;  %v10926_v14 = vmax.f32 %v4533_v18, 1e-07  ;;  %5968 = vrsqrt.f32 %v10922_v19 }
 0x6b2   :  { %v4773_v21 = vsub.f32 1.5, %v4772_v11  ;;  %v3808_v17 = vmul.f32 0.5, %v3776_v1  ;;  %v4534_v20 = vadd.f32 1.0, %v4482_v26  ;;  %vm4320_vm3 = vcmp.lt.f32.partialorder %v10688_v12, 0.0001 }
 0x6b3   :  { %5970 = vrsqrt.f32 %v10924_v27  ;;  %vm4776_vm4 = vcmp.eq.f32.partialorder %v10866_v56, inf  ;;  %v4779_v36 = vand.u32 2147483648, %v10866_v56  ;;  %vm4778_vm5 = vcmp.eq.f32.partialorder %v10866_v56, 0.0 }
 0x6b4   :  { %v4774_v60 = vmul.f32 %v5961_v6, %v4773_v21  ;;  %v4288_v51 = vmul.f32 %v4287_v16, %v3808_v17  ;;  %5972 = vrsqrt.f32 %v10926_v14  ;;  %v10941_v5 = vmax.f32 %v4534_v20, 1e-07 }
 0x6b5   :  { %v4535_v59 = vadd.f32 1.0, %v4485_v40  ;;  %v4536_v57 = vadd.f32 1.0, %v4488_v55  ;;  %vm4788_vm6 = vcmp.eq.f32.partialorder %v10914_v46, inf  ;;  %v4491_v33 = vpop.xlane.xlu1 %4490  ;;  %vm4790_vm7 = vcmp.eq.f32.partialorder %v10914_v46, 0.0 }
 0x6b6   :  { %v4775_v41 = vmul.f32 %v4774_v60, %v10866_v56  ;;  %v4352_v2 = vsel %vm4320_vm3, %v3584_v58, %v4288_v51  ;;  %v5967_v32 = vpop.eup %5966  ;;  %5974 = vrsqrt.f32 %v10941_v5  ;;  %v4791_v37 = vand.u32 2147483648, %v10914_v46 }
 0x6b7   :  { %v10935_v53 = vmul.f32 %v4352_v2, %v11703_v30  ;;  %v4782_v12 = vmul.f32 %v5967_v32, %v10914_v46  ;;  %v5969_v62 = vpop.eup %5968  ;;  %v10952_v61 = vmax.f32 %v4535_v59, 1e-07  ;;  %v10956_v42 = vmax.f32 %v4536_v57, 1e-07 }
 0x6b8   :  { %v4777_v6 = vsel %vm4776_vm4, %v10866_v56, %v4775_v41  ;;  %v4794_v56 = vmul.f32 %v5969_v62, %v10922_v19  ;;  %vm4800_vm8 = vcmp.eq.f32.partialorder %v10922_v19, inf  ;;  %vm4802_vm9 = vcmp.eq.f32.partialorder %v10922_v19, 0.0 }
 0x6b9   :  { %v4780_v28 = vsel %vm4778_vm5, %v4779_v36, %v4777_v6  ;;  %v4416_v4 = vmul.f32 %v10935_v53, %v10935_v53  ;;  %v4783_v43 = vmul.f32 %v5967_v32, %v4782_v12  ;;  %v5971_v39 = vpop.eup %5970  ;;  %5976 = vrsqrt.f32 %v10952_v61 }
 0x6ba   :  { %v4978_v54 = vmul.f32 %v10400_v29, %v4780_v28  ;;  %v4806_v49 = vmul.f32 %v5971_v39, %v10924_v27  ;;  %v5973_v23 = vpop.eup %5972  ;;  %v4795_v24 = vmul.f32 %v5969_v62, %v4794_v56  ;;  %v4803_v11 = vand.u32 2147483648, %v10922_v19 }
 0x6bb   :  { %v4510_v22 = vsel %vm181_vm0, %v4416_v4, 0.0  ;;  %v4784_v47 = vmul.f32 0.5, %v4783_v43  ;;  %v4818_v7 = vmul.f32 %v5973_v23, %v10926_v14  ;;  %vm4812_vm10 = vcmp.eq.f32.partialorder %v10924_v27, inf }
 0x6bc   :  { %v5010_v34 = vadd.f32 %v4978_v54, %v10032_v13  ;;  %4511 = vadd.xlane.f32.xlu2 %v4510_v22  ;;  %v4807_v44 = vmul.f32 %v5971_v39, %v4806_v49  ;;  %v4796_v18 = vmul.f32 0.5, %v4795_v24  ;;  %v4537_v1 = vadd.f32 1.0, %v4491_v33  ;;  %v5975_v50 = vpop.eup %5974 }
 0x6bd   :  { %v4785_v13 = vsub.f32 1.5, %v4784_v47  ;;  %v4819_v17 = vmul.f32 %v5973_v23, %v4818_v7  ;;  %5978 = vrsqrt.f32 %v10956_v42  ;;  %vm4814_vm11 = vcmp.eq.f32.partialorder %v10924_v27, 0.0 }
 0x6be   :  { %5042 = vst.msk [vmem:[%s11117_s2 + $0x80] sm:$0xff] %vm181_vm0, %v5010_v34  ;;  %v4808_v21 = vmul.f32 0.5, %v4807_v44  ;;  %v4797_v26 = vsub.f32 1.5, %v4796_v18  ;;  %v4815_v58 = vand.u32 2147483648, %v10924_v27  ;;  %v4830_v60 = vmul.f32 %v5975_v50, %v10941_v5 }
 0x6bf   :  { %v4786_v16 = vmul.f32 %v5967_v32, %v4785_v13  ;;  %v4820_v41 = vmul.f32 0.5, %v4819_v17  ;;  %vm4824_vm12 = vcmp.eq.f32.partialorder %v10926_v14, inf  ;;  %vm4826_vm13 = vcmp.eq.f32.partialorder %v10926_v14, 0.0  ;;  %v5977_v36 = vpop.eup %5976 }
 0x6c0   :  { %v4809_v20 = vsub.f32 1.5, %v4808_v21  ;;  %v4798_v2 = vmul.f32 %v5969_v62, %v4797_v26  ;;  %v4831_v40 = vmul.f32 %v5975_v50, %v4830_v60  ;;  %v10975_v32 = vmax.f32 %v4537_v1, 1e-07 }
 0x6c1   :  { %v4787_v51 = vmul.f32 %v4786_v16, %v10914_v46  ;;  %v4821_v6 = vsub.f32 1.5, %v4820_v41  ;;  %v4827_v12 = vand.u32 2147483648, %v10926_v14  ;;  %v4842_v57 = vmul.f32 %v5977_v36, %v10952_v61 }
 0x6c2   :  { %v4810_v55 = vmul.f32 %v5971_v39, %v4809_v20  ;;  %v4799_v4 = vmul.f32 %v4798_v2, %v10922_v19  ;;  %v4832_v59 = vmul.f32 0.5, %v4831_v40  ;;  %5980 = vrsqrt.f32 %v10975_v32 }
 0x6c3   :  { %v4789_v30 = vsel %vm4788_vm6, %v10914_v46, %v4787_v51  ;;  %v5979_v62 = vpop.eup %5978  ;;  %v4822_v22 = vmul.f32 %v5973_v23, %v4821_v6  ;;  %v4843_v46 = vmul.f32 %v5977_v36, %v4842_v57  ;;  %vm4836_vm14 = vcmp.eq.f32.partialorder %v10941_v5, inf }
 0x6c4   :  { %v4792_v28 = vsel %vm4790_vm7, %v4791_v37, %v4789_v30  ;;  %v4811_v43 = vmul.f32 %v4810_v55, %v10924_v27  ;;  %v4801_v39 = vsel %vm4800_vm8, %v10922_v19, %v4799_v4  ;;  %v4833_v56 = vsub.f32 1.5, %v4832_v59 }
 0x6c5   :  { %v4979_v54 = vmul.f32 %v10400_v29, %v4792_v28  ;;  %v4854_v34 = vmul.f32 %v5979_v62, %v10956_v42  ;;  %v4804_v49 = vsel %vm4802_vm9, %v4803_v11, %v4801_v39  ;;  %v4823_v23 = vmul.f32 %v4822_v22, %v10926_v14 }
 0x6c6   :  { %v4813_v33 = vsel %vm4812_vm10, %v10924_v27, %v4811_v43  ;;  %v4980_v37 = vmul.f32 %v10400_v29, %v4804_v49  ;;  %v4834_v13 = vmul.f32 %v5975_v50, %v4833_v56  ;;  %v4844_v44 = vmul.f32 0.5, %v4843_v46 }
 0x6c7   :  { %v5011_v47 = vadd.f32 %v4979_v54, %v10085_v63  ;;  %v4816_v24 = vsel %vm4814_vm11, %v4815_v58, %v4813_v33  ;;  %v4825_v19 = vsel %vm4824_vm12, %v10926_v14, %v4823_v23  ;;  %v4855_v7 = vmul.f32 %v5979_v62, %v4854_v34 }
 0x6c8   :  { %v4981_v63 = vmul.f32 %v10400_v29, %v4816_v24  ;;  %v5012_v18 = vadd.f32 %v4980_v37, %v10126_v10  ;;  %v4828_v27 = vsel %vm4826_vm13, %v4827_v12, %v4825_v19  ;;  %v4835_v11 = vmul.f32 %v4834_v13, %v10941_v5  ;;  %v4494_v50 = vpop.xlane.xlu2 %4493  ;;  %v5981_v16 = vpop.eup %5980 }
 0x6c9   :  { %5043 = vst.msk [vmem:[%s11117_s2 + $0x88] sm:$0xff] %vm181_vm0, %v5011_v47  ;;  %v4845_v1 = vsub.f32 1.5, %v4844_v44  ;;  %v4982_v17 = vmul.f32 %v10400_v29, %v4828_v27  ;;  %v4839_v26 = vand.u32 2147483648, %v10941_v5  ;;  %v4856_v58 = vmul.f32 0.5, %v4855_v7 }
 0x6ca   :  { %v5013_v21 = vadd.f32 %v4981_v63, %v10183_v31  ;;  %5044 = vst.msk [vmem:[%s11117_s2 + $0x90] sm:$0xff] %vm181_vm0, %v5012_v18  ;;  %v4837_v10 = vsel %vm4836_vm14, %v10941_v5, %v4835_v11  ;;  %vm4838_vm15 = vcmp.eq.f32.partialorder %v10941_v5, 0.0  ;;  %v4866_v60 = vmul.f32 %v5981_v16, %v10975_v32 }
 0x6cb   :  { %v4846_v14 = vmul.f32 %v5977_v36, %v4845_v1  ;;  %v5014_v31 = vadd.f32 %v4982_v17, %v10233_v35  ;;  %v4840_v51 = vsel %vm4838_vm15, %v4839_v26, %v4837_v10  ;;  %v4857_v20 = vsub.f32 1.5, %v4856_v58 }
 0x6cc   :  { %5045 = vst.msk [vmem:[%s11117_s2 + $0x98] sm:$0xff] %vm181_vm0, %v5013_v21  ;;  %v4538_v41 = vadd.f32 1.0, %v4494_v50  ;;  %v4983_v2 = vmul.f32 %v10400_v29, %v4840_v51  ;;  %v4867_v30 = vmul.f32 %v5981_v16, %v4866_v60  ;;  %vm4848_vm1 = vcmp.eq.f32.partialorder %v10952_v61, inf }
 0x6cd   :  { %v4847_v40 = vmul.f32 %v4846_v14, %v10952_v61  ;;  %5046 = vst.msk [vmem:[%s11117_s2 + $0xa0] sm:$0xff] %vm181_vm0, %v5014_v31  ;;  %v4851_v5 = vand.u32 2147483648, %v10952_v61  ;;  %v4858_v36 = vmul.f32 %v5979_v62, %v4857_v20  ;;  %vm4850_vm2 = vcmp.eq.f32.partialorder %v10952_v61, 0.0 }
 0x6ce   :  { %v4570_v55 = vmax.f32 %v4538_v41, 1e-07  ;;  %v5015_v35 = vadd.f32 %v4983_v2, %v10269_v45  ;;  %v4868_v12 = vmul.f32 0.5, %v4867_v30  ;;  %vm4860_vm3 = vcmp.eq.f32.partialorder %v10956_v42, inf }
 0x6cf   :  { %v4849_v6 = vsel %vm4848_vm1, %v10952_v61, %v4847_v40  ;;  %v4859_v4 = vmul.f32 %v4858_v36, %v10956_v42  ;;  %v4863_v45 = vand.u32 2147483648, %v10956_v42  ;;  %vm4862_vm4 = vcmp.eq.f32.partialorder %v10956_v42, 0.0 }
 0x6d0   :  { %v4852_v28 = vsel %vm4850_vm2, %v4851_v5, %v4849_v6  ;;  %5982 = vrsqrt.f32 %v4570_v55  ;;  %5047 = vst.msk [vmem:[%s11117_s2 + $0xa8] sm:$0xff] %vm181_vm0, %v5015_v35  ;;  %v4869_v57 = vsub.f32 1.5, %v4868_v12  ;;  %vm4872_vm5 = vcmp.eq.f32.partialorder %v10975_v32, inf }
 0x6d1   :  { %v4984_v59 = vmul.f32 %v10400_v29, %v4852_v28  ;;  %v4861_v62 = vsel %vm4860_vm3, %v10956_v42, %v4859_v4  ;;  %v4875_v42 = vand.u32 2147483648, %v10975_v32  ;;  %vm4874_vm6 = vcmp.eq.f32.partialorder %v10975_v32, 0.0 }
 0x6d2   :  { %v4864_v54 = vsel %vm4862_vm4, %v4863_v45, %v4861_v62  ;;  %v4870_v43 = vmul.f32 %v5981_v16, %v4869_v57  ;;  %vm4884_vm7 = vcmp.eq.f32.partialorder %v4570_v55, inf  ;;  %v4887_v19 = vand.u32 2147483648, %v4570_v55 }
 0x6d3   :  { %v5016_v61 = vadd.f32 %v4984_v59, %v10321_v25  ;;  %v4985_v22 = vmul.f32 %v10400_v29, %v4864_v54  ;;  %vm4886_vm8 = vcmp.eq.f32.partialorder %v4570_v55, 0.0 }
 0x6d4   :  { %v4871_v39 = vmul.f32 %v4870_v43, %v10975_v32 }
 0x6d5   :  { %5048 = vst.msk [vmem:[%s11117_s2 + $0xb0] sm:$0xff] %vm181_vm0, %v5016_v61  ;;  %v5017_v46 = vadd.f32 %v4985_v22, %v10360_v52 }
 0x6d6   :  { %v5983_v56 = vpop.eup %5982  ;;  %v4873_v25 = vsel %vm4872_vm5, %v10975_v32, %v4871_v39 }
 0x6d7   :  { %v4878_v34 = vmul.f32 %v5983_v56, %v4570_v55  ;;  %5049 = vst.msk [vmem:[%s11117_s2 + $0xb8] sm:$0xff] %vm181_vm0, %v5017_v46  ;;  %v4876_v47 = vsel %vm4874_vm6, %v4875_v42, %v4873_v25 }
 0x6d8   :  { %v4986_v49 = vmul.f32 %v10400_v29, %v4876_v47 }
 0x6d9   :  { %v4879_v33 = vmul.f32 %v5983_v56, %v4878_v34 }
 0x6da   :  { %v5018_v52 = vadd.f32 %v4986_v49, %v10421_v15 }
 0x6db   :  { %v4880_v23 = vmul.f32 0.5, %v4879_v33 }
 0x6dc   :  { %v4497_v37 = vpop.xlane.xlu0 %4496  ;;  %5050 = vst.msk [vmem:[%s11117_s2 + $0xc0] sm:$0xff] %vm181_vm0, %v5018_v52 }
 0x6dd   :  { %v4881_v32 = vsub.f32 1.5, %v4880_v23  ;;  %v4539_v24 = vadd.f32 1.0, %v4497_v37 }
 0x6df   :  { %v4882_v13 = vmul.f32 %v5983_v56, %v4881_v32  ;;  %v4571_v44 = vmax.f32 %v4539_v24, 1e-07 }
 0x6e1   :  { %v4883_v63 = vmul.f32 %v4882_v13, %v4570_v55  ;;  %5984 = vrsqrt.f32 %v4571_v44  ;;  %vm4896_vm9 = vcmp.eq.f32.partialorder %v4571_v44, inf  ;;  %v4899_v60 = vand.u32 2147483648, %v4571_v44 }
 0x6e2   :  { %vm4898_vm10 = vcmp.eq.f32.partialorder %v4571_v44, 0.0 }
 0x6e3   :  { %v4885_v7 = vsel %vm4884_vm7, %v4570_v55, %v4883_v63 }
 0x6e4   :  { %v4888_v18 = vsel %vm4886_vm8, %v4887_v19, %v4885_v7 }
 0x6e5   :  { %v4987_v15 = vmul.f32 %v10400_v29, %v4888_v18 }
 0x6e7   :  { %v5985_v27 = vpop.eup %5984  ;;  %v5019_v11 = vadd.f32 %v4987_v15, %v10509_v9 }
 0x6e8   :  { %v4890_v1 = vmul.f32 %v5985_v27, %v4571_v44 }
 0x6e9   :  { %5051 = vst.msk [vmem:[%s11117_s2 + $0xc8] sm:$0xff] %vm181_vm0, %v5019_v11 }
 0x6ea   :  { %v4891_v50 = vmul.f32 %v5985_v27, %v4890_v1 }
 0x6ec   :  { %v4892_v16 = vmul.f32 0.5, %v4891_v50 }
 0x6ee   :  { %v4893_v21 = vsub.f32 1.5, %v4892_v16 }
 0x6ef   :  { %v4500_v17 = vpop.xlane.xlu1 %4499 }
 0x6f0   :  { %v4894_v26 = vmul.f32 %v5985_v27, %v4893_v21  ;;  %v4540_v58 = vadd.f32 1.0, %v4500_v17 }
 0x6f2   :  { %v4895_v10 = vmul.f32 %v4894_v26, %v4571_v44  ;;  %v4572_v14 = vmax.f32 %v4540_v58, 1e-07 }
 0x6f4   :  { %v4897_v31 = vsel %vm4896_vm9, %v4571_v44, %v4895_v10  ;;  %5986 = vrsqrt.f32 %v4572_v14  ;;  %vm4908_vm11 = vcmp.eq.f32.partialorder %v4572_v14, inf  ;;  %v4911_v28 = vand.u32 2147483648, %v4572_v14 }
 0x6f5   :  { %v4900_v9 = vsel %vm4898_vm10, %v4899_v60, %v4897_v31  ;;  %vm4910_vm12 = vcmp.eq.f32.partialorder %v4572_v14, 0.0 }
 0x6f6   :  { %v4988_v51 = vmul.f32 %v10400_v29, %v4900_v9 }
 0x6f8   :  { %v5020_v20 = vadd.f32 %v4988_v51, %v10593_v48 }
 0x6fa   :  { %v5987_v41 = vpop.eup %5986  ;;  %5052 = vst.msk [vmem:[%s11117_s2 + $0xd0] sm:$0xff] %vm181_vm0, %v5020_v20 }
 0x6fb   :  { %v4902_v2 = vmul.f32 %v5987_v41, %v4572_v14 }
 0x6fd   :  { %v4903_v40 = vmul.f32 %v5987_v41, %v4902_v2 }
 0x6ff   :  { %v4904_v30 = vmul.f32 0.5, %v4903_v40 }
 0x701   :  { %v4905_v5 = vsub.f32 1.5, %v4904_v30 }
 0x703   :  { %v4503_v36 = vpop.xlane.xlu2 %4502  ;;  %v4906_v55 = vmul.f32 %v5987_v41, %v4905_v5 }
 0x704   :  { %v4541_v35 = vadd.f32 1.0, %v4503_v36 }
 0x705   :  { %v4907_v6 = vmul.f32 %v4906_v55, %v4572_v14 }
 0x706   :  { %v4573_v12 = vmax.f32 %v4541_v35, 1e-07 }
 0x707   :  { %v4909_v4 = vsel %vm4908_vm11, %v4572_v14, %v4907_v6 }
 0x708   :  { %5988 = vrsqrt.f32 %v4573_v12  ;;  %v4912_v48 = vsel %vm4910_vm12, %v4911_v28, %v4909_v4  ;;  %vm4920_vm13 = vcmp.eq.f32.partialorder %v4573_v12, inf  ;;  %v4923_v25 = vand.u32 2147483648, %v4573_v12 }
 0x709   :  { %v4989_v59 = vmul.f32 %v10400_v29, %v4912_v48  ;;  %vm4922_vm14 = vcmp.eq.f32.partialorder %v4573_v12, 0.0 }
 0x70b   :  { %v5021_v45 = vadd.f32 %v4989_v59, %v10683_v8 }
 0x70d   :  { %5053 = vst.msk [vmem:[%s11117_s2 + $0xd8] sm:$0xff] %vm181_vm0, %v5021_v45 }
 0x70e   :  { %v5989_v57 = vpop.eup %5988 }
 0x70f   :  { %v4914_v62 = vmul.f32 %v5989_v57, %v4573_v12 }
 0x711   :  { %v4915_v61 = vmul.f32 %v5989_v57, %v4914_v62 }
 0x713   :  { %v4916_v54 = vmul.f32 0.5, %v4915_v61 }
 0x714   :  { %v4506_v43 = vpop.xlane.xlu0 %4505 }
 0x715   :  { %v4917_v22 = vsub.f32 1.5, %v4916_v54  ;;  %v4542_v39 = vadd.f32 1.0, %v4506_v43 }
 0x717   :  { %v4918_v56 = vmul.f32 %v5989_v57, %v4917_v22  ;;  %v4574_v46 = vmax.f32 %v4542_v39, 1e-07 }
 0x719   :  { %v4919_v42 = vmul.f32 %v4918_v56, %v4573_v12  ;;  %5990 = vrsqrt.f32 %v4574_v46  ;;  %vm4932_vm15 = vcmp.eq.f32.partialorder %v4574_v46, inf  ;;  %v4935_v7 = vand.u32 2147483648, %v4574_v46 }
 0x71a   :  { %vm4934_vm1 = vcmp.eq.f32.partialorder %v4574_v46, 0.0 }
 0x71b   :  { %v4921_v34 = vsel %vm4920_vm13, %v4573_v12, %v4919_v42 }
 0x71c   :  { %v4924_v8 = vsel %vm4922_vm14, %v4923_v25, %v4921_v34 }
 0x71d   :  { %v4990_v47 = vmul.f32 %v10400_v29, %v4924_v8 }
 0x71f   :  { %v5991_v49 = vpop.eup %5990  ;;  %v5022_v33 = vadd.f32 %v4990_v47, %v10767_v3 }
 0x720   :  { %v4926_v52 = vmul.f32 %v5991_v49, %v4574_v46 }
 0x721   :  { %5054 = vst.msk [vmem:[%s11117_s2 + $0xe0] sm:$0xff] %vm181_vm0, %v5022_v33  ;;  %v4509_v23 = vpop.xlane.xlu1 %4508 }
 0x722   :  { %v4927_v37 = vmul.f32 %v5991_v49, %v4926_v52  ;;  %v4543_v32 = vadd.f32 1.0, %v4509_v23 }
 0x724   :  { %v4928_v24 = vmul.f32 0.5, %v4927_v37  ;;  %v4575_v13 = vmax.f32 %v4543_v32, 1e-07 }
 0x726   :  { %v4929_v44 = vsub.f32 1.5, %v4928_v24  ;;  %5992 = vrsqrt.f32 %v4575_v13  ;;  %vm4944_vm2 = vcmp.eq.f32.partialorder %v4575_v13, inf  ;;  %v4947_v60 = vand.u32 2147483648, %v4575_v13 }
 0x727   :  { %vm4946_vm3 = vcmp.eq.f32.partialorder %v4575_v13, 0.0 }
 0x728   :  { %v4930_v63 = vmul.f32 %v5991_v49, %v4929_v44 }
 0x72a   :  { %v4931_v19 = vmul.f32 %v4930_v63, %v4574_v46 }
 0x72c   :  { %v5993_v18 = vpop.eup %5992  ;;  %v4933_v15 = vsel %vm4932_vm15, %v4574_v46, %v4931_v19 }
 0x72d   :  { %v4936_v3 = vsel %vm4934_vm1, %v4935_v7, %v4933_v15  ;;  %v4938_v27 = vmul.f32 %v5993_v18, %v4575_v13 }
 0x72e   :  { %v4991_v11 = vmul.f32 %v10400_v29, %v4936_v3 }
 0x72f   :  { %v4512_v1 = vpop.xlane.xlu2 %4511  ;;  %v4939_v50 = vmul.f32 %v5993_v18, %v4938_v27 }
 0x730   :  { %v4544_v16 = vadd.f32 1.0, %v4512_v1  ;;  %v5023_v21 = vadd.f32 %v4991_v11, %v10838_v0 }
 0x731   :  { %v4940_v17 = vmul.f32 0.5, %v4939_v50 }
 0x732   :  { %v4576_v26 = vmax.f32 %v4544_v16, 1e-07  ;;  %5055 = vst.msk [vmem:[%s11117_s2 + $0xe8] sm:$0xff] %vm181_vm0, %v5023_v21 }
 0x733   :  { %v4941_v58 = vsub.f32 1.5, %v4940_v17 }
 0x734   :  { %5994 = vrsqrt.f32 %v4576_v26  ;;  %vm4956_vm4 = vcmp.eq.f32.partialorder %v4576_v26, inf  ;;  %v4959_v55 = vand.u32 2147483648, %v4576_v26  ;;  %vm4958_vm5 = vcmp.eq.f32.partialorder %v4576_v26, 0.0 }
 0x735   :  { %v4942_v10 = vmul.f32 %v5993_v18, %v4941_v58 }
 0x737   :  { %v4943_v14 = vmul.f32 %v4942_v10, %v4575_v13 }
 0x739   :  { %v4945_v9 = vsel %vm4944_vm2, %v4575_v13, %v4943_v14 }
 0x73a   :  { %v5995_v31 = vpop.eup %5994  ;;  %v4948_v51 = vsel %vm4946_vm3, %v4947_v60, %v4945_v9 }
 0x73b   :  { %v4950_v20 = vmul.f32 %v5995_v31, %v4576_v26  ;;  %v4992_v0 = vmul.f32 %v10400_v29, %v4948_v51 }
 0x73d   :  { %v4951_v41 = vmul.f32 %v5995_v31, %v4950_v20  ;;  %v5024_v2 = vadd.f32 %v4992_v0, %v10891_v38 }
 0x73f   :  { %v4952_v40 = vmul.f32 0.5, %v4951_v41  ;;  %5056 = vst.msk [vmem:[%s11117_s2 + $0xf0] sm:$0xff] %vm181_vm0, %v5024_v2 }
 0x741   :  { %v4953_v30 = vsub.f32 1.5, %v4952_v40 }
 0x743   :  { %v4954_v5 = vmul.f32 %v5995_v31, %v4953_v30 }
 0x745   :  { %v4955_v36 = vmul.f32 %v4954_v5, %v4576_v26 }
 0x747   :  { %v4957_v35 = vsel %vm4956_vm4, %v4576_v26, %v4955_v36 }
 0x748   :  { %v4960_v6 = vsel %vm4958_vm5, %v4959_v55, %v4957_v35 }
 0x749   :  { %v4993_v12 = vmul.f32 %v10400_v29, %v4960_v6 }
 0x74b   :  { %v5025_v28 = vadd.f32 %v4993_v12, %v10935_v53 }
 0x74d   :  { %5057 = vst.msk [vmem:[%s11117_s2 + $0xf8] sm:$0xff] %vm181_vm0, %v5025_v28 }

</bundles_post_ra>
